<compile_context>
chip_gen: v5e
topology: v5e:2x2
jax: 0.10.0
libtpu: 0.0.40
codegen_flags: <defaults>
</compile_context>

<pallas_src>
import functools
import math

import jax
import jax.numpy as jnp
import numpy as np
from jax.experimental import pallas as pl
from jax.experimental.pallas import tpu as pltpu


# ----------------------------------------------------------------------------
# Fused kernel: GCN (period branch, transposed orientation) -> 2x LSTM -> FC.
# Single grid point; all operands VMEM-resident (~1.6 MB).
#
# Packed operands (host, one-time):
#   xT      : (B, Fin, M)    x_period transposed (node axis M on lanes)
#   adjT    : (M, M)         adj^T
#   w1T,b1  : (nhid, Fin), (nhid, 1)
#   w2T     : (T, nhid)              T = noutput = LSTM seq length
#   wfused  : (M, 8H)        adj^T @ [Wih1 | Wih2], columns = [l1 i,f,g,o | l2 i,f,g,o]
#   gx_bias : (B*T, 8H)      gc2-bias fold + (b_ih + b_hh) of both LSTMs
#   whh1/2  : (H, 4H)        dense recurrent weights (torch gate order i,f,g,o)
#   fcw1/2  : (H, Fout)      fc weight split so no lane-concat of [h1|h2]
#   fcb     : (1, Fout)
# ----------------------------------------------------------------------------
def _fused_kernel(xT_ref, adjT_ref, w1T_ref, b1_ref, w2T_ref, wfused_ref,
                  gxb_ref, whh1_ref, whh2_ref, fcw1_ref, fcw2_ref, fcb_ref,
                  o_ref, gx_ref, *, B, T, H, nhid):
    f32 = jnp.float32
    adjT = adjT_ref[...]
    w1T = w1T_ref[...]
    b1 = b1_ref[...]
    w2T = w2T_ref[...]

    # ---- GCN period branch (transposed: M on lanes) ------------------------
    #   h1^T = relu((W1^T x^T) adj^T + b1)                      (nhid, M)
    #   gx   = (W2^T h1^T) @ W_fused + gx_bias                  (B*T, 8H)
    # adj^T of gc2 and all biases are already folded into W_fused / gx_bias.
    s1_all = jnp.concatenate(
        [jnp.dot(w1T, xT_ref[b], preferred_element_type=f32) for b in range(B)],
        axis=0)                                                   # (B*nhid, M)
    t1_all = jnp.dot(s1_all, adjT, preferred_element_type=f32)    # adjT streamed once
    s2_all = jnp.concatenate(
        [jnp.dot(w2T,
                 jnp.maximum(t1_all[b * nhid:(b + 1) * nhid] + b1, 0.0),
                 preferred_element_type=f32)
         for b in range(B)], axis=0)                              # (B*T, M)
    # dropout: eval mode -> identity
    gx_ref[...] = (jnp.dot(s2_all, wfused_ref[...], preferred_element_type=f32)
                   + gxb_ref[...])                                # (B*T, 8H)

    # ---- two LSTMs, recurrence fully unrolled; biases already in gx --------
    whh1 = whh1_ref[...]                                          # (H, 4H)
    whh2 = whh2_ref[...]                                          # (H, 4H)
    h1 = jnp.zeros((B, H), f32)
    c1 = jnp.zeros((B, H), f32)
    h2 = jnp.zeros((B, H), f32)
    c2 = jnp.zeros((B, H), f32)
    for t in range(T):
        # contiguous single-row loads; row layout of gx is b*T + t
        gx_t = jnp.concatenate(
            [gx_ref[pl.ds(b * T + t, 1), :] for b in range(B)], axis=0)  # (B, 8H)
        g1 = gx_t[:, :4 * H] + jnp.dot(h1, whh1, preferred_element_type=f32)
        g2 = gx_t[:, 4 * H:] + jnp.dot(h2, whh2, preferred_element_type=f32)

        i1 = jax.nn.sigmoid(g1[:, 0:H])
        f1 = jax.nn.sigmoid(g1[:, H:2 * H])
        gg1 = jnp.tanh(g1[:, 2 * H:3 * H])
        o1 = jax.nn.sigmoid(g1[:, 3 * H:4 * H])
        c1 = f1 * c1 + i1 * gg1
        h1 = o1 * jnp.tanh(c1)

        i2 = jax.nn.sigmoid(g2[:, 0:H])
        f2 = jax.nn.sigmoid(g2[:, H:2 * H])
        gg2 = jnp.tanh(g2[:, 2 * H:3 * H])
        o2 = jax.nn.sigmoid(g2[:, 3 * H:4 * H])
        c2 = f2 * c2 + i2 * gg2
        h2 = o2 * jnp.tanh(c2)

    # ---- final FC (weight pre-split: out = h1@W[:H] + h2@W[H:] + b) --------
    out = (jnp.dot(h1, fcw1_ref[...], preferred_element_type=f32)
           + jnp.dot(h2, fcw2_ref[...], preferred_element_type=f32)
           + fcb_ref[...])
    o_ref[...] = out.astype(o_ref.dtype)


# ----------------------------------------------------------------------------
# One-time host-side packing (call at model init, NOT per forward call).
# Gate column layout everywhere: [LSTM1 (i,f,g,o) | LSTM2 (i,f,g,o)].
# ----------------------------------------------------------------------------
def pack_params(params, adj, batch_size):
    p = params
    B = batch_size
    f32 = jnp.float32
    H = p["l1_whh"].shape[1]
    T = p["gc2_w"].shape[1]

    adjT = jnp.asarray(adj, f32).T                                   # (M, M)
    wih = jnp.concatenate([p["l1_wih"].T.astype(f32),
                           p["l2_wih"].T.astype(f32)], axis=1)       # (M, 8H)
    wfused = adjT @ wih                                              # adj fold
    blstm = jnp.concatenate([(p["l1_bih"] + p["l1_bhh"]).astype(f32),
                             (p["l2_bih"] + p["l2_bhh"]).astype(f32)])  # (8H,)
    b2 = p["gc2_b"].astype(f32)                                      # (T,)
    # gc2 bias fold: (b2 broadcast over nodes) @ wih == outer(b2, colsum(wih))
    gx_bias = b2[:, None] * jnp.sum(wih, axis=0)[None, :] + blstm[None, :]
    gx_bias = jnp.tile(gx_bias, (B, 1))                              # (B*T, 8H)

    fcwT = p["fc_w"].T.astype(f32)                                   # (2H, Fout)
    packed = dict(
        adjT=adjT,
        w1T=p["gc1_w"].T.astype(f32),
        b1=p["gc1_b"].astype(f32).reshape(-1, 1),
        w2T=p["gc2_w"].T.astype(f32),
        wfused=wfused,
        gx_bias=gx_bias,
        whh1=p["l1_whh"].T.astype(f32),                              # (H, 4H)
        whh2=p["l2_whh"].T.astype(f32),
        fcw1=fcwT[:H],
        fcw2=fcwT[H:],
        fcb=p["fc_b"].astype(f32).reshape(1, -1),
    )
    return jax.tree_util.tree_map(jnp.asarray, packed)


# ----------------------------------------------------------------------------
# Forward: one small transpose of x_period + a single pallas_call.
# ----------------------------------------------------------------------------
@jax.jit
def gcn_lstm_wrong_forward(packed, x_period, x_recent=None):
    # gc3/gc4 (x_recent) branch of the reference module is never consumed
    # downstream -> dead code, not computed.
    del x_recent
    B, M, Fin = x_period.shape
    nhid = packed["w1T"].shape[0]
    T = packed["w2T"].shape[0]
    H = packed["whh1"].shape[0]
    Fout = packed["fcb"].shape[1]

    xT = jnp.transpose(x_period, (0, 2, 1)).astype(jnp.float32)     # (B, Fin, M)

    kernel = functools.partial(_fused_kernel, B=B, T=T, H=H, nhid=nhid)
    return pl.pallas_call(
        kernel,
        out_shape=jax.ShapeDtypeStruct((B, Fout), jnp.float32),
        grid=(1,),
        in_specs=[
            pl.BlockSpec((B, Fin, M), lambda i: (0, 0, 0)),
            pl.BlockSpec((M, M), lambda i: (0, 0)),
            pl.BlockSpec((nhid, Fin), lambda i: (0, 0)),
            pl.BlockSpec((nhid, 1), lambda i: (0, 0)),
            pl.BlockSpec((T, nhid), lambda i: (0, 0)),
            pl.BlockSpec((M, 8 * H), lambda i: (0, 0)),
            pl.BlockSpec((B * T, 8 * H), lambda i: (0, 0)),
            pl.BlockSpec((H, 4 * H), lambda i: (0, 0)),
            pl.BlockSpec((H, 4 * H), lambda i: (0, 0)),
            pl.BlockSpec((H, Fout), lambda i: (0, 0)),
            pl.BlockSpec((H, Fout), lambda i: (0, 0)),
            pl.BlockSpec((1, Fout), lambda i: (0, 0)),
        ],
        out_specs=pl.BlockSpec((B, Fout), lambda i: (0, 0)),
        scratch_shapes=[pltpu.VMEM((B * T, 8 * H), jnp.float32)],
        compiler_params=pltpu.CompilerParams(
            dimension_semantics=("arbitrary",)),
    )(xT, packed["adjT"], packed["w1T"], packed["b1"], packed["w2T"],
      packed["wfused"], packed["gx_bias"], packed["whh1"], packed["whh2"],
      packed["fcw1"], packed["fcw2"], packed["fcb"])


# ----------------------------------------------------------------------------
# Pure-jnp reference (same math as the torch module) for a sanity check.
# ----------------------------------------------------------------------------
def _ref_gcn(x, adj, w, b, relu):
    out = jnp.einsum("mn,bnf->bmf", adj, x @ w) + b
    return jnp.maximum(out, 0.0) if relu else out


def _ref_lstm(x_seq, w_ih, w_hh, b_ih, b_hh):
    B, T, _ = x_seq.shape
    H = w_hh.shape[1]
    h = jnp.zeros((B, H), jnp.float32)
    c = jnp.zeros((B, H), jnp.float32)
    for t in range(T):
        g = x_seq[:, t, :] @ w_ih.T + h @ w_hh.T + b_ih + b_hh
        i = jax.nn.sigmoid(g[:, :H])
        f = jax.nn.sigmoid(g[:, H:2 * H])
        gg = jnp.tanh(g[:, 2 * H:3 * H])
        o = jax.nn.sigmoid(g[:, 3 * H:])
        c = f * c + i * gg
        h = o * jnp.tanh(c)
    return h


def _ref_forward(p, x_period, x_recent, adj):
    h = _ref_gcn(x_period, adj, p["gc1_w"], p["gc1_b"], True)
    h = _ref_gcn(h, adj, p["gc2_w"], p["gc2_b"], False)
    xp = jnp.transpose(h, (0, 2, 1))
    # (recent branch output unused in the torch module -> not computed)
    h1 = _ref_lstm(xp, p["l1_wih"], p["l1_whh"], p["l1_bih"], p["l1_bhh"])
    h2 = _ref_lstm(xp, p["l2_wih"], p["l2_whh"], p["l2_bih"], p["l2_bhh"])
    out = jnp.concatenate([h1, h2], axis=1)
    return out @ p["fc_w"].T + p["fc_b"]


# ----------------------------------------------------------------------------
# Deterministic parameter init (mirrors the torch init ranges).
# ----------------------------------------------------------------------------
def init_params(key, nfeat_period, nfeat_recent, nhid, noutput,
                lstm_in=156, lstm_hid=128, fc_out=156):
    keys = jax.random.split(key, 32)
    ki = iter(keys)

    def unif(k, shape, stdv):
        return jax.random.uniform(k, shape, jnp.float32, -stdv, stdv)

    p = {}
    # GraphConvolution: stdv = 1/sqrt(out_features)
    for name, fi, fo in [("gc1", nfeat_period, nhid), ("gc2", nhid, noutput),
                         ("gc3", nfeat_recent, nhid), ("gc4", nhid, noutput)]:
        s = 1.0 / math.sqrt(fo)
        p[f"{name}_w"] = unif(next(ki), (fi, fo), s)
        p[f"{name}_b"] = unif(next(ki), (fo,), s)
    # LSTMs: torch default uniform(-1/sqrt(H), 1/sqrt(H)); gate order i,f,g,o
    s = 1.0 / math.sqrt(lstm_hid)
    for name in ("l1", "l2"):
        p[f"{name}_wih"] = unif(next(ki), (4 * lstm_hid, lstm_in), s)
        p[f"{name}_whh"] = unif(next(ki), (4 * lstm_hid, lstm_hid), s)
        p[f"{name}_bih"] = unif(next(ki), (4 * lstm_hid,), s)
        p[f"{name}_bhh"] = unif(next(ki), (4 * lstm_hid,), s)
    # fc: Linear(256, 156)
    s = 1.0 / math.sqrt(2 * lstm_hid)
    p["fc_w"] = unif(next(ki), (fc_out, 2 * lstm_hid), s)
    p["fc_b"] = unif(next(ki), (fc_out,), s)
    return p


if __name__ == "__main__":
    # M=156 is pinned by the hardcoded LSTM input_size / fc output size.
    B, M = 2, 156
    nfeat_period, nfeat_recent, nhid, noutput = 4, 6, 16, 8

    key = jax.random.PRNGKey(0)
    kp, kr, ka, kw = jax.random.split(key, 4)
    x_period = jax.random.normal(kp, (B, M, nfeat_period), jnp.float32)
    x_recent = jax.random.normal(kr, (B, M, nfeat_recent), jnp.float32)
    adj = jax.random.uniform(ka, (M, M), jnp.float32)
    adj = adj / jnp.sum(adj, axis=1, keepdims=True)   # row-normalized dense adj

    params = init_params(kw, nfeat_period, nfeat_recent, nhid, noutput)

    # One-time packing (model init); nothing here runs per forward call.
    packed = jax.block_until_ready(pack_params(params, adj, batch_size=B))

    out = gcn_lstm_wrong_forward(packed, x_period, x_recent)
    out = jax.block_until_ready(out)
    assert out.shape == (B, 156), out.shape

    ref = jax.block_until_ready(_ref_forward(params, x_period, x_recent, adj))
    np.testing.assert_allclose(np.asarray(out), np.asarray(ref),
                               rtol=2e-4, atol=2e-4)

    print("KERNEL_OK")
</pallas_src>

<mosaic_0001>
module attributes {stable_mosaic.version = 11 : i64} {
  func.func @_fused_kernel(%arg0: i32, %arg1: memref<2x4x156xf32, #tpu.memory_space<vmem>>, %arg2: memref<156x156xf32, #tpu.memory_space<vmem>>, %arg3: memref<16x4xf32, #tpu.memory_space<vmem>>, %arg4: memref<16x1xf32, #tpu.memory_space<vmem>>, %arg5: memref<8x16xf32, #tpu.memory_space<vmem>>, %arg6: memref<156x1024xf32, #tpu.memory_space<vmem>>, %arg7: memref<16x1024xf32, #tpu.memory_space<vmem>>, %arg8: memref<128x512xf32, #tpu.memory_space<vmem>>, %arg9: memref<128x512xf32, #tpu.memory_space<vmem>>, %arg10: memref<128x156xf32, #tpu.memory_space<vmem>>, %arg11: memref<128x156xf32, #tpu.memory_space<vmem>>, %arg12: memref<1x156xf32, #tpu.memory_space<vmem>>, %arg13: memref<2x156xf32, #tpu.memory_space<vmem>>, %arg14: memref<16x1024xf32, #tpu.memory_space<vmem>>) attributes {dimension_semantics = [#tpu.dimension_semantics<arbitrary>], iteration_bounds = array<i64: 1>, scalar_prefetch = 0 : i64, scratch_operands = 1 : i64, tpu.core_type = #tpu.core_type<tc>, window_params = [{pipeline_mode = #tpu.pipeline_mode<synchronous>, transform_indices = @transform_0, window_bounds = array<i64: 2, 4, 156>}, {pipeline_mode = #tpu.pipeline_mode<synchronous>, transform_indices = @transform_1, window_bounds = array<i64: 156, 156>}, {pipeline_mode = #tpu.pipeline_mode<synchronous>, transform_indices = @transform_2, window_bounds = array<i64: 16, 4>}, {pipeline_mode = #tpu.pipeline_mode<synchronous>, transform_indices = @transform_3, window_bounds = array<i64: 16, 1>}, {pipeline_mode = #tpu.pipeline_mode<synchronous>, transform_indices = @transform_4, window_bounds = array<i64: 8, 16>}, {pipeline_mode = #tpu.pipeline_mode<synchronous>, transform_indices = @transform_5, window_bounds = array<i64: 156, 1024>}, {pipeline_mode = #tpu.pipeline_mode<synchronous>, transform_indices = @transform_6, window_bounds = array<i64: 16, 1024>}, {pipeline_mode = #tpu.pipeline_mode<synchronous>, transform_indices = @transform_7, window_bounds = array<i64: 128, 512>}, {pipeline_mode = #tpu.pipeline_mode<synchronous>, transform_indices = @transform_8, window_bounds = array<i64: 128, 512>}, {pipeline_mode = #tpu.pipeline_mode<synchronous>, transform_indices = @transform_9, window_bounds = array<i64: 128, 156>}, {pipeline_mode = #tpu.pipeline_mode<synchronous>, transform_indices = @transform_10, window_bounds = array<i64: 128, 156>}, {pipeline_mode = #tpu.pipeline_mode<synchronous>, transform_indices = @transform_11, window_bounds = array<i64: 1, 156>}, {pipeline_mode = #tpu.pipeline_mode<synchronous>, transform_indices = @transform_12, window_bounds = array<i64: 2, 156>}]} {
    %c0 = arith.constant 0 : index
    %c0_0 = arith.constant 0 : index
    %0 = vector.load %arg2[%c0, %c0_0] : memref<156x156xf32, #tpu.memory_space<vmem>>, vector<156x156xf32>
    %c0_1 = arith.constant 0 : index
    %c0_2 = arith.constant 0 : index
    %1 = vector.load %arg3[%c0_1, %c0_2] : memref<16x4xf32, #tpu.memory_space<vmem>>, vector<16x4xf32>
    %c0_3 = arith.constant 0 : index
    %c0_4 = arith.constant 0 : index
    %2 = vector.load %arg4[%c0_3, %c0_4] : memref<16x1xf32, #tpu.memory_space<vmem>>, vector<16x1xf32>
    %c0_5 = arith.constant 0 : index
    %c0_6 = arith.constant 0 : index
    %3 = vector.load %arg5[%c0_5, %c0_6] : memref<8x16xf32, #tpu.memory_space<vmem>>, vector<8x16xf32>
    %c0_7 = arith.constant 0 : index
    %c0_8 = arith.constant 0 : index
    %c0_9 = arith.constant 0 : index
    %4 = vector.load %arg1[%c0_7, %c0_8, %c0_9] : memref<2x4x156xf32, #tpu.memory_space<vmem>>, vector<1x4x156xf32>
    %5 = vector.shape_cast %4 : vector<1x4x156xf32> to vector<4x156xf32>
    %cst = arith.constant dense<0.000000e+00> : vector<16x156xf32>
    %6 = tpu.matmul %1, %5, %cst {dimension_numbers = #tpu.dot_dimension_numbers<[1], [0], [0], [1], [0, 0, 1, 1], [], []>} : vector<16x4xf32>, vector<4x156xf32>, vector<16x156xf32> -> vector<16x156xf32>
    %c1 = arith.constant 1 : index
    %c0_10 = arith.constant 0 : index
    %c0_11 = arith.constant 0 : index
    %7 = vector.load %arg1[%c1, %c0_10, %c0_11] : memref<2x4x156xf32, #tpu.memory_space<vmem>>, vector<1x4x156xf32>
    %8 = vector.shape_cast %7 : vector<1x4x156xf32> to vector<4x156xf32>
    %cst_12 = arith.constant dense<0.000000e+00> : vector<16x156xf32>
    %9 = tpu.matmul %1, %8, %cst_12 {dimension_numbers = #tpu.dot_dimension_numbers<[1], [0], [0], [1], [0, 0, 1, 1], [], []>} : vector<16x4xf32>, vector<4x156xf32>, vector<16x156xf32> -> vector<16x156xf32>
    %10 = tpu.concatenate %6, %9 in 0 : vector<16x156xf32>, vector<16x156xf32> -> vector<32x156xf32>
    %cst_13 = arith.constant dense<0.000000e+00> : vector<32x156xf32>
    %11 = tpu.matmul %10, %0, %cst_13 {dimension_numbers = #tpu.dot_dimension_numbers<[1], [0], [0], [1], [0, 0, 1, 1], [], []>} : vector<32x156xf32>, vector<156x156xf32>, vector<32x156xf32> -> vector<32x156xf32>
    %12 = vector.extract_strided_slice %11 {offsets = [0, 0], sizes = [16, 156], strides = [1, 1]} : vector<32x156xf32> to vector<16x156xf32>
    %13 = vector.broadcast %2 : vector<16x1xf32> to vector<16x156xf32>
    %14 = arith.addf %12, %13 : vector<16x156xf32>
    %cst_14 = arith.constant 0.000000e+00 : f32
    %15 = vector.broadcast %cst_14 : f32 to vector<16x156xf32>
    %16 = arith.maximumf %14, %15 : vector<16x156xf32>
    %cst_15 = arith.constant dense<0.000000e+00> : vector<8x156xf32>
    %17 = tpu.matmul %3, %16, %cst_15 {dimension_numbers = #tpu.dot_dimension_numbers<[1], [0], [0], [1], [0, 0, 1, 1], [], []>} : vector<8x16xf32>, vector<16x156xf32>, vector<8x156xf32> -> vector<8x156xf32>
    %18 = vector.extract_strided_slice %11 {offsets = [16, 0], sizes = [16, 156], strides = [1, 1]} : vector<32x156xf32> to vector<16x156xf32>
    %19 = vector.broadcast %2 : vector<16x1xf32> to vector<16x156xf32>
    %20 = arith.addf %18, %19 : vector<16x156xf32>
    %cst_16 = arith.constant 0.000000e+00 : f32
    %21 = vector.broadcast %cst_16 : f32 to vector<16x156xf32>
    %22 = arith.maximumf %20, %21 : vector<16x156xf32>
    %cst_17 = arith.constant dense<0.000000e+00> : vector<8x156xf32>
    %23 = tpu.matmul %3, %22, %cst_17 {dimension_numbers = #tpu.dot_dimension_numbers<[1], [0], [0], [1], [0, 0, 1, 1], [], []>} : vector<8x16xf32>, vector<16x156xf32>, vector<8x156xf32> -> vector<8x156xf32>
    %24 = tpu.concatenate %17, %23 in 0 : vector<8x156xf32>, vector<8x156xf32> -> vector<16x156xf32>
    %c0_18 = arith.constant 0 : index
    %c0_19 = arith.constant 0 : index
    %25 = vector.load %arg6[%c0_18, %c0_19] : memref<156x1024xf32, #tpu.memory_space<vmem>>, vector<156x1024xf32>
    %cst_20 = arith.constant dense<0.000000e+00> : vector<16x1024xf32>
    %26 = tpu.matmul %24, %25, %cst_20 {dimension_numbers = #tpu.dot_dimension_numbers<[1], [0], [0], [1], [0, 0, 1, 1], [], []>} : vector<16x156xf32>, vector<156x1024xf32>, vector<16x1024xf32> -> vector<16x1024xf32>
    %c0_21 = arith.constant 0 : index
    %c0_22 = arith.constant 0 : index
    %27 = vector.load %arg7[%c0_21, %c0_22] : memref<16x1024xf32, #tpu.memory_space<vmem>>, vector<16x1024xf32>
    %28 = arith.addf %26, %27 : vector<16x1024xf32>
    %c0_23 = arith.constant 0 : index
    %c0_24 = arith.constant 0 : index
    %29 = vector.load %arg14[%c0_23, %c0_24] : memref<16x1024xf32, #tpu.memory_space<vmem>>, vector<16x1024xf32>
    tpu.vector_store %arg14[%c0_23, %c0_24], %28 {strides = array<i32>} : memref<16x1024xf32, #tpu.memory_space<vmem>>, vector<16x1024xf32>,
    %c0_25 = arith.constant 0 : index
    %c0_26 = arith.constant 0 : index
    %30 = vector.load %arg8[%c0_25, %c0_26] : memref<128x512xf32, #tpu.memory_space<vmem>>, vector<128x512xf32>
    %c0_27 = arith.constant 0 : index
    %c0_28 = arith.constant 0 : index
    %31 = vector.load %arg9[%c0_27, %c0_28] : memref<128x512xf32, #tpu.memory_space<vmem>>, vector<128x512xf32>
    %cst_29 = arith.constant 0.000000e+00 : f32
    %32 = vector.broadcast %cst_29 : f32 to vector<2x128xf32>
    %cst_30 = arith.constant 0.000000e+00 : f32
    %33 = vector.broadcast %cst_30 : f32 to vector<2x128xf32>
    %cst_31 = arith.constant 0.000000e+00 : f32
    %34 = vector.broadcast %cst_31 : f32 to vector<2x128xf32>
    %cst_32 = arith.constant 0.000000e+00 : f32
    %35 = vector.broadcast %cst_32 : f32 to vector<2x128xf32>
    %c0_33 = arith.constant 0 : index
    %c0_34 = arith.constant 0 : index
    %36 = vector.load %arg14[%c0_33, %c0_34] : memref<16x1024xf32, #tpu.memory_space<vmem>>, vector<1x1024xf32>
    %c8 = arith.constant 8 : index
    %c0_35 = arith.constant 0 : index
    %37 = vector.load %arg14[%c8, %c0_35] : memref<16x1024xf32, #tpu.memory_space<vmem>>, vector<1x1024xf32>
    %38 = tpu.concatenate %36, %37 in 0 : vector<1x1024xf32>, vector<1x1024xf32> -> vector<2x1024xf32>
    %39 = vector.extract_strided_slice %38 {offsets = [0, 0], sizes = [2, 512], strides = [1, 1]} : vector<2x1024xf32> to vector<2x512xf32>
    %cst_36 = arith.constant dense<0.000000e+00> : vector<2x512xf32>
    %40 = tpu.matmul %32, %30, %cst_36 {dimension_numbers = #tpu.dot_dimension_numbers<[1], [0], [0], [1], [0, 0, 1, 1], [], []>} : vector<2x128xf32>, vector<128x512xf32>, vector<2x512xf32> -> vector<2x512xf32>
    %41 = arith.addf %39, %40 : vector<2x512xf32>
    %42 = vector.extract_strided_slice %38 {offsets = [0, 512], sizes = [2, 512], strides = [1, 1]} : vector<2x1024xf32> to vector<2x512xf32>
    %cst_37 = arith.constant dense<0.000000e+00> : vector<2x512xf32>
    %43 = tpu.matmul %34, %31, %cst_37 {dimension_numbers = #tpu.dot_dimension_numbers<[1], [0], [0], [1], [0, 0, 1, 1], [], []>} : vector<2x128xf32>, vector<128x512xf32>, vector<2x512xf32> -> vector<2x512xf32>
    %44 = arith.addf %42, %43 : vector<2x512xf32>
    %45 = vector.extract_strided_slice %41 {offsets = [0, 0], sizes = [2, 128], strides = [1, 1]} : vector<2x512xf32> to vector<2x128xf32>
    %46 = arith.negf %45 : vector<2x128xf32>
    %47 = math.exp %46 : vector<2x128xf32>
    %cst_38 = arith.constant 1.000000e+00 : f32
    %48 = vector.broadcast %cst_38 : f32 to vector<2x128xf32>
    %49 = arith.addf %48, %47 : vector<2x128xf32>
    %50 = arith.divf %48, %49 : vector<2x128xf32>
    %51 = vector.extract_strided_slice %41 {offsets = [0, 128], sizes = [2, 128], strides = [1, 1]} : vector<2x512xf32> to vector<2x128xf32>
    %52 = arith.negf %51 : vector<2x128xf32>
    %53 = math.exp %52 : vector<2x128xf32>
    %cst_39 = arith.constant 1.000000e+00 : f32
    %54 = vector.broadcast %cst_39 : f32 to vector<2x128xf32>
    %55 = arith.addf %54, %53 : vector<2x128xf32>
    %56 = arith.divf %54, %55 : vector<2x128xf32>
    %57 = vector.extract_strided_slice %41 {offsets = [0, 256], sizes = [2, 128], strides = [1, 1]} : vector<2x512xf32> to vector<2x128xf32>
    %58 = math.tanh %57 : vector<2x128xf32>
    %59 = vector.extract_strided_slice %41 {offsets = [0, 384], sizes = [2, 128], strides = [1, 1]} : vector<2x512xf32> to vector<2x128xf32>
    %60 = arith.negf %59 : vector<2x128xf32>
    %61 = math.exp %60 : vector<2x128xf32>
    %cst_40 = arith.constant 1.000000e+00 : f32
    %62 = vector.broadcast %cst_40 : f32 to vector<2x128xf32>
    %63 = arith.addf %62, %61 : vector<2x128xf32>
    %64 = arith.divf %62, %63 : vector<2x128xf32>
    %65 = arith.mulf %56, %33 : vector<2x128xf32>
    %66 = arith.mulf %50, %58 : vector<2x128xf32>
    %67 = arith.addf %65, %66 : vector<2x128xf32>
    %68 = math.tanh %67 : vector<2x128xf32>
    %69 = arith.mulf %64, %68 : vector<2x128xf32>
    %70 = vector.extract_strided_slice %44 {offsets = [0, 0], sizes = [2, 128], strides = [1, 1]} : vector<2x512xf32> to vector<2x128xf32>
    %71 = arith.negf %70 : vector<2x128xf32>
    %72 = math.exp %71 : vector<2x128xf32>
    %cst_41 = arith.constant 1.000000e+00 : f32
    %73 = vector.broadcast %cst_41 : f32 to vector<2x128xf32>
    %74 = arith.addf %73, %72 : vector<2x128xf32>
    %75 = arith.divf %73, %74 : vector<2x128xf32>
    %76 = vector.extract_strided_slice %44 {offsets = [0, 128], sizes = [2, 128], strides = [1, 1]} : vector<2x512xf32> to vector<2x128xf32>
    %77 = arith.negf %76 : vector<2x128xf32>
    %78 = math.exp %77 : vector<2x128xf32>
    %cst_42 = arith.constant 1.000000e+00 : f32
    %79 = vector.broadcast %cst_42 : f32 to vector<2x128xf32>
    %80 = arith.addf %79, %78 : vector<2x128xf32>
    %81 = arith.divf %79, %80 : vector<2x128xf32>
    %82 = vector.extract_strided_slice %44 {offsets = [0, 256], sizes = [2, 128], strides = [1, 1]} : vector<2x512xf32> to vector<2x128xf32>
    %83 = math.tanh %82 : vector<2x128xf32>
    %84 = vector.extract_strided_slice %44 {offsets = [0, 384], sizes = [2, 128], strides = [1, 1]} : vector<2x512xf32> to vector<2x128xf32>
    %85 = arith.negf %84 : vector<2x128xf32>
    %86 = math.exp %85 : vector<2x128xf32>
    %cst_43 = arith.constant 1.000000e+00 : f32
    %87 = vector.broadcast %cst_43 : f32 to vector<2x128xf32>
    %88 = arith.addf %87, %86 : vector<2x128xf32>
    %89 = arith.divf %87, %88 : vector<2x128xf32>
    %90 = arith.mulf %81, %35 : vector<2x128xf32>
    %91 = arith.mulf %75, %83 : vector<2x128xf32>
    %92 = arith.addf %90, %91 : vector<2x128xf32>
    %93 = math.tanh %92 : vector<2x128xf32>
    %94 = arith.mulf %89, %93 : vector<2x128xf32>
    %c1_44 = arith.constant 1 : index
    %c0_45 = arith.constant 0 : index
    %95 = vector.load %arg14[%c1_44, %c0_45] : memref<16x1024xf32, #tpu.memory_space<vmem>>, vector<1x1024xf32>
    %c9 = arith.constant 9 : index
    %c0_46 = arith.constant 0 : index
    %96 = vector.load %arg14[%c9, %c0_46] : memref<16x1024xf32, #tpu.memory_space<vmem>>, vector<1x1024xf32>
    %97 = tpu.concatenate %95, %96 in 0 : vector<1x1024xf32>, vector<1x1024xf32> -> vector<2x1024xf32>
    %98 = vector.extract_strided_slice %97 {offsets = [0, 0], sizes = [2, 512], strides = [1, 1]} : vector<2x1024xf32> to vector<2x512xf32>
    %cst_47 = arith.constant dense<0.000000e+00> : vector<2x512xf32>
    %99 = tpu.matmul %69, %30, %cst_47 {dimension_numbers = #tpu.dot_dimension_numbers<[1], [0], [0], [1], [0, 0, 1, 1], [], []>} : vector<2x128xf32>, vector<128x512xf32>, vector<2x512xf32> -> vector<2x512xf32>
    %100 = arith.addf %98, %99 : vector<2x512xf32>
    %101 = vector.extract_strided_slice %97 {offsets = [0, 512], sizes = [2, 512], strides = [1, 1]} : vector<2x1024xf32> to vector<2x512xf32>
    %cst_48 = arith.constant dense<0.000000e+00> : vector<2x512xf32>
    %102 = tpu.matmul %94, %31, %cst_48 {dimension_numbers = #tpu.dot_dimension_numbers<[1], [0], [0], [1], [0, 0, 1, 1], [], []>} : vector<2x128xf32>, vector<128x512xf32>, vector<2x512xf32> -> vector<2x512xf32>
    %103 = arith.addf %101, %102 : vector<2x512xf32>
    %104 = vector.extract_strided_slice %100 {offsets = [0, 0], sizes = [2, 128], strides = [1, 1]} : vector<2x512xf32> to vector<2x128xf32>
    %105 = arith.negf %104 : vector<2x128xf32>
    %106 = math.exp %105 : vector<2x128xf32>
    %cst_49 = arith.constant 1.000000e+00 : f32
    %107 = vector.broadcast %cst_49 : f32 to vector<2x128xf32>
    %108 = arith.addf %107, %106 : vector<2x128xf32>
    %109 = arith.divf %107, %108 : vector<2x128xf32>
    %110 = vector.extract_strided_slice %100 {offsets = [0, 128], sizes = [2, 128], strides = [1, 1]} : vector<2x512xf32> to vector<2x128xf32>
    %111 = arith.negf %110 : vector<2x128xf32>
    %112 = math.exp %111 : vector<2x128xf32>
    %cst_50 = arith.constant 1.000000e+00 : f32
    %113 = vector.broadcast %cst_50 : f32 to vector<2x128xf32>
    %114 = arith.addf %113, %112 : vector<2x128xf32>
    %115 = arith.divf %113, %114 : vector<2x128xf32>
    %116 = vector.extract_strided_slice %100 {offsets = [0, 256], sizes = [2, 128], strides = [1, 1]} : vector<2x512xf32> to vector<2x128xf32>
    %117 = math.tanh %116 : vector<2x128xf32>
    %118 = vector.extract_strided_slice %100 {offsets = [0, 384], sizes = [2, 128], strides = [1, 1]} : vector<2x512xf32> to vector<2x128xf32>
    %119 = arith.negf %118 : vector<2x128xf32>
    %120 = math.exp %119 : vector<2x128xf32>
    %cst_51 = arith.constant 1.000000e+00 : f32
    %121 = vector.broadcast %cst_51 : f32 to vector<2x128xf32>
    %122 = arith.addf %121, %120 : vector<2x128xf32>
    %123 = arith.divf %121, %122 : vector<2x128xf32>
    %124 = arith.mulf %115, %67 : vector<2x128xf32>
    %125 = arith.mulf %109, %117 : vector<2x128xf32>
    %126 = arith.addf %124, %125 : vector<2x128xf32>
    %127 = math.tanh %126 : vector<2x128xf32>
    %128 = arith.mulf %123, %127 : vector<2x128xf32>
    %129 = vector.extract_strided_slice %103 {offsets = [0, 0], sizes = [2, 128], strides = [1, 1]} : vector<2x512xf32> to vector<2x128xf32>
    %130 = arith.negf %129 : vector<2x128xf32>
    %131 = math.exp %130 : vector<2x128xf32>
    %cst_52 = arith.constant 1.000000e+00 : f32
    %132 = vector.broadcast %cst_52 : f32 to vector<2x128xf32>
    %133 = arith.addf %132, %131 : vector<2x128xf32>
    %134 = arith.divf %132, %133 : vector<2x128xf32>
    %135 = vector.extract_strided_slice %103 {offsets = [0, 128], sizes = [2, 128], strides = [1, 1]} : vector<2x512xf32> to vector<2x128xf32>
    %136 = arith.negf %135 : vector<2x128xf32>
    %137 = math.exp %136 : vector<2x128xf32>
    %cst_53 = arith.constant 1.000000e+00 : f32
    %138 = vector.broadcast %cst_53 : f32 to vector<2x128xf32>
    %139 = arith.addf %138, %137 : vector<2x128xf32>
    %140 = arith.divf %138, %139 : vector<2x128xf32>
    %141 = vector.extract_strided_slice %103 {offsets = [0, 256], sizes = [2, 128], strides = [1, 1]} : vector<2x512xf32> to vector<2x128xf32>
    %142 = math.tanh %141 : vector<2x128xf32>
    %143 = vector.extract_strided_slice %103 {offsets = [0, 384], sizes = [2, 128], strides = [1, 1]} : vector<2x512xf32> to vector<2x128xf32>
    %144 = arith.negf %143 : vector<2x128xf32>
    %145 = math.exp %144 : vector<2x128xf32>
    %cst_54 = arith.constant 1.000000e+00 : f32
    %146 = vector.broadcast %cst_54 : f32 to vector<2x128xf32>
    %147 = arith.addf %146, %145 : vector<2x128xf32>
    %148 = arith.divf %146, %147 : vector<2x128xf32>
    %149 = arith.mulf %140, %92 : vector<2x128xf32>
    %150 = arith.mulf %134, %142 : vector<2x128xf32>
    %151 = arith.addf %149, %150 : vector<2x128xf32>
    %152 = math.tanh %151 : vector<2x128xf32>
    %153 = arith.mulf %148, %152 : vector<2x128xf32>
    %c2 = arith.constant 2 : index
    %c0_55 = arith.constant 0 : index
    %154 = vector.load %arg14[%c2, %c0_55] : memref<16x1024xf32, #tpu.memory_space<vmem>>, vector<1x1024xf32>
    %c10 = arith.constant 10 : index
    %c0_56 = arith.constant 0 : index
    %155 = vector.load %arg14[%c10, %c0_56] : memref<16x1024xf32, #tpu.memory_space<vmem>>, vector<1x1024xf32>
    %156 = tpu.concatenate %154, %155 in 0 : vector<1x1024xf32>, vector<1x1024xf32> -> vector<2x1024xf32>
    %157 = vector.extract_strided_slice %156 {offsets = [0, 0], sizes = [2, 512], strides = [1, 1]} : vector<2x1024xf32> to vector<2x512xf32>
    %cst_57 = arith.constant dense<0.000000e+00> : vector<2x512xf32>
    %158 = tpu.matmul %128, %30, %cst_57 {dimension_numbers = #tpu.dot_dimension_numbers<[1], [0], [0], [1], [0, 0, 1, 1], [], []>} : vector<2x128xf32>, vector<128x512xf32>, vector<2x512xf32> -> vector<2x512xf32>
    %159 = arith.addf %157, %158 : vector<2x512xf32>
    %160 = vector.extract_strided_slice %156 {offsets = [0, 512], sizes = [2, 512], strides = [1, 1]} : vector<2x1024xf32> to vector<2x512xf32>
    %cst_58 = arith.constant dense<0.000000e+00> : vector<2x512xf32>
    %161 = tpu.matmul %153, %31, %cst_58 {dimension_numbers = #tpu.dot_dimension_numbers<[1], [0], [0], [1], [0, 0, 1, 1], [], []>} : vector<2x128xf32>, vector<128x512xf32>, vector<2x512xf32> -> vector<2x512xf32>
    %162 = arith.addf %160, %161 : vector<2x512xf32>
    %163 = vector.extract_strided_slice %159 {offsets = [0, 0], sizes = [2, 128], strides = [1, 1]} : vector<2x512xf32> to vector<2x128xf32>
    %164 = arith.negf %163 : vector<2x128xf32>
    %165 = math.exp %164 : vector<2x128xf32>
    %cst_59 = arith.constant 1.000000e+00 : f32
    %166 = vector.broadcast %cst_59 : f32 to vector<2x128xf32>
    %167 = arith.addf %166, %165 : vector<2x128xf32>
    %168 = arith.divf %166, %167 : vector<2x128xf32>
    %169 = vector.extract_strided_slice %159 {offsets = [0, 128], sizes = [2, 128], strides = [1, 1]} : vector<2x512xf32> to vector<2x128xf32>
    %170 = arith.negf %169 : vector<2x128xf32>
    %171 = math.exp %170 : vector<2x128xf32>
    %cst_60 = arith.constant 1.000000e+00 : f32
    %172 = vector.broadcast %cst_60 : f32 to vector<2x128xf32>
    %173 = arith.addf %172, %171 : vector<2x128xf32>
    %174 = arith.divf %172, %173 : vector<2x128xf32>
    %175 = vector.extract_strided_slice %159 {offsets = [0, 256], sizes = [2, 128], strides = [1, 1]} : vector<2x512xf32> to vector<2x128xf32>
    %176 = math.tanh %175 : vector<2x128xf32>
    %177 = vector.extract_strided_slice %159 {offsets = [0, 384], sizes = [2, 128], strides = [1, 1]} : vector<2x512xf32> to vector<2x128xf32>
    %178 = arith.negf %177 : vector<2x128xf32>
    %179 = math.exp %178 : vector<2x128xf32>
    %cst_61 = arith.constant 1.000000e+00 : f32
    %180 = vector.broadcast %cst_61 : f32 to vector<2x128xf32>
    %181 = arith.addf %180, %179 : vector<2x128xf32>
    %182 = arith.divf %180, %181 : vector<2x128xf32>
    %183 = arith.mulf %174, %126 : vector<2x128xf32>
    %184 = arith.mulf %168, %176 : vector<2x128xf32>
    %185 = arith.addf %183, %184 : vector<2x128xf32>
    %186 = math.tanh %185 : vector<2x128xf32>
    %187 = arith.mulf %182, %186 : vector<2x128xf32>
    %188 = vector.extract_strided_slice %162 {offsets = [0, 0], sizes = [2, 128], strides = [1, 1]} : vector<2x512xf32> to vector<2x128xf32>
    %189 = arith.negf %188 : vector<2x128xf32>
    %190 = math.exp %189 : vector<2x128xf32>
    %cst_62 = arith.constant 1.000000e+00 : f32
    %191 = vector.broadcast %cst_62 : f32 to vector<2x128xf32>
    %192 = arith.addf %191, %190 : vector<2x128xf32>
    %193 = arith.divf %191, %192 : vector<2x128xf32>
    %194 = vector.extract_strided_slice %162 {offsets = [0, 128], sizes = [2, 128], strides = [1, 1]} : vector<2x512xf32> to vector<2x128xf32>
    %195 = arith.negf %194 : vector<2x128xf32>
    %196 = math.exp %195 : vector<2x128xf32>
    %cst_63 = arith.constant 1.000000e+00 : f32
    %197 = vector.broadcast %cst_63 : f32 to vector<2x128xf32>
    %198 = arith.addf %197, %196 : vector<2x128xf32>
    %199 = arith.divf %197, %198 : vector<2x128xf32>
    %200 = vector.extract_strided_slice %162 {offsets = [0, 256], sizes = [2, 128], strides = [1, 1]} : vector<2x512xf32> to vector<2x128xf32>
    %201 = math.tanh %200 : vector<2x128xf32>
    %202 = vector.extract_strided_slice %162 {offsets = [0, 384], sizes = [2, 128], strides = [1, 1]} : vector<2x512xf32> to vector<2x128xf32>
    %203 = arith.negf %202 : vector<2x128xf32>
    %204 = math.exp %203 : vector<2x128xf32>
    %cst_64 = arith.constant 1.000000e+00 : f32
    %205 = vector.broadcast %cst_64 : f32 to vector<2x128xf32>
    %206 = arith.addf %205, %204 : vector<2x128xf32>
    %207 = arith.divf %205, %206 : vector<2x128xf32>
    %208 = arith.mulf %199, %151 : vector<2x128xf32>
    %209 = arith.mulf %193, %201 : vector<2x128xf32>
    %210 = arith.addf %208, %209 : vector<2x128xf32>
    %211 = math.tanh %210 : vector<2x128xf32>
    %212 = arith.mulf %207, %211 : vector<2x128xf32>
    %c3 = arith.constant 3 : index
    %c0_65 = arith.constant 0 : index
    %213 = vector.load %arg14[%c3, %c0_65] : memref<16x1024xf32, #tpu.memory_space<vmem>>, vector<1x1024xf32>
    %c11 = arith.constant 11 : index
    %c0_66 = arith.constant 0 : index
    %214 = vector.load %arg14[%c11, %c0_66] : memref<16x1024xf32, #tpu.memory_space<vmem>>, vector<1x1024xf32>
    %215 = tpu.concatenate %213, %214 in 0 : vector<1x1024xf32>, vector<1x1024xf32> -> vector<2x1024xf32>
    %216 = vector.extract_strided_slice %215 {offsets = [0, 0], sizes = [2, 512], strides = [1, 1]} : vector<2x1024xf32> to vector<2x512xf32>
    %cst_67 = arith.constant dense<0.000000e+00> : vector<2x512xf32>
    %217 = tpu.matmul %187, %30, %cst_67 {dimension_numbers = #tpu.dot_dimension_numbers<[1], [0], [0], [1], [0, 0, 1, 1], [], []>} : vector<2x128xf32>, vector<128x512xf32>, vector<2x512xf32> -> vector<2x512xf32>
    %218 = arith.addf %216, %217 : vector<2x512xf32>
    %219 = vector.extract_strided_slice %215 {offsets = [0, 512], sizes = [2, 512], strides = [1, 1]} : vector<2x1024xf32> to vector<2x512xf32>
    %cst_68 = arith.constant dense<0.000000e+00> : vector<2x512xf32>
    %220 = tpu.matmul %212, %31, %cst_68 {dimension_numbers = #tpu.dot_dimension_numbers<[1], [0], [0], [1], [0, 0, 1, 1], [], []>} : vector<2x128xf32>, vector<128x512xf32>, vector<2x512xf32> -> vector<2x512xf32>
    %221 = arith.addf %219, %220 : vector<2x512xf32>
    %222 = vector.extract_strided_slice %218 {offsets = [0, 0], sizes = [2, 128], strides = [1, 1]} : vector<2x512xf32> to vector<2x128xf32>
    %223 = arith.negf %222 : vector<2x128xf32>
    %224 = math.exp %223 : vector<2x128xf32>
    %cst_69 = arith.constant 1.000000e+00 : f32
    %225 = vector.broadcast %cst_69 : f32 to vector<2x128xf32>
    %226 = arith.addf %225, %224 : vector<2x128xf32>
    %227 = arith.divf %225, %226 : vector<2x128xf32>
    %228 = vector.extract_strided_slice %218 {offsets = [0, 128], sizes = [2, 128], strides = [1, 1]} : vector<2x512xf32> to vector<2x128xf32>
    %229 = arith.negf %228 : vector<2x128xf32>
    %230 = math.exp %229 : vector<2x128xf32>
    %cst_70 = arith.constant 1.000000e+00 : f32
    %231 = vector.broadcast %cst_70 : f32 to vector<2x128xf32>
    %232 = arith.addf %231, %230 : vector<2x128xf32>
    %233 = arith.divf %231, %232 : vector<2x128xf32>
    %234 = vector.extract_strided_slice %218 {offsets = [0, 256], sizes = [2, 128], strides = [1, 1]} : vector<2x512xf32> to vector<2x128xf32>
    %235 = math.tanh %234 : vector<2x128xf32>
    %236 = vector.extract_strided_slice %218 {offsets = [0, 384], sizes = [2, 128], strides = [1, 1]} : vector<2x512xf32> to vector<2x128xf32>
    %237 = arith.negf %236 : vector<2x128xf32>
    %238 = math.exp %237 : vector<2x128xf32>
    %cst_71 = arith.constant 1.000000e+00 : f32
    %239 = vector.broadcast %cst_71 : f32 to vector<2x128xf32>
    %240 = arith.addf %239, %238 : vector<2x128xf32>
    %241 = arith.divf %239, %240 : vector<2x128xf32>
    %242 = arith.mulf %233, %185 : vector<2x128xf32>
    %243 = arith.mulf %227, %235 : vector<2x128xf32>
    %244 = arith.addf %242, %243 : vector<2x128xf32>
    %245 = math.tanh %244 : vector<2x128xf32>
    %246 = arith.mulf %241, %245 : vector<2x128xf32>
    %247 = vector.extract_strided_slice %221 {offsets = [0, 0], sizes = [2, 128], strides = [1, 1]} : vector<2x512xf32> to vector<2x128xf32>
    %248 = arith.negf %247 : vector<2x128xf32>
    %249 = math.exp %248 : vector<2x128xf32>
    %cst_72 = arith.constant 1.000000e+00 : f32
    %250 = vector.broadcast %cst_72 : f32 to vector<2x128xf32>
    %251 = arith.addf %250, %249 : vector<2x128xf32>
    %252 = arith.divf %250, %251 : vector<2x128xf32>
    %253 = vector.extract_strided_slice %221 {offsets = [0, 128], sizes = [2, 128], strides = [1, 1]} : vector<2x512xf32> to vector<2x128xf32>
    %254 = arith.negf %253 : vector<2x128xf32>
    %255 = math.exp %254 : vector<2x128xf32>
    %cst_73 = arith.constant 1.000000e+00 : f32
    %256 = vector.broadcast %cst_73 : f32 to vector<2x128xf32>
    %257 = arith.addf %256, %255 : vector<2x128xf32>
    %258 = arith.divf %256, %257 : vector<2x128xf32>
    %259 = vector.extract_strided_slice %221 {offsets = [0, 256], sizes = [2, 128], strides = [1, 1]} : vector<2x512xf32> to vector<2x128xf32>
    %260 = math.tanh %259 : vector<2x128xf32>
    %261 = vector.extract_strided_slice %221 {offsets = [0, 384], sizes = [2, 128], strides = [1, 1]} : vector<2x512xf32> to vector<2x128xf32>
    %262 = arith.negf %261 : vector<2x128xf32>
    %263 = math.exp %262 : vector<2x128xf32>
    %cst_74 = arith.constant 1.000000e+00 : f32
    %264 = vector.broadcast %cst_74 : f32 to vector<2x128xf32>
    %265 = arith.addf %264, %263 : vector<2x128xf32>
    %266 = arith.divf %264, %265 : vector<2x128xf32>
    %267 = arith.mulf %258, %210 : vector<2x128xf32>
    %268 = arith.mulf %252, %260 : vector<2x128xf32>
    %269 = arith.addf %267, %268 : vector<2x128xf32>
    %270 = math.tanh %269 : vector<2x128xf32>
    %271 = arith.mulf %266, %270 : vector<2x128xf32>
    %c4 = arith.constant 4 : index
    %c0_75 = arith.constant 0 : index
    %272 = vector.load %arg14[%c4, %c0_75] : memref<16x1024xf32, #tpu.memory_space<vmem>>, vector<1x1024xf32>
    %c12 = arith.constant 12 : index
    %c0_76 = arith.constant 0 : index
    %273 = vector.load %arg14[%c12, %c0_76] : memref<16x1024xf32, #tpu.memory_space<vmem>>, vector<1x1024xf32>
    %274 = tpu.concatenate %272, %273 in 0 : vector<1x1024xf32>, vector<1x1024xf32> -> vector<2x1024xf32>
    %275 = vector.extract_strided_slice %274 {offsets = [0, 0], sizes = [2, 512], strides = [1, 1]} : vector<2x1024xf32> to vector<2x512xf32>
    %cst_77 = arith.constant dense<0.000000e+00> : vector<2x512xf32>
    %276 = tpu.matmul %246, %30, %cst_77 {dimension_numbers = #tpu.dot_dimension_numbers<[1], [0], [0], [1], [0, 0, 1, 1], [], []>} : vector<2x128xf32>, vector<128x512xf32>, vector<2x512xf32> -> vector<2x512xf32>
    %277 = arith.addf %275, %276 : vector<2x512xf32>
    %278 = vector.extract_strided_slice %274 {offsets = [0, 512], sizes = [2, 512], strides = [1, 1]} : vector<2x1024xf32> to vector<2x512xf32>
    %cst_78 = arith.constant dense<0.000000e+00> : vector<2x512xf32>
    %279 = tpu.matmul %271, %31, %cst_78 {dimension_numbers = #tpu.dot_dimension_numbers<[1], [0], [0], [1], [0, 0, 1, 1], [], []>} : vector<2x128xf32>, vector<128x512xf32>, vector<2x512xf32> -> vector<2x512xf32>
    %280 = arith.addf %278, %279 : vector<2x512xf32>
    %281 = vector.extract_strided_slice %277 {offsets = [0, 0], sizes = [2, 128], strides = [1, 1]} : vector<2x512xf32> to vector<2x128xf32>
    %282 = arith.negf %281 : vector<2x128xf32>
    %283 = math.exp %282 : vector<2x128xf32>
    %cst_79 = arith.constant 1.000000e+00 : f32
    %284 = vector.broadcast %cst_79 : f32 to vector<2x128xf32>
    %285 = arith.addf %284, %283 : vector<2x128xf32>
    %286 = arith.divf %284, %285 : vector<2x128xf32>
    %287 = vector.extract_strided_slice %277 {offsets = [0, 128], sizes = [2, 128], strides = [1, 1]} : vector<2x512xf32> to vector<2x128xf32>
    %288 = arith.negf %287 : vector<2x128xf32>
    %289 = math.exp %288 : vector<2x128xf32>
    %cst_80 = arith.constant 1.000000e+00 : f32
    %290 = vector.broadcast %cst_80 : f32 to vector<2x128xf32>
    %291 = arith.addf %290, %289 : vector<2x128xf32>
    %292 = arith.divf %290, %291 : vector<2x128xf32>
    %293 = vector.extract_strided_slice %277 {offsets = [0, 256], sizes = [2, 128], strides = [1, 1]} : vector<2x512xf32> to vector<2x128xf32>
    %294 = math.tanh %293 : vector<2x128xf32>
    %295 = vector.extract_strided_slice %277 {offsets = [0, 384], sizes = [2, 128], strides = [1, 1]} : vector<2x512xf32> to vector<2x128xf32>
    %296 = arith.negf %295 : vector<2x128xf32>
    %297 = math.exp %296 : vector<2x128xf32>
    %cst_81 = arith.constant 1.000000e+00 : f32
    %298 = vector.broadcast %cst_81 : f32 to vector<2x128xf32>
    %299 = arith.addf %298, %297 : vector<2x128xf32>
    %300 = arith.divf %298, %299 : vector<2x128xf32>
    %301 = arith.mulf %292, %244 : vector<2x128xf32>
    %302 = arith.mulf %286, %294 : vector<2x128xf32>
    %303 = arith.addf %301, %302 : vector<2x128xf32>
    %304 = math.tanh %303 : vector<2x128xf32>
    %305 = arith.mulf %300, %304 : vector<2x128xf32>
    %306 = vector.extract_strided_slice %280 {offsets = [0, 0], sizes = [2, 128], strides = [1, 1]} : vector<2x512xf32> to vector<2x128xf32>
    %307 = arith.negf %306 : vector<2x128xf32>
    %308 = math.exp %307 : vector<2x128xf32>
    %cst_82 = arith.constant 1.000000e+00 : f32
    %309 = vector.broadcast %cst_82 : f32 to vector<2x128xf32>
    %310 = arith.addf %309, %308 : vector<2x128xf32>
    %311 = arith.divf %309, %310 : vector<2x128xf32>
    %312 = vector.extract_strided_slice %280 {offsets = [0, 128], sizes = [2, 128], strides = [1, 1]} : vector<2x512xf32> to vector<2x128xf32>
    %313 = arith.negf %312 : vector<2x128xf32>
    %314 = math.exp %313 : vector<2x128xf32>
    %cst_83 = arith.constant 1.000000e+00 : f32
    %315 = vector.broadcast %cst_83 : f32 to vector<2x128xf32>
    %316 = arith.addf %315, %314 : vector<2x128xf32>
    %317 = arith.divf %315, %316 : vector<2x128xf32>
    %318 = vector.extract_strided_slice %280 {offsets = [0, 256], sizes = [2, 128], strides = [1, 1]} : vector<2x512xf32> to vector<2x128xf32>
    %319 = math.tanh %318 : vector<2x128xf32>
    %320 = vector.extract_strided_slice %280 {offsets = [0, 384], sizes = [2, 128], strides = [1, 1]} : vector<2x512xf32> to vector<2x128xf32>
    %321 = arith.negf %320 : vector<2x128xf32>
    %322 = math.exp %321 : vector<2x128xf32>
    %cst_84 = arith.constant 1.000000e+00 : f32
    %323 = vector.broadcast %cst_84 : f32 to vector<2x128xf32>
    %324 = arith.addf %323, %322 : vector<2x128xf32>
    %325 = arith.divf %323, %324 : vector<2x128xf32>
    %326 = arith.mulf %317, %269 : vector<2x128xf32>
    %327 = arith.mulf %311, %319 : vector<2x128xf32>
    %328 = arith.addf %326, %327 : vector<2x128xf32>
    %329 = math.tanh %328 : vector<2x128xf32>
    %330 = arith.mulf %325, %329 : vector<2x128xf32>
    %c5 = arith.constant 5 : index
    %c0_85 = arith.constant 0 : index
    %331 = vector.load %arg14[%c5, %c0_85] : memref<16x1024xf32, #tpu.memory_space<vmem>>, vector<1x1024xf32>
    %c13 = arith.constant 13 : index
    %c0_86 = arith.constant 0 : index
    %332 = vector.load %arg14[%c13, %c0_86] : memref<16x1024xf32, #tpu.memory_space<vmem>>, vector<1x1024xf32>
    %333 = tpu.concatenate %331, %332 in 0 : vector<1x1024xf32>, vector<1x1024xf32> -> vector<2x1024xf32>
    %334 = vector.extract_strided_slice %333 {offsets = [0, 0], sizes = [2, 512], strides = [1, 1]} : vector<2x1024xf32> to vector<2x512xf32>
    %cst_87 = arith.constant dense<0.000000e+00> : vector<2x512xf32>
    %335 = tpu.matmul %305, %30, %cst_87 {dimension_numbers = #tpu.dot_dimension_numbers<[1], [0], [0], [1], [0, 0, 1, 1], [], []>} : vector<2x128xf32>, vector<128x512xf32>, vector<2x512xf32> -> vector<2x512xf32>
    %336 = arith.addf %334, %335 : vector<2x512xf32>
    %337 = vector.extract_strided_slice %333 {offsets = [0, 512], sizes = [2, 512], strides = [1, 1]} : vector<2x1024xf32> to vector<2x512xf32>
    %cst_88 = arith.constant dense<0.000000e+00> : vector<2x512xf32>
    %338 = tpu.matmul %330, %31, %cst_88 {dimension_numbers = #tpu.dot_dimension_numbers<[1], [0], [0], [1], [0, 0, 1, 1], [], []>} : vector<2x128xf32>, vector<128x512xf32>, vector<2x512xf32> -> vector<2x512xf32>
    %339 = arith.addf %337, %338 : vector<2x512xf32>
    %340 = vector.extract_strided_slice %336 {offsets = [0, 0], sizes = [2, 128], strides = [1, 1]} : vector<2x512xf32> to vector<2x128xf32>
    %341 = arith.negf %340 : vector<2x128xf32>
    %342 = math.exp %341 : vector<2x128xf32>
    %cst_89 = arith.constant 1.000000e+00 : f32
    %343 = vector.broadcast %cst_89 : f32 to vector<2x128xf32>
    %344 = arith.addf %343, %342 : vector<2x128xf32>
    %345 = arith.divf %343, %344 : vector<2x128xf32>
    %346 = vector.extract_strided_slice %336 {offsets = [0, 128], sizes = [2, 128], strides = [1, 1]} : vector<2x512xf32> to vector<2x128xf32>
    %347 = arith.negf %346 : vector<2x128xf32>
    %348 = math.exp %347 : vector<2x128xf32>
    %cst_90 = arith.constant 1.000000e+00 : f32
    %349 = vector.broadcast %cst_90 : f32 to vector<2x128xf32>
    %350 = arith.addf %349, %348 : vector<2x128xf32>
    %351 = arith.divf %349, %350 : vector<2x128xf32>
    %352 = vector.extract_strided_slice %336 {offsets = [0, 256], sizes = [2, 128], strides = [1, 1]} : vector<2x512xf32> to vector<2x128xf32>
    %353 = math.tanh %352 : vector<2x128xf32>
    %354 = vector.extract_strided_slice %336 {offsets = [0, 384], sizes = [2, 128], strides = [1, 1]} : vector<2x512xf32> to vector<2x128xf32>
    %355 = arith.negf %354 : vector<2x128xf32>
    %356 = math.exp %355 : vector<2x128xf32>
    %cst_91 = arith.constant 1.000000e+00 : f32
    %357 = vector.broadcast %cst_91 : f32 to vector<2x128xf32>
    %358 = arith.addf %357, %356 : vector<2x128xf32>
    %359 = arith.divf %357, %358 : vector<2x128xf32>
    %360 = arith.mulf %351, %303 : vector<2x128xf32>
    %361 = arith.mulf %345, %353 : vector<2x128xf32>
    %362 = arith.addf %360, %361 : vector<2x128xf32>
    %363 = math.tanh %362 : vector<2x128xf32>
    %364 = arith.mulf %359, %363 : vector<2x128xf32>
    %365 = vector.extract_strided_slice %339 {offsets = [0, 0], sizes = [2, 128], strides = [1, 1]} : vector<2x512xf32> to vector<2x128xf32>
    %366 = arith.negf %365 : vector<2x128xf32>
    %367 = math.exp %366 : vector<2x128xf32>
    %cst_92 = arith.constant 1.000000e+00 : f32
    %368 = vector.broadcast %cst_92 : f32 to vector<2x128xf32>
    %369 = arith.addf %368, %367 : vector<2x128xf32>
    %370 = arith.divf %368, %369 : vector<2x128xf32>
    %371 = vector.extract_strided_slice %339 {offsets = [0, 128], sizes = [2, 128], strides = [1, 1]} : vector<2x512xf32> to vector<2x128xf32>
    %372 = arith.negf %371 : vector<2x128xf32>
    %373 = math.exp %372 : vector<2x128xf32>
    %cst_93 = arith.constant 1.000000e+00 : f32
    %374 = vector.broadcast %cst_93 : f32 to vector<2x128xf32>
    %375 = arith.addf %374, %373 : vector<2x128xf32>
    %376 = arith.divf %374, %375 : vector<2x128xf32>
    %377 = vector.extract_strided_slice %339 {offsets = [0, 256], sizes = [2, 128], strides = [1, 1]} : vector<2x512xf32> to vector<2x128xf32>
    %378 = math.tanh %377 : vector<2x128xf32>
    %379 = vector.extract_strided_slice %339 {offsets = [0, 384], sizes = [2, 128], strides = [1, 1]} : vector<2x512xf32> to vector<2x128xf32>
    %380 = arith.negf %379 : vector<2x128xf32>
    %381 = math.exp %380 : vector<2x128xf32>
    %cst_94 = arith.constant 1.000000e+00 : f32
    %382 = vector.broadcast %cst_94 : f32 to vector<2x128xf32>
    %383 = arith.addf %382, %381 : vector<2x128xf32>
    %384 = arith.divf %382, %383 : vector<2x128xf32>
    %385 = arith.mulf %376, %328 : vector<2x128xf32>
    %386 = arith.mulf %370, %378 : vector<2x128xf32>
    %387 = arith.addf %385, %386 : vector<2x128xf32>
    %388 = math.tanh %387 : vector<2x128xf32>
    %389 = arith.mulf %384, %388 : vector<2x128xf32>
    %c6 = arith.constant 6 : index
    %c0_95 = arith.constant 0 : index
    %390 = vector.load %arg14[%c6, %c0_95] : memref<16x1024xf32, #tpu.memory_space<vmem>>, vector<1x1024xf32>
    %c14 = arith.constant 14 : index
    %c0_96 = arith.constant 0 : index
    %391 = vector.load %arg14[%c14, %c0_96] : memref<16x1024xf32, #tpu.memory_space<vmem>>, vector<1x1024xf32>
    %392 = tpu.concatenate %390, %391 in 0 : vector<1x1024xf32>, vector<1x1024xf32> -> vector<2x1024xf32>
    %393 = vector.extract_strided_slice %392 {offsets = [0, 0], sizes = [2, 512], strides = [1, 1]} : vector<2x1024xf32> to vector<2x512xf32>
    %cst_97 = arith.constant dense<0.000000e+00> : vector<2x512xf32>
    %394 = tpu.matmul %364, %30, %cst_97 {dimension_numbers = #tpu.dot_dimension_numbers<[1], [0], [0], [1], [0, 0, 1, 1], [], []>} : vector<2x128xf32>, vector<128x512xf32>, vector<2x512xf32> -> vector<2x512xf32>
    %395 = arith.addf %393, %394 : vector<2x512xf32>
    %396 = vector.extract_strided_slice %392 {offsets = [0, 512], sizes = [2, 512], strides = [1, 1]} : vector<2x1024xf32> to vector<2x512xf32>
    %cst_98 = arith.constant dense<0.000000e+00> : vector<2x512xf32>
    %397 = tpu.matmul %389, %31, %cst_98 {dimension_numbers = #tpu.dot_dimension_numbers<[1], [0], [0], [1], [0, 0, 1, 1], [], []>} : vector<2x128xf32>, vector<128x512xf32>, vector<2x512xf32> -> vector<2x512xf32>
    %398 = arith.addf %396, %397 : vector<2x512xf32>
    %399 = vector.extract_strided_slice %395 {offsets = [0, 0], sizes = [2, 128], strides = [1, 1]} : vector<2x512xf32> to vector<2x128xf32>
    %400 = arith.negf %399 : vector<2x128xf32>
    %401 = math.exp %400 : vector<2x128xf32>
    %cst_99 = arith.constant 1.000000e+00 : f32
    %402 = vector.broadcast %cst_99 : f32 to vector<2x128xf32>
    %403 = arith.addf %402, %401 : vector<2x128xf32>
    %404 = arith.divf %402, %403 : vector<2x128xf32>
    %405 = vector.extract_strided_slice %395 {offsets = [0, 128], sizes = [2, 128], strides = [1, 1]} : vector<2x512xf32> to vector<2x128xf32>
    %406 = arith.negf %405 : vector<2x128xf32>
    %407 = math.exp %406 : vector<2x128xf32>
    %cst_100 = arith.constant 1.000000e+00 : f32
    %408 = vector.broadcast %cst_100 : f32 to vector<2x128xf32>
    %409 = arith.addf %408, %407 : vector<2x128xf32>
    %410 = arith.divf %408, %409 : vector<2x128xf32>
    %411 = vector.extract_strided_slice %395 {offsets = [0, 256], sizes = [2, 128], strides = [1, 1]} : vector<2x512xf32> to vector<2x128xf32>
    %412 = math.tanh %411 : vector<2x128xf32>
    %413 = vector.extract_strided_slice %395 {offsets = [0, 384], sizes = [2, 128], strides = [1, 1]} : vector<2x512xf32> to vector<2x128xf32>
    %414 = arith.negf %413 : vector<2x128xf32>
    %415 = math.exp %414 : vector<2x128xf32>
    %cst_101 = arith.constant 1.000000e+00 : f32
    %416 = vector.broadcast %cst_101 : f32 to vector<2x128xf32>
    %417 = arith.addf %416, %415 : vector<2x128xf32>
    %418 = arith.divf %416, %417 : vector<2x128xf32>
    %419 = arith.mulf %410, %362 : vector<2x128xf32>
    %420 = arith.mulf %404, %412 : vector<2x128xf32>
    %421 = arith.addf %419, %420 : vector<2x128xf32>
    %422 = math.tanh %421 : vector<2x128xf32>
    %423 = arith.mulf %418, %422 : vector<2x128xf32>
    %424 = vector.extract_strided_slice %398 {offsets = [0, 0], sizes = [2, 128], strides = [1, 1]} : vector<2x512xf32> to vector<2x128xf32>
    %425 = arith.negf %424 : vector<2x128xf32>
    %426 = math.exp %425 : vector<2x128xf32>
    %cst_102 = arith.constant 1.000000e+00 : f32
    %427 = vector.broadcast %cst_102 : f32 to vector<2x128xf32>
    %428 = arith.addf %427, %426 : vector<2x128xf32>
    %429 = arith.divf %427, %428 : vector<2x128xf32>
    %430 = vector.extract_strided_slice %398 {offsets = [0, 128], sizes = [2, 128], strides = [1, 1]} : vector<2x512xf32> to vector<2x128xf32>
    %431 = arith.negf %430 : vector<2x128xf32>
    %432 = math.exp %431 : vector<2x128xf32>
    %cst_103 = arith.constant 1.000000e+00 : f32
    %433 = vector.broadcast %cst_103 : f32 to vector<2x128xf32>
    %434 = arith.addf %433, %432 : vector<2x128xf32>
    %435 = arith.divf %433, %434 : vector<2x128xf32>
    %436 = vector.extract_strided_slice %398 {offsets = [0, 256], sizes = [2, 128], strides = [1, 1]} : vector<2x512xf32> to vector<2x128xf32>
    %437 = math.tanh %436 : vector<2x128xf32>
    %438 = vector.extract_strided_slice %398 {offsets = [0, 384], sizes = [2, 128], strides = [1, 1]} : vector<2x512xf32> to vector<2x128xf32>
    %439 = arith.negf %438 : vector<2x128xf32>
    %440 = math.exp %439 : vector<2x128xf32>
    %cst_104 = arith.constant 1.000000e+00 : f32
    %441 = vector.broadcast %cst_104 : f32 to vector<2x128xf32>
    %442 = arith.addf %441, %440 : vector<2x128xf32>
    %443 = arith.divf %441, %442 : vector<2x128xf32>
    %444 = arith.mulf %435, %387 : vector<2x128xf32>
    %445 = arith.mulf %429, %437 : vector<2x128xf32>
    %446 = arith.addf %444, %445 : vector<2x128xf32>
    %447 = math.tanh %446 : vector<2x128xf32>
    %448 = arith.mulf %443, %447 : vector<2x128xf32>
    %c7 = arith.constant 7 : index
    %c0_105 = arith.constant 0 : index
    %449 = vector.load %arg14[%c7, %c0_105] : memref<16x1024xf32, #tpu.memory_space<vmem>>, vector<1x1024xf32>
    %c15 = arith.constant 15 : index
    %c0_106 = arith.constant 0 : index
    %450 = vector.load %arg14[%c15, %c0_106] : memref<16x1024xf32, #tpu.memory_space<vmem>>, vector<1x1024xf32>
    %451 = tpu.concatenate %449, %450 in 0 : vector<1x1024xf32>, vector<1x1024xf32> -> vector<2x1024xf32>
    %452 = vector.extract_strided_slice %451 {offsets = [0, 0], sizes = [2, 512], strides = [1, 1]} : vector<2x1024xf32> to vector<2x512xf32>
    %cst_107 = arith.constant dense<0.000000e+00> : vector<2x512xf32>
    %453 = tpu.matmul %423, %30, %cst_107 {dimension_numbers = #tpu.dot_dimension_numbers<[1], [0], [0], [1], [0, 0, 1, 1], [], []>} : vector<2x128xf32>, vector<128x512xf32>, vector<2x512xf32> -> vector<2x512xf32>
    %454 = arith.addf %452, %453 : vector<2x512xf32>
    %455 = vector.extract_strided_slice %451 {offsets = [0, 512], sizes = [2, 512], strides = [1, 1]} : vector<2x1024xf32> to vector<2x512xf32>
    %cst_108 = arith.constant dense<0.000000e+00> : vector<2x512xf32>
    %456 = tpu.matmul %448, %31, %cst_108 {dimension_numbers = #tpu.dot_dimension_numbers<[1], [0], [0], [1], [0, 0, 1, 1], [], []>} : vector<2x128xf32>, vector<128x512xf32>, vector<2x512xf32> -> vector<2x512xf32>
    %457 = arith.addf %455, %456 : vector<2x512xf32>
    %458 = vector.extract_strided_slice %454 {offsets = [0, 0], sizes = [2, 128], strides = [1, 1]} : vector<2x512xf32> to vector<2x128xf32>
    %459 = arith.negf %458 : vector<2x128xf32>
    %460 = math.exp %459 : vector<2x128xf32>
    %cst_109 = arith.constant 1.000000e+00 : f32
    %461 = vector.broadcast %cst_109 : f32 to vector<2x128xf32>
    %462 = arith.addf %461, %460 : vector<2x128xf32>
    %463 = arith.divf %461, %462 : vector<2x128xf32>
    %464 = vector.extract_strided_slice %454 {offsets = [0, 128], sizes = [2, 128], strides = [1, 1]} : vector<2x512xf32> to vector<2x128xf32>
    %465 = arith.negf %464 : vector<2x128xf32>
    %466 = math.exp %465 : vector<2x128xf32>
    %cst_110 = arith.constant 1.000000e+00 : f32
    %467 = vector.broadcast %cst_110 : f32 to vector<2x128xf32>
    %468 = arith.addf %467, %466 : vector<2x128xf32>
    %469 = arith.divf %467, %468 : vector<2x128xf32>
    %470 = vector.extract_strided_slice %454 {offsets = [0, 256], sizes = [2, 128], strides = [1, 1]} : vector<2x512xf32> to vector<2x128xf32>
    %471 = math.tanh %470 : vector<2x128xf32>
    %472 = vector.extract_strided_slice %454 {offsets = [0, 384], sizes = [2, 128], strides = [1, 1]} : vector<2x512xf32> to vector<2x128xf32>
    %473 = arith.negf %472 : vector<2x128xf32>
    %474 = math.exp %473 : vector<2x128xf32>
    %cst_111 = arith.constant 1.000000e+00 : f32
    %475 = vector.broadcast %cst_111 : f32 to vector<2x128xf32>
    %476 = arith.addf %475, %474 : vector<2x128xf32>
    %477 = arith.divf %475, %476 : vector<2x128xf32>
    %478 = arith.mulf %469, %421 : vector<2x128xf32>
    %479 = arith.mulf %463, %471 : vector<2x128xf32>
    %480 = arith.addf %478, %479 : vector<2x128xf32>
    %481 = math.tanh %480 : vector<2x128xf32>
    %482 = arith.mulf %477, %481 : vector<2x128xf32>
    %483 = vector.extract_strided_slice %457 {offsets = [0, 0], sizes = [2, 128], strides = [1, 1]} : vector<2x512xf32> to vector<2x128xf32>
    %484 = arith.negf %483 : vector<2x128xf32>
    %485 = math.exp %484 : vector<2x128xf32>
    %cst_112 = arith.constant 1.000000e+00 : f32
    %486 = vector.broadcast %cst_112 : f32 to vector<2x128xf32>
    %487 = arith.addf %486, %485 : vector<2x128xf32>
    %488 = arith.divf %486, %487 : vector<2x128xf32>
    %489 = vector.extract_strided_slice %457 {offsets = [0, 128], sizes = [2, 128], strides = [1, 1]} : vector<2x512xf32> to vector<2x128xf32>
    %490 = arith.negf %489 : vector<2x128xf32>
    %491 = math.exp %490 : vector<2x128xf32>
    %cst_113 = arith.constant 1.000000e+00 : f32
    %492 = vector.broadcast %cst_113 : f32 to vector<2x128xf32>
    %493 = arith.addf %492, %491 : vector<2x128xf32>
    %494 = arith.divf %492, %493 : vector<2x128xf32>
    %495 = vector.extract_strided_slice %457 {offsets = [0, 256], sizes = [2, 128], strides = [1, 1]} : vector<2x512xf32> to vector<2x128xf32>
    %496 = math.tanh %495 : vector<2x128xf32>
    %497 = vector.extract_strided_slice %457 {offsets = [0, 384], sizes = [2, 128], strides = [1, 1]} : vector<2x512xf32> to vector<2x128xf32>
    %498 = arith.negf %497 : vector<2x128xf32>
    %499 = math.exp %498 : vector<2x128xf32>
    %cst_114 = arith.constant 1.000000e+00 : f32
    %500 = vector.broadcast %cst_114 : f32 to vector<2x128xf32>
    %501 = arith.addf %500, %499 : vector<2x128xf32>
    %502 = arith.divf %500, %501 : vector<2x128xf32>
    %503 = arith.mulf %494, %446 : vector<2x128xf32>
    %504 = arith.mulf %488, %496 : vector<2x128xf32>
    %505 = arith.addf %503, %504 : vector<2x128xf32>
    %506 = math.tanh %505 : vector<2x128xf32>
    %507 = arith.mulf %502, %506 : vector<2x128xf32>
    %c0_115 = arith.constant 0 : index
    %c0_116 = arith.constant 0 : index
    %508 = vector.load %arg10[%c0_115, %c0_116] : memref<128x156xf32, #tpu.memory_space<vmem>>, vector<128x156xf32>
    %cst_117 = arith.constant dense<0.000000e+00> : vector<2x156xf32>
    %509 = tpu.matmul %482, %508, %cst_117 {dimension_numbers = #tpu.dot_dimension_numbers<[1], [0], [0], [1], [0, 0, 1, 1], [], []>} : vector<2x128xf32>, vector<128x156xf32>, vector<2x156xf32> -> vector<2x156xf32>
    %c0_118 = arith.constant 0 : index
    %c0_119 = arith.constant 0 : index
    %510 = vector.load %arg11[%c0_118, %c0_119] : memref<128x156xf32, #tpu.memory_space<vmem>>, vector<128x156xf32>
    %cst_120 = arith.constant dense<0.000000e+00> : vector<2x156xf32>
    %511 = tpu.matmul %507, %510, %cst_120 {dimension_numbers = #tpu.dot_dimension_numbers<[1], [0], [0], [1], [0, 0, 1, 1], [], []>} : vector<2x128xf32>, vector<128x156xf32>, vector<2x156xf32> -> vector<2x156xf32>
    %512 = arith.addf %509, %511 : vector<2x156xf32>
    %c0_121 = arith.constant 0 : index
    %c0_122 = arith.constant 0 : index
    %513 = vector.load %arg12[%c0_121, %c0_122] : memref<1x156xf32, #tpu.memory_space<vmem>>, vector<1x156xf32>
    %514 = vector.broadcast %513 : vector<1x156xf32> to vector<2x156xf32>
    %515 = arith.addf %512, %514 : vector<2x156xf32>
    %c0_123 = arith.constant 0 : index
    %c0_124 = arith.constant 0 : index
    %516 = vector.load %arg13[%c0_123, %c0_124] : memref<2x156xf32, #tpu.memory_space<vmem>>, vector<2x156xf32>
    tpu.vector_store %arg13[%c0_123, %c0_124], %515 {strides = array<i32>} : memref<2x156xf32, #tpu.memory_space<vmem>>, vector<2x156xf32>,
    return
  }
  func.func @transform_0(%arg0: i32) -> (i32, i32, i32) {
    %c0_i32 = arith.constant 0 : i32
    %c0_i32_0 = arith.constant 0 : i32
    %c0_i32_1 = arith.constant 0 : i32
    %c0_i32_2 = arith.constant 0 : i32
    return %c0_i32, %c0_i32_0, %c0_i32_1 : i32, i32, i32
  }
  func.func @transform_1(%arg0: i32) -> (i32, i32) {
    %c0_i32 = arith.constant 0 : i32
    %c0_i32_0 = arith.constant 0 : i32
    %c0_i32_1 = arith.constant 0 : i32
    return %c0_i32, %c0_i32_0 : i32, i32
  }
  func.func @transform_2(%arg0: i32) -> (i32, i32) {
    %c0_i32 = arith.constant 0 : i32
    %c0_i32_0 = arith.constant 0 : i32
    %c0_i32_1 = arith.constant 0 : i32
    return %c0_i32, %c0_i32_0 : i32, i32
  }
  func.func @transform_3(%arg0: i32) -> (i32, i32) {
    %c0_i32 = arith.constant 0 : i32
    %c0_i32_0 = arith.constant 0 : i32
    %c0_i32_1 = arith.constant 0 : i32
    return %c0_i32, %c0_i32_0 : i32, i32
  }
  func.func @transform_4(%arg0: i32) -> (i32, i32) {
    %c0_i32 = arith.constant 0 : i32
    %c0_i32_0 = arith.constant 0 : i32
    %c0_i32_1 = arith.constant 0 : i32
    return %c0_i32, %c0_i32_0 : i32, i32
  }
  func.func @transform_5(%arg0: i32) -> (i32, i32) {
    %c0_i32 = arith.constant 0 : i32
    %c0_i32_0 = arith.constant 0 : i32
    %c0_i32_1 = arith.constant 0 : i32
    return %c0_i32, %c0_i32_0 : i32, i32
  }
  func.func @transform_6(%arg0: i32) -> (i32, i32) {
    %c0_i32 = arith.constant 0 : i32
    %c0_i32_0 = arith.constant 0 : i32
    %c0_i32_1 = arith.constant 0 : i32
    return %c0_i32, %c0_i32_0 : i32, i32
  }
  func.func @transform_7(%arg0: i32) -> (i32, i32) {
    %c0_i32 = arith.constant 0 : i32
    %c0_i32_0 = arith.constant 0 : i32
    %c0_i32_1 = arith.constant 0 : i32
    return %c0_i32, %c0_i32_0 : i32, i32
  }
  func.func @transform_8(%arg0: i32) -> (i32, i32) {
    %c0_i32 = arith.constant 0 : i32
    %c0_i32_0 = arith.constant 0 : i32
    %c0_i32_1 = arith.constant 0 : i32
    return %c0_i32, %c0_i32_0 : i32, i32
  }
  func.func @transform_9(%arg0: i32) -> (i32, i32) {
    %c0_i32 = arith.constant 0 : i32
    %c0_i32_0 = arith.constant 0 : i32
    %c0_i32_1 = arith.constant 0 : i32
    return %c0_i32, %c0_i32_0 : i32, i32
  }
  func.func @transform_10(%arg0: i32) -> (i32, i32) {
    %c0_i32 = arith.constant 0 : i32
    %c0_i32_0 = arith.constant 0 : i32
    %c0_i32_1 = arith.constant 0 : i32
    return %c0_i32, %c0_i32_0 : i32, i32
  }
  func.func @transform_11(%arg0: i32) -> (i32, i32) {
    %c0_i32 = arith.constant 0 : i32
    %c0_i32_0 = arith.constant 0 : i32
    %c0_i32_1 = arith.constant 0 : i32
    return %c0_i32, %c0_i32_0 : i32, i32
  }
  func.func @transform_12(%arg0: i32) -> (i32, i32) {
    %c0_i32 = arith.constant 0 : i32
    %c0_i32_0 = arith.constant 0 : i32
    %c0_i32_1 = arith.constant 0 : i32
    return %c0_i32, %c0_i32_0 : i32, i32
  }
}

</mosaic_0001>

<bundles_post_ra>
// kernel: gcn_lstm_wrong_forward.1
= control target key start
LH: loop header
LB: loop body
LE: loop exit
PB: predicated region body
PF: predicated region fallthrough
CT: control target
= control target key end

     0   :  { %17 = vsyncpa [#allocation4], 0  ;;  %s9073_s0 = inlined_call_operand.vmem [shape: f32[2,4,156], index: 0, kind: input, shape index: {}]   ;;  %s9074_s1 = inlined_call_operand.hbm [shape: f32[156,156], index: 1, kind: input, shape index: {}]   ;;  %s9075_s2 = inlined_call_operand.vmem [shape: f32[16,4], index: 2, kind: input, shape index: {}]   ;;  %s9076_s3 = inlined_call_operand.vmem [shape: f32[16,1], index: 3, kind: input, shape index: {}]   ;;  %s9077_s4 = inlined_call_operand.vmem [shape: f32[8,16], index: 4, kind: input, shape index: {}]   ;;  %s9078_s5 = inlined_call_operand.hbm [shape: f32[156,1024], index: 5, kind: input, shape index: {}]   ;;  %s9079_s6 = inlined_call_operand.vmem [shape: f32[16,1024], index: 6, kind: input, shape index: {}]   ;;  %s9080_s7 = inlined_call_operand.vmem [shape: f32[128,512], index: 7, kind: input, shape index: {}]   ;;  %s9081_s8 = inlined_call_operand.hbm [shape: f32[128,512], index: 8, kind: input, shape index: {}]   ;;  %s9082_s9 = inlined_call_operand.vmem [shape: f32[128,156], index: 9, kind: input, shape index: {}]   ;;  %s9083_s10 = inlined_call_operand.vmem [shape: f32[128,156], index: 10, kind: input, shape index: {}]   ;;  %s9084_s11 = inlined_call_operand.vmem [shape: f32[1,156], index: 11, kind: input, shape index: {}]   ;;  %s9085_s12 = inlined_call_operand.hbm [shape: f32[2,156], index: 12, kind: output, shape index: {}]  }
   0x1   :  { %18 = vsyncpa [#allocation7], 0  ;;  %s45_s23 = sshll.u32 %s9078_s5, 4  ;;  %s46_s23 = int_to_ptr.hbm [resolvable:$true] %s45_s23 }
   0x2   :  { %19 = vsyncpa [#allocation5], 0  ;;  %s5001_s24 = smov [#allocation6]   ;;  %s26_s28 = sshll.u32 %s9074_s1, 4  ;;  %s27_s28 = int_to_ptr.hbm [resolvable:$true] %s26_s28 }
   0x3   :  { %s47_s25 = sshll.u32 %s5001_s24, 4  ;;  %s5002_s29 = smov 1024   ;;  %s48_s25 = int_to_ptr.vmem [resolvable:$true] %s47_s25 }
   0x4   :  { %s5003_s30 = smov 64   ;;  %s5004_s13 = smov [#allocation3]  }
   0x5   :  { %53 = dma.hbm_to_vmem [thread:$0]  %s46_s23, 20480, %s48_s25, [#allocation7], %s5002_s29, %s5002_s29, %s5003_s30  }
   0x6   :  { %s28_s14 = sshll.u32 %s5004_s13, 4  ;;  %s5005_s15 = smov 256   ;;  %s29_s14 = int_to_ptr.vmem [resolvable:$true] %s28_s14 }
   0x7   :  { %s5006_s16 = smov 16   ;;  %s62_s18 = sshll.u32 %s9081_s8, 4  ;;  %s63_s18 = int_to_ptr.hbm [resolvable:$true] %s62_s18 }
   0x8   :  { %34 = dma.hbm_to_vmem [thread:$0]  %s27_s28, 5120, %s29_s14, [#allocation4], %s5005_s15, %s5005_s15, %s5006_s16  }
   0x9   :  { %s5007_s19 = smov [#allocation8]   ;;  %s5008_s21 = smov 512  }
   0xa   :  { %s64_s20 = sshll.u32 %s5007_s19, 4  ;;  %s5009_s1 = smov 32   ;;  %s65_s20 = int_to_ptr.vmem [resolvable:$true] %s64_s20 }
   0xb   :  { %70 = dma.hbm_to_vmem [thread:$0]  %s63_s18, 8192, %s65_s20, [#allocation7], %s5008_s21, %s5008_s21, %s5009_s1  }
   0xc   :  { %4995 = dma.done.wait [#allocation4], 5120  }
   0xd   :  { %4996 = vsyncadd [#allocation4], 4294962176 }
   0xe   :  { %4997 = dma.done.wait [#allocation7], 28672  }
   0xf   :  { %4998 = vsyncadd [#allocation7], 4294938624  ;;  %v134_v0 = vld [vmem:[%s9073_s0] sm:$0xff]  ;;  %vm146_vm0 = vcmask 1043456   ;;  %v4153_v1 = vld [vmem:[%s9073_s0 + $0x8] sm:$0xff]  ;;  %vm139_vm1 = vcmask 31744  }
  0x10   :  { %136 = vst [vmem:[#allocation1] ss:$2 sm:$0xff] %v134_v0  ;;  %v129_v2 = vld [vmem:[%s9075_s2] sm:$0xff]  ;;  %v119_v3 = vld [vmem:[#allocation3 + $0xf0] sm:$0xff]  ;;  %v117_v6 = vld [vmem:[#allocation3 + $0xe0] sm:$0xff]  ;;  %v5010_v49 = vmov 0  }
  0x11   :  { %v127_v7 = vld [vmem:[#allocation3 + $0x130] sm:$0xf]  ;;  %v125_v9 = vld [vmem:[#allocation3 + $0x120] sm:$0xff]  ;;  %v120_v14 = vld [vmem:[#allocation3 + $0xf8] sm:$0xff]  ;;  %4258 = vset.pattern.permute.xlu0 %v5010_v49  ;;  %vm253_vm2 = vcmask 228352   ;;  %vm406_vm3 = vcmask 130048  }
  0x12   :  { %v115_v8 = vld [vmem:[#allocation3 + $0xd0] sm:$0xff]  ;;  %v130_v11 = vld [vmem:[%s9075_s2 + $0x8] sm:$0xff]  ;;  %v128_v16 = vld [vmem:[#allocation3 + $0x138] sm:$0xf]  ;;  %vm1257_vm4 = vcmask 1040384   ;;  %s5012_s29 = smov [#allocation9]  }
  0x13   :  { %v123_v10 = vld [vmem:[#allocation3 + $0x110] sm:$0xff]  ;;  %v113_v15 = vld [vmem:[#allocation3 + $0xc0] sm:$0xff]  ;;  %v118_v17 = vld [vmem:[#allocation3 + $0xe8] sm:$0xff]  ;;  %s4134_s30 = sshll.u32 %s5012_s29, 4  ;;  %s4135_s30 = int_to_ptr.vmem [resolvable:$true] %s4134_s30 }
  0x14   :  { %v111_v18 = vld [vmem:[#allocation3 + $0xb0] sm:$0xff]  ;;  %v126_v19 = vld [vmem:[#allocation3 + $0x128] sm:$0xff]  ;;  %v116_v20 = vld [vmem:[#allocation3 + $0xd8] sm:$0xff] }
  0x15   :  { %v109_v21 = vld [vmem:[#allocation3 + $0xa0] sm:$0xff]  ;;  %v124_v22 = vld [vmem:[#allocation3 + $0x118] sm:$0xff]  ;;  %v114_v23 = vld [vmem:[#allocation3 + $0xc8] sm:$0xff] }
  0x16   :  { %v107_v24 = vld [vmem:[#allocation3 + $0x90] sm:$0xff]  ;;  %v112_v25 = vld [vmem:[#allocation3 + $0xb8] sm:$0xff]  ;;  %v105_v26 = vld [vmem:[#allocation3 + $0x80] sm:$0xff] }
  0x17   :  { %v137_v4 = vld.sshfl [vmem:[#allocation1] sm:$0xff pattern:$0x75316420]  ;;  %v138_v5 = vld.sshfl [vmem:[#allocation1 + $0x8] sm:$0xff pattern:$0x75316420] }
  0x18   :  { %4147 = vmatpush.msk.msra.mxu0 %vm146_vm0, %v137_v4  ;;  %4150 = vmatpush.msk.msra.mxu1 %vm146_vm0, %v138_v5  ;;  %200 = vst [vmem:[#allocation1] ss:$2 sm:$0xff] %v4153_v1  ;;  %v110_v27 = vld [vmem:[#allocation3 + $0xa8] sm:$0xff]  ;;  %v103_v28 = vld [vmem:[#allocation3 + $0x70] sm:$0xff]  ;;  %v108_v29 = vld [vmem:[#allocation3 + $0x98] sm:$0xff] }
  0x19   :  { %4148 = vmatmul.msk.f32.vlgmr.msra.gmra.mxu0 %vm139_vm1, %v129_v2  ;;  %4151 = vmatmul.msk.f32.vlgmr.msra.gmra.mxu1 %vm139_vm1, %v129_v2  ;;  %v101_v30 = vld [vmem:[#allocation3 + $0x60] sm:$0xff]  ;;  %v106_v31 = vld [vmem:[#allocation3 + $0x88] sm:$0xff]  ;;  %v99_v32 = vld [vmem:[#allocation3 + $0x50] sm:$0xff] }
  0x1a   :  { %272 = vmatpush.msrb.mxu0 %v119_v3  ;;  %4160 = vmatpush.msk.msrb.mxu1 %vm146_vm0, %v127_v7  ;;  %v104_v33 = vld [vmem:[#allocation3 + $0x78] sm:$0xff]  ;;  %v97_v34 = vld [vmem:[#allocation3 + $0x40] sm:$0xff]  ;;  %v102_v35 = vld [vmem:[#allocation3 + $0x68] sm:$0xff] }
  0x1b   :  { %v95_v36 = vld [vmem:[#allocation3 + $0x30] sm:$0xff]  ;;  %v100_v37 = vld [vmem:[#allocation3 + $0x58] sm:$0xff]  ;;  %v93_v38 = vld [vmem:[#allocation3 + $0x20] sm:$0xff] }
  0x1c   :  { %273 = vmatpush.msrb.mxu0 %v117_v6  ;;  %314 = vmatpush.msrb.mxu1 %v125_v9  ;;  %v98_v39 = vld [vmem:[#allocation3 + $0x48] sm:$0xff]  ;;  %v91_v40 = vld [vmem:[#allocation3 + $0x10] sm:$0xff]  ;;  %v96_v41 = vld [vmem:[#allocation3 + $0x38] sm:$0xff] }
  0x1d   :  { %v94_v42 = vld [vmem:[#allocation3 + $0x28] sm:$0xff]  ;;  %v92_v43 = vld [vmem:[#allocation3 + $0x18] sm:$0xff]  ;;  %v89_v44 = vld [vmem:[#allocation3] sm:$0xff] }
  0x1e   :  { %274 = vmatpush.msrb.mxu0 %v115_v8  ;;  %315 = vmatpush.msrb.mxu1 %v123_v10  ;;  %v121_v45 = vld [vmem:[#allocation3 + $0x100] sm:$0xff]  ;;  %v90_v46 = vld [vmem:[#allocation3 + $0x8] sm:$0xff]  ;;  %v131_v50 = vld [vmem:[%s9076_s3] sm:$0xff] }
  0x1f   :  { %v201_v12 = vld.sshfl [vmem:[#allocation1] sm:$0xff pattern:$0x75316420]  ;;  %v202_v13 = vld.sshfl [vmem:[#allocation1 + $0x8] sm:$0xff pattern:$0x75316420] }
  0x20   :  { %4154 = vmatpush.msk.msra.mxu2 %vm146_vm0, %v201_v12  ;;  %4157 = vmatpush.msk.msra.mxu3 %vm146_vm0, %v202_v13  ;;  %v122_v47 = vld [vmem:[#allocation3 + $0x108] sm:$0xff]  ;;  %v132_v48 = vld [vmem:[%s9076_s3 + $0x8] sm:$0xff] }
  0x21   :  { %4149 = vmatmul.msk.f32.gmra.mxu0 %vm139_vm1, %v130_v11  ;;  %4152 = vmatmul.msk.f32.gmra.mxu1 %vm139_vm1, %v130_v11  ;;  %v618_v5 = vld [vmem:[#allocation6 + $0x3c0] sm:$0xff]  ;;  %v619_v10 = vld [vmem:[#allocation6 + $0x3c8] sm:$0xff] }
  0x22   :  { %4155 = vmatmul.msk.f32.vlgmr.msra.gmra.mxu2 %vm139_vm1, %v129_v2  ;;  %4158 = vmatmul.msk.f32.vlgmr.msra.gmra.mxu3 %vm139_vm1, %v129_v2  ;;  %v610_v6 = vld [vmem:[#allocation6 + $0x380] sm:$0xff] }
  0x23   :  { %330 = vmatpush.msrb.mxu2 %v120_v14  ;;  %275 = vmatpush.msrb.mxu0 %v113_v15  ;;  %v602_v9 = vld [vmem:[#allocation6 + $0x340] sm:$0xff]  ;;  %v603_v14 = vld [vmem:[#allocation6 + $0x348] sm:$0xff] }
  0x24   :  { %4165 = vmatpush.msk.msrb.mxu3 %vm146_vm0, %v128_v16  ;;  %316 = vmatpush.msrb.mxu1 %v121_v45  ;;  %v594_v13 = vld [vmem:[#allocation6 + $0x300] sm:$0xff] }
  0x25   :  { %331 = vmatpush.msrb.mxu2 %v118_v17  ;;  %276 = vmatpush.msrb.mxu0 %v111_v18 }
  0x26   :  { %372 = vmatpush.msrb.mxu3 %v126_v19  ;;  %395 = vperm.xlu0 %4258, %v132_v48   ;;  %v5136_v19 = vld [vmem:[%s9077_s4] sm:$0xff]  ;;  %v547_v48 = vld [vmem:[#allocation6 + $0x188] sm:$0xff]  ;;  %s4136_s4 = sshll.u32 %s9085_s12, 4  ;;  %s4137_s4 = int_to_ptr.hbm [resolvable:$true] %s4136_s4 }
  0x27   :  { %332 = vmatpush.msrb.mxu2 %v116_v20  ;;  %277 = vmatpush.msrb.mxu0 %v109_v21  ;;  %v586_v20 = vld [vmem:[#allocation6 + $0x2c0] sm:$0xff] }
  0x28   :  { %373 = vmatpush.msrb.mxu3 %v124_v22 }
  0x29   :  { %333 = vmatpush.msrb.mxu2 %v114_v23  ;;  %278 = vmatpush.msrb.mxu0 %v107_v24  ;;  %v595_v24 = vld [vmem:[#allocation6 + $0x308] sm:$0xff] }
  0x2a   :  { %4156 = vmatmul.msk.f32.gmra.mxu2 %vm139_vm1, %v130_v11  ;;  %4159 = vmatmul.msk.f32.gmra.mxu3 %vm139_vm1, %v130_v11  ;;  %v611_v11 = vld [vmem:[#allocation6 + $0x388] sm:$0xff] }
  0x2b   :  { %334 = vmatpush.msrb.mxu2 %v112_v25  ;;  %279 = vmatpush.msrb.mxu0 %v105_v26  ;;  %v578_v25 = vld [vmem:[#allocation6 + $0x280] sm:$0xff] }
  0x2c   :  { %374 = vmatpush.msrb.mxu3 %v122_v47  ;;  %v538_v47 = vld [vmem:[#allocation6 + $0x140] sm:$0xff] }
  0x2d   :  { %335 = vmatpush.msrb.mxu2 %v110_v27  ;;  %280 = vmatpush.msrb.mxu0 %v103_v28  ;;  %v587_v28 = vld [vmem:[#allocation6 + $0x2c8] sm:$0xff] }
  0x2e   :  { %390 = vperm.xlu0 %4258, %v131_v50   ;;  %v530_v50 = vld [vmem:[#allocation6 + $0x100] sm:$0xff] }
  0x2f   :  { %336 = vmatpush.msrb.mxu2 %v108_v29  ;;  %281 = vmatpush.msrb.mxu0 %v101_v30  ;;  %v570_v29 = vld [vmem:[#allocation6 + $0x240] sm:$0xff] }
  0x31   :  { %337 = vmatpush.msrb.mxu2 %v106_v31  ;;  %282 = vmatpush.msrb.mxu0 %v99_v32  ;;  %v579_v31 = vld [vmem:[#allocation6 + $0x288] sm:$0xff]  ;;  %v562_v32 = vld [vmem:[#allocation6 + $0x200] sm:$0xff] }
  0x33   :  { %338 = vmatpush.msrb.mxu2 %v104_v33  ;;  %283 = vmatpush.msrb.mxu0 %v97_v34  ;;  %v571_v34 = vld [vmem:[#allocation6 + $0x248] sm:$0xff] }
  0x35   :  { %339 = vmatpush.msrb.mxu2 %v102_v35  ;;  %284 = vmatpush.msrb.mxu0 %v95_v36 }
  0x37   :  { %340 = vmatpush.msrb.mxu2 %v100_v37  ;;  %285 = vmatpush.msrb.mxu0 %v93_v38  ;;  %v554_v38 = vld [vmem:[#allocation6 + $0x1c0] sm:$0xff] }
  0x39   :  { %341 = vmatpush.msrb.mxu2 %v98_v39  ;;  %286 = vmatpush.msrb.mxu0 %v91_v40 }
  0x3b   :  { %342 = vmatpush.msrb.mxu2 %v96_v41  ;;  %287 = vmatpush.msrb.mxu0 %v89_v44  ;;  %v563_v41 = vld [vmem:[#allocation6 + $0x208] sm:$0xff] }
  0x3c   :  { %v555_v44 = vld [vmem:[#allocation6 + $0x1c8] sm:$0xff] }
  0x3d   :  { %343 = vmatpush.msrb.mxu2 %v94_v42  ;;  %704 = vmatpush.msra.mxu0 %v618_v5  ;;  %v650_v5 = vld [vmem:[#allocation6 + $0x4c0] sm:$0xf] }
  0x3f   :  { %344 = vmatpush.msrb.mxu2 %v92_v43  ;;  %705 = vmatpush.msra.mxu0 %v610_v6  ;;  %v546_v43 = vld [vmem:[#allocation6 + $0x180] sm:$0xff] }
  0x41   :  { %345 = vmatpush.msrb.mxu2 %v90_v46  ;;  %706 = vmatpush.msra.mxu0 %v602_v9  ;;  %v604_v9 = vld [vmem:[#allocation6 + $0x350] sm:$0xff] }
  0x43   :  { %750 = vmatpush.msra.mxu2 %v619_v10  ;;  %707 = vmatpush.msra.mxu0 %v594_v13  ;;  %v621_v10 = vld [vmem:[#allocation6 + $0x3d8] sm:$0xff]  ;;  %v588_v13 = vld [vmem:[#allocation6 + $0x2d0] sm:$0xff] }
  0x45   :  { %751 = vmatpush.msra.mxu2 %v611_v11  ;;  %708 = vmatpush.msra.mxu0 %v586_v20  ;;  %v596_v11 = vld [vmem:[#allocation6 + $0x310] sm:$0xff]  ;;  %v581_v20 = vld [vmem:[#allocation6 + $0x298] sm:$0xff] }
  0x47   :  { %752 = vmatpush.msra.mxu2 %v603_v14  ;;  %709 = vmatpush.msra.mxu0 %v578_v25  ;;  %v605_v14 = vld [vmem:[#allocation6 + $0x358] sm:$0xff]  ;;  %v540_v25 = vld [vmem:[#allocation6 + $0x150] sm:$0xff] }
  0x49   :  { %753 = vmatpush.msra.mxu2 %v595_v24  ;;  %710 = vmatpush.msra.mxu0 %v570_v29  ;;  %v565_v24 = vld [vmem:[#allocation6 + $0x218] sm:$0xff]  ;;  %v508_v29 = vld [vmem:[#allocation6 + $0x50] sm:$0xff] }
  0x4b   :  { %754 = vmatpush.msra.mxu2 %v587_v28  ;;  %711 = vmatpush.msra.mxu0 %v562_v32  ;;  %v516_v28 = vld [vmem:[#allocation6 + $0x90] sm:$0xff]  ;;  %v557_v32 = vld [vmem:[#allocation6 + $0x1d8] sm:$0xff] }
  0x4d   :  { %755 = vmatpush.msra.mxu2 %v579_v31  ;;  %712 = vmatpush.msra.mxu0 %v554_v38  ;;  %v642_v31 = vld [vmem:[#allocation6 + $0x480] sm:$0xff]  ;;  %v533_v38 = vld [vmem:[#allocation6 + $0x118] sm:$0xff] }
  0x4f   :  { %756 = vmatpush.msra.mxu2 %v571_v34  ;;  %713 = vmatpush.msra.mxu0 %v546_v43  ;;  %v549_v34 = vld [vmem:[#allocation6 + $0x198] sm:$0xff]  ;;  %v651_v43 = vld [vmem:[#allocation6 + $0x4c8] sm:$0xf] }
  0x51   :  { %757 = vmatpush.msra.mxu2 %v563_v41  ;;  %714 = vmatpush.msra.mxu0 %v538_v47  ;;  %v636_v41 = vld [vmem:[#allocation6 + $0x450] sm:$0xff]  ;;  %v501_v47 = vld [vmem:[#allocation6 + $0x18] sm:$0xff] }
  0x53   :  { %758 = vmatpush.msra.mxu2 %v555_v44  ;;  %715 = vmatpush.msra.mxu0 %v530_v50  ;;  %v628_v44 = vld [vmem:[#allocation6 + $0x410] sm:$0xff]  ;;  %v653_v50 = vld [vmem:[#allocation6 + $0x4d8] sm:$0xf] }
  0x55   :  { %759 = vmatpush.msra.mxu2 %v547_v48  ;;  %v635_v48 = vld [vmem:[#allocation6 + $0x448] sm:$0xff] }
  0x96   :  { %v168_v51 = vpop.f32.mrf.mxu0  ;;  %v191_v52 = vpop.f32.mrf.mxu1 }
  0x97   :  { %288 = vmatmul.f32.vlgmr.msrb.gmra.mxu0 %v168_v51  ;;  %4161 = vmatmul.msk.f32.vlgmr.msrb.gmra.mxu1 %vm253_vm2, %v191_v52 }
  0x98   :  { %346 = vmatmul.f32.vlgmr.msrb.gmra.mxu2 %v168_v51  ;;  %4166 = vmatmul.msk.f32.vlgmr.msrb.gmra.mxu3 %vm253_vm2, %v191_v52  ;;  %v5127_v59 = vpop.permute.xlu0 %395  ;;  %v539_v52 = vld [vmem:[#allocation6 + $0x148] sm:$0xff] }
  0x99   :  { %760 = vmatpush.msra.mxu2 %v539_v52  ;;  %v637_v52 = vld [vmem:[#allocation6 + $0x458] sm:$0xff] }
  0x9e   :  { %v171_v53 = vpop.f32.mrf.mxu0  ;;  %v194_v54 = vpop.f32.mrf.mxu1 }
  0x9f   :  { %291 = vmatmul.f32.gmra.mxu0 %v171_v53  ;;  %4162 = vmatmul.msk.f32.gmra.mxu1 %vm253_vm2, %v194_v54 }
  0xa0   :  { %349 = vmatmul.f32.gmra.mxu2 %v171_v53  ;;  %4167 = vmatmul.msk.f32.gmra.mxu3 %vm253_vm2, %v194_v54  ;;  %v5129_v62 = vpop.permute.xlu0 %390 }
  0xa5   :  { %v224_v55 = vpop.f32.mrf.mxu2  ;;  %v247_v56 = vpop.f32.mrf.mxu3 }
  0xa7   :  { %294 = vmatmul.f32.gmra.mxu0 %v224_v55  ;;  %4163 = vmatmul.msk.f32.gmra.mxu1 %vm253_vm2, %v247_v56 }
  0xa8   :  { %352 = vmatmul.f32.gmra.mxu2 %v224_v55  ;;  %4168 = vmatmul.msk.f32.gmra.mxu3 %vm253_vm2, %v247_v56  ;;  %v522_v56 = vld [vmem:[#allocation6 + $0xc0] sm:$0xff] }
  0xa9   :  { %716 = vmatpush.msra.mxu0 %v522_v56 }
  0xad   :  { %v227_v57 = vpop.f32.mrf.mxu2  ;;  %v250_v58 = vpop.f32.mrf.mxu3 }
  0xaf   :  { %297 = vmatmul.f32.gmra.mxu0 %v227_v57  ;;  %4164 = vmatmul.msk.f32.gmra.mxu1 %vm253_vm2, %v250_v58 }
  0xb0   :  { %355 = vmatmul.f32.gmra.mxu2 %v227_v57  ;;  %4169 = vmatmul.msk.f32.gmra.mxu3 %vm253_vm2, %v250_v58  ;;  %v531_v58 = vld [vmem:[#allocation6 + $0x108] sm:$0xff] }
  0xb1   :  { %761 = vmatpush.msra.mxu2 %v531_v58  ;;  %v647_v58 = vld [vmem:[#allocation6 + $0x4a8] sm:$0xff] }
 0x114   :  { %v289_v60 = vpop.f32.mrf.mxu0  ;;  %v318_v61 = vpop.f32.mrf.mxu1 }
 0x115   :  { %v319_v63 = vadd.f32 %v318_v61, %v289_v60  ;;  %v514_v60 = vld [vmem:[#allocation6 + $0x80] sm:$0xff] }
 0x116   :  { %717 = vmatpush.msra.mxu0 %v514_v60  ;;  %v607_v60 = vld [vmem:[#allocation6 + $0x368] sm:$0xff] }
 0x117   :  { %v398_v7 = vadd.f32 %v5129_v62, %v319_v63 }
 0x119   :  { %v402_v18 = vmax.f32 %v398_v7, 0.0  ;;  %v620_v7 = vld [vmem:[#allocation6 + $0x3d0] sm:$0xff] }
 0x11b   :  { %v347_v0 = vpop.f32.mrf.mxu2  ;;  %v376_v1 = vpop.f32.mrf.mxu3 }
 0x11c   :  { %v292_v2 = vpop.f32.mrf.mxu0  ;;  %v321_v3 = vpop.f32.mrf.mxu1  ;;  %v377_v15 = vadd.f32 %v376_v1, %v347_v0  ;;  %v523_v0 = vld [vmem:[#allocation6 + $0xc8] sm:$0xff]  ;;  %v506_v1 = vld [vmem:[#allocation6 + $0x40] sm:$0xff] }
 0x11d   :  { %v322_v4 = vadd.f32 %v321_v3, %v292_v2  ;;  %v515_v3 = vld [vmem:[#allocation6 + $0x88] sm:$0xff]  ;;  %762 = vmatpush.msra.mxu2 %v523_v0  ;;  %718 = vmatpush.msra.mxu0 %v506_v1 }
 0x11e   :  { %v399_v26 = vadd.f32 %v5129_v62, %v377_v15  ;;  %v580_v15 = vld [vmem:[#allocation6 + $0x290] sm:$0xff]  ;;  %v631_v0 = vld [vmem:[#allocation6 + $0x428] sm:$0xff] }
 0x11f   :  { %v400_v8 = vadd.f32 %v5127_v59, %v322_v4  ;;  %v498_v4 = vld [vmem:[#allocation6] sm:$0xff]  ;;  %763 = vmatpush.msra.mxu2 %v515_v3  ;;  %v591_v1 = vld [vmem:[#allocation6 + $0x2e8] sm:$0xff] }
 0x120   :  { %v403_v33 = vmax.f32 %v399_v26, 0.0  ;;  %719 = vmatpush.msra.mxu0 %v498_v4  ;;  %v532_v26 = vld [vmem:[#allocation6 + $0x110] sm:$0xff]  ;;  %v575_v3 = vld [vmem:[#allocation6 + $0x268] sm:$0xff]  ;;  %v622_v4 = vld [vmem:[#allocation6 + $0x3e0] sm:$0xff] }
 0x121   :  { %v404_v12 = vmax.f32 %v400_v8, 0.0  ;;  %v499_v8 = vld [vmem:[#allocation6 + $0x8] sm:$0xff] }
 0x122   :  { %796 = vmatpush.msrb.mxu0 %v620_v7  ;;  %v654_v7 = vld [vmem:[#allocation6 + $0x4e0] sm:$0xf] }
 0x123   :  { %v350_v16 = vpop.f32.mrf.mxu2  ;;  %v379_v17 = vpop.f32.mrf.mxu3  ;;  %424 = vmatpush.msra.mxu1 %v404_v12  ;;  %v613_v12 = vld [vmem:[#allocation6 + $0x398] sm:$0xff] }
 0x124   :  { %v380_v21 = vadd.f32 %v379_v17, %v350_v16  ;;  %v295_v22 = vpop.f32.mrf.mxu0  ;;  %v324_v23 = vpop.f32.mrf.mxu1  ;;  %v597_v16 = vld [vmem:[#allocation6 + $0x318] sm:$0xff]  ;;  %v572_v17 = vld [vmem:[#allocation6 + $0x250] sm:$0xff] }
 0x125   :  { %425 = vmatpush.msra.mxu1 %v402_v18  ;;  %v325_v35 = vadd.f32 %v324_v23, %v295_v22  ;;  %v589_v18 = vld [vmem:[#allocation6 + $0x2d8] sm:$0xff]  ;;  %v548_v23 = vld [vmem:[#allocation6 + $0x190] sm:$0xff] }
 0x126   :  { %v401_v27 = vadd.f32 %v5127_v59, %v380_v21  ;;  %4170 = vmatmul.msk.f32.vlgmr.msra.gmra.mxu1 %vm406_vm3, %v5136_v19  ;;  %v556_v21 = vld [vmem:[#allocation6 + $0x1d0] sm:$0xff]  ;;  %v573_v22 = vld [vmem:[#allocation6 + $0x258] sm:$0xff] }
 0x127   :  { %v450_v45 = vadd.f32 %v5129_v62, %v325_v35  ;;  %v626_v35 = vld [vmem:[#allocation6 + $0x400] sm:$0xff] }
 0x128   :  { %v405_v30 = vmax.f32 %v401_v27, 0.0  ;;  %v524_v27 = vld [vmem:[#allocation6 + $0xd0] sm:$0xff] }
 0x129   :  { %v454_v55 = vmax.f32 %v450_v45, 0.0  ;;  %v509_v45 = vld [vmem:[#allocation6 + $0x58] sm:$0xff] }
 0x12a   :  { %444 = vmatpush.msra.mxu3 %v405_v30  ;;  %v500_v30 = vld [vmem:[#allocation6 + $0x10] sm:$0xff] }
 0x12b   :  { %v353_v36 = vpop.f32.mrf.mxu2  ;;  %v382_v37 = vpop.f32.mrf.mxu3 }
 0x12c   :  { %445 = vmatpush.msra.mxu3 %v403_v33  ;;  %v298_v39 = vpop.f32.mrf.mxu0  ;;  %v327_v40 = vpop.f32.mrf.mxu1  ;;  %v383_v51 = vadd.f32 %v382_v37, %v353_v36  ;;  %v634_v33 = vld [vmem:[#allocation6 + $0x440] sm:$0xff]  ;;  %v541_v36 = vld [vmem:[#allocation6 + $0x158] sm:$0xff]  ;;  %v652_v37 = vld [vmem:[#allocation6 + $0x4d0] sm:$0xf] }
 0x12d   :  { %v328_v42 = vadd.f32 %v327_v40, %v298_v39  ;;  %4171 = vmatmul.msk.f32.vlgmr.msra.gmra.mxu3 %vm406_vm3, %v5136_v19  ;;  %v644_v39 = vld [vmem:[#allocation6 + $0x490] sm:$0xff]  ;;  %v525_v40 = vld [vmem:[#allocation6 + $0xd8] sm:$0xff] }
 0x12e   :  { %v451_v61 = vadd.f32 %v5129_v62, %v383_v51  ;;  %v507_v62 = vld [vmem:[#allocation6 + $0x48] sm:$0xff]  ;;  %v645_v51 = vld [vmem:[#allocation6 + $0x498] sm:$0xff] }
 0x12f   :  { %v452_v46 = vadd.f32 %v5127_v59, %v328_v42  ;;  %764 = vmatpush.msra.mxu2 %v507_v62  ;;  %v517_v42 = vld [vmem:[#allocation6 + $0x98] sm:$0xff]  ;;  %v614_v62 = vld [vmem:[#allocation6 + $0x3a0] sm:$0xff] }
 0x130   :  { %v455_v6 = vmax.f32 %v451_v61, 0.0  ;;  %v639_v61 = vld [vmem:[#allocation6 + $0x468] sm:$0xff] }
 0x131   :  { %v456_v49 = vmax.f32 %v452_v46, 0.0  ;;  %765 = vmatpush.msra.mxu2 %v499_v8  ;;  %v643_v46 = vld [vmem:[#allocation6 + $0x488] sm:$0xff] }
 0x133   :  { %v356_v53 = vpop.f32.mrf.mxu2  ;;  %v385_v54 = vpop.f32.mrf.mxu3  ;;  %472 = vmatpush.msrb.mxu1 %v456_v49  ;;  %842 = vmatpush.msrb.mxu2 %v621_v10  ;;  %v627_v49 = vld [vmem:[#allocation6 + $0x408] sm:$0xff]  ;;  %v606_v10 = vld [vmem:[#allocation6 + $0x360] sm:$0xff] }
 0x134   :  { %v386_v57 = vadd.f32 %v385_v54, %v356_v53  ;;  %v629_v53 = vld [vmem:[#allocation6 + $0x418] sm:$0xff]  ;;  %v623_v54 = vld [vmem:[#allocation6 + $0x3e8] sm:$0xff] }
 0x135   :  { %473 = vmatpush.msrb.mxu1 %v454_v55  ;;  %843 = vmatpush.msrb.mxu2 %v613_v12  ;;  %v655_v55 = vld [vmem:[#allocation6 + $0x4e8] sm:$0xf]  ;;  %v638_v12 = vld [vmem:[#allocation6 + $0x460] sm:$0xff] }
 0x136   :  { %v453_v63 = vadd.f32 %v5127_v59, %v386_v57  ;;  %4172 = vmatmul.msk.f32.vlgmr.msrb.gmra.mxu1 %vm406_vm3, %v5136_v19  ;;  %v612_v59 = vld [vmem:[#allocation6 + $0x390] sm:$0xff]  ;;  %v615_v57 = vld [vmem:[#allocation6 + $0x3a8] sm:$0xff] }
 0x137   :  { %4174 = vmatpush.msk.msra.mxu1 %vm146_vm0, %v650_v5  ;;  %797 = vmatpush.msrb.mxu0 %v612_v59  ;;  %v559_v59 = vld [vmem:[#allocation6 + $0x1e8] sm:$0xff] }
 0x138   :  { %v457_v2 = vmax.f32 %v453_v63, 0.0  ;;  %844 = vmatpush.msrb.mxu2 %v605_v14  ;;  %v599_v63 = vld [vmem:[#allocation6 + $0x328] sm:$0xff] }
 0x139   :  { %798 = vmatpush.msrb.mxu0 %v604_v9  ;;  %740 = vmatpush.msra.mxu1 %v642_v31  ;;  %v646_v9 = vld [vmem:[#allocation6 + $0x4a0] sm:$0xff]  ;;  %v543_v14 = vld [vmem:[#allocation6 + $0x168] sm:$0xff] }
 0x13a   :  { %492 = vmatpush.msrb.mxu3 %v457_v2  ;;  %845 = vmatpush.msrb.mxu2 %v597_v16  ;;  %v583_v2 = vld [vmem:[#allocation6 + $0x2a8] sm:$0xff]  ;;  %v590_v16 = vld [vmem:[#allocation6 + $0x2e0] sm:$0xff] }
 0x13b   :  { %799 = vmatpush.msrb.mxu0 %v596_v11  ;;  %741 = vmatpush.msra.mxu1 %v634_v33  ;;  %v551_v11 = vld [vmem:[#allocation6 + $0x1a8] sm:$0xff]  ;;  %v657_v33 = vld [vmem:[#allocation6 + $0x4f8] sm:$0xf] }
 0x13c   :  { %493 = vmatpush.msrb.mxu3 %v455_v6  ;;  %846 = vmatpush.msrb.mxu2 %v589_v18  ;;  %v567_v6 = vld [vmem:[#allocation6 + $0x228] sm:$0xff]  ;;  %v582_v18 = vld [vmem:[#allocation6 + $0x2a0] sm:$0xff] }
 0x13d   :  { %4173 = vmatmul.msk.f32.vlgmr.msrb.gmra.mxu3 %vm406_vm3, %v5136_v19  ;;  %800 = vmatpush.msrb.mxu0 %v588_v13  ;;  %v564_v19 = vld [vmem:[#allocation6 + $0x210] sm:$0xff]  ;;  %v598_v13 = vld [vmem:[#allocation6 + $0x320] sm:$0xff]  ;;  %v503_v31 = vld [vmem:[#allocation6 + $0x28] sm:$0xff] }
 0x13e   :  { %847 = vmatpush.msrb.mxu2 %v581_v20  ;;  %742 = vmatpush.msra.mxu1 %v626_v35  ;;  %v527_v20 = vld [vmem:[#allocation6 + $0xe8] sm:$0xff]  ;;  %v585_v35 = vld [vmem:[#allocation6 + $0x2b8] sm:$0xff] }
 0x13f   :  { %801 = vmatpush.msrb.mxu0 %v580_v15  ;;  %4177 = vmatpush.msk.msra.mxu3 %vm146_vm0, %v651_v43  ;;  %v630_v15 = vld [vmem:[#allocation6 + $0x420] sm:$0xff]  ;;  %v569_v43 = vld [vmem:[#allocation6 + $0x238] sm:$0xff] }
 0x140   :  { %848 = vmatpush.msrb.mxu2 %v573_v22  ;;  %4180 = vmatpush.msk.msrb.mxu1 %vm146_vm0, %v652_v37  ;;  %v617_v22 = vld [vmem:[#allocation6 + $0x3b8] sm:$0xff]  ;;  %v534_v37 = vld [vmem:[#allocation6 + $0x120] sm:$0xff] }
 0x141   :  { %802 = vmatpush.msrb.mxu0 %v572_v17  ;;  %786 = vmatpush.msra.mxu3 %v643_v46  ;;  %v535_v17 = vld [vmem:[#allocation6 + $0x128] sm:$0xff]  ;;  %v608_v46 = vld [vmem:[#allocation6 + $0x370] sm:$0xff] }
 0x142   :  { %849 = vmatpush.msrb.mxu2 %v565_v24  ;;  %832 = vmatpush.msrb.mxu1 %v644_v39  ;;  %v566_v24 = vld [vmem:[#allocation6 + $0x220] sm:$0xff]  ;;  %v577_v39 = vld [vmem:[#allocation6 + $0x278] sm:$0xff] }
 0x143   :  { %803 = vmatpush.msrb.mxu0 %v564_v19  ;;  %787 = vmatpush.msra.mxu3 %v635_v48  ;;  %v625_v19 = vld [vmem:[#allocation6 + $0x3f8] sm:$0xff]  ;;  %v5190_v48 = vld [vmem:[%s9080_s7 + $0x1f0] sm:$0xff] }
 0x144   :  { %850 = vmatpush.msrb.mxu2 %v557_v32  ;;  %833 = vmatpush.msrb.mxu1 %v636_v41  ;;  %v593_v32 = vld [vmem:[#allocation6 + $0x2f8] sm:$0xff]  ;;  %v526_v41 = vld [vmem:[#allocation6 + $0xe0] sm:$0xff] }
 0x145   :  { %804 = vmatpush.msrb.mxu0 %v556_v21  ;;  %788 = vmatpush.msra.mxu3 %v627_v49  ;;  %v574_v21 = vld [vmem:[#allocation6 + $0x260] sm:$0xff] }
 0x146   :  { %851 = vmatpush.msrb.mxu2 %v549_v34  ;;  %834 = vmatpush.msrb.mxu1 %v628_v44  ;;  %v542_v34 = vld [vmem:[#allocation6 + $0x160] sm:$0xff]  ;;  %v633_v44 = vld [vmem:[#allocation6 + $0x438] sm:$0xff] }
 0x147   :  { %805 = vmatpush.msrb.mxu0 %v548_v23  ;;  %4183 = vmatpush.msk.msrb.mxu3 %vm146_vm0, %v653_v50  ;;  %v519_v23 = vld [vmem:[#allocation6 + $0xa8] sm:$0xff]  ;;  %v510_v49 = vld [vmem:[#allocation6 + $0x60] sm:$0xff]  ;;  %v600_v50 = vld [vmem:[#allocation6 + $0x330] sm:$0xff] }
 0x148   :  { %852 = vmatpush.msrb.mxu2 %v541_v36  ;;  %v649_v36 = vld [vmem:[#allocation6 + $0x4b8] sm:$0xff] }
 0x149   :  { %806 = vmatpush.msrb.mxu0 %v540_v25  ;;  %878 = vmatpush.msrb.mxu3 %v645_v51  ;;  %v609_v25 = vld [vmem:[#allocation6 + $0x378] sm:$0xff] }
 0x14a   :  { %853 = vmatpush.msrb.mxu2 %v533_v38  ;;  %v624_v38 = vld [vmem:[#allocation6 + $0x3f0] sm:$0xff]  ;;  %v553_v51 = vld [vmem:[#allocation6 + $0x1b8] sm:$0xff] }
 0x14b   :  { %807 = vmatpush.msrb.mxu0 %v532_v26  ;;  %879 = vmatpush.msrb.mxu3 %v637_v52  ;;  %v5198_v52 = vld [vmem:[%s9080_s7 + $0x1d0] sm:$0xff] }
 0x14c   :  { %854 = vmatpush.msrb.mxu2 %v525_v40  ;;  %v641_v40 = vld [vmem:[#allocation6 + $0x478] sm:$0xff] }
 0x14d   :  { %808 = vmatpush.msrb.mxu0 %v524_v27  ;;  %880 = vmatpush.msrb.mxu3 %v629_v53  ;;  %v511_v27 = vld [vmem:[#allocation6 + $0x68] sm:$0xff]  ;;  %v502_v53 = vld [vmem:[#allocation6 + $0x20] sm:$0xff] }
 0x14e   :  { %855 = vmatpush.msrb.mxu2 %v517_v42  ;;  %v616_v42 = vld [vmem:[#allocation6 + $0x3b0] sm:$0xff] }
 0x14f   :  { %809 = vmatpush.msrb.mxu0 %v516_v28  ;;  %v558_v28 = vld [vmem:[#allocation6 + $0x1e0] sm:$0xff] }
 0x150   :  { %856 = vmatpush.msrb.mxu2 %v509_v45  ;;  %v518_v45 = vld [vmem:[#allocation6 + $0xa0] sm:$0xff] }
 0x151   :  { %810 = vmatpush.msrb.mxu0 %v508_v29  ;;  %v601_v29 = vld [vmem:[#allocation6 + $0x338] sm:$0xff] }
 0x152   :  { %857 = vmatpush.msrb.mxu2 %v501_v47  ;;  %v561_v47 = vld [vmem:[#allocation6 + $0x1f8] sm:$0xff] }
 0x153   :  { %811 = vmatpush.msrb.mxu0 %v500_v30  ;;  %v550_v30 = vld [vmem:[#allocation6 + $0x1a0] sm:$0xff] }
 0x1a3   :  { %v5156_v56 = vpop.f32.mrf.mxu1 }
 0x1a4   :  { %720 = vmatmul.f32.vlgmr.msra.gmra.mxu0 %v5156_v56  ;;  %766 = vmatmul.f32.vlgmr.msra.gmra.mxu2 %v5156_v56 }
 0x1a5   :  { %934 = vmatpush.msra.mxu0 %v623_v54  ;;  %4189 = vmatpush.msk.msra.mxu2 %vm146_vm0, %v655_v55  ;;  %v592_v54 = vld [vmem:[#allocation6 + $0x2f0] sm:$0xff]  ;;  %v545_v55 = vld [vmem:[#allocation6 + $0x178] sm:$0xff] }
 0x1a7   :  { %935 = vmatpush.msra.mxu0 %v615_v57  ;;  %970 = vmatpush.msra.mxu2 %v647_v58  ;;  %v5205_v57 = vld [vmem:[%s9080_s7 + $0x1b0] sm:$0xff]  ;;  %v656_v58 = vld [vmem:[#allocation6 + $0x4f0] sm:$0xf] }
 0x1a9   :  { %936 = vmatpush.msra.mxu0 %v607_v60  ;;  %971 = vmatpush.msra.mxu2 %v639_v61  ;;  %v584_v60 = vld [vmem:[#allocation6 + $0x2b0] sm:$0xff]  ;;  %v537_v61 = vld [vmem:[#allocation6 + $0x138] sm:$0xff] }
 0x1ab   :  { %937 = vmatpush.msra.mxu0 %v599_v63  ;;  %972 = vmatpush.msra.mxu2 %v631_v0  ;;  %v5214_v63 = vld [vmem:[%s9080_s7 + $0x190] sm:$0xff]  ;;  %v648_v0 = vld [vmem:[#allocation6 + $0x4b0] sm:$0xff] }
 0x1ad   :  { %938 = vmatpush.msra.mxu0 %v591_v1  ;;  %v576_v1 = vld [vmem:[#allocation6 + $0x270] sm:$0xff] }
 0x1af   :  { %939 = vmatpush.msra.mxu0 %v583_v2  ;;  %v529_v2 = vld [vmem:[#allocation6 + $0xf8] sm:$0xff] }
 0x1b0   :  { %v5161_v5 = vpop.f32.mrf.mxu3 }
 0x1b1   :  { %4175 = vmatmul.msk.f32.vlgmr.msra.gmra.mxu1 %vm253_vm2, %v5161_v5  ;;  %940 = vmatpush.msra.mxu0 %v575_v3  ;;  %v5222_v3 = vld [vmem:[%s9080_s7 + $0x170] sm:$0xff] }
 0x1b2   :  { %888 = vmatpush.msra.mxu1 %v622_v4  ;;  %4178 = vmatmul.msk.f32.vlgmr.msra.gmra.mxu3 %vm253_vm2, %v5161_v5  ;;  %v640_v4 = vld [vmem:[#allocation6 + $0x470] sm:$0xff] }
 0x1b3   :  { %v5167_v8 = vpop.f32.mrf.mxu1  ;;  %941 = vmatpush.msra.mxu0 %v567_v6  ;;  %4186 = vmatpush.msk.msra.mxu3 %vm146_vm0, %v654_v7  ;;  %v568_v6 = vld [vmem:[#allocation6 + $0x230] sm:$0xff]  ;;  %v521_v7 = vld [vmem:[#allocation6 + $0xb8] sm:$0xff] }
 0x1b4   :  { %723 = vmatmul.f32.gmra.mxu0 %v5167_v8  ;;  %769 = vmatmul.f32.gmra.mxu2 %v5167_v8 }
 0x1b5   :  { %889 = vmatpush.msra.mxu1 %v614_v62  ;;  %942 = vmatpush.msra.mxu0 %v559_v59  ;;  %v5230_v62 = vld [vmem:[%s9080_s7 + $0x150] sm:$0xff]  ;;  %v632_v59 = vld [vmem:[#allocation6 + $0x430] sm:$0xff] }
 0x1b6   :  { %924 = vmatpush.msra.mxu3 %v646_v9  ;;  %v560_v9 = vld [vmem:[#allocation6 + $0x1f0] sm:$0xff] }
 0x1b7   :  { %890 = vmatpush.msra.mxu1 %v606_v10  ;;  %943 = vmatpush.msra.mxu0 %v551_v11  ;;  %v513_v10 = vld [vmem:[#allocation6 + $0x78] sm:$0xff] }
 0x1b8   :  { %925 = vmatpush.msra.mxu3 %v638_v12  ;;  %v5237_v11 = vld [vmem:[%s9080_s7 + $0x1e0] sm:$0xff]  ;;  %v5244_v12 = vld [vmem:[%s9080_s7 + $0x130] sm:$0xff] }
 0x1b9   :  { %891 = vmatpush.msra.mxu1 %v598_v13  ;;  %944 = vmatpush.msra.mxu0 %v543_v14  ;;  %v552_v13 = vld [vmem:[#allocation6 + $0x1b0] sm:$0xff]  ;;  %v505_v14 = vld [vmem:[#allocation6 + $0x38] sm:$0xff] }
 0x1ba   :  { %926 = vmatpush.msra.mxu3 %v630_v15  ;;  %v5250_v15 = vld [vmem:[%s9080_s7 + $0x1c0] sm:$0xff] }
 0x1bb   :  { %892 = vmatpush.msra.mxu1 %v590_v16  ;;  %945 = vmatpush.msra.mxu0 %v535_v17  ;;  %v5256_v16 = vld [vmem:[%s9080_s7 + $0x110] sm:$0xff]  ;;  %v5261_v17 = vld [vmem:[%s9080_s7 + $0x1f8] sm:$0xff] }
 0x1bc   :  { %812 = vmatmul.f32.vlgmr.msrb.gmra.mxu0 %v5156_v56  ;;  %858 = vmatmul.f32.vlgmr.msrb.gmra.mxu2 %v5156_v56 }
 0x1bd   :  { %893 = vmatpush.msra.mxu1 %v582_v18  ;;  %1026 = vmatpush.msrb.mxu2 %v625_v19  ;;  %v544_v18 = vld [vmem:[#allocation6 + $0x170] sm:$0xff]  ;;  %v5268_v19 = vld [vmem:[%s9080_s7 + $0x1a0] sm:$0xff] }
 0x1be   :  { %946 = vmatpush.msra.mxu0 %v527_v20  ;;  %v5275_v20 = vld [vmem:[%s9080_s7 + $0xf0] sm:$0xff] }
 0x1bf   :  { %894 = vmatpush.msra.mxu1 %v574_v21  ;;  %1027 = vmatpush.msrb.mxu2 %v617_v22  ;;  %v5280_v21 = vld [vmem:[%s9080_s7 + $0x1d8] sm:$0xff] }
 0x1c0   :  { %v5174_v26 = vpop.f32.mrf.mxu3  ;;  %947 = vmatpush.msra.mxu0 %v519_v23  ;;  %v536_v22 = vld [vmem:[#allocation6 + $0x130] sm:$0xff]  ;;  %v5286_v23 = vld [vmem:[%s9080_s7 + $0x180] sm:$0xff] }
 0x1c1   :  { %4176 = vmatmul.msk.f32.gmra.mxu1 %vm253_vm2, %v5174_v26  ;;  %4179 = vmatmul.msk.f32.gmra.mxu3 %vm253_vm2, %v5174_v26 }
 0x1c2   :  { %895 = vmatpush.msra.mxu1 %v566_v24  ;;  %1028 = vmatpush.msrb.mxu2 %v609_v25  ;;  %v5294_v24 = vld [vmem:[%s9080_s7 + $0xd0] sm:$0xff]  ;;  %v5299_v25 = vld [vmem:[%s9080_s7 + $0x1b8] sm:$0xff] }
 0x1c3   :  { %948 = vmatpush.msra.mxu0 %v511_v27  ;;  %v528_v27 = vld [vmem:[#allocation6 + $0xf0] sm:$0xff] }
 0x1c4   :  { %896 = vmatpush.msra.mxu1 %v558_v28  ;;  %1029 = vmatpush.msrb.mxu2 %v601_v29  ;;  %v5307_v28 = vld [vmem:[%s9080_s7 + $0x160] sm:$0xff]  ;;  %v5314_v29 = vld [vmem:[%s9080_s7 + $0xb0] sm:$0xff] }
 0x1c5   :  { %815 = vmatmul.f32.gmra.mxu0 %v5167_v8  ;;  %861 = vmatmul.f32.gmra.mxu2 %v5167_v8 }
 0x1c6   :  { %897 = vmatpush.msra.mxu1 %v550_v30  ;;  %949 = vmatpush.msra.mxu0 %v503_v31  ;;  %v5319_v30 = vld [vmem:[%s9080_s7 + $0x198] sm:$0xff] }
 0x1c7   :  { %1030 = vmatpush.msrb.mxu2 %v593_v32  ;;  %v520_v31 = vld [vmem:[#allocation6 + $0xb0] sm:$0xff]  ;;  %v5327_v32 = vld [vmem:[%s9080_s7 + $0x140] sm:$0xff] }
 0x1c8   :  { %4195 = vmatpush.msk.msrb.mxu0 %vm146_vm0, %v657_v33  ;;  %898 = vmatpush.msra.mxu1 %v542_v34  ;;  %v5333_v33 = vld [vmem:[%s9080_s7 + $0x90] sm:$0xff]  ;;  %v5338_v34 = vld [vmem:[%s9080_s7 + $0x178] sm:$0xff] }
 0x1c9   :  { %1031 = vmatpush.msrb.mxu2 %v585_v35  ;;  %4181 = vmatmul.msk.f32.vlgmr.msrb.gmra.mxu1 %vm253_vm2, %v5161_v5  ;;  %v512_v35 = vld [vmem:[#allocation6 + $0x70] sm:$0xff] }
 0x1ca   :  { %1062 = vmatpush.msrb.mxu0 %v649_v36  ;;  %4184 = vmatmul.msk.f32.vlgmr.msrb.gmra.mxu3 %vm253_vm2, %v5161_v5  ;;  %v5346_v36 = vld [vmem:[%s9080_s7 + $0x120] sm:$0xff] }
 0x1cb   :  { %899 = vmatpush.msra.mxu1 %v534_v37  ;;  %980 = vmatpush.msrb.mxu3 %v624_v38  ;;  %v5353_v37 = vld [vmem:[%s9080_s7 + $0x70] sm:$0xff]  ;;  %v5358_v38 = vld [vmem:[%s9080_s7 + $0x158] sm:$0xff] }
 0x1cc   :  { %1032 = vmatpush.msrb.mxu2 %v577_v39  ;;  %1063 = vmatpush.msrb.mxu0 %v641_v40  ;;  %v504_v39 = vld [vmem:[#allocation6 + $0x30] sm:$0xff]  ;;  %v5364_v40 = vld [vmem:[%s9080_s7 + $0x100] sm:$0xff] }
 0x1cd   :  { %900 = vmatpush.msra.mxu1 %v526_v41  ;;  %981 = vmatpush.msrb.mxu3 %v616_v42  ;;  %v5372_v41 = vld [vmem:[%s9080_s7 + $0x50] sm:$0xff]  ;;  %v5377_v42 = vld [vmem:[%s9080_s7 + $0x1e8] sm:$0xff] }
 0x1ce   :  { %1033 = vmatpush.msrb.mxu2 %v569_v43  ;;  %1064 = vmatpush.msrb.mxu0 %v633_v44  ;;  %v5384_v43 = vld [vmem:[%s9080_s7 + $0x138] sm:$0xff]  ;;  %v5390_v44 = vld [vmem:[%s9080_s7 + $0x30] sm:$0xff] }
 0x1cf   :  { %901 = vmatpush.msra.mxu1 %v518_v45  ;;  %950 = vmatmul.f32.vlgmr.msra.gmra.mxu0 %v5156_v56  ;;  %v5397_v45 = vld [vmem:[%s9080_s7 + $0xe0] sm:$0xff] }
 0x1d0   :  { %4190 = vmatmul.msk.f32.vlgmr.msra.gmra.mxu2 %vm253_vm2, %v5161_v5  ;;  %982 = vmatpush.msrb.mxu3 %v608_v46  ;;  %v5402_v46 = vld [vmem:[%s9080_s7 + $0x1c8] sm:$0xff] }
 0x1d1   :  { %1034 = vmatpush.msrb.mxu2 %v561_v47  ;;  %1306 = vmatpush.msra.mxu0 %v5190_v48  ;;  %v5409_v47 = vld [vmem:[%s9080_s7 + $0x118] sm:$0xff] }
 0x1d2   :  { %902 = vmatpush.msra.mxu1 %v510_v49  ;;  %983 = vmatpush.msrb.mxu3 %v600_v50  ;;  %v5414_v49 = vld [vmem:[%s9080_s7 + $0x10] sm:$0xff]  ;;  %v5422_v50 = vld [vmem:[%s9080_s7 + $0xc0] sm:$0xff] }
 0x1d3   :  { %1035 = vmatpush.msrb.mxu2 %v553_v51  ;;  %1307 = vmatpush.msra.mxu0 %v5198_v52  ;;  %v5436_v51 = vld [vmem:[#allocation8 + $0x1f0] sm:$0xff] }
 0x1d4   :  { %4182 = vmatmul.msk.f32.gmra.mxu1 %vm253_vm2, %v5174_v26  ;;  %4185 = vmatmul.msk.f32.gmra.mxu3 %vm253_vm2, %v5174_v26 }
 0x1d5   :  { %903 = vmatpush.msra.mxu1 %v502_v53  ;;  %984 = vmatpush.msrb.mxu3 %v592_v54  ;;  %v5443_v53 = vld [vmem:[%s9080_s7 + $0xa0] sm:$0xff]  ;;  %v5448_v54 = vld [vmem:[%s9080_s7 + $0x188] sm:$0xff] }
 0x1d6   :  { %1036 = vmatpush.msrb.mxu2 %v545_v55  ;;  %1308 = vmatpush.msra.mxu0 %v5205_v57  ;;  %v5455_v55 = vld [vmem:[%s9080_s7 + $0xd8] sm:$0xff] }
 0x1d7   :  { %4192 = vmatpush.msk.msrb.mxu1 %vm146_vm0, %v656_v58  ;;  %985 = vmatpush.msrb.mxu3 %v584_v60  ;;  %v5457_v58 = vld [vmem:[#allocation8 + $0x1d0] sm:$0xff]  ;;  %v5464_v60 = vld [vmem:[%s9080_s7 + $0x80] sm:$0xff] }
 0x1d8   :  { %1037 = vmatpush.msrb.mxu2 %v537_v61  ;;  %1309 = vmatpush.msra.mxu0 %v5214_v63  ;;  %v5469_v61 = vld [vmem:[%s9080_s7 + $0x168] sm:$0xff] }
 0x1d9   :  { %1016 = vmatpush.msrb.mxu1 %v648_v0  ;;  %953 = vmatmul.f32.gmra.mxu0 %v5167_v8  ;;  %v5476_v0 = vld [vmem:[%s9080_s7 + $0xb8] sm:$0xff] }
 0x1da   :  { %4191 = vmatmul.msk.f32.gmra.mxu2 %vm253_vm2, %v5174_v26  ;;  %986 = vmatpush.msrb.mxu3 %v576_v1  ;;  %v5478_v1 = vld [vmem:[#allocation8 + $0x1b0] sm:$0xff] }
 0x1db   :  { %1038 = vmatpush.msrb.mxu2 %v529_v2  ;;  %1310 = vmatpush.msra.mxu0 %v5222_v3  ;;  %9434 = vst [vmem:[#allocation13_spill] sm:$0xff] %v5478_v1  ;;  %v5487_v2 = vld [vmem:[%s9080_s7 + $0x60] sm:$0xff] }
 0x1dc   :  { %1017 = vmatpush.msrb.mxu1 %v640_v4  ;;  %987 = vmatpush.msrb.mxu3 %v568_v6  ;;  %v5492_v4 = vld [vmem:[%s9080_s7 + $0x148] sm:$0xff]  ;;  %v5499_v6 = vld [vmem:[%s9080_s7 + $0x98] sm:$0xff] }
 0x1dd   :  { %1039 = vmatpush.msrb.mxu2 %v521_v7  ;;  %1311 = vmatpush.msra.mxu0 %v5230_v62  ;;  %v5501_v7 = vld [vmem:[#allocation8 + $0x190] sm:$0xff] }
 0x1de   :  { %1018 = vmatpush.msrb.mxu1 %v632_v59  ;;  %4187 = vmatmul.msk.f32.vlgmr.msra.gmra.mxu3 %vm253_vm2, %v5161_v5  ;;  %9435 = vst [vmem:[#allocation14_spill] sm:$0xff] %v5501_v7  ;;  %v5509_v59 = vld [vmem:[%s9080_s7 + $0x40] sm:$0xff] }
 0x1df   :  { %904 = vmatmul.f32.vlgmr.msra.gmra.mxu1 %v5156_v56  ;;  %988 = vmatpush.msrb.mxu3 %v560_v9  ;;  %v5514_v9 = vld [vmem:[%s9080_s7 + $0x128] sm:$0xff] }
 0x1e0   :  { %1040 = vmatpush.msrb.mxu2 %v513_v10  ;;  %1266 = vmatpush.msra.mxu1 %v5237_v11  ;;  %v5530_v10 = vld [vmem:[%s9080_s7 + $0x20] sm:$0xff] }
 0x1e1   :  { %1312 = vmatpush.msra.mxu0 %v5244_v12  ;;  %989 = vmatpush.msrb.mxu3 %v552_v13  ;;  %9437 = vst [vmem:[#allocation16_spill] sm:$0xff] %v5530_v10  ;;  %v5535_v13 = vld [vmem:[%s9080_s7 + $0x108] sm:$0xff] }
 0x1e2   :  { %1041 = vmatpush.msrb.mxu2 %v505_v14  ;;  %1267 = vmatpush.msra.mxu1 %v5250_v15  ;;  %v5542_v14 = vld [vmem:[%s9080_s7 + $0x58] sm:$0xff] }
 0x1e3   :  { %1313 = vmatpush.msra.mxu0 %v5256_v16  ;;  %990 = vmatpush.msrb.mxu3 %v544_v18  ;;  %9438 = vst [vmem:[#allocation17_spill] sm:$0xff] %v5542_v14  ;;  %v5544_v18 = vld [vmem:[#allocation8 + $0x150] sm:$0xff] }
 0x1e4   :  { %1326 = vmatpush.msra.mxu2 %v5261_v17  ;;  %4196 = vmatmul.msk.f32.vlgmr.msrb.gmra.mxu0 %vm253_vm2, %v5161_v5  ;;  %9439 = vst [vmem:[#allocation18_spill] sm:$0xff] %v5544_v18 }
 0x1e5   :  { %1042 = vmatmul.f32.vlgmr.msrb.gmra.mxu2 %v5156_v56  ;;  %1268 = vmatpush.msra.mxu1 %v5268_v19 }
 0x1e6   :  { %1314 = vmatpush.msra.mxu0 %v5275_v20  ;;  %1327 = vmatpush.msra.mxu2 %v5280_v21 }
 0x1e7   :  { %991 = vmatpush.msrb.mxu3 %v536_v22  ;;  %1269 = vmatpush.msra.mxu1 %v5286_v23  ;;  %v5551_v22 = vld [vmem:[%s9080_s7] sm:$0xff] }
 0x1e8   :  { %1315 = vmatpush.msra.mxu0 %v5294_v24  ;;  %1328 = vmatpush.msra.mxu2 %v5299_v25  ;;  %9440 = vst [vmem:[#allocation19_spill] sm:$0xff] %v5551_v22 }
 0x1e9   :  { %907 = vmatmul.f32.gmra.mxu1 %v5167_v8  ;;  %4188 = vmatmul.msk.f32.gmra.mxu3 %vm253_vm2, %v5174_v26 }
 0x1ea   :  { %992 = vmatpush.msrb.mxu3 %v528_v27  ;;  %1270 = vmatpush.msra.mxu1 %v5307_v28  ;;  %v5556_v27 = vld [vmem:[%s9080_s7 + $0xe8] sm:$0xff] }
 0x1eb   :  { %1316 = vmatpush.msra.mxu0 %v5314_v29  ;;  %1329 = vmatpush.msra.mxu2 %v5319_v30  ;;  %9441 = vst [vmem:[#allocation20_spill] sm:$0xff] %v5556_v27 }
 0x1ec   :  { %993 = vmatpush.msrb.mxu3 %v520_v31  ;;  %1271 = vmatpush.msra.mxu1 %v5327_v32  ;;  %v5563_v31 = vld [vmem:[%s9080_s7 + $0x38] sm:$0xff] }
 0x1ed   :  { %1317 = vmatpush.msra.mxu0 %v5333_v33  ;;  %1330 = vmatpush.msra.mxu2 %v5338_v34  ;;  %9442 = vst [vmem:[#allocation21_spill] sm:$0xff] %v5563_v31 }
 0x1ee   :  { %994 = vmatpush.msrb.mxu3 %v512_v35  ;;  %1045 = vmatmul.f32.gmra.mxu2 %v5167_v8  ;;  %v5565_v35 = vld [vmem:[#allocation8 + $0x1e0] sm:$0xff] }
 0x1ef   :  { %4197 = vmatmul.msk.f32.gmra.mxu0 %vm253_vm2, %v5174_v26  ;;  %1272 = vmatpush.msra.mxu1 %v5346_v36  ;;  %9443 = vst [vmem:[#allocation22_spill] sm:$0xff] %v5565_v35 }
 0x1f0   :  { %1318 = vmatpush.msra.mxu0 %v5353_v37  ;;  %1331 = vmatpush.msra.mxu2 %v5358_v38 }
 0x1f1   :  { %995 = vmatpush.msrb.mxu3 %v504_v39  ;;  %1273 = vmatpush.msra.mxu1 %v5364_v40  ;;  %v5569_v39 = vld [vmem:[#allocation8 + $0x130] sm:$0xff] }
 0x1f2   :  { %1319 = vmatpush.msra.mxu0 %v5372_v41  ;;  %1332 = vmatpush.msra.mxu2 %v5384_v43  ;;  %9444 = vst [vmem:[#allocation23_spill] sm:$0xff] %v5569_v39 }
 0x1f3   :  { %1286 = vmatpush.msra.mxu3 %v5377_v42  ;;  %4193 = vmatmul.msk.f32.vlgmr.msrb.gmra.mxu1 %vm253_vm2, %v5161_v5  ;;  %v5434_v5 = vld [vmem:[%s9080_s7 + $0xf8] sm:$0xff] }
 0x1f4   :  { %996 = vmatmul.f32.vlgmr.msrb.gmra.mxu3 %v5156_v56  ;;  %1320 = vmatpush.msra.mxu0 %v5390_v44  ;;  %v5427_v56 = vld [vmem:[%s9080_s7 + $0x1a8] sm:$0xff] }
 0x1f5   :  { %1274 = vmatpush.msra.mxu1 %v5397_v45  ;;  %1287 = vmatpush.msra.mxu3 %v5402_v46 }
 0x1f6   :  { %1333 = vmatpush.msra.mxu2 %v5409_v47  ;;  %1321 = vmatpush.msra.mxu0 %v5414_v49 }
 0x1f7   :  { %1275 = vmatpush.msra.mxu1 %v5422_v50  ;;  %1288 = vmatpush.msra.mxu3 %v5427_v56 }
 0x1f8   :  { %1334 = vmatpush.msra.mxu2 %v5434_v5  ;;  %1390 = vmatpush.msrb.mxu0 %v5436_v51 }
 0x1f9   :  { %1276 = vmatpush.msra.mxu1 %v5443_v53  ;;  %1289 = vmatpush.msra.mxu3 %v5448_v54 }
 0x1fa   :  { %1335 = vmatpush.msra.mxu2 %v5455_v55  ;;  %1391 = vmatpush.msrb.mxu0 %v5457_v58 }
 0x1fb   :  { %1277 = vmatpush.msra.mxu1 %v5464_v60  ;;  %1290 = vmatpush.msra.mxu3 %v5469_v61 }
 0x1fc   :  { %1336 = vmatpush.msra.mxu2 %v5476_v0  ;;  %1392 = vmatpush.msrb.mxu0 %v5478_v1  ;;  %v5589_v1 = vld [vmem:[#allocation8 + $0x1f8] sm:$0xff] }
 0x1fd   :  { %999 = vmatmul.f32.gmra.mxu3 %v5167_v8  ;;  %4194 = vmatmul.msk.f32.gmra.mxu1 %vm253_vm2, %v5174_v26  ;;  %v5521_v8 = vld [vmem:[%s9080_s7 + $0x78] sm:$0xff]  ;;  %9449 = vst [vmem:[#allocation28_spill] sm:$0xff] %v5589_v1 }
 0x1fe   :  { %1278 = vmatpush.msra.mxu1 %v5487_v2  ;;  %1291 = vmatpush.msra.mxu3 %v5492_v4  ;;  %v5523_v26 = vld [vmem:[#allocation8 + $0x170] sm:$0xff] }
 0x1ff   :  { %9436 = vst [vmem:[#allocation15_spill] sm:$0xff] %v5523_v26  ;;  %1337 = vmatpush.msra.mxu2 %v5499_v6  ;;  %1393 = vmatpush.msrb.mxu0 %v5501_v7  ;;  %v5581_v7 = vld [vmem:[%s9080_s7 + $0x18] sm:$0xff] }
 0x200   :  { %1279 = vmatpush.msra.mxu1 %v5509_v59  ;;  %1292 = vmatpush.msra.mxu3 %v5514_v9  ;;  %9446 = vst [vmem:[#allocation25_spill] sm:$0xff] %v5581_v7 }
 0x201   :  { %1338 = vmatpush.msra.mxu2 %v5521_v8  ;;  %1394 = vmatpush.msrb.mxu0 %v5523_v26  ;;  %v5574_v26 = vld [vmem:[%s9080_s7 + $0xc8] sm:$0xff] }
 0x202   :  { %1280 = vmatpush.msra.mxu1 %v5530_v10  ;;  %1293 = vmatpush.msra.mxu3 %v5535_v13  ;;  %9445 = vst [vmem:[#allocation24_spill] sm:$0xff] %v5574_v26  ;;  %v5583_v10 = vld [vmem:[#allocation8 + $0x1c0] sm:$0xff] }
 0x203   :  { %1339 = vmatpush.msra.mxu2 %v5542_v14  ;;  %1395 = vmatpush.msrb.mxu0 %v5544_v18  ;;  %9447 = vst [vmem:[#allocation26_spill] sm:$0xff] %v5583_v10  ;;  %v5587_v18 = vld [vmem:[#allocation8 + $0x110] sm:$0xff]  ;;  %v5695_v14 = vld [vmem:[#allocation8 + $0x1c8] sm:$0xff] }
 0x204   :  { %1281 = vmatpush.msra.mxu1 %v5551_v22  ;;  %1294 = vmatpush.msra.mxu3 %v5556_v27  ;;  %9448 = vst [vmem:[#allocation27_spill] sm:$0xff] %v5587_v18  ;;  %v5596_v22 = vld [vmem:[%s9080_s7 + $0xa8] sm:$0xff] }
 0x205   :  { %1340 = vmatpush.msra.mxu2 %v5563_v31  ;;  %1396 = vmatpush.msrb.mxu0 %v5569_v39  ;;  %9450 = vst [vmem:[#allocation29_spill] sm:$0xff] %v5596_v22  ;;  %v5598_v27 = vld [vmem:[#allocation8 + $0x1a0] sm:$0xff]  ;;  %v5604_v31 = vld [vmem:[#allocation8 + $0x1d8] sm:$0xff] }
 0x206   :  { %1350 = vmatpush.msrb.mxu1 %v5565_v35  ;;  %1295 = vmatpush.msra.mxu3 %v5574_v26  ;;  %9451 = vst [vmem:[#allocation30_spill] sm:$0xff] %v5598_v27  ;;  %v5602_v35 = vld [vmem:[#allocation8 + $0xf0] sm:$0xff]  ;;  %v5611_v39 = vld [vmem:[%s9080_s7 + $0x88] sm:$0xff] }
 0x207   :  { %1341 = vmatpush.msra.mxu2 %v5581_v7  ;;  %9452 = vst [vmem:[#allocation31_spill] sm:$0xff] %v5602_v35  ;;  %1397 = vmatpush.msrb.mxu0 %v5587_v18  ;;  %v5613_v26 = vld [vmem:[#allocation8 + $0x180] sm:$0xff]  ;;  %v5619_v7 = vld [vmem:[#allocation8 + $0x1b8] sm:$0xff] }
 0x208   :  { %1351 = vmatpush.msrb.mxu1 %v5583_v10  ;;  %9453 = vst [vmem:[#allocation32_spill] sm:$0xff] %v5604_v31  ;;  %1296 = vmatpush.msra.mxu3 %v5596_v22  ;;  %v5617_v10 = vld [vmem:[#allocation8 + $0xd0] sm:$0xff]  ;;  %v5626_v18 = vld [vmem:[%s9080_s7 + $0x68] sm:$0xff]  ;;  %v5634_v22 = vld [vmem:[#allocation8 + $0x198] sm:$0xff] }
 0x209   :  { %1410 = vmatpush.msrb.mxu2 %v5589_v1  ;;  %9454 = vst [vmem:[#allocation33_spill] sm:$0xff] %v5611_v39  ;;  %1398 = vmatpush.msrb.mxu0 %v5602_v35  ;;  %v5628_v1 = vld [vmem:[#allocation8 + $0x160] sm:$0xff] }
 0x20a   :  { %9455 = vst [vmem:[#allocation34_spill] sm:$0xff] %v5613_v26  ;;  %1352 = vmatpush.msrb.mxu1 %v5598_v27  ;;  %1297 = vmatpush.msra.mxu3 %v5611_v39  ;;  %v5632_v27 = vld [vmem:[#allocation8 + $0xb0] sm:$0xff]  ;;  %v5641_v35 = vld [vmem:[%s9080_s7 + $0x48] sm:$0xff] }
 0x20b   :  { %9456 = vst [vmem:[#allocation35_spill] sm:$0xff] %v5617_v10  ;;  %1411 = vmatpush.msrb.mxu2 %v5604_v31  ;;  %1399 = vmatpush.msrb.mxu0 %v5617_v10  ;;  %v5645_v31 = vld [vmem:[#allocation8 + $0x140] sm:$0xff]  ;;  %v5651_v10 = vld [vmem:[#allocation8 + $0x178] sm:$0xff] }
 0x20c   :  { %9457 = vst [vmem:[#allocation36_spill] sm:$0xff] %v5619_v7  ;;  %1353 = vmatpush.msrb.mxu1 %v5613_v26  ;;  %1298 = vmatpush.msra.mxu3 %v5626_v18  ;;  %v5647_v26 = vld [vmem:[#allocation8 + $0x90] sm:$0xff]  ;;  %v5675_v39 = vld [vmem:[#allocation8 + $0x100] sm:$0xff] }
 0x20d   :  { %9458 = vst [vmem:[#allocation37_spill] sm:$0xff] %v5626_v18  ;;  %1412 = vmatpush.msrb.mxu2 %v5619_v7  ;;  %1400 = vmatpush.msrb.mxu0 %v5632_v27  ;;  %v9115_v7 = vmov 0.0   ;;  %v5658_v18 = vld [vmem:[%s9080_s7 + $0x28] sm:$0xff] }
 0x20e   :  { %9459 = vst [vmem:[#allocation38_spill] sm:$0xff] %v5628_v1  ;;  %1354 = vmatpush.msrb.mxu1 %v5628_v1  ;;  %1299 = vmatpush.msra.mxu3 %v5641_v35  ;;  %v5660_v1 = vld [vmem:[#allocation8 + $0x120] sm:$0xff] }
 0x20f   :  { %9460 = vst [vmem:[#allocation39_spill] sm:$0xff] %v5632_v27  ;;  %1413 = vmatpush.msrb.mxu2 %v5634_v22  ;;  %1401 = vmatpush.msrb.mxu0 %v5647_v26  ;;  %v5664_v27 = vld [vmem:[#allocation8 + $0x70] sm:$0xff] }
 0x210   :  { %9461 = vst [vmem:[#allocation40_spill] sm:$0xff] %v5634_v22  ;;  %1342 = vmatmul.f32.vlgmr.msra.gmra.mxu2 %v9115_v7  ;;  %1355 = vmatpush.msrb.mxu1 %v5645_v31  ;;  %v5666_v22 = vld [vmem:[#allocation8 + $0x158] sm:$0xff] }
 0x211   :  { %9462 = vst [vmem:[#allocation41_spill] sm:$0xff] %v5641_v35  ;;  %1322 = vmatmul.f32.vlgmr.msra.gmra.mxu0 %v9115_v7  ;;  %1414 = vmatpush.msrb.mxu2 %v5651_v10  ;;  %v5673_v35 = vld [vmem:[%s9080_s7 + $0x8] sm:$0xff]  ;;  %v5683_v7 = vld [vmem:[#allocation8 + $0x1e8] sm:$0xff] }
 0x212   :  { %9463 = vst [vmem:[#allocation42_spill] sm:$0xff] %v5645_v31  ;;  %1300 = vmatpush.msra.mxu3 %v5658_v18  ;;  %1356 = vmatpush.msrb.mxu1 %v5660_v1  ;;  %v5685_v31 = vld [vmem:[#allocation8 + $0x138] sm:$0xff] }
 0x213   :  { %9464 = vst [vmem:[#allocation43_spill] sm:$0xff] %v5647_v26  ;;  %v5679_v26 = vld [vmem:[#allocation8 + $0x50] sm:$0xff]  ;;  %1402 = vmatpush.msrb.mxu0 %v5664_v27  ;;  %1415 = vmatpush.msrb.mxu2 %v5666_v22 }
 0x214   :  { %9465 = vst [vmem:[#allocation44_spill] sm:$0xff] %v5651_v10  ;;  %1301 = vmatpush.msra.mxu3 %v5673_v35  ;;  %1357 = vmatpush.msrb.mxu1 %v5675_v39  ;;  %v5689_v10 = vld [vmem:[#allocation8 + $0x30] sm:$0xff] }
 0x215   :  { %9466 = vst [vmem:[#allocation45_spill] sm:$0xff] %v5658_v18  ;;  %1403 = vmatpush.msrb.mxu0 %v5679_v26  ;;  %v9476_v18 = vmov 0.0   ;;  %1416 = vmatpush.msrb.mxu2 %v5685_v31 }
 0x216   :  { %9467 = vst [vmem:[#allocation46_spill] sm:$0xff] %v5660_v1  ;;  %1302 = vmatmul.f32.vlgmr.msra.gmra.mxu3 %v9476_v18  ;;  %v5693_v1 = vld [vmem:[#allocation8 + $0xe0] sm:$0xff]  ;;  %1282 = vmatmul.f32.vlgmr.msra.gmra.mxu1 %v9476_v18 }
 0x217   :  { %9468 = vst [vmem:[#allocation47_spill] sm:$0xff] %v5664_v27  ;;  %1370 = vmatpush.msrb.mxu3 %v5683_v7  ;;  %v5699_v27 = vld [vmem:[#allocation8 + $0x118] sm:$0xff]  ;;  %1404 = vmatpush.msrb.mxu0 %v5689_v10 }
 0x218   :  { %9469 = vst [vmem:[#allocation48_spill] sm:$0xff] %v5666_v22  ;;  %v5701_v22 = vld [vmem:[#allocation8 + $0x10] sm:$0xff]  ;;  %1358 = vmatpush.msrb.mxu1 %v5693_v1  ;;  %1417 = vmatpush.msrb.mxu2 %v5699_v27 }
 0x219   :  { %9470 = vst [vmem:[#allocation49_spill] sm:$0xff] %v5673_v35  ;;  %1371 = vmatpush.msrb.mxu3 %v5695_v14  ;;  %v5711_v35 = vld [vmem:[#allocation8 + $0xf8] sm:$0xff]  ;;  %1405 = vmatpush.msrb.mxu0 %v5701_v22 }
 0x21a   :  { %9471 = vst [vmem:[#allocation50_spill] sm:$0xff] %v5675_v39  ;;  %v5705_v39 = vld [vmem:[#allocation8 + $0xc0] sm:$0xff]  ;;  %1406 = vmatmul.f32.vlgmr.msrb.gmra.mxu0 %v9476_v18  ;;  %1418 = vmatpush.msrb.mxu2 %v5711_v35 }
 0x21b   :  { %9472 = vst [vmem:[#allocation51_spill] sm:$0xff] %v5679_v26  ;;  %v5707_v26 = vld [vmem:[#allocation8 + $0x1a8] sm:$0xff]  ;;  %1359 = vmatpush.msrb.mxu1 %v5705_v39  ;;  %1650 = vmatpush.msra.mxu0 %v5190_v48  ;;  %v5754_v48 = vld [vmem:[#allocation8 + $0x20] sm:$0xff] }
 0x21c   :  { %9473 = vst [vmem:[#allocation52_spill] sm:$0xff] %v5683_v7  ;;  %v5717_v7 = vld [vmem:[#allocation8 + $0x188] sm:$0xff]  ;;  %1372 = vmatpush.msrb.mxu3 %v5707_v26 }
 0x21d   :  { %9474 = vst [vmem:[#allocation53_spill] sm:$0xff] %v5685_v31  ;;  %v5715_v31 = vld [vmem:[#allocation8 + $0xa0] sm:$0xff]  ;;  %1651 = vmatpush.msra.mxu0 %v5198_v52 }
 0x21e   :  { %9475 = vst [vmem:[#allocation54_spill] sm:$0xff] %v5689_v10  ;;  %v5721_v10 = vld [vmem:[#allocation8 + $0xd8] sm:$0xff]  ;;  %1360 = vmatpush.msrb.mxu1 %v5715_v31  ;;  %1373 = vmatpush.msrb.mxu3 %v5717_v7  ;;  %v5764_v52 = vld [vmem:[#allocation8] sm:$0xff] }
 0x21f   :  { %9477 = vst [vmem:[#allocation55_spill] sm:$0xff] %v5693_v1  ;;  %v5725_v1 = vld [vmem:[#allocation8 + $0x80] sm:$0xff]  ;;  %1419 = vmatpush.msrb.mxu2 %v5721_v10  ;;  %1652 = vmatpush.msra.mxu0 %v5205_v57  ;;  %v5774_v57 = vld [vmem:[#allocation8 + $0xc8] sm:$0xff] }
 0x220   :  { %9478 = vst [vmem:[#allocation56_spill] sm:$0xff] %v5695_v14  ;;  %v5727_v14 = vld [vmem:[#allocation8 + $0x168] sm:$0xff]  ;;  %1361 = vmatpush.msrb.mxu1 %v5725_v1 }
 0x221   :  { %9479 = vst [vmem:[#allocation57_spill] sm:$0xff] %v5701_v22  ;;  %v5731_v22 = vld [vmem:[#allocation8 + $0xb8] sm:$0xff]  ;;  %1374 = vmatpush.msrb.mxu3 %v5727_v14  ;;  %1653 = vmatpush.msra.mxu0 %v5214_v63  ;;  %v5783_v63 = vld [vmem:[#allocation8 + $0xa8] sm:$0xff] }
 0x222   :  { %9480 = vst [vmem:[#allocation58_spill] sm:$0xff] %v5705_v39  ;;  %v5734_v39 = vld [vmem:[#allocation8 + $0x60] sm:$0xff]  ;;  %1420 = vmatpush.msrb.mxu2 %v5731_v22 }
 0x223   :  { %9481 = vst [vmem:[#allocation59_spill] sm:$0xff] %v5707_v26  ;;  %v5736_v26 = vld [vmem:[#allocation8 + $0x148] sm:$0xff]  ;;  %1362 = vmatpush.msrb.mxu1 %v5734_v39  ;;  %1654 = vmatpush.msra.mxu0 %v5222_v3 }
 0x224   :  { %9482 = vst [vmem:[#allocation60_spill] sm:$0xff] %v5711_v35  ;;  %v5741_v35 = vld [vmem:[#allocation8 + $0x98] sm:$0xff]  ;;  %1375 = vmatpush.msrb.mxu3 %v5736_v26  ;;  %v5791_v3 = vld [vmem:[#allocation8 + $0x88] sm:$0xff] }
 0x225   :  { %9483 = vst [vmem:[#allocation61_spill] sm:$0xff] %v5715_v31  ;;  %v5744_v31 = vld [vmem:[#allocation8 + $0x40] sm:$0xff]  ;;  %1421 = vmatpush.msrb.mxu2 %v5741_v35  ;;  %1655 = vmatpush.msra.mxu0 %v5230_v62 }
 0x226   :  { %9484 = vst [vmem:[#allocation62_spill] sm:$0xff] %v5717_v7  ;;  %v5746_v7 = vld [vmem:[#allocation8 + $0x128] sm:$0xff]  ;;  %1363 = vmatpush.msrb.mxu1 %v5744_v31 }
 0x227   :  { %9485 = vst [vmem:[#allocation63_spill] sm:$0xff] %v5721_v10  ;;  %v5751_v10 = vld [vmem:[#allocation8 + $0x78] sm:$0xff]  ;;  %1376 = vmatpush.msrb.mxu3 %v5746_v7  ;;  %1656 = vmatpush.msra.mxu0 %v5244_v12  ;;  %v5817_v12 = vld [vmem:[#allocation8 + $0x8] sm:$0xff] }
 0x228   :  { %9486 = vst [vmem:[#allocation64_spill] sm:$0xff] %v5725_v1  ;;  %v5756_v1 = vld [vmem:[#allocation8 + $0x108] sm:$0xff]  ;;  %1422 = vmatpush.msrb.mxu2 %v5751_v10  ;;  %1364 = vmatpush.msrb.mxu1 %v5754_v48 }
 0x229   :  { %9487 = vst [vmem:[#allocation65_spill] sm:$0xff] %v5731_v22  ;;  %v5761_v22 = vld [vmem:[#allocation8 + $0x58] sm:$0xff]  ;;  %1377 = vmatpush.msrb.mxu3 %v5756_v1  ;;  %1657 = vmatpush.msra.mxu0 %v5256_v16 }
 0x22a   :  { %9488 = vst [vmem:[#allocation66_spill] sm:$0xff] %v5734_v39  ;;  %v5766_v39 = vld [vmem:[#allocation8 + $0xe8] sm:$0xff]  ;;  %1423 = vmatpush.msrb.mxu2 %v5761_v22  ;;  %1365 = vmatpush.msrb.mxu1 %v5764_v52 }
 0x22b   :  { %9489 = vst [vmem:[#allocation67_spill] sm:$0xff] %v5741_v35  ;;  %v5771_v35 = vld [vmem:[#allocation8 + $0x38] sm:$0xff]  ;;  %1378 = vmatpush.msrb.mxu3 %v5766_v39  ;;  %1366 = vmatmul.f32.vlgmr.msrb.gmra.mxu1 %v9476_v18 }
 0x22c   :  { %9490 = vst [vmem:[#allocation68_spill] sm:$0xff] %v5744_v31  ;;  %v5779_v31 = vld [vmem:[#allocation8 + $0x18] sm:$0xff]  ;;  %1424 = vmatpush.msrb.mxu2 %v5771_v35  ;;  %1610 = vmatpush.msra.mxu1 %v5237_v11  ;;  %v5802_v11 = vld [vmem:[#allocation8 + $0x48] sm:$0xff] }
 0x22d   :  { %9491 = vst [vmem:[#allocation69_spill] sm:$0xff] %v5754_v48  ;;  %v721_v48 = vpop.f32.mrf.mxu0  ;;  %1379 = vmatpush.msrb.mxu3 %v5774_v57  ;;  %1658 = vmatpush.msra.mxu0 %v5275_v20 }
 0x22e   :  { %9492 = vst [vmem:[#allocation70_spill] sm:$0xff] %v5761_v22  ;;  %v658_v22 = vld [vmem:[%s9079_s6] sm:$0xff]  ;;  %1425 = vmatpush.msrb.mxu2 %v5779_v31  ;;  %1611 = vmatpush.msra.mxu1 %v5250_v15  ;;  %v744_v62 = vpop.f32.mrf.mxu1  ;;  %v659_v15 = vld [vmem:[%s9079_s6 + $0x8] sm:$0xff] }
 0x22f   :  { %9493 = vst [vmem:[#allocation71_spill] sm:$0xff] %v5764_v52  ;;  %1426 = vmatmul.f32.vlgmr.msrb.gmra.mxu2 %v9476_v18  ;;  %1380 = vmatpush.msrb.mxu3 %v5783_v63  ;;  %v5796_v52 = vld [vmem:[#allocation8 + $0x68] sm:$0xff] }
 0x230   :  { %9494 = vst [vmem:[#allocation72_spill] sm:$0xff] %v5771_v35  ;;  %v722_v35 = vadd.f32 %v721_v48, %v658_v22  ;;  %1670 = vmatpush.msra.mxu2 %v5261_v17  ;;  %1612 = vmatpush.msra.mxu1 %v5268_v19  ;;  %v5808_v22 = vld [vmem:[#allocation8 + $0x28] sm:$0xff]  ;;  %v663_v48 = vld [vmem:[%s9079_s6 + $0x28] sm:$0xff] }
 0x231   :  { %9495 = vst [vmem:[#allocation73_spill] sm:$0xff] %v5779_v31  ;;  %1381 = vmatpush.msrb.mxu3 %v5791_v3  ;;  %v767_v31 = vpop.f32.mrf.mxu2  ;;  %1659 = vmatpush.msra.mxu0 %v5294_v24  ;;  %v666_v24 = vld [vmem:[%s9079_s6 + $0x40] sm:$0xff] }
 0x232   :  { %1671 = vmatpush.msra.mxu2 %v5280_v21  ;;  %v745_v17 = vadd.f32 %v744_v62, %v722_v35  ;;  %1613 = vmatpush.msra.mxu1 %v5286_v23  ;;  %v768_v16 = vadd.f32 %v767_v31, %v659_v15  ;;  %v9514_v31 = vld [vmem:[#allocation37_spill] sm:$0xff]  ;;  %v9515_v35 = vld [vmem:[#allocation36_spill] sm:$0xff]  ;;  %v9516_v15 = vld [vmem:[#allocation34_spill] sm:$0xff] }
 0x233   :  { %1382 = vmatpush.msrb.mxu3 %v5796_v52  ;;  %1660 = vmatpush.msra.mxu0 %v5314_v29  ;;  %v667_v29 = vld [vmem:[%s9079_s6 + $0x48] sm:$0xff] }
 0x234   :  { %1672 = vmatpush.msra.mxu2 %v5299_v25  ;;  %1072 = vst [vmem:[#allocation2] sm:$0xff] %v745_v17  ;;  %1614 = vmatpush.msra.mxu1 %v5307_v28  ;;  %v9517_v17 = vld [vmem:[#allocation23_spill] sm:$0xff] }
 0x235   :  { %1383 = vmatpush.msrb.mxu3 %v5802_v11  ;;  %v724_v19 = vpop.f32.mrf.mxu0  ;;  %v790_v20 = vpop.f32.mrf.mxu3  ;;  %1661 = vmatpush.msra.mxu0 %v5333_v33 }
 0x236   :  { %1673 = vmatpush.msra.mxu2 %v5319_v30  ;;  %1615 = vmatpush.msra.mxu1 %v5327_v32  ;;  %v791_v21 = vadd.f32 %v790_v20, %v768_v16  ;;  %v725_v25 = vadd.f32 %v724_v19, %v666_v24  ;;  %v9518_v16 = vld [vmem:[#allocation41_spill] sm:$0xff]  ;;  %v9519_v20 = vld [vmem:[#allocation40_spill] sm:$0xff]  ;;  %v9521_v24 = vld [vmem:[#allocation27_spill] sm:$0xff] }
 0x237   :  { %1384 = vmatpush.msrb.mxu3 %v5808_v22  ;;  %1662 = vmatpush.msra.mxu0 %v5353_v37 }
 0x238   :  { %1674 = vmatpush.msra.mxu2 %v5338_v34  ;;  %1616 = vmatpush.msra.mxu1 %v5346_v36  ;;  %1073 = vst [vmem:[#allocation2 + $0x8] sm:$0xff] %v791_v21  ;;  %v660_v36 = vld [vmem:[%s9079_s6 + $0x10] sm:$0xff] }
 0x239   :  { %1385 = vmatpush.msrb.mxu3 %v5817_v12  ;;  %v770_v23 = vpop.f32.mrf.mxu2  ;;  %1663 = vmatpush.msra.mxu0 %v5372_v41  ;;  %v9496_v41 = vld [vmem:[#allocation17_spill] sm:$0xff] }
 0x23a   :  { %1386 = vmatmul.f32.vlgmr.msrb.gmra.mxu3 %v9476_v18  ;;  %1675 = vmatpush.msra.mxu2 %v5358_v38  ;;  %v771_v34 = vadd.f32 %v770_v23, %v667_v29  ;;  %v9520_v23 = vld [vmem:[#allocation38_spill] sm:$0xff]  ;;  %v9522_v29 = vld [vmem:[#allocation45_spill] sm:$0xff] }
 0x23b   :  { %1630 = vmatpush.msra.mxu3 %v5377_v42  ;;  %1617 = vmatpush.msra.mxu1 %v5364_v40  ;;  %v9497_v42 = vld [vmem:[#allocation13_spill] sm:$0xff] }
 0x23c   :  { %1676 = vmatpush.msra.mxu2 %v5384_v43  ;;  %1664 = vmatpush.msra.mxu0 %v5390_v44  ;;  %v9498_v44 = vld [vmem:[#allocation20_spill] sm:$0xff] }
 0x23d   :  { %1631 = vmatpush.msra.mxu3 %v5402_v46  ;;  %1618 = vmatpush.msra.mxu1 %v5397_v45  ;;  %v813_v28 = vpop.f32.mrf.mxu0  ;;  %v9499_v45 = vld [vmem:[#allocation16_spill] sm:$0xff] }
 0x23e   :  { %1677 = vmatpush.msra.mxu2 %v5409_v47  ;;  %v747_v30 = vpop.f32.mrf.mxu1  ;;  %1665 = vmatpush.msra.mxu0 %v5414_v49  ;;  %v814_v43 = vadd.f32 %v813_v28, %v660_v36  ;;  %v9500_v47 = vld [vmem:[#allocation21_spill] sm:$0xff]  ;;  %v9501_v49 = vld [vmem:[#allocation14_spill] sm:$0xff]  ;;  %v9525_v36 = vld [vmem:[#allocation31_spill] sm:$0xff] }
 0x23f   :  { %1632 = vmatpush.msra.mxu3 %v5427_v56  ;;  %1619 = vmatpush.msra.mxu1 %v5422_v50  ;;  %v748_v32 = vadd.f32 %v747_v30, %v725_v25  ;;  %v9502_v56 = vld [vmem:[#allocation24_spill] sm:$0xff] }
 0x240   :  { %1678 = vmatpush.msra.mxu2 %v5434_v5  ;;  %1734 = vmatpush.msrb.mxu0 %v5436_v51  ;;  %v9503_v5 = vld [vmem:[#allocation19_spill] sm:$0xff]  ;;  %v9523_v30 = vld [vmem:[#allocation44_spill] sm:$0xff] }
 0x241   :  { %1633 = vmatpush.msra.mxu3 %v5448_v54  ;;  %1620 = vmatpush.msra.mxu1 %v5443_v53  ;;  %v859_v33 = vpop.f32.mrf.mxu2  ;;  %1080 = vst [vmem:[#allocation2 + $0x40] sm:$0xff] %v748_v32  ;;  %v661_v51 = vld [vmem:[%s9079_s6 + $0x18] sm:$0xff]  ;;  %v9504_v54 = vld [vmem:[#allocation25_spill] sm:$0xff] }
 0x242   :  { %1679 = vmatpush.msra.mxu2 %v5455_v55  ;;  %1735 = vmatpush.msrb.mxu0 %v5457_v58  ;;  %v9505_v55 = vld [vmem:[#allocation22_spill] sm:$0xff]  ;;  %v9506_v58 = vld [vmem:[#allocation29_spill] sm:$0xff] }
 0x243   :  { %1634 = vmatpush.msra.mxu3 %v5469_v61  ;;  %1621 = vmatpush.msra.mxu1 %v5464_v60  ;;  %v9507_v60 = vld [vmem:[#allocation28_spill] sm:$0xff]  ;;  %v9508_v61 = vld [vmem:[#allocation26_spill] sm:$0xff] }
 0x244   :  { %1680 = vmatpush.msra.mxu2 %v5476_v0  ;;  %v793_v37 = vpop.f32.mrf.mxu3  ;;  %1736 = vmatpush.msrb.mxu0 %v9497_v42  ;;  %v9509_v0 = vld [vmem:[#allocation15_spill] sm:$0xff]  ;;  %v9529_v42 = vld [vmem:[#allocation46_spill] sm:$0xff] }
 0x245   :  { %1635 = vmatpush.msra.mxu3 %v5492_v4  ;;  %1622 = vmatpush.msra.mxu1 %v5487_v2  ;;  %v816_v38 = vpop.f32.mrf.mxu0  ;;  %v794_v40 = vadd.f32 %v793_v37, %v771_v34  ;;  %v860_v2 = vadd.f32 %v859_v33, %v661_v51  ;;  %v9510_v4 = vld [vmem:[#allocation33_spill] sm:$0xff]  ;;  %v669_v32 = vld [vmem:[%s9079_s6 + $0x58] sm:$0xff] }
 0x246   :  { %1681 = vmatpush.msra.mxu2 %v5499_v6  ;;  %v836_v46 = vpop.f32.mrf.mxu1  ;;  %1737 = vmatpush.msrb.mxu0 %v9501_v49  ;;  %v9511_v6 = vld [vmem:[#allocation32_spill] sm:$0xff]  ;;  %v9524_v34 = vld [vmem:[#allocation42_spill] sm:$0xff] }
 0x247   :  { %1636 = vmatpush.msra.mxu3 %v5514_v9  ;;  %1623 = vmatpush.msra.mxu1 %v5509_v59  ;;  %1081 = vst [vmem:[#allocation2 + $0x48] sm:$0xff] %v794_v40  ;;  %v837_v50 = vadd.f32 %v836_v46, %v814_v43  ;;  %v668_v59 = vld [vmem:[%s9079_s6 + $0x50] sm:$0xff]  ;;  %v9527_v40 = vld [vmem:[#allocation48_spill] sm:$0xff] }
 0x248   :  { %1682 = vmatpush.msra.mxu2 %v5521_v8  ;;  %1738 = vmatpush.msrb.mxu0 %v9509_v0  ;;  %v9512_v8 = vld [vmem:[#allocation30_spill] sm:$0xff]  ;;  %v817_v19 = vadd.f32 %v816_v38, %v668_v59  ;;  %v9526_v38 = vld [vmem:[#allocation49_spill] sm:$0xff]  ;;  %v9541_v0 = vld [vmem:[#allocation63_spill] sm:$0xff] }
 0x249   :  { %1637 = vmatpush.msra.mxu3 %v5535_v13  ;;  %1624 = vmatpush.msra.mxu1 %v9499_v45  ;;  %v862_v53 = vpop.f32.mrf.mxu2  ;;  %1074 = vst [vmem:[#allocation2 + $0x10] sm:$0xff] %v837_v50  ;;  %v9513_v13 = vld [vmem:[#allocation18_spill] sm:$0xff]  ;;  %v9531_v45 = vld [vmem:[#allocation35_spill] sm:$0xff] }
 0x24a   :  { %1683 = vmatpush.msra.mxu2 %v9496_v41  ;;  %1739 = vmatpush.msrb.mxu0 %v9513_v13  ;;  %v9528_v41 = vld [vmem:[#allocation52_spill] sm:$0xff]  ;;  %v863_v43 = vadd.f32 %v862_v53, %v669_v32  ;;  %v9533_v49 = vld [vmem:[#allocation50_spill] sm:$0xff]  ;;  %v9535_v53 = vld [vmem:[#allocation59_spill] sm:$0xff] }
 0x24b   :  { %1638 = vmatpush.msra.mxu3 %v9498_v44  ;;  %1625 = vmatpush.msra.mxu1 %v9503_v5  ;;  %v9530_v44 = vld [vmem:[#allocation53_spill] sm:$0xff] }
 0x24c   :  { %1684 = vmatpush.msra.mxu2 %v9500_v47  ;;  %1740 = vmatpush.msrb.mxu0 %v9517_v17  ;;  %v9532_v47 = vld [vmem:[#allocation56_spill] sm:$0xff]  ;;  %v9544_v13 = vld [vmem:[#allocation65_spill] sm:$0xff] }
 0x24d   :  { %1639 = vmatpush.msra.mxu3 %v9502_v56  ;;  %1694 = vmatpush.msrb.mxu1 %v9505_v55  ;;  %v882_v9 = vpop.f32.mrf.mxu3  ;;  %v951_v62 = vpop.f32.mrf.mxu0  ;;  %v9534_v56 = vld [vmem:[#allocation39_spill] sm:$0xff]  ;;  %v671_v5 = vld [vmem:[%s9079_s6 + $0x68] sm:$0xff] }
 0x24e   :  { %1685 = vmatpush.msra.mxu2 %v9504_v54  ;;  %v883_v18 = vadd.f32 %v882_v9, %v860_v2  ;;  %1741 = vmatpush.msrb.mxu0 %v9521_v24  ;;  %v952_v25 = vadd.f32 %v951_v62, %v663_v48  ;;  %v9536_v54 = vld [vmem:[#allocation55_spill] sm:$0xff]  ;;  %v9537_v55 = vld [vmem:[#allocation60_spill] sm:$0xff]  ;;  %v9543_v9 = vld [vmem:[#allocation61_spill] sm:$0xff] }
 0x24f   :  { %1640 = vmatpush.msra.mxu3 %v9506_v58  ;;  %1695 = vmatpush.msrb.mxu1 %v9508_v61  ;;  %v9538_v58 = vld [vmem:[#allocation43_spill] sm:$0xff]  ;;  %v9540_v61 = vld [vmem:[#allocation58_spill] sm:$0xff] }
 0x250   :  { %1754 = vmatpush.msrb.mxu2 %v9507_v60  ;;  %1075 = vst [vmem:[#allocation2 + $0x18] sm:$0xff] %v883_v18  ;;  %1742 = vmatpush.msrb.mxu0 %v9525_v36  ;;  %v9539_v60 = vld [vmem:[#allocation62_spill] sm:$0xff]  ;;  %v9542_v2 = vld [vmem:[#allocation47_spill] sm:$0xff] }
 0x251   :  { %1641 = vmatpush.msra.mxu3 %v9510_v4  ;;  %1696 = vmatpush.msrb.mxu1 %v9512_v8  ;;  %v839_v21 = vpop.f32.mrf.mxu1  ;;  %v662_v4 = vld [vmem:[%s9079_s6 + $0x20] sm:$0xff]  ;;  %v9548_v62 = vld [vmem:[#allocation54_spill] sm:$0xff] }
 0x252   :  { %1755 = vmatpush.msrb.mxu2 %v9511_v6  ;;  %v840_v28 = vadd.f32 %v839_v21, %v817_v19  ;;  %1743 = vmatpush.msrb.mxu0 %v9531_v45  ;;  %v9545_v18 = vld [vmem:[#allocation51_spill] sm:$0xff]  ;;  %v9550_v19 = vld [vmem:[#allocation57_spill] sm:$0xff]  ;;  %v9554_v21 = vld [vmem:[#allocation72_spill] sm:$0xff] }
 0x253   :  { %1642 = vmatpush.msra.mxu3 %v9514_v31  ;;  %1697 = vmatpush.msrb.mxu1 %v9516_v15  ;;  %v974_v33 = vpop.f32.mrf.mxu2  ;;  %v9546_v31 = vld [vmem:[#allocation64_spill] sm:$0xff]  ;;  %v9547_v48 = vld [vmem:[#allocation67_spill] sm:$0xff] }
 0x254   :  { %1756 = vmatpush.msrb.mxu2 %v9515_v35  ;;  %1082 = vst [vmem:[#allocation2 + $0x50] sm:$0xff] %v840_v28  ;;  %v975_v37 = vadd.f32 %v974_v33, %v952_v25  ;;  %1744 = vmatpush.msrb.mxu0 %v9534_v56  ;;  %v9556_v28 = vld [vmem:[#allocation73_spill] sm:$0xff]  ;;  %v673_v33 = vld [vmem:[%s9079_s6 + $0x78] sm:$0xff] }
 0x255   :  { %1643 = vmatpush.msra.mxu3 %v9518_v16  ;;  %1698 = vmatpush.msrb.mxu1 %v9520_v23  ;;  %v9552_v16 = vld [vmem:[#allocation70_spill] sm:$0xff]  ;;  %v9555_v23 = vld [vmem:[#allocation71_spill] sm:$0xff] }
 0x256   :  { %1757 = vmatpush.msrb.mxu2 %v9519_v20  ;;  %1077 = vst [vmem:[#allocation2 + $0x28] sm:$0xff] %v975_v37  ;;  %v954_v51 = vpop.f32.mrf.mxu0  ;;  %1745 = vmatpush.msrb.mxu0 %v9538_v58  ;;  %v665_v20 = vld [vmem:[%s9079_s6 + $0x38] sm:$0xff]  ;;  %v664_v37 = vld [vmem:[%s9079_s6 + $0x30] sm:$0xff] }
 0x257   :  { %1644 = vmatpush.msra.mxu3 %v9522_v29  ;;  %1699 = vmatpush.msrb.mxu1 %v9524_v34  ;;  %v885_v46 = vpop.f32.mrf.mxu3  ;;  %v1216_v45 = vld [vmem:[#allocation2] ss:$8 sm:$0xf] }
 0x258   :  { %1758 = vmatpush.msrb.mxu2 %v9523_v30  ;;  %v886_v50 = vadd.f32 %v885_v46, %v863_v43  ;;  %1746 = vmatpush.msrb.mxu0 %v9542_v2 }
 0x259   :  { %1645 = vmatpush.msra.mxu3 %v9526_v38  ;;  %1700 = vmatpush.msrb.mxu1 %v9529_v42 }
 0x25a   :  { %1759 = vmatpush.msrb.mxu2 %v9527_v40  ;;  %1083 = vst [vmem:[#allocation2 + $0x58] sm:$0xff] %v886_v50  ;;  %1747 = vmatpush.msrb.mxu0 %v9545_v18 }
 0x25b   :  { %1714 = vmatpush.msrb.mxu3 %v9528_v41  ;;  %1701 = vmatpush.msrb.mxu1 %v9533_v49 }
 0x25c   :  { %1760 = vmatpush.msrb.mxu2 %v9530_v44  ;;  %v905_v6 = vpop.f32.mrf.mxu1  ;;  %1748 = vmatpush.msrb.mxu0 %v9548_v62 }
 0x25d   :  { %1715 = vmatpush.msrb.mxu3 %v9532_v47  ;;  %1702 = vmatpush.msrb.mxu1 %v9536_v54  ;;  %v977_v59 = vpop.f32.mrf.mxu2  ;;  %v906_v35 = vadd.f32 %v905_v6, %v662_v4 }
 0x25e   :  { %1761 = vmatpush.msrb.mxu2 %v5699_v27  ;;  %v955_v27 = vadd.f32 %v954_v51, %v671_v5  ;;  %1749 = vmatpush.msrb.mxu0 %v9550_v19 }
 0x25f   :  { %1716 = vmatpush.msrb.mxu3 %v9535_v53  ;;  %1703 = vmatpush.msrb.mxu1 %v9540_v61 }
 0x260   :  { %1762 = vmatpush.msrb.mxu2 %v9537_v55  ;;  %v978_v8 = vadd.f32 %v977_v59, %v955_v27 }
 0x261   :  { %1717 = vmatpush.msrb.mxu3 %v9539_v60  ;;  %1704 = vmatpush.msrb.mxu1 %v9543_v9  ;;  %v928_v15 = vpop.f32.mrf.mxu3  ;;  %v1066_v29 = vpop.f32.mrf.mxu0  ;;  %v1220_v46 = vld [vmem:[#allocation2 + $0x40] ss:$8 sm:$0xf] }
 0x262   :  { %1763 = vmatpush.msrb.mxu2 %v9541_v0  ;;  %1085 = vst [vmem:[#allocation2 + $0x68] sm:$0xff] %v978_v8  ;;  %v929_v17 = vadd.f32 %v928_v15, %v906_v35 }
 0x263   :  { %1718 = vmatpush.msrb.mxu3 %v5727_v14  ;;  %1705 = vmatpush.msrb.mxu1 %v9546_v31  ;;  %v9549_v14 = vld [vmem:[#allocation66_spill] sm:$0xff] }
 0x264   :  { %1764 = vmatpush.msrb.mxu2 %v9544_v13  ;;  %1076 = vst [vmem:[#allocation2 + $0x20] sm:$0xff] %v929_v17 }
 0x265   :  { %1719 = vmatpush.msrb.mxu3 %v5736_v26  ;;  %1706 = vmatpush.msrb.mxu1 %v9549_v14  ;;  %v9551_v26 = vld [vmem:[#allocation68_spill] sm:$0xff] }
 0x266   :  { %1765 = vmatpush.msrb.mxu2 %v9547_v48  ;;  %v908_v24 = vpop.f32.mrf.mxu1 }
 0x267   :  { %1720 = vmatpush.msrb.mxu3 %v5746_v7  ;;  %1707 = vmatpush.msrb.mxu1 %v9551_v26  ;;  %v9553_v7 = vld [vmem:[#allocation69_spill] sm:$0xff] }
 0x268   :  { %1766 = vmatpush.msrb.mxu2 %v5751_v10  ;;  %v1043_v10 = vpop.f32.mrf.mxu2 }
 0x269   :  { %1721 = vmatpush.msrb.mxu3 %v5756_v1  ;;  %1708 = vmatpush.msrb.mxu1 %v9553_v7  ;;  %v670_v1 = vld [vmem:[%s9079_s6 + $0x60] sm:$0xff]  ;;  %v1044_v25 = vadd.f32 %v1043_v10, %v665_v20 }
 0x26a   :  { %1767 = vmatpush.msrb.mxu2 %v9552_v16  ;;  %v909_v30 = vadd.f32 %v908_v24, %v670_v1 }
 0x26b   :  { %1722 = vmatpush.msrb.mxu3 %v5766_v39  ;;  %1709 = vmatpush.msrb.mxu1 %v9555_v23  ;;  %v1067_v39 = vadd.f32 %v1066_v29, %v1044_v25 }
 0x26c   :  { %1768 = vmatpush.msrb.mxu2 %v9554_v21  ;;  %v931_v32 = vpop.f32.mrf.mxu3  ;;  %v1069_v36 = vpop.f32.mrf.mxu0 }
 0x26d   :  { %1723 = vmatpush.msrb.mxu3 %v5774_v57  ;;  %1079 = vst [vmem:[#allocation2 + $0x38] sm:$0xff] %v1067_v39  ;;  %v932_v57 = vadd.f32 %v931_v32, %v909_v30 }
 0x26e   :  { %1769 = vmatpush.msrb.mxu2 %v9556_v28 }
 0x26f   :  { %1724 = vmatpush.msrb.mxu3 %v5783_v63  ;;  %1084 = vst [vmem:[#allocation2 + $0x60] sm:$0xff] %v932_v57 }
 0x270   :  { %v1020_v40 = vpop.f32.mrf.mxu1 }
 0x271   :  { %1725 = vmatpush.msrb.mxu3 %v5791_v3  ;;  %v1046_v34 = vpop.f32.mrf.mxu2 }
 0x272   :  { %v1047_v63 = vadd.f32 %v1046_v34, %v673_v33 }
 0x273   :  { %1726 = vmatpush.msrb.mxu3 %v5796_v52 }
 0x274   :  { %v1070_v3 = vadd.f32 %v1069_v36, %v1047_v63 }
 0x275   :  { %1727 = vmatpush.msrb.mxu3 %v5802_v11  ;;  %v672_v11 = vld [vmem:[%s9079_s6 + $0x70] sm:$0xff] }
 0x276   :  { %1087 = vst [vmem:[#allocation2 + $0x78] sm:$0xff] %v1070_v3 }
 0x277   :  { %1728 = vmatpush.msrb.mxu3 %v5808_v22  ;;  %v997_v52 = vpop.f32.mrf.mxu3 }
 0x278   :  { %v998_v38 = vadd.f32 %v997_v52, %v664_v37 }
 0x279   :  { %1729 = vmatpush.msrb.mxu3 %v5817_v12 }
 0x27a   :  { %v1021_v41 = vadd.f32 %v1020_v40, %v998_v38  ;;  %v1023_v43 = vpop.f32.mrf.mxu1 }
 0x27c   :  { %1078 = vst [vmem:[#allocation2 + $0x30] sm:$0xff] %v1021_v41 }
 0x280   :  { %v1000_v22 = vpop.f32.mrf.mxu3 }
 0x281   :  { %v1001_v42 = vadd.f32 %v1000_v22, %v672_v11 }
 0x283   :  { %v1024_v44 = vadd.f32 %v1023_v43, %v1001_v42  ;;  %v1217_v12 = vld [vmem:[#allocation2] ss:$8 sm:$0xf0] }
 0x284   :  { %v5976_v47 = vor.u32 %v1217_v12, %v1216_v45 }
 0x285   :  { %1086 = vst [vmem:[#allocation2 + $0x70] sm:$0xff] %v1024_v44 }
 0x286   :  { %v1224_v56 = vperm.slane %v5976_v47, 0  ;;  %v1227_v51 = vperm.slane %v5976_v47, 3  ;;  %v1225_v2 = vperm.slane %v5976_v47, 1  ;;  %v1228_v15 = vperm.slane %v5976_v47, 4 }
 0x287   :  { %v1226_v7 = vperm.slane %v5976_v47, 2  ;;  %v1231_v32 = vperm.slane %v5976_v47, 7 }
 0x28c   :  { %v1221_v49 = vld [vmem:[#allocation2 + $0x40] ss:$8 sm:$0xf0] }
 0x28d   :  { %v5978_v50 = vor.u32 %v1221_v49, %v1220_v46 }
 0x28e   :  { %v1323_v28 = vpop.f32.mrf.mxu0 }
 0x28f   :  { %v1241_v5 = vperm.slane %v5978_v50, 0  ;;  %v1244_v53 = vperm.slane %v5978_v50, 3  ;;  %v1242_v61 = vperm.slane %v5978_v50, 1  ;;  %v1245_v48 = vperm.slane %v5978_v50, 4 }
 0x290   :  { %v1243_v16 = vperm.slane %v5978_v50, 2  ;;  %v1248_v24 = vperm.slane %v5978_v50, 7 }
 0x291   :  { %v1258_v55 = vsel %vm1257_vm4, %v1224_v56, %v1241_v5  ;;  %v1261_v60 = vsel %vm1257_vm4, %v1227_v51, %v1244_v53  ;;  %v1259_v59 = vsel %vm1257_vm4, %v1225_v2, %v1242_v61  ;;  %v1262_v19 = vsel %vm1257_vm4, %v1228_v15, %v1245_v48 }
 0x292   :  { %v1260_v23 = vsel %vm1257_vm4, %v1226_v7, %v1243_v16  ;;  %v1265_v3 = vsel %vm1257_vm4, %v1231_v32, %v1248_v24  ;;  %v1246_v51 = vperm.slane %v5978_v50, 5  ;;  %v6034_v7 = vld [vmem:[%s9080_s7 + $0x1e0] sm:$0xff]  ;;  %v6091_v32 = vld [vmem:[%s9080_s7 + $0x1a8] sm:$0xff] }
 0x293   :  { %v1343_v54 = vpop.f32.mrf.mxu2  ;;  %v1283_v58 = vpop.f32.mrf.mxu1  ;;  %v1348_v30 = vadd.f32 %v1323_v28, %v1260_v23  ;;  %v6047_v23 = vld [vmem:[%s9080_s7 + $0x1f0] sm:$0xff]  ;;  %v6059_v24 = vld [vmem:[%s9080_s7 + $0x1c0] sm:$0xff] }
 0x294   :  { %v1346_v27 = vadd.f32 %v1283_v58, %v1258_v55  ;;  %v1349_v0 = vadd.f32 %v1343_v54, %v1261_v60  ;;  %v1229_v58 = vperm.slane %v5976_v47, 5 }
 0x296   :  { %v4198_v4 = vmul.f32 -1.442695, %v1346_v27  ;;  %v4200_v6 = vmul.f32 -1.442695, %v1349_v0  ;;  %v1263_v0 = vsel %vm1257_vm4, %v1229_v58, %v1246_v51  ;;  %v6178_v51 = vld [vmem:[%s9080_s7 + $0x140] sm:$0xff] }
 0x297   :  { %v1407_v28 = vpop.f32.mrf.mxu0 }
 0x298   :  { %4259 = vpow2.f32 %v4198_v4 }
 0x299   :  { %v1303_v9 = vpop.f32.mrf.mxu3  ;;  %4261 = vpow2.f32 %v4200_v6 }
 0x29a   :  { %v1347_v8 = vadd.f32 %v1303_v9, %v1259_v59 }
 0x29c   :  { %v4199_v13 = vmul.f32 -1.442695, %v1347_v8 }
 0x29e   :  { %4263 = vpow2.f32 %v4199_v13  ;;  %v4260_v18 = vpop.eup %4259 }
 0x29f   :  { %v4262_v31 = vpop.eup %4261  ;;  %v1437_v35 = vadd.f32 1.0, %v4260_v18 }
 0x2a0   :  { %v5990_v62 = vadd.f32 1.0, %v4262_v31 }
 0x2a1   :  { %4265 = vrcp.f32 %v1437_v35  ;;  %v1449_v63 = vand.u32 2147483648, %v1437_v35  ;;  %vm1443_vm6 = vweird.f32 %v1437_v35  ;;  %v1447_v52 = vand.u32 2147483647, %v1437_v35 }
 0x2a2   :  { %4267 = vrcp.f32 %v5990_v62  ;;  %v1488_v8 = vand.u32 2147483648, %v5990_v62  ;;  %vm1482_vm14 = vweird.f32 %v5990_v62  ;;  %v1486_v13 = vand.u32 2147483647, %v5990_v62 }
 0x2a3   :  { %v1450_v44 = vor.u32 1.1754944e-38, %v1449_v63  ;;  %vm1448_vm9 = vcmp.eq.f32.partialorder %v1447_v52, 8.507059e+37  ;;  %v6106_v63 = vld [vmem:[%s9080_s7 + $0x1b8] sm:$0xff]  ;;  %v6120_v52 = vld [vmem:[%s9080_s7 + $0x188] sm:$0xff] }
 0x2a4   :  { %v4264_v14 = vpop.eup %4263  ;;  %v1489_v48 = vor.u32 1.1754944e-38, %v1488_v8  ;;  %vm1487_vm0 = vcmp.eq.f32.partialorder %v1486_v13, 8.507059e+37  ;;  %v6228_v8 = vld [vmem:[%s9080_s7 + $0x138] sm:$0xff] }
 0x2a5   :  { %v1456_v17 = vadd.f32 1.0, %v4264_v14 }
 0x2a7   :  { %4269 = vrcp.f32 %v1456_v17  ;;  %v4266_v10 = vpop.eup %4265  ;;  %v1468_v41 = vand.u32 2147483648, %v1456_v17  ;;  %v1466_v43 = vand.u32 2147483647, %v1456_v17  ;;  %vm1462_vm10 = vweird.f32 %v1456_v17 }
 0x2a8   :  { %v1367_v26 = vpop.f32.mrf.mxu1  ;;  %v1439_v1 = vmul.f32 %v4266_v10, %v1437_v35  ;;  %v5999_v25 = vpop.eup %4267  ;;  %vm1444_vm5 = vweird.f32 %v4266_v10 }
 0x2a9   :  { %v1430_v20 = vadd.f32 %v1367_v26, %v1262_v19  ;;  %v1478_v36 = vmul.f32 %v5999_v25, %v5990_v62  ;;  %vm1445_vm7 = vmor %vm1443_vm6, %vm1444_vm5  ;;  %v1469_v56 = vor.u32 1.1754944e-38, %v1468_v41  ;;  %vm1467_vm12 = vcmp.eq.f32.partialorder %v1466_v43, 8.507059e+37  ;;  %v6130_v41 = vld [vmem:[%s9080_s7 + $0x190] sm:$0xff]  ;;  %v6145_v43 = vld [vmem:[%s9080_s7 + $0x160] sm:$0xff] }
 0x2aa   :  { %v1440_v29 = vsub.f32 1.0, %v1439_v1  ;;  %vm1483_vm13 = vweird.f32 %v5999_v25  ;;  %v6053_v1 = vld [vmem:[%s9080_s7 + $0x1f8] sm:$0xff] }
 0x2ab   :  { %v4201_v21 = vmul.f32 -1.442695, %v1430_v20  ;;  %v1479_v12 = vsub.f32 1.0, %v1478_v36  ;;  %vm1484_vm15 = vmor %vm1482_vm14, %vm1483_vm13 }
 0x2ac   :  { %v1441_v57 = vmul.f32 %v4266_v10, %v1440_v29 }
 0x2ad   :  { %4271 = vpow2.f32 %v4201_v21  ;;  %v4270_v39 = vpop.eup %4269  ;;  %v1480_v60 = vmul.f32 %v5999_v25, %v1479_v12  ;;  %v6040_v21 = vld [vmem:[%s9080_s7 + $0x1e8] sm:$0xff] }
 0x2ae   :  { %v1458_v33 = vmul.f32 %v4270_v39, %v1456_v17  ;;  %v1442_v37 = vadd.f32 %v4266_v10, %v1441_v57  ;;  %4273 = vtanh.f32 %v1348_v30  ;;  %vm1463_vm8 = vweird.f32 %v4270_v39  ;;  %v6079_v30 = vld [vmem:[%s9080_s7 + $0x1d8] sm:$0xff] }
 0x2af   :  { %vm1464_vm11 = vmor %vm1462_vm10, %vm1463_vm8  ;;  %v1481_v59 = vadd.f32 %v5999_v25, %v1480_v60  ;;  %v6196_v60 = vld [vmem:[%s9080_s7 + $0x150] sm:$0xff] }
 0x2b0   :  { %v1459_v38 = vsub.f32 1.0, %v1458_v33  ;;  %v1446_v22 = vsel %vm1445_vm7, %v4266_v10, %v1442_v37  ;;  %v1247_v10 = vperm.slane %v5978_v50, 6  ;;  %v6065_v50 = vld [vmem:[%s9080_s7 + $0x1c8] sm:$0xff]  ;;  %v6114_v37 = vld [vmem:[%s9080_s7 + $0x180] sm:$0xff] }
 0x2b1   :  { %v1451_v49 = vsel %vm1448_vm9, %v1450_v44, %v1446_v22  ;;  %v1485_v35 = vsel %vm1484_vm15, %v5999_v25, %v1481_v59  ;;  %v1230_v25 = vperm.slane %v5976_v47, 6  ;;  %v6085_v47 = vld [vmem:[%s9080_s7 + $0x1a0] sm:$0xff]  ;;  %v6151_v44 = vld [vmem:[%s9080_s7 + $0x168] sm:$0xff] }
 0x2b2   :  { %v1427_v34 = vpop.f32.mrf.mxu2  ;;  %v1460_v42 = vmul.f32 %v4270_v39, %v1459_v38  ;;  %v1490_v19 = vsel %vm1487_vm0, %v1489_v48, %v1485_v35  ;;  %v6242_v35 = vld [vmem:[%s9080_s7 + $0x108] sm:$0xff] }
 0x2b3   :  { %v4272_v40 = vpop.eup %4271  ;;  %v1433_v11 = vadd.f32 %v1427_v34, %v1265_v3  ;;  %v1264_v33 = vsel %vm1257_vm4, %v1230_v25, %v1247_v10  ;;  %v6100_v34 = vld [vmem:[%s9080_s7 + $0x1b0] sm:$0xff] }
 0x2b4   :  { %v1461_v45 = vadd.f32 %v4270_v39, %v1460_v42  ;;  %v6005_v46 = vadd.f32 1.0, %v4272_v40  ;;  %v4274_v54 = vpop.eup %4273  ;;  %v1432_v3 = vadd.f32 %v1407_v28, %v1264_v33  ;;  %v6274_v28 = vld [vmem:[%s9080_s7 + $0xf0] sm:$0xff]  ;;  %v6286_v33 = vld [vmem:[%s9080_s7 + $0xc0] sm:$0xff] }
 0x2b5   :  { %v4203_v5 = vmul.f32 -1.442695, %v1433_v11  ;;  %v1493_v27 = vmul.f32 %v4274_v54, %v1451_v49  ;;  %v6136_v11 = vld [vmem:[%s9080_s7 + $0x198] sm:$0xff]  ;;  %v6159_v49 = vld [vmem:[%s9080_s7 + $0x170] sm:$0xff]  ;;  %9559 = vst [vmem:[#allocation17_spill] sm:$0xff] %v6274_v28 }
 0x2b6   :  { %v1465_v53 = vsel %vm1464_vm11, %v4270_v39, %v1461_v45  ;;  %4275 = vrcp.f32 %v6005_v46  ;;  %v6073_v39 = vld [vmem:[%s9080_s7 + $0x1d0] sm:$0xff]  ;;  %v1512_v22 = vand.u32 2147483648, %v6005_v46  ;;  %vm1506_vm2 = vweird.f32 %v6005_v46  ;;  %9561 = vst [vmem:[#allocation20_spill] sm:$0xff] %v6286_v33 }
 0x2b7   :  { %v1470_v55 = vsel %vm1467_vm12, %v1469_v56, %v1465_v53  ;;  %4277 = vpow2.f32 %v4203_v5  ;;  %v1510_v12 = vand.u32 2147483647, %v6005_v46  ;;  %v6165_v56 = vld [vmem:[%s9080_s7 + $0x178] sm:$0xff]  ;;  %v6184_v53 = vld [vmem:[%s9080_s7 + $0x148] sm:$0xff] }
 0x2b8   :  { %v1492_v61 = vmul.f32 0.0, %v1470_v55 }
 0x2b9   :  { %vm1511_vm6 = vcmp.eq.f32.partialorder %v1510_v12, 8.507059e+37  ;;  %v6320_v12 = vld [vmem:[%s9080_s7 + $0xa8] sm:$0xff] }
 0x2ba   :  { %v6012_v6 = vadd.f32 %v1493_v27, %v1492_v61  ;;  %v6202_v61 = vld [vmem:[%s9080_s7 + $0x158] sm:$0xff]  ;;  %v1513_v27 = vor.u32 1.1754944e-38, %v1512_v22  ;;  %9567 = vst [vmem:[#allocation25_spill] sm:$0xff] %v6320_v12 }
 0x2bc   :  { %4279 = vtanh.f32 %v6012_v6  ;;  %v6020_v18 = vpop.eup %4275 }
 0x2bd   :  { %v1387_v2 = vpop.f32.mrf.mxu3  ;;  %v4278_v31 = vpop.eup %4277  ;;  %v1502_v14 = vmul.f32 %v6020_v18, %v6005_v46  ;;  %vm1507_vm1 = vweird.f32 %v6020_v18  ;;  %v6328_v46 = vld [vmem:[%s9080_s7 + $0xb0] sm:$0xff] }
 0x2be   :  { %v1431_v4 = vadd.f32 %v1387_v2, %v1263_v0  ;;  %v6025_v17 = vadd.f32 1.0, %v4278_v31  ;;  %vm6170_vm3 = vmor %vm1506_vm2, %vm1507_vm1  ;;  %v6208_v2 = vld [vmem:[%s9080_s7 + $0x120] sm:$0xff]  ;;  %9568 = vst [vmem:[#allocation22_spill] sm:$0xff] %v6328_v46 }
 0x2bf   :  { %v1503_v62 = vsub.f32 1.0, %v1502_v14  ;;  %v6236_v31 = vld [vmem:[%s9080_s7 + $0x100] sm:$0xff]  ;;  %v6255_v14 = vld [vmem:[%s9080_s7 + $0x118] sm:$0xff] }
 0x2c0   :  { %v4202_v9 = vmul.f32 -1.442695, %v1431_v4  ;;  %v6214_v4 = vld [vmem:[%s9080_s7 + $0x128] sm:$0xff]  ;;  %vm1545_vm11 = vweird.f32 %v6025_v17 }
 0x2c1   :  { %v1504_v29 = vmul.f32 %v6020_v18, %v1503_v62  ;;  %v6268_v62 = vld [vmem:[%s9080_s7 + $0xe8] sm:$0xff] }
 0x2c2   :  { %4281 = vpow2.f32 %v4202_v9  ;;  %v4280_v15 = vpop.eup %4279  ;;  %v6222_v9 = vld [vmem:[%s9080_s7 + $0x130] sm:$0xff] }
 0x2c3   :  { %v1496_v26 = vmul.f32 %v4280_v15, %v1490_v19  ;;  %4283 = vrcp.f32 %v6025_v17  ;;  %v1505_v38 = vadd.f32 %v6020_v18, %v1504_v29  ;;  %v6249_v15 = vld [vmem:[%s9080_s7 + $0x110] sm:$0xff]  ;;  %v6280_v29 = vld [vmem:[%s9080_s7 + $0xf8] sm:$0xff] }
 0x2c4   :  { %9560 = vst [vmem:[#allocation13_spill] sm:$0xff] %v6280_v29 }
 0x2c5   :  { %1626 = vmatmul.f32.vlgmr.msra.gmra.mxu1 %v1496_v26  ;;  %1646 = vmatmul.f32.vlgmr.msra.gmra.mxu3 %v1496_v26  ;;  %v1509_v54 = vsel %vm6170_vm3, %v6020_v18, %v1505_v38  ;;  %v6300_v38 = vld [vmem:[%s9080_s7 + $0xd0] sm:$0xff] }
 0x2c6   :  { %1666 = vmatmul.f32.vlgmr.msra.gmra.mxu0 %v1496_v26  ;;  %1686 = vmatmul.f32.vlgmr.msra.gmra.mxu2 %v1496_v26  ;;  %v1514_v13 = vsel %vm1511_vm6, %v1513_v27, %v1509_v54  ;;  %9564 = vst [vmem:[#allocation14_spill] sm:$0xff] %v6300_v38  ;;  %v1549_v54 = vand.u32 2147483647, %v6025_v17  ;;  %v6423_v27 = vld [vmem:[%s9080_s7 + $0x20] sm:$0xff] }
 0x2c7   :  { %1954 = vmatpush.msra.mxu1 %v6034_v7  ;;  %1974 = vmatpush.msra.mxu3 %v6040_v21  ;;  %9584 = vst [vmem:[#allocation40_spill] sm:$0xff] %v6423_v27 }
 0x2c8   :  { %v4282_v16 = vpop.eup %4281  ;;  %1994 = vmatpush.msra.mxu0 %v6047_v23  ;;  %2014 = vmatpush.msra.mxu2 %v6053_v1  ;;  %vm1550_vm13 = vcmp.eq.f32.partialorder %v1549_v54, 8.507059e+37 }
 0x2c9   :  { %v6027_v20 = vadd.f32 1.0, %v4282_v16  ;;  %1955 = vmatpush.msra.mxu1 %v6059_v24  ;;  %1975 = vmatpush.msra.mxu3 %v6065_v50  ;;  %v6094_v57 = vpop.eup %4283 }
 0x2ca   :  { %1995 = vmatpush.msra.mxu0 %v6073_v39  ;;  %2015 = vmatpush.msra.mxu2 %v6079_v30  ;;  %v1541_v42 = vmul.f32 %v6094_v57, %v6025_v17  ;;  %vm1546_vm10 = vweird.f32 %v6094_v57 }
 0x2cb   :  { %4285 = vrcp.f32 %v6027_v20  ;;  %1956 = vmatpush.msra.mxu1 %v6085_v47  ;;  %1976 = vmatpush.msra.mxu3 %v6091_v32  ;;  %v1531_v5 = vand.u32 2147483648, %v6027_v20  ;;  %v1529_v58 = vand.u32 2147483647, %v6027_v20  ;;  %vm1525_vm7 = vweird.f32 %v6027_v20  ;;  %vm6353_vm12 = vmor %vm1545_vm11, %vm1546_vm10 }
 0x2cc   :  { %1996 = vmatpush.msra.mxu0 %v6100_v34  ;;  %2016 = vmatpush.msra.mxu2 %v6106_v63  ;;  %4287 = vtanh.f32 %v1432_v3  ;;  %v1542_v0 = vsub.f32 1.0, %v1541_v42  ;;  %v6314_v42 = vld [vmem:[%s9080_s7 + $0xa0] sm:$0xff] }
 0x2cd   :  { %1957 = vmatpush.msra.mxu1 %v6114_v37  ;;  %1977 = vmatpush.msra.mxu3 %v6120_v52  ;;  %v1532_v18 = vor.u32 1.1754944e-38, %v1531_v5  ;;  %vm1530_vm9 = vcmp.eq.f32.partialorder %v1529_v58, 8.507059e+37  ;;  %9566 = vst [vmem:[#allocation19_spill] sm:$0xff] %v6314_v42  ;;  %v6334_v5 = vld [vmem:[%s9080_s7 + $0xb8] sm:$0xff]  ;;  %v6348_v58 = vld [vmem:[%s9080_s7 + $0x88] sm:$0xff] }
 0x2ce   :  { %1997 = vmatpush.msra.mxu0 %v6130_v41  ;;  %2017 = vmatpush.msra.mxu2 %v6136_v11  ;;  %v1543_v16 = vmul.f32 %v6094_v57, %v1542_v0  ;;  %9569 = vst [vmem:[#allocation29_spill] sm:$0xff] %v6334_v5  ;;  %v6366_v0 = vld [vmem:[%s9080_s7 + $0x98] sm:$0xff] }
 0x2cf   :  { %1958 = vmatpush.msra.mxu1 %v6145_v43  ;;  %1978 = vmatpush.msra.mxu3 %v6151_v44  ;;  %9571 = vst [vmem:[#allocation26_spill] sm:$0xff] %v6348_v58 }
 0x2d0   :  { %1998 = vmatpush.msra.mxu0 %v6159_v49  ;;  %2018 = vmatpush.msra.mxu2 %v6165_v56  ;;  %v1544_v22 = vadd.f32 %v6094_v57, %v1543_v16  ;;  %9575 = vst [vmem:[#allocation33_spill] sm:$0xff] %v6366_v0  ;;  %v6405_v16 = vld [vmem:[%s9080_s7 + $0x48] sm:$0xff] }
 0x2d1   :  { %v6109_v36 = vpop.eup %4285  ;;  %1959 = vmatpush.msra.mxu1 %v6178_v51  ;;  %1979 = vmatpush.msra.mxu3 %v6184_v53  ;;  %9581 = vst [vmem:[#allocation34_spill] sm:$0xff] %v6405_v16 }
 0x2d2   :  { %v1521_v40 = vmul.f32 %v6109_v36, %v6027_v20  ;;  %vm1526_vm5 = vweird.f32 %v6109_v36  ;;  %1999 = vmatpush.msra.mxu0 %v6196_v60  ;;  %2019 = vmatpush.msra.mxu2 %v6202_v61  ;;  %v4288_v19 = vpop.eup %4287  ;;  %v6262_v20 = vld [vmem:[%s9080_s7 + $0xe0] sm:$0xff] }
 0x2d3   :  { %1960 = vmatpush.msra.mxu1 %v6208_v2  ;;  %1980 = vmatpush.msra.mxu3 %v6214_v4  ;;  %vm1527_vm8 = vmor %vm1525_vm7, %vm1526_vm5  ;;  %v1556_v25 = vmul.f32 %v4288_v19, %v1514_v13  ;;  %v6375_v13 = vld [vmem:[%s9080_s7 + $0x60] sm:$0xff]  ;;  %v6387_v19 = vld [vmem:[%s9080_s7 + $0x70] sm:$0xff] }
 0x2d4   :  { %v1522_v45 = vsub.f32 1.0, %v1521_v40  ;;  %2000 = vmatpush.msra.mxu0 %v6222_v9  ;;  %2020 = vmatpush.msra.mxu2 %v6228_v8  ;;  %v6306_v40 = vld [vmem:[%s9080_s7 + $0xd8] sm:$0xff]  ;;  %9576 = vst [vmem:[#allocation32_spill] sm:$0xff] %v6375_v13 }
 0x2d5   :  { %1961 = vmatpush.msra.mxu1 %v6236_v31  ;;  %1981 = vmatpush.msra.mxu3 %v6242_v35  ;;  %9565 = vst [vmem:[#allocation24_spill] sm:$0xff] %v6306_v40 }
 0x2d6   :  { %v1523_v55 = vmul.f32 %v6109_v36, %v1522_v45  ;;  %2001 = vmatpush.msra.mxu0 %v6249_v15  ;;  %2021 = vmatpush.msra.mxu2 %v6255_v14  ;;  %v1551_v45 = vand.u32 2147483648, %v6025_v17  ;;  %v6360_v17 = vld [vmem:[%s9080_s7 + $0x90] sm:$0xff]  ;;  %9578 = vst [vmem:[#allocation18_spill] sm:$0xff] %v6387_v19 }
 0x2d7   :  { %1962 = vmatpush.msra.mxu1 %v6262_v20  ;;  %1982 = vmatpush.msra.mxu3 %v6268_v62  ;;  %9574 = vst [vmem:[#allocation15_spill] sm:$0xff] %v6360_v17 }
 0x2d8   :  { %v1524_v59 = vadd.f32 %v6109_v36, %v1523_v55  ;;  %2002 = vmatpush.msra.mxu0 %v6274_v28  ;;  %2022 = vmatpush.msra.mxu2 %v6280_v29  ;;  %v6342_v55 = vld [vmem:[%s9080_s7 + $0x80] sm:$0xff] }
 0x2d9   :  { %1963 = vmatpush.msra.mxu1 %v6286_v33  ;;  %9570 = vst [vmem:[#allocation28_spill] sm:$0xff] %v6342_v55 }
 0x2da   :  { %v1528_v48 = vsel %vm1527_vm8, %v6109_v36, %v1524_v59  ;;  %v6292_v36 = vld [vmem:[%s9080_s7 + $0xc8] sm:$0xff]  ;;  %2003 = vmatpush.msra.mxu0 %v6300_v38  ;;  %2023 = vmatpush.msra.mxu2 %v6306_v40  ;;  %v1548_v59 = vsel %vm6353_vm12, %v6094_v57, %v1544_v22  ;;  %v6393_v57 = vld [vmem:[%s9080_s7 + $0x78] sm:$0xff]  ;;  %v6411_v22 = vld [vmem:[%s9080_s7 + $0x50] sm:$0xff] }
 0x2db   :  { %v1533_v26 = vsel %vm1530_vm9, %v1532_v18, %v1528_v48  ;;  %9562 = vst [vmem:[#allocation16_spill] sm:$0xff] %v6292_v36  ;;  %1983 = vmatpush.msra.mxu3 %v6292_v36  ;;  %1964 = vmatpush.msra.mxu1 %v6314_v42  ;;  %v6381_v18 = vld [vmem:[%s9080_s7 + $0x68] sm:$0xff]  ;;  %v1552_v48 = vor.u32 1.1754944e-38, %v1551_v45  ;;  %v6417_v45 = vld [vmem:[%s9080_s7 + $0x58] sm:$0xff] }
 0x2dc   :  { %v1555_v10 = vmul.f32 0.0, %v1533_v26  ;;  %2004 = vmatpush.msra.mxu0 %v6328_v46  ;;  %2024 = vmatpush.msra.mxu2 %v6334_v5  ;;  %9577 = vst [vmem:[#allocation30_spill] sm:$0xff] %v6381_v18  ;;  %v6399_v26 = vld [vmem:[%s9080_s7 + $0x40] sm:$0xff] }
 0x2dd   :  { %1984 = vmatpush.msra.mxu3 %v6320_v12  ;;  %1965 = vmatpush.msra.mxu1 %v6342_v55  ;;  %9579 = vst [vmem:[#allocation37_spill] sm:$0xff] %v6393_v57 }
 0x2de   :  { %v6295_v3 = vadd.f32 %v1556_v25, %v1555_v10  ;;  %2005 = vmatpush.msra.mxu0 %v6360_v17  ;;  %2025 = vmatpush.msra.mxu2 %v6366_v0  ;;  %9580 = vst [vmem:[#allocation36_spill] sm:$0xff] %v6399_v26  ;;  %v1553_v25 = vsel %vm1550_vm13, %v1552_v48, %v1548_v59  ;;  %v6429_v59 = vld [vmem:[%s9080_s7 + $0x28] sm:$0xff]  ;;  %v6435_v48 = vld [vmem:[%s9080_s7 + $0x30] sm:$0xff] }
 0x2df   :  { %1985 = vmatpush.msra.mxu3 %v6348_v58  ;;  %1966 = vmatpush.msra.mxu1 %v6375_v13  ;;  %9582 = vst [vmem:[#allocation23_spill] sm:$0xff] %v6411_v22 }
 0x2e0   :  { %9563 = vst [vmem:[#allocation21_spill] sm:$0xff] %v6295_v3  ;;  %4289 = vtanh.f32 %v6295_v3  ;;  %2006 = vmatpush.msra.mxu0 %v6387_v19  ;;  %2026 = vmatpush.msra.mxu2 %v6393_v57 }
 0x2e1   :  { %1986 = vmatpush.msra.mxu3 %v6381_v18  ;;  %1967 = vmatpush.msra.mxu1 %v6399_v26  ;;  %9583 = vst [vmem:[#allocation41_spill] sm:$0xff] %v6417_v45 }
 0x2e2   :  { %2007 = vmatpush.msra.mxu0 %v6411_v22  ;;  %2027 = vmatpush.msra.mxu2 %v6417_v45  ;;  %9585 = vst [vmem:[#allocation38_spill] sm:$0xff] %v6429_v59  ;;  %v1565_v45 = vld [vmem:[#allocation2 + $0x41] ss:$8 sm:$0xf] }
 0x2e3   :  { %1987 = vmatpush.msra.mxu3 %v6405_v16  ;;  %1968 = vmatpush.msra.mxu1 %v6423_v27  ;;  %9586 = vst [vmem:[#allocation27_spill] sm:$0xff] %v6435_v48  ;;  %v6480_v27 = vld [vmem:[#allocation8 + $0x1c0] sm:$0xff] }
 0x2e4   :  { %2008 = vmatpush.msra.mxu0 %v6435_v48  ;;  %v6453_v48 = vld [vmem:[%s9080_s7 + $0x8] sm:$0xff]  ;;  %9596 = vst [vmem:[#allocation35_spill] sm:$0xff] %v6480_v27 }
 0x2e5   :  { %1988 = vmatpush.msra.mxu3 %v6429_v59  ;;  %9589 = vst [vmem:[#allocation42_spill] sm:$0xff] %v6453_v48  ;;  %v6471_v59 = vld [vmem:[#allocation8 + $0x1e8] sm:$0xff] }
 0x2e6   :  { %v4290_v10 = vpop.eup %4289  ;;  %9593 = vst [vmem:[#allocation52_spill] sm:$0xff] %v6471_v59  ;;  %v1562_v22 = vld [vmem:[#allocation2 + $0x1] ss:$8 sm:$0xf0] }
 0x2e7   :  { %v1559_v54 = vmul.f32 %v4290_v10, %v1553_v25  ;;  %v6441_v10 = vld [vmem:[%s9080_s7 + $0x38] sm:$0xff]  ;;  %v6447_v25 = vld [vmem:[%s9080_s7] sm:$0xff]  ;;  %1989 = vmatpush.msra.mxu3 %v6453_v48 }
 0x2e8   :  { %9587 = vst [vmem:[#allocation45_spill] sm:$0xff] %v6441_v10  ;;  %2028 = vmatpush.msra.mxu2 %v6441_v10  ;;  %1969 = vmatpush.msra.mxu1 %v6447_v25  ;;  %v6459_v10 = vld [vmem:[%s9080_s7 + $0x10] sm:$0xff]  ;;  %v6474_v48 = vld [vmem:[#allocation8 + $0x1f0] sm:$0xff] }
 0x2e9   :  { %1710 = vmatmul.f32.vlgmr.msrb.gmra.mxu1 %v1559_v54  ;;  %1730 = vmatmul.f32.vlgmr.msrb.gmra.mxu3 %v1559_v54  ;;  %9588 = vst [vmem:[#allocation44_spill] sm:$0xff] %v6447_v25  ;;  %v6468_v25 = vld [vmem:[#allocation8 + $0x1e0] sm:$0xff] }
 0x2ea   :  { %1750 = vmatmul.f32.vlgmr.msrb.gmra.mxu0 %v1559_v54  ;;  %1770 = vmatmul.f32.vlgmr.msrb.gmra.mxu2 %v1559_v54  ;;  %9590 = vst [vmem:[#allocation31_spill] sm:$0xff] %v6459_v10  ;;  %v6465_v54 = vld [vmem:[%s9080_s7 + $0x18] sm:$0xff] }
 0x2eb   :  { %2009 = vmatpush.msra.mxu0 %v6459_v10  ;;  %9591 = vst [vmem:[#allocation49_spill] sm:$0xff] %v6465_v54  ;;  %2029 = vmatpush.msra.mxu2 %v6465_v54  ;;  %v6477_v10 = vld [vmem:[#allocation8 + $0x1f8] sm:$0xff]  ;;  %v6483_v54 = vld [vmem:[#allocation8 + $0x1c8] sm:$0xff] }
 0x2ec   :  { %9592 = vst [vmem:[#allocation48_spill] sm:$0xff] %v6468_v25  ;;  %2038 = vmatpush.msrb.mxu1 %v6468_v25  ;;  %2058 = vmatpush.msrb.mxu3 %v6471_v59  ;;  %v6486_v25 = vld [vmem:[#allocation8 + $0x1d0] sm:$0xff]  ;;  %v6489_v59 = vld [vmem:[#allocation8 + $0x1d8] sm:$0xff] }
 0x2ed   :  { %9594 = vst [vmem:[#allocation46_spill] sm:$0xff] %v6474_v48  ;;  %2078 = vmatpush.msrb.mxu0 %v6474_v48  ;;  %2098 = vmatpush.msrb.mxu2 %v6477_v10  ;;  %v6492_v48 = vld [vmem:[#allocation8 + $0x1a0] sm:$0xff] }
 0x2ee   :  { %9595 = vst [vmem:[#allocation53_spill] sm:$0xff] %v6477_v10  ;;  %2039 = vmatpush.msrb.mxu1 %v6480_v27  ;;  %2059 = vmatpush.msrb.mxu3 %v6483_v54  ;;  %v6495_v10 = vld [vmem:[#allocation8 + $0x1a8] sm:$0xff]  ;;  %v6498_v27 = vld [vmem:[#allocation8 + $0x1b0] sm:$0xff] }
 0x2ef   :  { %9597 = vst [vmem:[#allocation56_spill] sm:$0xff] %v6483_v54  ;;  %2079 = vmatpush.msrb.mxu0 %v6486_v25  ;;  %2099 = vmatpush.msrb.mxu2 %v6489_v59  ;;  %v6501_v54 = vld [vmem:[#allocation8 + $0x1b8] sm:$0xff] }
 0x2f0   :  { %9598 = vst [vmem:[#allocation50_spill] sm:$0xff] %v6486_v25  ;;  %2040 = vmatpush.msrb.mxu1 %v6492_v48  ;;  %2060 = vmatpush.msrb.mxu3 %v6495_v10  ;;  %v6504_v25 = vld [vmem:[#allocation8 + $0x180] sm:$0xff] }
 0x2f1   :  { %9599 = vst [vmem:[#allocation39_spill] sm:$0xff] %v6489_v59  ;;  %2080 = vmatpush.msrb.mxu0 %v6498_v27  ;;  %2100 = vmatpush.msrb.mxu2 %v6501_v54  ;;  %v6507_v59 = vld [vmem:[#allocation8 + $0x188] sm:$0xff] }
 0x2f2   :  { %9600 = vst [vmem:[#allocation59_spill] sm:$0xff] %v6492_v48  ;;  %2041 = vmatpush.msrb.mxu1 %v6504_v25  ;;  %2061 = vmatpush.msrb.mxu3 %v6507_v59  ;;  %v6510_v48 = vld [vmem:[#allocation8 + $0x190] sm:$0xff] }
 0x2f3   :  { %9601 = vst [vmem:[#allocation55_spill] sm:$0xff] %v6495_v10  ;;  %2081 = vmatpush.msrb.mxu0 %v6510_v48  ;;  %v6513_v10 = vld [vmem:[#allocation8 + $0x198] sm:$0xff] }
 0x2f4   :  { %9602 = vst [vmem:[#allocation60_spill] sm:$0xff] %v6498_v27  ;;  %2101 = vmatpush.msrb.mxu2 %v6513_v10  ;;  %v6516_v27 = vld [vmem:[#allocation8 + $0x160] sm:$0xff] }
 0x2f5   :  { %9603 = vst [vmem:[#allocation43_spill] sm:$0xff] %v6501_v54  ;;  %2042 = vmatpush.msrb.mxu1 %v6516_v27  ;;  %v6519_v54 = vld [vmem:[#allocation8 + $0x168] sm:$0xff] }
 0x2f6   :  { %9604 = vst [vmem:[#allocation62_spill] sm:$0xff] %v6504_v25  ;;  %2062 = vmatpush.msrb.mxu3 %v6519_v54  ;;  %v6522_v25 = vld [vmem:[#allocation8 + $0x170] sm:$0xff] }
 0x2f7   :  { %9605 = vst [vmem:[#allocation58_spill] sm:$0xff] %v6507_v59  ;;  %2082 = vmatpush.msrb.mxu0 %v6522_v25  ;;  %v6525_v59 = vld [vmem:[#allocation8 + $0x178] sm:$0xff] }
 0x2f8   :  { %9606 = vst [vmem:[#allocation63_spill] sm:$0xff] %v6510_v48  ;;  %2102 = vmatpush.msrb.mxu2 %v6525_v59  ;;  %v6528_v48 = vld [vmem:[#allocation8 + $0x140] sm:$0xff] }
 0x2f9   :  { %9607 = vst [vmem:[#allocation47_spill] sm:$0xff] %v6513_v10  ;;  %2043 = vmatpush.msrb.mxu1 %v6528_v48  ;;  %v6531_v10 = vld [vmem:[#allocation8 + $0x148] sm:$0xff] }
 0x2fa   :  { %9608 = vst [vmem:[#allocation61_spill] sm:$0xff] %v6516_v27  ;;  %2063 = vmatpush.msrb.mxu3 %v6531_v10  ;;  %v6534_v27 = vld [vmem:[#allocation8 + $0x150] sm:$0xff] }
 0x2fb   :  { %9609 = vst [vmem:[#allocation65_spill] sm:$0xff] %v6519_v54  ;;  %2083 = vmatpush.msrb.mxu0 %v6534_v27  ;;  %v6537_v54 = vld [vmem:[#allocation8 + $0x158] sm:$0xff] }
 0x2fc   :  { %9610 = vst [vmem:[#allocation51_spill] sm:$0xff] %v6522_v25  ;;  %2103 = vmatpush.msrb.mxu2 %v6537_v54  ;;  %v6540_v25 = vld [vmem:[#allocation8 + $0x120] sm:$0xff] }
 0x2fd   :  { %9611 = vst [vmem:[#allocation64_spill] sm:$0xff] %v6525_v59  ;;  %2044 = vmatpush.msrb.mxu1 %v6540_v25  ;;  %v6543_v59 = vld [vmem:[#allocation8 + $0x128] sm:$0xff] }
 0x2fe   :  { %9612 = vst [vmem:[#allocation67_spill] sm:$0xff] %v6528_v48  ;;  %2064 = vmatpush.msrb.mxu3 %v6543_v59  ;;  %v6546_v48 = vld [vmem:[#allocation8 + $0x130] sm:$0xff] }
 0x2ff   :  { %9613 = vst [vmem:[#allocation54_spill] sm:$0xff] %v6531_v10  ;;  %2084 = vmatpush.msrb.mxu0 %v6546_v48  ;;  %v6549_v10 = vld [vmem:[#allocation8 + $0x138] sm:$0xff] }
 0x300   :  { %9614 = vst [vmem:[#allocation66_spill] sm:$0xff] %v6534_v27  ;;  %2104 = vmatpush.msrb.mxu2 %v6549_v10  ;;  %v6552_v27 = vld [vmem:[#allocation8 + $0x100] sm:$0xff] }
 0x301   :  { %9615 = vst [vmem:[#allocation57_spill] sm:$0xff] %v6537_v54  ;;  %2045 = vmatpush.msrb.mxu1 %v6552_v27  ;;  %v6555_v54 = vld [vmem:[#allocation8 + $0x108] sm:$0xff] }
 0x302   :  { %9616 = vst [vmem:[#allocation68_spill] sm:$0xff] %v6540_v25  ;;  %2065 = vmatpush.msrb.mxu3 %v6555_v54  ;;  %v6558_v25 = vld [vmem:[#allocation8 + $0x110] sm:$0xff] }
 0x303   :  { %9617 = vst [vmem:[#allocation70_spill] sm:$0xff] %v6543_v59  ;;  %2085 = vmatpush.msrb.mxu0 %v6558_v25  ;;  %v6561_v59 = vld [vmem:[#allocation8 + $0x118] sm:$0xff] }
 0x304   :  { %9618 = vst [vmem:[#allocation69_spill] sm:$0xff] %v6546_v48  ;;  %2105 = vmatpush.msrb.mxu2 %v6561_v59  ;;  %v6564_v48 = vld [vmem:[#allocation8 + $0xe0] sm:$0xff] }
 0x305   :  { %9619 = vst [vmem:[#allocation72_spill] sm:$0xff] %v6549_v10  ;;  %2046 = vmatpush.msrb.mxu1 %v6564_v48  ;;  %v6567_v10 = vld [vmem:[#allocation8 + $0xe8] sm:$0xff] }
 0x306   :  { %9620 = vst [vmem:[#allocation71_spill] sm:$0xff] %v6552_v27  ;;  %2066 = vmatpush.msrb.mxu3 %v6567_v10  ;;  %v6570_v27 = vld [vmem:[#allocation8 + $0xf0] sm:$0xff] }
 0x307   :  { %9621 = vst [vmem:[#allocation73_spill] sm:$0xff] %v6555_v54  ;;  %2086 = vmatpush.msrb.mxu0 %v6570_v27  ;;  %v6573_v54 = vld [vmem:[#allocation8 + $0xf8] sm:$0xff] }
 0x308   :  { %9622 = vst [vmem:[#allocation74_spill] sm:$0xff] %v6558_v25  ;;  %2106 = vmatpush.msrb.mxu2 %v6573_v54  ;;  %v6576_v25 = vld [vmem:[#allocation8 + $0xc0] sm:$0xff] }
 0x309   :  { %9623 = vst [vmem:[#allocation75_spill] sm:$0xff] %v6561_v59  ;;  %2047 = vmatpush.msrb.mxu1 %v6576_v25  ;;  %v6579_v59 = vld [vmem:[#allocation8 + $0xc8] sm:$0xff] }
 0x30a   :  { %9624 = vst [vmem:[#allocation76_spill] sm:$0xff] %v6564_v48  ;;  %2067 = vmatpush.msrb.mxu3 %v6579_v59  ;;  %v6582_v48 = vld [vmem:[#allocation8 + $0xd0] sm:$0xff] }
 0x30b   :  { %9625 = vst [vmem:[#allocation77_spill] sm:$0xff] %v6567_v10  ;;  %2087 = vmatpush.msrb.mxu0 %v6582_v48  ;;  %v6585_v10 = vld [vmem:[#allocation8 + $0xd8] sm:$0xff] }
 0x30c   :  { %9626 = vst [vmem:[#allocation78_spill] sm:$0xff] %v6570_v27  ;;  %2107 = vmatpush.msrb.mxu2 %v6585_v10  ;;  %v6588_v27 = vld [vmem:[#allocation8 + $0xa0] sm:$0xff] }
 0x30d   :  { %9627 = vst [vmem:[#allocation79_spill] sm:$0xff] %v6573_v54  ;;  %2048 = vmatpush.msrb.mxu1 %v6588_v27  ;;  %v6591_v54 = vld [vmem:[#allocation8 + $0xa8] sm:$0xff] }
 0x30e   :  { %9628 = vst [vmem:[#allocation80_spill] sm:$0xff] %v6576_v25  ;;  %2068 = vmatpush.msrb.mxu3 %v6591_v54  ;;  %v6594_v25 = vld [vmem:[#allocation8 + $0xb0] sm:$0xff] }
 0x30f   :  { %9629 = vst [vmem:[#allocation81_spill] sm:$0xff] %v6579_v59  ;;  %2088 = vmatpush.msrb.mxu0 %v6594_v25  ;;  %v6597_v59 = vld [vmem:[#allocation8 + $0xb8] sm:$0xff] }
 0x310   :  { %9630 = vst [vmem:[#allocation82_spill] sm:$0xff] %v6582_v48  ;;  %2108 = vmatpush.msrb.mxu2 %v6597_v59  ;;  %v6600_v48 = vld [vmem:[#allocation8 + $0x80] sm:$0xff] }
 0x311   :  { %9631 = vst [vmem:[#allocation83_spill] sm:$0xff] %v6585_v10  ;;  %2049 = vmatpush.msrb.mxu1 %v6600_v48  ;;  %v6603_v10 = vld [vmem:[#allocation8 + $0x88] sm:$0xff] }
 0x312   :  { %9632 = vst [vmem:[#allocation84_spill] sm:$0xff] %v6588_v27  ;;  %2069 = vmatpush.msrb.mxu3 %v6603_v10  ;;  %v6606_v27 = vld [vmem:[#allocation8 + $0x90] sm:$0xff] }
 0x313   :  { %9633 = vst [vmem:[#allocation85_spill] sm:$0xff] %v6591_v54  ;;  %2089 = vmatpush.msrb.mxu0 %v6606_v27  ;;  %v6609_v54 = vld [vmem:[#allocation8 + $0x98] sm:$0xff] }
 0x314   :  { %9634 = vst [vmem:[#allocation86_spill] sm:$0xff] %v6594_v25  ;;  %2109 = vmatpush.msrb.mxu2 %v6609_v54  ;;  %v6612_v25 = vld [vmem:[#allocation8 + $0x60] sm:$0xff] }
 0x315   :  { %9635 = vst [vmem:[#allocation87_spill] sm:$0xff] %v6597_v59  ;;  %2050 = vmatpush.msrb.mxu1 %v6612_v25  ;;  %v6615_v59 = vld [vmem:[#allocation8 + $0x68] sm:$0xff] }
 0x316   :  { %9636 = vst [vmem:[#allocation88_spill] sm:$0xff] %v6600_v48  ;;  %2070 = vmatpush.msrb.mxu3 %v6615_v59  ;;  %v6618_v48 = vld [vmem:[#allocation8 + $0x70] sm:$0xff] }
 0x317   :  { %9637 = vst [vmem:[#allocation89_spill] sm:$0xff] %v6603_v10  ;;  %2090 = vmatpush.msrb.mxu0 %v6618_v48  ;;  %v6621_v10 = vld [vmem:[#allocation8 + $0x78] sm:$0xff] }
 0x318   :  { %9638 = vst [vmem:[#allocation90_spill] sm:$0xff] %v6606_v27  ;;  %2110 = vmatpush.msrb.mxu2 %v6621_v10  ;;  %v6624_v27 = vld [vmem:[#allocation8 + $0x40] sm:$0xff] }
 0x319   :  { %9639 = vst [vmem:[#allocation91_spill] sm:$0xff] %v6609_v54  ;;  %2051 = vmatpush.msrb.mxu1 %v6624_v27  ;;  %v6627_v54 = vld [vmem:[#allocation8 + $0x48] sm:$0xff] }
 0x31a   :  { %9640 = vst [vmem:[#allocation92_spill] sm:$0xff] %v6612_v25  ;;  %2071 = vmatpush.msrb.mxu3 %v6627_v54  ;;  %v6630_v25 = vld [vmem:[#allocation8 + $0x50] sm:$0xff] }
 0x31b   :  { %9641 = vst [vmem:[#allocation93_spill] sm:$0xff] %v6615_v59  ;;  %2091 = vmatpush.msrb.mxu0 %v6630_v25  ;;  %v6633_v59 = vld [vmem:[#allocation8 + $0x58] sm:$0xff] }
 0x31c   :  { %9642 = vst [vmem:[#allocation94_spill] sm:$0xff] %v6618_v48  ;;  %2111 = vmatpush.msrb.mxu2 %v6633_v59  ;;  %v6636_v48 = vld [vmem:[#allocation8 + $0x20] sm:$0xff] }
 0x31d   :  { %9643 = vst [vmem:[#allocation95_spill] sm:$0xff] %v6621_v10  ;;  %2052 = vmatpush.msrb.mxu1 %v6636_v48  ;;  %v6639_v10 = vld [vmem:[#allocation8 + $0x28] sm:$0xff] }
 0x31e   :  { %9644 = vst [vmem:[#allocation96_spill] sm:$0xff] %v6624_v27  ;;  %2072 = vmatpush.msrb.mxu3 %v6639_v10  ;;  %v6642_v27 = vld [vmem:[#allocation8 + $0x30] sm:$0xff] }
 0x31f   :  { %9645 = vst [vmem:[#allocation97_spill] sm:$0xff] %v6627_v54  ;;  %2092 = vmatpush.msrb.mxu0 %v6642_v27  ;;  %v6645_v54 = vld [vmem:[#allocation8 + $0x38] sm:$0xff] }
 0x320   :  { %9646 = vst [vmem:[#allocation98_spill] sm:$0xff] %v6630_v25  ;;  %2112 = vmatpush.msrb.mxu2 %v6645_v54  ;;  %v6648_v25 = vld [vmem:[#allocation8] sm:$0xff] }
 0x321   :  { %9647 = vst [vmem:[#allocation99_spill] sm:$0xff] %v6633_v59  ;;  %2053 = vmatpush.msrb.mxu1 %v6648_v25  ;;  %v6651_v59 = vld [vmem:[#allocation8 + $0x8] sm:$0xff] }
 0x322   :  { %9648 = vst [vmem:[#allocation100_spill] sm:$0xff] %v6636_v48  ;;  %2073 = vmatpush.msrb.mxu3 %v6651_v59  ;;  %v6654_v48 = vld [vmem:[#allocation8 + $0x10] sm:$0xff] }
 0x323   :  { %9649 = vst [vmem:[#allocation101_spill] sm:$0xff] %v6639_v10  ;;  %2093 = vmatpush.msrb.mxu0 %v6654_v48  ;;  %v6657_v10 = vld [vmem:[#allocation8 + $0x18] sm:$0xff] }
 0x324   :  { %9650 = vst [vmem:[#allocation102_spill] sm:$0xff] %v6642_v27  ;;  %2113 = vmatpush.msrb.mxu2 %v6657_v10  ;;  %v1566_v27 = vld [vmem:[#allocation2 + $0x41] ss:$8 sm:$0xf0] }
 0x325   :  { %9651 = vst [vmem:[#allocation103_spill] sm:$0xff] %v6645_v54  ;;  %v6660_v54 = vor.u32 %v1566_v27, %v1565_v45  ;;  %v1561_v16 = vld [vmem:[#allocation2 + $0x1] ss:$8 sm:$0xf] }
 0x326   :  { %9652 = vst [vmem:[#allocation104_spill] sm:$0xff] %v6648_v25  ;;  %v6662_v26 = vor.u32 %v1562_v22, %v1561_v16 }
 0x327   :  { %9653 = vst [vmem:[#allocation105_spill] sm:$0xff] %v6651_v59  ;;  %v1586_v25 = vperm.slane %v6660_v54, 0  ;;  %v1587_v18 = vperm.slane %v6660_v54, 1  ;;  %v1591_v28 = vperm.slane %v6660_v54, 5 }
 0x328   :  { %9654 = vst [vmem:[#allocation106_spill] sm:$0xff] %v6654_v48  ;;  %v1569_v59 = vperm.slane %v6662_v26, 0  ;;  %v1570_v0 = vperm.slane %v6662_v26, 1  ;;  %v1572_v45 = vperm.slane %v6662_v26, 3 }
 0x329   :  { %9655 = vst [vmem:[#allocation107_spill] sm:$0xff] %v6657_v10  ;;  %v1589_v10 = vperm.slane %v6660_v54, 3 }
 0x32a   :  { %v1602_v57 = vsel %vm1257_vm4, %v1569_v59, %v1586_v25  ;;  %v1603_v16 = vsel %vm1257_vm4, %v1570_v0, %v1587_v18  ;;  %v1588_v18 = vperm.slane %v6660_v54, 2 }
 0x32b   :  { %v1605_v17 = vsel %vm1257_vm4, %v1572_v45, %v1589_v10 }
 0x342   :  { %v1627_v19 = vpop.f32.mrf.mxu1 }
 0x343   :  { %v1690_v48 = vadd.f32 %v1627_v19, %v1602_v57  ;;  %v1667_v10 = vpop.f32.mrf.mxu0 }
 0x345   :  { %v4204_v13 = vmul.f32 -1.442695, %v1690_v48 }
 0x347   :  { %4291 = vpow2.f32 %v4204_v13 }
 0x348   :  { %v1647_v22 = vpop.f32.mrf.mxu3 }
 0x349   :  { %v1691_v27 = vadd.f32 %v1647_v22, %v1603_v16  ;;  %v1687_v58 = vpop.f32.mrf.mxu2 }
 0x34a   :  { %v1693_v59 = vadd.f32 %v1687_v58, %v1605_v17  ;;  %v1571_v17 = vperm.slane %v6662_v26, 2 }
 0x34b   :  { %v4205_v25 = vmul.f32 -1.442695, %v1691_v27 }
 0x34c   :  { %v4206_v19 = vmul.f32 -1.442695, %v1693_v59  ;;  %v1604_v45 = vsel %vm1257_vm4, %v1571_v17, %v1588_v18 }
 0x34d   :  { %v4292_v57 = vpop.eup %4291  ;;  %4293 = vpow2.f32 %v4205_v25  ;;  %v1692_v27 = vadd.f32 %v1667_v10, %v1604_v45 }
 0x34e   :  { %v1781_v48 = vadd.f32 1.0, %v4292_v57  ;;  %4295 = vpow2.f32 %v4206_v19  ;;  %v1590_v57 = vperm.slane %v6660_v54, 4 }
 0x350   :  { %4297 = vrcp.f32 %v1781_v48  ;;  %v1793_v25 = vand.u32 2147483648, %v1781_v48  ;;  %vm1787_vm15 = vweird.f32 %v1781_v48 }
 0x353   :  { %v4294_v55 = vpop.eup %4293 }
 0x354   :  { %v4296_v5 = vpop.eup %4295  ;;  %v1800_v13 = vadd.f32 1.0, %v4294_v55 }
 0x355   :  { %v6673_v46 = vadd.f32 1.0, %v4296_v5 }
 0x356   :  { %v4298_v12 = vpop.eup %4297  ;;  %4299 = vrcp.f32 %v1800_v13  ;;  %v1812_v18 = vand.u32 2147483648, %v1800_v13  ;;  %v1810_v45 = vand.u32 2147483647, %v1800_v13  ;;  %vm1806_vm3 = vweird.f32 %v1800_v13 }
 0x357   :  { %v1783_v0 = vmul.f32 %v4298_v12, %v1781_v48  ;;  %4301 = vrcp.f32 %v6673_v46  ;;  %vm1788_vm14 = vweird.f32 %v4298_v12  ;;  %vm1826_vm8 = vweird.f32 %v6673_v46 }
 0x358   :  { %vm6684_vm0 = vmor %vm1787_vm15, %vm1788_vm14  ;;  %4303 = vtanh.f32 %v1692_v27  ;;  %v1813_v27 = vor.u32 1.1754944e-38, %v1812_v18  ;;  %vm1811_vm6 = vcmp.eq.f32.partialorder %v1810_v45, 8.507059e+37 }
 0x359   :  { %v1784_v58 = vsub.f32 1.0, %v1783_v0  ;;  %v1791_v0 = vand.u32 2147483647, %v1781_v48 }
 0x35b   :  { %v1785_v16 = vmul.f32 %v4298_v12, %v1784_v58  ;;  %v1573_v58 = vperm.slane %v6662_v26, 4  ;;  %vm1792_vm2 = vcmp.eq.f32.partialorder %v1791_v0, 8.507059e+37 }
 0x35c   :  { %v4300_v22 = vpop.eup %4299 }
 0x35d   :  { %v6679_v59 = vpop.eup %4301  ;;  %v1786_v5 = vadd.f32 %v4298_v12, %v1785_v16  ;;  %v1802_v55 = vmul.f32 %v4300_v22, %v1800_v13  ;;  %vm1807_vm1 = vweird.f32 %v4300_v22  ;;  %v1794_v16 = vor.u32 1.1754944e-38, %v1793_v25 }
 0x35e   :  { %v1822_v19 = vmul.f32 %v6679_v59, %v6673_v46  ;;  %v1606_v36 = vsel %vm1257_vm4, %v1573_v58, %v1590_v57  ;;  %vm1808_vm5 = vmor %vm1806_vm3, %vm1807_vm1  ;;  %v1574_v25 = vperm.slane %v6662_v26, 5  ;;  %vm1827_vm7 = vweird.f32 %v6679_v59 }
 0x35f   :  { %v1803_v42 = vsub.f32 1.0, %v1802_v55  ;;  %v1790_v17 = vsel %vm6684_vm0, %v4298_v12, %v1786_v5  ;;  %v4304_v12 = vpop.eup %4303  ;;  %vm1828_vm9 = vmor %vm1826_vm8, %vm1827_vm7 }
 0x360   :  { %v1823_v38 = vsub.f32 1.0, %v1822_v19  ;;  %v1795_v29 = vsel %vm1792_vm2, %v1794_v16, %v1790_v17  ;;  %v1607_v0 = vsel %vm1257_vm4, %v1574_v25, %v1591_v28  ;;  %v1830_v28 = vand.u32 2147483647, %v6673_v46 }
 0x361   :  { %v1804_v10 = vmul.f32 %v4300_v22, %v1803_v42  ;;  %v1593_v42 = vperm.slane %v6660_v54, 7  ;;  %v1837_v57 = vmul.f32 %v4304_v12, %v1795_v29 }
 0x362   :  { %v1824_v19 = vmul.f32 %v6679_v59, %v1823_v38  ;;  %v1832_v38 = vand.u32 2147483648, %v6673_v46  ;;  %vm1831_vm10 = vcmp.eq.f32.partialorder %v1830_v28, 8.507059e+37  ;;  %v9674_v28 = vld [vmem:[#allocation33_spill] sm:$0xff] }
 0x363   :  { %v1805_v55 = vadd.f32 %v4300_v22, %v1804_v10 }
 0x364   :  { %v1825_v10 = vadd.f32 %v6679_v59, %v1824_v19 }
 0x365   :  { %v1809_v3 = vsel %vm1808_vm5, %v4300_v22, %v1805_v55  ;;  %v1833_v55 = vor.u32 1.1754944e-38, %v1832_v38  ;;  %v9672_v38 = vld [vmem:[#allocation26_spill] sm:$0xff] }
 0x366   :  { %v1711_v48 = vpop.f32.mrf.mxu1  ;;  %v1814_v5 = vsel %vm1811_vm6, %v1813_v27, %v1809_v3 }
 0x367   :  { %v1774_v33 = vadd.f32 %v1711_v48, %v1606_v36  ;;  %v1576_v36 = vperm.slane %v6662_v26, 7  ;;  %v1836_v13 = vmul.f32 %v1814_v5, %v6012_v6  ;;  %v1829_v48 = vsel %vm1828_vm9, %v6679_v59, %v1825_v10 }
 0x369   :  { %v4207_v40 = vmul.f32 -1.442695, %v1774_v33  ;;  %v1609_v33 = vsel %vm1257_vm4, %v1576_v36, %v1593_v42  ;;  %v6700_v17 = vadd.f32 %v1837_v57, %v1836_v13  ;;  %v1592_v57 = vperm.slane %v6660_v54, 6  ;;  %v1751_v13 = vpop.f32.mrf.mxu0  ;;  %v9663_v54 = vld [vmem:[#allocation20_spill] sm:$0xff] }
 0x36b   :  { %4305 = vpow2.f32 %v4207_v40  ;;  %v1834_v40 = vsel %vm1831_vm10, %v1833_v55, %v1829_v48  ;;  %v9676_v48 = vld [vmem:[#allocation30_spill] sm:$0xff] }
 0x36c   :  { %v1731_v18 = vpop.f32.mrf.mxu3  ;;  %4307 = vtanh.f32 %v6700_v17 }
 0x36d   :  { %v1775_v22 = vadd.f32 %v1731_v18, %v1607_v0  ;;  %v1771_v58 = vpop.f32.mrf.mxu2  ;;  %v9665_v0 = vld [vmem:[#allocation14_spill] sm:$0xff]  ;;  %v9666_v18 = vld [vmem:[#allocation24_spill] sm:$0xff] }
 0x36e   :  { %v1777_v3 = vadd.f32 %v1771_v58, %v1609_v33  ;;  %v9669_v58 = vld [vmem:[#allocation22_spill] sm:$0xff] }
 0x36f   :  { %v4208_v29 = vmul.f32 -1.442695, %v1775_v22  ;;  %v9668_v22 = vld [vmem:[#allocation25_spill] sm:$0xff] }
 0x370   :  { %v4209_v6 = vmul.f32 -1.442695, %v1777_v3  ;;  %v9670_v3 = vld [vmem:[#allocation29_spill] sm:$0xff] }
 0x371   :  { %v4306_v45 = vpop.eup %4305  ;;  %4309 = vpow2.f32 %v4208_v29  ;;  %v9671_v29 = vld [vmem:[#allocation28_spill] sm:$0xff] }
 0x372   :  { %v6708_v16 = vadd.f32 1.0, %v4306_v45  ;;  %4311 = vpow2.f32 %v4209_v6  ;;  %v4308_v27 = vpop.eup %4307  ;;  %v9673_v6 = vld [vmem:[#allocation15_spill] sm:$0xff] }
 0x373   :  { %v1840_v42 = vmul.f32 %v4308_v27, %v1834_v40  ;;  %v9677_v27 = vld [vmem:[#allocation18_spill] sm:$0xff]  ;;  %v9678_v40 = vld [vmem:[#allocation37_spill] sm:$0xff] }
 0x374   :  { %4313 = vrcp.f32 %v6708_v16  ;;  %vm1850_vm12 = vweird.f32 %v6708_v16 }
 0x375   :  { %1970 = vmatmul.f32.vlgmr.msra.gmra.mxu1 %v1840_v42  ;;  %1990 = vmatmul.f32.vlgmr.msra.gmra.mxu3 %v1840_v42 }
 0x376   :  { %2010 = vmatmul.f32.vlgmr.msra.gmra.mxu0 %v1840_v42  ;;  %2030 = vmatmul.f32.vlgmr.msra.gmra.mxu2 %v1840_v42  ;;  %v9679_v42 = vld [vmem:[#allocation36_spill] sm:$0xff] }
 0x377   :  { %v4310_v12 = vpop.eup %4309  ;;  %2298 = vmatpush.msra.mxu1 %v6034_v7  ;;  %2318 = vmatpush.msra.mxu3 %v6040_v21  ;;  %v1575_v7 = vperm.slane %v6662_v26, 6 }
 0x378   :  { %v4312_v5 = vpop.eup %4311  ;;  %v6712_v25 = vadd.f32 1.0, %v4310_v12  ;;  %2338 = vmatpush.msra.mxu0 %v6047_v23  ;;  %2358 = vmatpush.msra.mxu2 %v6053_v1  ;;  %v9680_v12 = vld [vmem:[#allocation34_spill] sm:$0xff] }
 0x379   :  { %v6714_v46 = vadd.f32 1.0, %v4312_v5  ;;  %2299 = vmatpush.msra.mxu1 %v6059_v24  ;;  %2319 = vmatpush.msra.mxu3 %v6065_v50  ;;  %v1608_v21 = vsel %vm1257_vm4, %v1575_v7, %v1592_v57  ;;  %v9683_v57 = vld [vmem:[#allocation40_spill] sm:$0xff]  ;;  %v9685_v7 = vld [vmem:[#allocation27_spill] sm:$0xff] }
 0x37a   :  { %v6716_v19 = vpop.eup %4313  ;;  %4315 = vrcp.f32 %v6712_v25  ;;  %2339 = vmatpush.msra.mxu0 %v6073_v39  ;;  %2359 = vmatpush.msra.mxu2 %v6079_v30  ;;  %v1776_v24 = vadd.f32 %v1751_v13, %v1608_v21  ;;  %vm1869_vm0 = vweird.f32 %v6712_v25  ;;  %v9686_v13 = vld [vmem:[#allocation45_spill] sm:$0xff]  ;;  %v9687_v21 = vld [vmem:[#allocation44_spill] sm:$0xff] }
 0x37b   :  { %v1846_v59 = vmul.f32 %v6716_v19, %v6708_v16  ;;  %4317 = vrcp.f32 %v6714_v46  ;;  %2300 = vmatpush.msra.mxu1 %v6085_v47  ;;  %2320 = vmatpush.msra.mxu3 %v6091_v32  ;;  %vm1851_vm11 = vweird.f32 %v6716_v19  ;;  %v1856_v47 = vand.u32 2147483648, %v6708_v16 }
 0x37c   :  { %2340 = vmatpush.msra.mxu0 %v6100_v34  ;;  %2360 = vmatpush.msra.mxu2 %v6106_v63  ;;  %v1854_v34 = vand.u32 2147483647, %v6708_v16  ;;  %vm6756_vm13 = vmor %vm1850_vm12, %vm1851_vm11  ;;  %4319 = vtanh.f32 %v1776_v24  ;;  %v1895_v33 = vand.u32 2147483648, %v6714_v46  ;;  %vm1889_vm5 = vweird.f32 %v6714_v46  ;;  %v9675_v16 = vld [vmem:[#allocation32_spill] sm:$0xff]  ;;  %v9690_v24 = vld [vmem:[#allocation49_spill] sm:$0xff] }
 0x37d   :  { %v1847_v36 = vsub.f32 1.0, %v1846_v59  ;;  %2301 = vmatpush.msra.mxu1 %v6114_v37  ;;  %2321 = vmatpush.msra.mxu3 %v6120_v52  ;;  %v1875_v52 = vand.u32 2147483648, %v6712_v25  ;;  %v1893_v10 = vand.u32 2147483647, %v6714_v46  ;;  %v9698_v37 = vld [vmem:[#allocation39_spill] sm:$0xff] }
 0x37e   :  { %2341 = vmatpush.msra.mxu0 %v6130_v41  ;;  %2361 = vmatpush.msra.mxu2 %v6136_v11  ;;  %vm1855_vm15 = vcmp.eq.f32.partialorder %v1854_v34, 8.507059e+37  ;;  %v1896_v55 = vor.u32 1.1754944e-38, %v1895_v33  ;;  %v9696_v34 = vld [vmem:[#allocation56_spill] sm:$0xff]  ;;  %v9724_v33 = vld [vmem:[#allocation77_spill] sm:$0xff] }
 0x37f   :  { %v1848_v23 = vmul.f32 %v6716_v19, %v1847_v36  ;;  %2302 = vmatpush.msra.mxu1 %v6145_v43  ;;  %2322 = vmatpush.msra.mxu3 %v6151_v44  ;;  %v1873_v43 = vand.u32 2147483647, %v6712_v25  ;;  %v1857_v44 = vor.u32 1.1754944e-38, %v1856_v47  ;;  %vm1894_vm7 = vcmp.eq.f32.partialorder %v1893_v10, 8.507059e+37  ;;  %v9684_v36 = vld [vmem:[#allocation38_spill] sm:$0xff]  ;;  %v9694_v47 = vld [vmem:[#allocation53_spill] sm:$0xff] }
 0x380   :  { %v4316_v1 = vpop.eup %4315  ;;  %2342 = vmatpush.msra.mxu0 %v6159_v49  ;;  %2362 = vmatpush.msra.mxu2 %v6165_v56  ;;  %v9727_v10 = vld [vmem:[#allocation80_spill] sm:$0xff] }
 0x381   :  { %v6740_v50 = vpop.eup %4317  ;;  %v1849_v39 = vadd.f32 %v6716_v19, %v1848_v23  ;;  %v1865_v30 = vmul.f32 %v4316_v1, %v6712_v25  ;;  %2303 = vmatpush.msra.mxu1 %v6178_v51  ;;  %2323 = vmatpush.msra.mxu3 %v6184_v53  ;;  %vm1870_vm14 = vweird.f32 %v4316_v1  ;;  %v1876_v53 = vor.u32 1.1754944e-38, %v1875_v52  ;;  %v9688_v23 = vld [vmem:[#allocation42_spill] sm:$0xff]  ;;  %v9699_v52 = vld [vmem:[#allocation59_spill] sm:$0xff] }
 0x382   :  { %v1885_v32 = vmul.f32 %v6740_v50, %v6714_v46  ;;  %2343 = vmatpush.msra.mxu0 %v6196_v60  ;;  %2363 = vmatpush.msra.mxu2 %v6202_v61  ;;  %vm1871_vm1 = vmor %vm1869_vm0, %vm1870_vm14  ;;  %vm1874_vm2 = vcmp.eq.f32.partialorder %v1873_v43, 8.507059e+37  ;;  %v4320_v61 = vpop.eup %4319  ;;  %vm1890_vm3 = vweird.f32 %v6740_v50  ;;  %v9681_v46 = vld [vmem:[#allocation23_spill] sm:$0xff] }
 0x383   :  { %v1866_v63 = vsub.f32 1.0, %v1865_v30  ;;  %v1853_v41 = vsel %vm6756_vm13, %v6716_v19, %v1849_v39  ;;  %2304 = vmatpush.msra.mxu1 %v6208_v2  ;;  %2324 = vmatpush.msra.mxu3 %v6214_v4  ;;  %vm1891_vm6 = vmor %vm1889_vm5, %vm1890_vm3  ;;  %v9682_v19 = vld [vmem:[#allocation41_spill] sm:$0xff]  ;;  %v9692_v39 = vld [vmem:[#allocation52_spill] sm:$0xff] }
 0x384   :  { %v1886_v49 = vsub.f32 1.0, %v1885_v32  ;;  %2344 = vmatpush.msra.mxu0 %v6222_v9  ;;  %2364 = vmatpush.msra.mxu2 %v6228_v8  ;;  %v1858_v51 = vsel %vm1855_vm15, %v1857_v44, %v1853_v41  ;;  %v9660_v8 = vld [vmem:[#allocation21_spill] sm:$0xff]  ;;  %v9693_v30 = vld [vmem:[#allocation46_spill] sm:$0xff]  ;;  %v9695_v32 = vld [vmem:[#allocation35_spill] sm:$0xff] }
 0x385   :  { %v1867_v11 = vmul.f32 %v4316_v1, %v1866_v63  ;;  %2305 = vmatpush.msra.mxu1 %v6236_v31  ;;  %2325 = vmatpush.msra.mxu3 %v6242_v35  ;;  %v1900_v9 = vmul.f32 %v4320_v61, %v1858_v51  ;;  %v9661_v31 = vld [vmem:[#allocation17_spill] sm:$0xff]  ;;  %v9697_v63 = vld [vmem:[#allocation50_spill] sm:$0xff]  ;;  %v9700_v41 = vld [vmem:[#allocation55_spill] sm:$0xff] }
 0x386   :  { %2345 = vmatpush.msra.mxu0 %v6249_v15  ;;  %2365 = vmatpush.msra.mxu2 %v6255_v14  ;;  %v1887_v4 = vmul.f32 %v6740_v50, %v1886_v49  ;;  %v9662_v35 = vld [vmem:[#allocation13_spill] sm:$0xff]  ;;  %v9664_v15 = vld [vmem:[#allocation16_spill] sm:$0xff]  ;;  %v9702_v43 = vld [vmem:[#allocation43_spill] sm:$0xff] }
 0x387   :  { %v1868_v56 = vadd.f32 %v4316_v1, %v1867_v11  ;;  %2306 = vmatpush.msra.mxu1 %v6262_v20  ;;  %2326 = vmatpush.msra.mxu3 %v6268_v62  ;;  %v9667_v62 = vld [vmem:[#allocation19_spill] sm:$0xff]  ;;  %v9701_v11 = vld [vmem:[#allocation60_spill] sm:$0xff]  ;;  %v9703_v44 = vld [vmem:[#allocation62_spill] sm:$0xff] }
 0x388   :  { %2346 = vmatpush.msra.mxu0 %v9661_v31  ;;  %2366 = vmatpush.msra.mxu2 %v9662_v35  ;;  %v1888_v20 = vadd.f32 %v6740_v50, %v1887_v4  ;;  %v9704_v49 = vld [vmem:[#allocation58_spill] sm:$0xff]  ;;  %v9706_v51 = vld [vmem:[#allocation47_spill] sm:$0xff]  ;;  %v9715_v31 = vld [vmem:[#allocation68_spill] sm:$0xff] }
 0x389   :  { %v1872_v60 = vsel %vm1871_vm1, %v4316_v1, %v1868_v56  ;;  %2307 = vmatpush.msra.mxu1 %v9663_v54  ;;  %2327 = vmatpush.msra.mxu3 %v9664_v15  ;;  %v9689_v1 = vld [vmem:[#allocation31_spill] sm:$0xff]  ;;  %v9716_v35 = vld [vmem:[#allocation70_spill] sm:$0xff]  ;;  %v9717_v54 = vld [vmem:[#allocation69_spill] sm:$0xff] }
 0x38a   :  { %v1877_v2 = vsel %vm1874_vm2, %v1876_v53, %v1872_v60  ;;  %2347 = vmatpush.msra.mxu0 %v9665_v0  ;;  %2367 = vmatpush.msra.mxu2 %v9666_v18  ;;  %v1892_v45 = vsel %vm1891_vm6, %v6740_v50, %v1888_v20  ;;  %v9691_v50 = vld [vmem:[#allocation48_spill] sm:$0xff]  ;;  %v9705_v56 = vld [vmem:[#allocation63_spill] sm:$0xff]  ;;  %v9707_v53 = vld [vmem:[#allocation61_spill] sm:$0xff] }
 0x38b   :  { %v1899_v26 = vmul.f32 %v1877_v2, %v9660_v8  ;;  %2308 = vmatpush.msra.mxu1 %v9667_v62  ;;  %2328 = vmatpush.msra.mxu3 %v9668_v22  ;;  %v1897_v25 = vsel %vm1894_vm7, %v1896_v55, %v1892_v45  ;;  %v9708_v60 = vld [vmem:[#allocation65_spill] sm:$0xff]  ;;  %v9709_v61 = vld [vmem:[#allocation51_spill] sm:$0xff]  ;;  %v9710_v2 = vld [vmem:[#allocation64_spill] sm:$0xff] }
 0x38c   :  { %2348 = vmatpush.msra.mxu0 %v9669_v58  ;;  %2368 = vmatpush.msra.mxu2 %v9670_v3  ;;  %v9711_v4 = vld [vmem:[#allocation67_spill] sm:$0xff]  ;;  %v9713_v8 = vld [vmem:[#allocation66_spill] sm:$0xff]  ;;  %v9718_v15 = vld [vmem:[#allocation72_spill] sm:$0xff] }
 0x38d   :  { %v6786_v14 = vadd.f32 %v1900_v9, %v1899_v26  ;;  %2309 = vmatpush.msra.mxu1 %v9671_v29  ;;  %2329 = vmatpush.msra.mxu3 %v9672_v38  ;;  %v9712_v9 = vld [vmem:[#allocation54_spill] sm:$0xff]  ;;  %v9714_v26 = vld [vmem:[#allocation57_spill] sm:$0xff]  ;;  %v9719_v0 = vld [vmem:[#allocation71_spill] sm:$0xff] }
 0x38e   :  { %2349 = vmatpush.msra.mxu0 %v9673_v6  ;;  %2369 = vmatpush.msra.mxu2 %v9674_v28  ;;  %v9720_v18 = vld [vmem:[#allocation73_spill] sm:$0xff]  ;;  %v9721_v20 = vld [vmem:[#allocation74_spill] sm:$0xff]  ;;  %v9722_v62 = vld [vmem:[#allocation75_spill] sm:$0xff] }
 0x38f   :  { %4321 = vtanh.f32 %v6786_v14  ;;  %2310 = vmatpush.msra.mxu1 %v9675_v16  ;;  %2330 = vmatpush.msra.mxu3 %v9676_v48  ;;  %v9723_v22 = vld [vmem:[#allocation76_spill] sm:$0xff]  ;;  %v9725_v58 = vld [vmem:[#allocation78_spill] sm:$0xff]  ;;  %v9726_v3 = vld [vmem:[#allocation79_spill] sm:$0xff] }
 0x390   :  { %2350 = vmatpush.msra.mxu0 %v9677_v27  ;;  %2370 = vmatpush.msra.mxu2 %v9678_v40  ;;  %v9728_v29 = vld [vmem:[#allocation81_spill] sm:$0xff]  ;;  %v9729_v38 = vld [vmem:[#allocation82_spill] sm:$0xff]  ;;  %v9730_v6 = vld [vmem:[#allocation83_spill] sm:$0xff] }
 0x391   :  { %2311 = vmatpush.msra.mxu1 %v9679_v42  ;;  %2331 = vmatpush.msra.mxu3 %v9680_v12  ;;  %v9731_v28 = vld [vmem:[#allocation84_spill] sm:$0xff]  ;;  %v9732_v45 = vld [vmem:[#allocation85_spill] sm:$0xff]  ;;  %v9733_v16 = vld [vmem:[#allocation86_spill] sm:$0xff] }
 0x392   :  { %2351 = vmatpush.msra.mxu0 %v9681_v46  ;;  %2371 = vmatpush.msra.mxu2 %v9682_v19  ;;  %v9734_v48 = vld [vmem:[#allocation87_spill] sm:$0xff]  ;;  %v9735_v55 = vld [vmem:[#allocation88_spill] sm:$0xff]  ;;  %v9736_v27 = vld [vmem:[#allocation89_spill] sm:$0xff] }
 0x393   :  { %2312 = vmatpush.msra.mxu1 %v9683_v57  ;;  %2332 = vmatpush.msra.mxu3 %v9684_v36  ;;  %v9737_v40 = vld [vmem:[#allocation90_spill] sm:$0xff]  ;;  %v9738_v42 = vld [vmem:[#allocation91_spill] sm:$0xff]  ;;  %v9739_v12 = vld [vmem:[#allocation92_spill] sm:$0xff] }
 0x394   :  { %2352 = vmatpush.msra.mxu0 %v9685_v7  ;;  %2372 = vmatpush.msra.mxu2 %v9686_v13  ;;  %v9742_v46 = vld [vmem:[#allocation95_spill] sm:$0xff]  ;;  %v9743_v19 = vld [vmem:[#allocation96_spill] sm:$0xff]  ;;  %v9745_v57 = vld [vmem:[#allocation98_spill] sm:$0xff] }
 0x395   :  { %v4322_v5 = vpop.eup %4321  ;;  %2313 = vmatpush.msra.mxu1 %v9687_v21  ;;  %2333 = vmatpush.msra.mxu3 %v9688_v23  ;;  %v9746_v36 = vld [vmem:[#allocation99_spill] sm:$0xff]  ;;  %v9747_v7 = vld [vmem:[#allocation100_spill] sm:$0xff]  ;;  %v9748_v13 = vld [vmem:[#allocation101_spill] sm:$0xff] }
 0x396   :  { %v1903_v59 = vmul.f32 %v4322_v5, %v1897_v25  ;;  %2353 = vmatpush.msra.mxu0 %v9689_v1  ;;  %2373 = vmatpush.msra.mxu2 %v9690_v24  ;;  %v9740_v5 = vld [vmem:[#allocation93_spill] sm:$0xff]  ;;  %v9741_v25 = vld [vmem:[#allocation94_spill] sm:$0xff]  ;;  %v9750_v23 = vld [vmem:[#allocation103_spill] sm:$0xff] }
 0x397   :  { %v9749_v21 = vld [vmem:[#allocation102_spill] sm:$0xff]  ;;  %v9751_v1 = vld [vmem:[#allocation104_spill] sm:$0xff]  ;;  %v9752_v24 = vld [vmem:[#allocation105_spill] sm:$0xff] }
 0x398   :  { %2054 = vmatmul.f32.vlgmr.msrb.gmra.mxu1 %v1903_v59  ;;  %2074 = vmatmul.f32.vlgmr.msrb.gmra.mxu3 %v1903_v59 }
 0x399   :  { %2094 = vmatmul.f32.vlgmr.msrb.gmra.mxu0 %v1903_v59  ;;  %2114 = vmatmul.f32.vlgmr.msrb.gmra.mxu2 %v1903_v59  ;;  %v9744_v59 = vld [vmem:[#allocation97_spill] sm:$0xff] }
 0x39a   :  { %2382 = vmatpush.msrb.mxu1 %v9691_v50  ;;  %2402 = vmatpush.msrb.mxu3 %v9692_v39  ;;  %v9753_v50 = vld [vmem:[#allocation106_spill] sm:$0xff]  ;;  %v9754_v39 = vld [vmem:[#allocation107_spill] sm:$0xff] }
 0x39b   :  { %2422 = vmatpush.msrb.mxu0 %v9693_v30  ;;  %2442 = vmatpush.msrb.mxu2 %v9694_v47  ;;  %v1910_v30 = vld [vmem:[#allocation2 + $0x42] ss:$8 sm:$0xf0] }
 0x39c   :  { %2383 = vmatpush.msrb.mxu1 %v9695_v32  ;;  %2403 = vmatpush.msrb.mxu3 %v9696_v34  ;;  %v1909_v47 = vld [vmem:[#allocation2 + $0x42] ss:$8 sm:$0xf] }
 0x39d   :  { %2423 = vmatpush.msrb.mxu0 %v9697_v63  ;;  %2443 = vmatpush.msrb.mxu2 %v9698_v37  ;;  %v1906_v32 = vld [vmem:[#allocation2 + $0x2] ss:$8 sm:$0xf0]  ;;  %v6885_v34 = vor.u32 %v1910_v30, %v1909_v47 }
 0x39e   :  { %2384 = vmatpush.msrb.mxu1 %v9699_v52  ;;  %2404 = vmatpush.msrb.mxu3 %v9700_v41  ;;  %v1905_v63 = vld [vmem:[#allocation2 + $0x2] ss:$8 sm:$0xf] }
 0x39f   :  { %2424 = vmatpush.msrb.mxu0 %v9701_v11  ;;  %2444 = vmatpush.msrb.mxu2 %v9702_v43  ;;  %v6887_v37 = vor.u32 %v1906_v32, %v1905_v63  ;;  %v1930_v52 = vperm.slane %v6885_v34, 0  ;;  %v1935_v30 = vperm.slane %v6885_v34, 5  ;;  %v1937_v63 = vperm.slane %v6885_v34, 7 }
 0x3a0   :  { %2385 = vmatpush.msrb.mxu1 %v9703_v44  ;;  %2405 = vmatpush.msrb.mxu3 %v9704_v49  ;;  %v1931_v49 = vperm.slane %v6885_v34, 1 }
 0x3a1   :  { %2425 = vmatpush.msrb.mxu0 %v9705_v56  ;;  %2445 = vmatpush.msrb.mxu2 %v9706_v51  ;;  %v1913_v41 = vperm.slane %v6887_v37, 0  ;;  %v1933_v51 = vperm.slane %v6885_v34, 3 }
 0x3a2   :  { %2386 = vmatpush.msrb.mxu1 %v9707_v53  ;;  %2406 = vmatpush.msrb.mxu3 %v9708_v60  ;;  %v1914_v53 = vperm.slane %v6887_v37, 1  ;;  %v1916_v60 = vperm.slane %v6887_v37, 3 }
 0x3a3   :  { %2426 = vmatpush.msrb.mxu0 %v9709_v61  ;;  %2446 = vmatpush.msrb.mxu2 %v9710_v2  ;;  %v1946_v11 = vsel %vm1257_vm4, %v1913_v41, %v1930_v52 }
 0x3a4   :  { %2387 = vmatpush.msrb.mxu1 %v9711_v4  ;;  %2407 = vmatpush.msrb.mxu3 %v9712_v9  ;;  %v1947_v61 = vsel %vm1257_vm4, %v1914_v53, %v1931_v49  ;;  %v1949_v9 = vsel %vm1257_vm4, %v1916_v60, %v1933_v51  ;;  %v1920_v49 = vperm.slane %v6887_v37, 7 }
 0x3a5   :  { %2427 = vmatpush.msrb.mxu0 %v9713_v8  ;;  %2447 = vmatpush.msrb.mxu2 %v9714_v26 }
 0x3a6   :  { %2388 = vmatpush.msrb.mxu1 %v9715_v31  ;;  %2408 = vmatpush.msrb.mxu3 %v9716_v35 }
 0x3a7   :  { %2428 = vmatpush.msrb.mxu0 %v9717_v54  ;;  %2448 = vmatpush.msrb.mxu2 %v9718_v15 }
 0x3a8   :  { %2389 = vmatpush.msrb.mxu1 %v9719_v0  ;;  %2409 = vmatpush.msrb.mxu3 %v9720_v18 }
 0x3a9   :  { %2429 = vmatpush.msrb.mxu0 %v9721_v20  ;;  %2449 = vmatpush.msrb.mxu2 %v9722_v62 }
 0x3aa   :  { %2390 = vmatpush.msrb.mxu1 %v9723_v22  ;;  %2410 = vmatpush.msrb.mxu3 %v9724_v33 }
 0x3ab   :  { %2430 = vmatpush.msrb.mxu0 %v9725_v58  ;;  %2450 = vmatpush.msrb.mxu2 %v9726_v3  ;;  %v1932_v58 = vperm.slane %v6885_v34, 2 }
 0x3ac   :  { %2391 = vmatpush.msrb.mxu1 %v9727_v10  ;;  %2411 = vmatpush.msrb.mxu3 %v9728_v29  ;;  %v1915_v10 = vperm.slane %v6887_v37, 2 }
 0x3ad   :  { %2431 = vmatpush.msrb.mxu0 %v9729_v38  ;;  %2451 = vmatpush.msrb.mxu2 %v9730_v6 }
 0x3ae   :  { %2392 = vmatpush.msrb.mxu1 %v9731_v28  ;;  %2412 = vmatpush.msrb.mxu3 %v9732_v45  ;;  %v1948_v38 = vsel %vm1257_vm4, %v1915_v10, %v1932_v58 }
 0x3af   :  { %2432 = vmatpush.msrb.mxu0 %v9733_v16  ;;  %2452 = vmatpush.msrb.mxu2 %v9734_v48 }
 0x3b0   :  { %2393 = vmatpush.msrb.mxu1 %v9735_v55  ;;  %2413 = vmatpush.msrb.mxu3 %v9736_v27 }
 0x3b1   :  { %2433 = vmatpush.msrb.mxu0 %v9737_v40  ;;  %2453 = vmatpush.msrb.mxu2 %v9738_v42  ;;  %v1934_v42 = vperm.slane %v6885_v34, 4 }
 0x3b2   :  { %2394 = vmatpush.msrb.mxu1 %v9739_v12  ;;  %2414 = vmatpush.msrb.mxu3 %v9740_v5 }
 0x3b3   :  { %2434 = vmatpush.msrb.mxu0 %v9741_v25  ;;  %2454 = vmatpush.msrb.mxu2 %v9742_v46  ;;  %v7000_v25 = vld [vmem:[%s9080_s7 + $0x1a0] sm:$0xff] }
 0x3b4   :  { %2395 = vmatpush.msrb.mxu1 %v9743_v19  ;;  %2415 = vmatpush.msrb.mxu3 %v9744_v59  ;;  %v1917_v19 = vperm.slane %v6887_v37, 4 }
 0x3b5   :  { %2435 = vmatpush.msrb.mxu0 %v9745_v57  ;;  %2455 = vmatpush.msrb.mxu2 %v9746_v36 }
 0x3b6   :  { %2396 = vmatpush.msrb.mxu1 %v9747_v7  ;;  %2416 = vmatpush.msrb.mxu3 %v9748_v13 }
 0x3b7   :  { %2436 = vmatpush.msrb.mxu0 %v9749_v21  ;;  %2456 = vmatpush.msrb.mxu2 %v9750_v23  ;;  %v1950_v21 = vsel %vm1257_vm4, %v1917_v19, %v1934_v42 }
 0x3b8   :  { %2397 = vmatpush.msrb.mxu1 %v9751_v1  ;;  %2417 = vmatpush.msrb.mxu3 %v9752_v24 }
 0x3b9   :  { %2437 = vmatpush.msrb.mxu0 %v9753_v50  ;;  %2457 = vmatpush.msrb.mxu2 %v9754_v39 }
 0x3f2   :  { %v1971_v43 = vpop.f32.mrf.mxu1 }
 0x3f3   :  { %v2034_v44 = vadd.f32 %v1971_v43, %v1946_v11  ;;  %v2011_v29 = vpop.f32.mrf.mxu0  ;;  %v1918_v11 = vperm.slane %v6887_v37, 5 }
 0x3f4   :  { %v2036_v45 = vadd.f32 %v2011_v29, %v1948_v38  ;;  %v6947_v38 = vld [vmem:[%s9080_s7 + $0x1e0] sm:$0xff] }
 0x3f5   :  { %v4210_v56 = vmul.f32 -1.442695, %v2034_v44  ;;  %v1951_v51 = vsel %vm1257_vm4, %v1918_v11, %v1935_v30  ;;  %v7075_v11 = vld [vmem:[%s9080_s7 + $0x170] sm:$0xff] }
 0x3f7   :  { %4323 = vpow2.f32 %v4210_v56 }
 0x3f8   :  { %v1991_v2 = vpop.f32.mrf.mxu3 }
 0x3f9   :  { %v2035_v4 = vadd.f32 %v1991_v2, %v1947_v61  ;;  %v2031_v8 = vpop.f32.mrf.mxu2  ;;  %v1953_v61 = vsel %vm1257_vm4, %v1920_v49, %v1937_v63  ;;  %v7067_v63 = vld [vmem:[%s9080_s7 + $0x168] sm:$0xff] }
 0x3fa   :  { %v2037_v26 = vadd.f32 %v2031_v8, %v1949_v9 }
 0x3fb   :  { %v4211_v31 = vmul.f32 -1.442695, %v2035_v4 }
 0x3fc   :  { %v4212_v35 = vmul.f32 -1.442695, %v2037_v26 }
 0x3fd   :  { %v4324_v54 = vpop.eup %4323  ;;  %4325 = vpow2.f32 %v4211_v31 }
 0x3fe   :  { %v2125_v15 = vadd.f32 1.0, %v4324_v54  ;;  %4327 = vpow2.f32 %v4212_v35 }
 0x400   :  { %4329 = vrcp.f32 %v2125_v15  ;;  %v2137_v27 = vand.u32 2147483648, %v2125_v15  ;;  %vm2131_vm9 = vweird.f32 %v2125_v15  ;;  %v2135_v12 = vand.u32 2147483647, %v2125_v15 }
 0x402   :  { %v2138_v7 = vor.u32 1.1754944e-38, %v2137_v27  ;;  %vm2136_vm12 = vcmp.eq.f32.partialorder %v2135_v12, 8.507059e+37  ;;  %v6988_v12 = vld [vmem:[%s9080_s7 + $0x1d0] sm:$0xff] }
 0x403   :  { %v4326_v0 = vpop.eup %4325 }
 0x404   :  { %v4328_v18 = vpop.eup %4327  ;;  %v2144_v20 = vadd.f32 1.0, %v4326_v0 }
 0x405   :  { %v6898_v62 = vadd.f32 1.0, %v4328_v18 }
 0x406   :  { %v4330_v22 = vpop.eup %4329  ;;  %4331 = vrcp.f32 %v2144_v20  ;;  %v2156_v46 = vand.u32 2147483648, %v2144_v20  ;;  %v2154_v36 = vand.u32 2147483647, %v2144_v20  ;;  %vm2150_vm13 = vweird.f32 %v2144_v20 }
 0x407   :  { %v2127_v33 = vmul.f32 %v4330_v22, %v2125_v15  ;;  %4333 = vrcp.f32 %v6898_v62  ;;  %vm2132_vm8 = vweird.f32 %v4330_v22  ;;  %v2176_v31 = vand.u32 2147483648, %v6898_v62 }
 0x408   :  { %vm6909_vm10 = vmor %vm2131_vm9, %vm2132_vm8  ;;  %4335 = vtanh.f32 %v2036_v45  ;;  %v2157_v39 = vor.u32 1.1754944e-38, %v2156_v46  ;;  %vm2155_vm15 = vcmp.eq.f32.partialorder %v2154_v36, 8.507059e+37  ;;  %vm2170_vm1 = vweird.f32 %v6898_v62 }
 0x409   :  { %v2128_v3 = vsub.f32 1.0, %v2127_v33  ;;  %v2174_v35 = vand.u32 2147483647, %v6898_v62  ;;  %v2177_v18 = vor.u32 1.1754944e-38, %v2176_v31  ;;  %v1936_v45 = vperm.slane %v6885_v34, 6  ;;  %v6975_v34 = vld [vmem:[%s9080_s7 + $0x1c0] sm:$0xff] }
 0x40a   :  { %v7124_v31 = vld [vmem:[%s9080_s7 + $0x120] sm:$0xff] }
 0x40b   :  { %v2129_v6 = vmul.f32 %v4330_v22, %v2128_v3  ;;  %vm2175_vm3 = vcmp.eq.f32.partialorder %v2174_v35, 8.507059e+37 }
 0x40c   :  { %v4332_v28 = vpop.eup %4331 }
 0x40d   :  { %v6904_v16 = vpop.eup %4333  ;;  %v2130_v48 = vadd.f32 %v4330_v22, %v2129_v6  ;;  %v2146_v55 = vmul.f32 %v4332_v28, %v2144_v20  ;;  %vm2151_vm11 = vweird.f32 %v4332_v28  ;;  %v6953_v6 = vld [vmem:[%s9080_s7 + $0x1e8] sm:$0xff] }
 0x40e   :  { %v2166_v40 = vmul.f32 %v6904_v16, %v6898_v62  ;;  %vm2152_vm14 = vmor %vm2150_vm13, %vm2151_vm11  ;;  %v4336_v52 = vpop.eup %4335  ;;  %vm2171_vm0 = vweird.f32 %v6904_v16 }
 0x40f   :  { %v2147_v5 = vsub.f32 1.0, %v2146_v55  ;;  %v2134_v59 = vsel %vm6909_vm10, %v4330_v22, %v2130_v48  ;;  %vm2172_vm2 = vmor %vm2170_vm1, %vm2171_vm0  ;;  %v6969_v48 = vld [vmem:[%s9080_s7 + $0x1f8] sm:$0xff]  ;;  %v6981_v55 = vld [vmem:[%s9080_s7 + $0x1c8] sm:$0xff] }
 0x410   :  { %v2167_v13 = vsub.f32 1.0, %v2166_v40  ;;  %v2139_v50 = vsel %vm2136_vm12, %v2138_v7, %v2134_v59  ;;  %v1919_v40 = vperm.slane %v6887_v37, 6  ;;  %v7006_v37 = vld [vmem:[%s9080_s7 + $0x1a8] sm:$0xff]  ;;  %v7014_v59 = vld [vmem:[%s9080_s7 + $0x1b0] sm:$0xff] }
 0x411   :  { %v2148_v57 = vmul.f32 %v4332_v28, %v2147_v5  ;;  %v2181_v44 = vmul.f32 %v4336_v52, %v2139_v50  ;;  %v6994_v5 = vld [vmem:[%s9080_s7 + $0x1d8] sm:$0xff]  ;;  %v7046_v50 = vld [vmem:[%s9080_s7 + $0x190] sm:$0xff] }
 0x412   :  { %v2168_v43 = vmul.f32 %v6904_v16, %v2167_v13  ;;  %v1952_v46 = vsel %vm1257_vm4, %v1919_v40, %v1936_v45  ;;  %v7028_v13 = vld [vmem:[%s9080_s7 + $0x180] sm:$0xff] }
 0x413   :  { %v2149_v1 = vadd.f32 %v4332_v28, %v2148_v57  ;;  %v7020_v57 = vld [vmem:[%s9080_s7 + $0x1b8] sm:$0xff]  ;;  %v7178_v45 = vld [vmem:[%s9080_s7 + $0xe0] sm:$0xff] }
 0x414   :  { %v2169_v8 = vadd.f32 %v6904_v16, %v2168_v43  ;;  %v7081_v43 = vld [vmem:[%s9080_s7 + $0x178] sm:$0xff] }
 0x415   :  { %v2055_v23 = vpop.f32.mrf.mxu1  ;;  %v2153_v47 = vsel %vm2152_vm14, %v4332_v28, %v2149_v1 }
 0x416   :  { %v2118_v24 = vadd.f32 %v2055_v23, %v1950_v21  ;;  %v2158_v41 = vsel %vm2155_vm15, %v2157_v39, %v2153_v47  ;;  %v2173_v0 = vsel %vm2172_vm2, %v6904_v16, %v2169_v8  ;;  %v6963_v16 = vld [vmem:[%s9080_s7 + $0x1f0] sm:$0xff]  ;;  %v2095_v42 = vpop.f32.mrf.mxu0  ;;  %v7034_v21 = vld [vmem:[%s9080_s7 + $0x188] sm:$0xff]  ;;  %v7052_v39 = vld [vmem:[%s9080_s7 + $0x198] sm:$0xff] }
 0x417   :  { %v2180_v56 = vmul.f32 %v2158_v41, %v6700_v17  ;;  %v2178_v22 = vsel %vm2175_vm3, %v2177_v18, %v2173_v0  ;;  %v2120_v7 = vadd.f32 %v2095_v42, %v1952_v46  ;;  %v7191_v46 = vld [vmem:[%s9080_s7 + $0xf0] sm:$0xff] }
 0x418   :  { %v4213_v32 = vmul.f32 -1.442695, %v2118_v24  ;;  %9759 = vst [vmem:[#allocation21_spill] sm:$0xff] %v7191_v46 }
 0x419   :  { %v6925_v4 = vadd.f32 %v2181_v44, %v2180_v56  ;;  %v7094_v56 = vld [vmem:[%s9080_s7 + $0x140] sm:$0xff]  ;;  %v7245_v44 = vld [vmem:[%s9080_s7 + $0xb0] sm:$0xff] }
 0x41a   :  { %4337 = vpow2.f32 %v4213_v32  ;;  %v7061_v32 = vld [vmem:[%s9080_s7 + $0x160] sm:$0xff]  ;;  %9768 = vst [vmem:[#allocation22_spill] sm:$0xff] %v7245_v44 }
 0x41b   :  { %v2075_v53 = vpop.f32.mrf.mxu3  ;;  %4339 = vtanh.f32 %v6925_v4 }
 0x41c   :  { %v2119_v60 = vadd.f32 %v2075_v53, %v1951_v51  ;;  %v2115_v2 = vpop.f32.mrf.mxu2  ;;  %v7100_v51 = vld [vmem:[%s9080_s7 + $0x148] sm:$0xff] }
 0x41d   :  { %v2121_v9 = vadd.f32 %v2115_v2, %v1953_v61  ;;  %v7112_v2 = vld [vmem:[%s9080_s7 + $0x150] sm:$0xff] }
 0x41e   :  { %v4214_v26 = vmul.f32 -1.442695, %v2119_v60 }
 0x41f   :  { %v4215_v17 = vmul.f32 -1.442695, %v2121_v9  ;;  %v7118_v9 = vld [vmem:[%s9080_s7 + $0x158] sm:$0xff] }
 0x420   :  { %v4338_v54 = vpop.eup %4337  ;;  %4341 = vpow2.f32 %v4214_v26 }
 0x421   :  { %v6933_v15 = vadd.f32 1.0, %v4338_v54  ;;  %4343 = vpow2.f32 %v4215_v17  ;;  %v4340_v20 = vpop.eup %4339  ;;  %v7130_v17 = vld [vmem:[%s9080_s7 + $0x128] sm:$0xff]  ;;  %v7138_v54 = vld [vmem:[%s9080_s7 + $0x130] sm:$0xff] }
 0x422   :  { %v2184_v33 = vmul.f32 %v4340_v20, %v2178_v22  ;;  %v7152_v20 = vld [vmem:[%s9080_s7 + $0x100] sm:$0xff]  ;;  %v7158_v22 = vld [vmem:[%s9080_s7 + $0x108] sm:$0xff] }
 0x423   :  { %4345 = vrcp.f32 %v6933_v15  ;;  %v2200_v30 = vand.u32 2147483648, %v6933_v15  ;;  %vm2194_vm6 = vweird.f32 %v6933_v15  ;;  %v2198_v52 = vand.u32 2147483647, %v6933_v15 }
 0x424   :  { %2314 = vmatmul.f32.vlgmr.msra.gmra.mxu1 %v2184_v33  ;;  %2334 = vmatmul.f32.vlgmr.msra.gmra.mxu3 %v2184_v33 }
 0x425   :  { %2354 = vmatmul.f32.vlgmr.msra.gmra.mxu0 %v2184_v33  ;;  %2374 = vmatmul.f32.vlgmr.msra.gmra.mxu2 %v2184_v33  ;;  %v2201_v8 = vor.u32 1.1754944e-38, %v2200_v30  ;;  %vm2199_vm9 = vcmp.eq.f32.partialorder %v2198_v52, 8.507059e+37  ;;  %v7237_v52 = vld [vmem:[%s9080_s7 + $0xa8] sm:$0xff] }
 0x426   :  { %v4342_v58 = vpop.eup %4341  ;;  %2642 = vmatpush.msra.mxu1 %v6947_v38  ;;  %2662 = vmatpush.msra.mxu3 %v6953_v6  ;;  %9767 = vst [vmem:[#allocation25_spill] sm:$0xff] %v7237_v52 }
 0x427   :  { %v4344_v3 = vpop.eup %4343  ;;  %v6937_v10 = vadd.f32 1.0, %v4342_v58  ;;  %2682 = vmatpush.msra.mxu0 %v6963_v16  ;;  %2702 = vmatpush.msra.mxu2 %v6969_v48  ;;  %v7165_v58 = vld [vmem:[%s9080_s7 + $0x110] sm:$0xff] }
 0x428   :  { %v6939_v62 = vadd.f32 1.0, %v4344_v3  ;;  %2643 = vmatpush.msra.mxu1 %v6975_v34  ;;  %2663 = vmatpush.msra.mxu3 %v6981_v55  ;;  %v7171_v3 = vld [vmem:[%s9080_s7 + $0x118] sm:$0xff] }
 0x429   :  { %v6941_v29 = vpop.eup %4345  ;;  %4347 = vrcp.f32 %v6937_v10  ;;  %2683 = vmatpush.msra.mxu0 %v6988_v12  ;;  %2703 = vmatpush.msra.mxu2 %v6994_v5  ;;  %v2219_v49 = vand.u32 2147483648, %v6937_v10  ;;  %v2217_v61 = vand.u32 2147483647, %v6937_v10  ;;  %vm2213_vm10 = vweird.f32 %v6937_v10 }
 0x42a   :  { %v2190_v28 = vmul.f32 %v6941_v29, %v6933_v15  ;;  %4349 = vrcp.f32 %v6939_v62  ;;  %2644 = vmatpush.msra.mxu1 %v7000_v25  ;;  %2664 = vmatpush.msra.mxu3 %v7006_v37  ;;  %vm2195_vm5 = vweird.f32 %v6941_v29  ;;  %v7144_v15 = vld [vmem:[%s9080_s7 + $0x138] sm:$0xff]  ;;  %vm2233_vm14 = vweird.f32 %v6939_v62 }
 0x42b   :  { %2684 = vmatpush.msra.mxu0 %v7014_v59  ;;  %2704 = vmatpush.msra.mxu2 %v7020_v57  ;;  %vm7086_vm7 = vmor %vm2194_vm6, %vm2195_vm5  ;;  %4351 = vtanh.f32 %v2120_v7  ;;  %v2220_v18 = vor.u32 1.1754944e-38, %v2219_v49  ;;  %vm2218_vm12 = vcmp.eq.f32.partialorder %v2217_v61, 8.507059e+37  ;;  %v7251_v49 = vld [vmem:[%s9080_s7 + $0xb8] sm:$0xff]  ;;  %v7265_v61 = vld [vmem:[%s9080_s7 + $0x88] sm:$0xff] }
 0x42c   :  { %v2191_v27 = vsub.f32 1.0, %v2190_v28  ;;  %2645 = vmatpush.msra.mxu1 %v7028_v13  ;;  %2665 = vmatpush.msra.mxu3 %v7034_v21  ;;  %9769 = vst [vmem:[#allocation29_spill] sm:$0xff] %v7251_v49 }
 0x42d   :  { %2685 = vmatpush.msra.mxu0 %v7046_v50  ;;  %2705 = vmatpush.msra.mxu2 %v7052_v39  ;;  %9771 = vst [vmem:[#allocation26_spill] sm:$0xff] %v7265_v61 }
 0x42e   :  { %v2192_v19 = vmul.f32 %v6941_v29, %v2191_v27  ;;  %2646 = vmatpush.msra.mxu1 %v7061_v32  ;;  %2666 = vmatpush.msra.mxu3 %v7067_v63  ;;  %v7184_v27 = vld [vmem:[%s9080_s7 + $0xe8] sm:$0xff] }
 0x42f   :  { %v7023_v36 = vpop.eup %4347  ;;  %2686 = vmatpush.msra.mxu0 %v7075_v11  ;;  %2706 = vmatpush.msra.mxu2 %v7081_v43 }
 0x430   :  { %v7037_v23 = vpop.eup %4349  ;;  %v2193_v1 = vadd.f32 %v6941_v29, %v2192_v19  ;;  %v2209_v24 = vmul.f32 %v7023_v36, %v6937_v10  ;;  %2647 = vmatpush.msra.mxu1 %v7094_v56  ;;  %2667 = vmatpush.msra.mxu3 %v7100_v51  ;;  %vm2214_vm8 = vweird.f32 %v7023_v36  ;;  %v7197_v19 = vld [vmem:[%s9080_s7 + $0xf8] sm:$0xff] }
 0x431   :  { %v2229_v47 = vmul.f32 %v7037_v23, %v6939_v62  ;;  %2687 = vmatpush.msra.mxu0 %v7112_v2  ;;  %2707 = vmatpush.msra.mxu2 %v7118_v9  ;;  %vm2215_vm11 = vmor %vm2213_vm10, %vm2214_vm8  ;;  %v4352_v10 = vpop.eup %4351  ;;  %9760 = vst [vmem:[#allocation17_spill] sm:$0xff] %v7197_v19  ;;  %vm2234_vm13 = vweird.f32 %v7037_v23 }
 0x432   :  { %v2210_v41 = vsub.f32 1.0, %v2209_v24  ;;  %v2197_v53 = vsel %vm7086_vm7, %v6941_v29, %v2193_v1  ;;  %2648 = vmatpush.msra.mxu1 %v7124_v31  ;;  %2668 = vmatpush.msra.mxu3 %v7130_v17  ;;  %v7217_v1 = vld [vmem:[%s9080_s7 + $0xd0] sm:$0xff]  ;;  %v7223_v24 = vld [vmem:[%s9080_s7 + $0xd8] sm:$0xff]  ;;  %vm7270_vm15 = vmor %vm2233_vm14, %vm2234_vm13 }
 0x433   :  { %v2230_v26 = vsub.f32 1.0, %v2229_v47  ;;  %2688 = vmatpush.msra.mxu0 %v7138_v54  ;;  %2708 = vmatpush.msra.mxu2 %v7144_v15  ;;  %v2202_v0 = vsel %vm2199_vm9, %v2201_v8, %v2197_v53  ;;  %9764 = vst [vmem:[#allocation14_spill] sm:$0xff] %v7217_v1  ;;  %v7231_v47 = vld [vmem:[%s9080_s7 + $0xa0] sm:$0xff]  ;;  %v2237_v53 = vand.u32 2147483647, %v6939_v62 }
 0x434   :  { %v2211_v60 = vmul.f32 %v7023_v36, %v2210_v41  ;;  %2649 = vmatpush.msra.mxu1 %v7152_v20  ;;  %2669 = vmatpush.msra.mxu3 %v7158_v22  ;;  %v2244_v40 = vmul.f32 %v4352_v10, %v2202_v0  ;;  %9765 = vst [vmem:[#allocation24_spill] sm:$0xff] %v7223_v24  ;;  %v2239_v41 = vand.u32 2147483648, %v6939_v62  ;;  %v7277_v62 = vld [vmem:[%s9080_s7 + $0x90] sm:$0xff]  ;;  %v7292_v0 = vld [vmem:[%s9080_s7 + $0x60] sm:$0xff] }
 0x435   :  { %2689 = vmatpush.msra.mxu0 %v7165_v58  ;;  %2709 = vmatpush.msra.mxu2 %v7171_v3  ;;  %v2231_v28 = vmul.f32 %v7037_v23, %v2230_v26  ;;  %9766 = vst [vmem:[#allocation19_spill] sm:$0xff] %v7231_v47  ;;  %v7283_v26 = vld [vmem:[%s9080_s7 + $0x98] sm:$0xff]  ;;  %v7304_v10 = vld [vmem:[%s9080_s7 + $0x70] sm:$0xff]  ;;  %vm2238_vm0 = vcmp.eq.f32.partialorder %v2237_v53, 8.507059e+37  ;;  %v7340_v8 = vld [vmem:[%s9080_s7 + $0x20] sm:$0xff] }
 0x436   :  { %v2212_v35 = vadd.f32 %v7023_v36, %v2211_v60  ;;  %2650 = vmatpush.msra.mxu1 %v7178_v45  ;;  %2670 = vmatpush.msra.mxu3 %v7184_v27  ;;  %v7259_v60 = vld [vmem:[%s9080_s7 + $0x80] sm:$0xff]  ;;  %9774 = vst [vmem:[#allocation15_spill] sm:$0xff] %v7277_v62 }
 0x437   :  { %2690 = vmatpush.msra.mxu0 %v7191_v46  ;;  %2710 = vmatpush.msra.mxu2 %v7197_v19  ;;  %v2232_v30 = vadd.f32 %v7037_v23, %v2231_v28  ;;  %9770 = vst [vmem:[#allocation28_spill] sm:$0xff] %v7259_v60  ;;  %v7322_v28 = vld [vmem:[%s9080_s7 + $0x48] sm:$0xff] }
 0x438   :  { %v2216_v33 = vsel %vm2215_vm11, %v7023_v36, %v2212_v35  ;;  %v7203_v36 = vld [vmem:[%s9080_s7 + $0xc0] sm:$0xff]  ;;  %9775 = vst [vmem:[#allocation33_spill] sm:$0xff] %v7283_v26 }
 0x439   :  { %v2221_v29 = vsel %vm2218_vm12, %v2220_v18, %v2216_v33  ;;  %9761 = vst [vmem:[#allocation13_spill] sm:$0xff] %v7203_v36  ;;  %2651 = vmatpush.msra.mxu1 %v7203_v36  ;;  %2691 = vmatpush.msra.mxu0 %v7217_v1  ;;  %v2236_v35 = vsel %vm7270_vm15, %v7037_v23, %v2232_v30  ;;  %v7298_v18 = vld [vmem:[%s9080_s7 + $0x68] sm:$0xff]  ;;  %v2240_v33 = vor.u32 1.1754944e-38, %v2239_v41  ;;  %v7310_v23 = vld [vmem:[%s9080_s7 + $0x78] sm:$0xff]  ;;  %v7328_v30 = vld [vmem:[%s9080_s7 + $0x50] sm:$0xff] }
 0x43a   :  { %v2243_v42 = vmul.f32 %v2221_v29, %v6786_v14  ;;  %v7209_v14 = vld [vmem:[%s9080_s7 + $0xc8] sm:$0xff]  ;;  %2711 = vmatpush.msra.mxu2 %v7223_v24  ;;  %9776 = vst [vmem:[#allocation32_spill] sm:$0xff] %v7292_v0  ;;  %v7316_v29 = vld [vmem:[%s9080_s7 + $0x40] sm:$0xff]  ;;  %v7334_v41 = vld [vmem:[%s9080_s7 + $0x58] sm:$0xff] }
 0x43b   :  { %9762 = vst [vmem:[#allocation20_spill] sm:$0xff] %v7209_v14  ;;  %2671 = vmatpush.msra.mxu3 %v7209_v14  ;;  %2652 = vmatpush.msra.mxu1 %v7231_v47 }
 0x43c   :  { %v7212_v7 = vadd.f32 %v2244_v40, %v2243_v42  ;;  %2692 = vmatpush.msra.mxu0 %v7245_v44  ;;  %2712 = vmatpush.msra.mxu2 %v7251_v49  ;;  %9777 = vst [vmem:[#allocation30_spill] sm:$0xff] %v7298_v18  ;;  %v2241_v42 = vsel %vm2238_vm0, %v2240_v33, %v2236_v35  ;;  %v7346_v35 = vld [vmem:[%s9080_s7 + $0x28] sm:$0xff]  ;;  %v7352_v33 = vld [vmem:[%s9080_s7 + $0x30] sm:$0xff] }
 0x43d   :  { %2672 = vmatpush.msra.mxu3 %v7237_v52  ;;  %2653 = vmatpush.msra.mxu1 %v7259_v60  ;;  %9778 = vst [vmem:[#allocation18_spill] sm:$0xff] %v7304_v10 }
 0x43e   :  { %9763 = vst [vmem:[#allocation16_spill] sm:$0xff] %v7212_v7  ;;  %4353 = vtanh.f32 %v7212_v7  ;;  %2693 = vmatpush.msra.mxu0 %v7277_v62  ;;  %2713 = vmatpush.msra.mxu2 %v7283_v26 }
 0x43f   :  { %2673 = vmatpush.msra.mxu3 %v7265_v61  ;;  %2654 = vmatpush.msra.mxu1 %v7292_v0  ;;  %9779 = vst [vmem:[#allocation37_spill] sm:$0xff] %v7310_v23 }
 0x440   :  { %2694 = vmatpush.msra.mxu0 %v7304_v10  ;;  %2714 = vmatpush.msra.mxu2 %v7310_v23  ;;  %9780 = vst [vmem:[#allocation36_spill] sm:$0xff] %v7316_v29 }
 0x441   :  { %2674 = vmatpush.msra.mxu3 %v7298_v18  ;;  %2655 = vmatpush.msra.mxu1 %v7316_v29  ;;  %9781 = vst [vmem:[#allocation34_spill] sm:$0xff] %v7322_v28 }
 0x442   :  { %9782 = vst [vmem:[#allocation23_spill] sm:$0xff] %v7328_v30  ;;  %2695 = vmatpush.msra.mxu0 %v7328_v30  ;;  %2715 = vmatpush.msra.mxu2 %v7334_v41  ;;  %v2250_v30 = vld [vmem:[#allocation2 + $0x3] ss:$8 sm:$0xf0] }
 0x443   :  { %2675 = vmatpush.msra.mxu3 %v7322_v28  ;;  %9783 = vst [vmem:[#allocation41_spill] sm:$0xff] %v7334_v41  ;;  %2656 = vmatpush.msra.mxu1 %v7340_v8  ;;  %v2253_v41 = vld [vmem:[#allocation2 + $0x43] ss:$8 sm:$0xf] }
 0x444   :  { %v4354_v40 = vpop.eup %4353  ;;  %9784 = vst [vmem:[#allocation40_spill] sm:$0xff] %v7340_v8  ;;  %2696 = vmatpush.msra.mxu0 %v7352_v33  ;;  %v7397_v8 = vld [vmem:[#allocation8 + $0x1c0] sm:$0xff] }
 0x445   :  { %v2247_v53 = vmul.f32 %v4354_v40, %v2241_v42  ;;  %9785 = vst [vmem:[#allocation38_spill] sm:$0xff] %v7346_v35  ;;  %2676 = vmatpush.msra.mxu3 %v7346_v35  ;;  %v7358_v40 = vld [vmem:[%s9080_s7 + $0x38] sm:$0xff]  ;;  %v7364_v42 = vld [vmem:[%s9080_s7] sm:$0xff]  ;;  %v7388_v35 = vld [vmem:[#allocation8 + $0x1e8] sm:$0xff] }
 0x446   :  { %9786 = vst [vmem:[#allocation27_spill] sm:$0xff] %v7352_v33  ;;  %2716 = vmatpush.msra.mxu2 %v7358_v40  ;;  %2657 = vmatpush.msra.mxu1 %v7364_v42  ;;  %v7370_v33 = vld [vmem:[%s9080_s7 + $0x8] sm:$0xff] }
 0x447   :  { %9787 = vst [vmem:[#allocation45_spill] sm:$0xff] %v7358_v40  ;;  %2398 = vmatmul.f32.vlgmr.msrb.gmra.mxu1 %v2247_v53  ;;  %2418 = vmatmul.f32.vlgmr.msrb.gmra.mxu3 %v2247_v53  ;;  %v7376_v40 = vld [vmem:[%s9080_s7 + $0x10] sm:$0xff] }
 0x448   :  { %2438 = vmatmul.f32.vlgmr.msrb.gmra.mxu0 %v2247_v53  ;;  %2458 = vmatmul.f32.vlgmr.msrb.gmra.mxu2 %v2247_v53  ;;  %9788 = vst [vmem:[#allocation44_spill] sm:$0xff] %v7364_v42  ;;  %v7382_v53 = vld [vmem:[%s9080_s7 + $0x18] sm:$0xff]  ;;  %v7385_v42 = vld [vmem:[#allocation8 + $0x1e0] sm:$0xff] }
 0x449   :  { %9789 = vst [vmem:[#allocation42_spill] sm:$0xff] %v7370_v33  ;;  %2677 = vmatpush.msra.mxu3 %v7370_v33  ;;  %2697 = vmatpush.msra.mxu0 %v7376_v40  ;;  %v7391_v33 = vld [vmem:[#allocation8 + $0x1f0] sm:$0xff] }
 0x44a   :  { %9790 = vst [vmem:[#allocation31_spill] sm:$0xff] %v7376_v40  ;;  %2717 = vmatpush.msra.mxu2 %v7382_v53  ;;  %2726 = vmatpush.msrb.mxu1 %v7385_v42  ;;  %v7394_v40 = vld [vmem:[#allocation8 + $0x1f8] sm:$0xff] }
 0x44b   :  { %9791 = vst [vmem:[#allocation49_spill] sm:$0xff] %v7382_v53  ;;  %2746 = vmatpush.msrb.mxu3 %v7388_v35  ;;  %2766 = vmatpush.msrb.mxu0 %v7391_v33  ;;  %v7400_v53 = vld [vmem:[#allocation8 + $0x1c8] sm:$0xff] }
 0x44c   :  { %9792 = vst [vmem:[#allocation48_spill] sm:$0xff] %v7385_v42  ;;  %2786 = vmatpush.msrb.mxu2 %v7394_v40  ;;  %2727 = vmatpush.msrb.mxu1 %v7397_v8  ;;  %v7403_v42 = vld [vmem:[#allocation8 + $0x1d0] sm:$0xff] }
 0x44d   :  { %9793 = vst [vmem:[#allocation52_spill] sm:$0xff] %v7388_v35  ;;  %2747 = vmatpush.msrb.mxu3 %v7400_v53  ;;  %2767 = vmatpush.msrb.mxu0 %v7403_v42  ;;  %v7406_v35 = vld [vmem:[#allocation8 + $0x1d8] sm:$0xff] }
 0x44e   :  { %9794 = vst [vmem:[#allocation46_spill] sm:$0xff] %v7391_v33  ;;  %2787 = vmatpush.msrb.mxu2 %v7406_v35  ;;  %v7409_v33 = vld [vmem:[#allocation8 + $0x1a0] sm:$0xff] }
 0x44f   :  { %9795 = vst [vmem:[#allocation53_spill] sm:$0xff] %v7394_v40  ;;  %2728 = vmatpush.msrb.mxu1 %v7409_v33  ;;  %v7412_v40 = vld [vmem:[#allocation8 + $0x1a8] sm:$0xff] }
 0x450   :  { %9796 = vst [vmem:[#allocation35_spill] sm:$0xff] %v7397_v8  ;;  %2748 = vmatpush.msrb.mxu3 %v7412_v40  ;;  %v7415_v8 = vld [vmem:[#allocation8 + $0x1b0] sm:$0xff] }
 0x451   :  { %9797 = vst [vmem:[#allocation56_spill] sm:$0xff] %v7400_v53  ;;  %2768 = vmatpush.msrb.mxu0 %v7415_v8  ;;  %v7418_v53 = vld [vmem:[#allocation8 + $0x1b8] sm:$0xff] }
 0x452   :  { %9798 = vst [vmem:[#allocation50_spill] sm:$0xff] %v7403_v42  ;;  %2788 = vmatpush.msrb.mxu2 %v7418_v53  ;;  %v7421_v42 = vld [vmem:[#allocation8 + $0x180] sm:$0xff] }
 0x453   :  { %9799 = vst [vmem:[#allocation39_spill] sm:$0xff] %v7406_v35  ;;  %2729 = vmatpush.msrb.mxu1 %v7421_v42  ;;  %v7424_v35 = vld [vmem:[#allocation8 + $0x188] sm:$0xff] }
 0x454   :  { %9800 = vst [vmem:[#allocation59_spill] sm:$0xff] %v7409_v33  ;;  %2749 = vmatpush.msrb.mxu3 %v7424_v35  ;;  %v7427_v33 = vld [vmem:[#allocation8 + $0x190] sm:$0xff] }
 0x455   :  { %9801 = vst [vmem:[#allocation55_spill] sm:$0xff] %v7412_v40  ;;  %2769 = vmatpush.msrb.mxu0 %v7427_v33  ;;  %v7430_v40 = vld [vmem:[#allocation8 + $0x198] sm:$0xff] }
 0x456   :  { %9802 = vst [vmem:[#allocation60_spill] sm:$0xff] %v7415_v8  ;;  %2789 = vmatpush.msrb.mxu2 %v7430_v40  ;;  %v7433_v8 = vld [vmem:[#allocation8 + $0x160] sm:$0xff] }
 0x457   :  { %9803 = vst [vmem:[#allocation43_spill] sm:$0xff] %v7418_v53  ;;  %2730 = vmatpush.msrb.mxu1 %v7433_v8  ;;  %v7436_v53 = vld [vmem:[#allocation8 + $0x168] sm:$0xff] }
 0x458   :  { %9804 = vst [vmem:[#allocation62_spill] sm:$0xff] %v7421_v42  ;;  %2750 = vmatpush.msrb.mxu3 %v7436_v53  ;;  %v7439_v42 = vld [vmem:[#allocation8 + $0x170] sm:$0xff] }
 0x459   :  { %9805 = vst [vmem:[#allocation58_spill] sm:$0xff] %v7424_v35  ;;  %2770 = vmatpush.msrb.mxu0 %v7439_v42  ;;  %v7442_v35 = vld [vmem:[#allocation8 + $0x178] sm:$0xff] }
 0x45a   :  { %9806 = vst [vmem:[#allocation63_spill] sm:$0xff] %v7427_v33  ;;  %2790 = vmatpush.msrb.mxu2 %v7442_v35  ;;  %v7445_v33 = vld [vmem:[#allocation8 + $0x140] sm:$0xff] }
 0x45b   :  { %9807 = vst [vmem:[#allocation47_spill] sm:$0xff] %v7430_v40  ;;  %2731 = vmatpush.msrb.mxu1 %v7445_v33  ;;  %v7448_v40 = vld [vmem:[#allocation8 + $0x148] sm:$0xff] }
 0x45c   :  { %9808 = vst [vmem:[#allocation61_spill] sm:$0xff] %v7433_v8  ;;  %2751 = vmatpush.msrb.mxu3 %v7448_v40  ;;  %v7451_v8 = vld [vmem:[#allocation8 + $0x150] sm:$0xff] }
 0x45d   :  { %9809 = vst [vmem:[#allocation65_spill] sm:$0xff] %v7436_v53  ;;  %2771 = vmatpush.msrb.mxu0 %v7451_v8  ;;  %v7454_v53 = vld [vmem:[#allocation8 + $0x158] sm:$0xff] }
 0x45e   :  { %9810 = vst [vmem:[#allocation51_spill] sm:$0xff] %v7439_v42  ;;  %2791 = vmatpush.msrb.mxu2 %v7454_v53  ;;  %v7457_v42 = vld [vmem:[#allocation8 + $0x120] sm:$0xff] }
 0x45f   :  { %9811 = vst [vmem:[#allocation64_spill] sm:$0xff] %v7442_v35  ;;  %2732 = vmatpush.msrb.mxu1 %v7457_v42  ;;  %v7460_v35 = vld [vmem:[#allocation8 + $0x128] sm:$0xff] }
 0x460   :  { %9812 = vst [vmem:[#allocation67_spill] sm:$0xff] %v7445_v33  ;;  %2752 = vmatpush.msrb.mxu3 %v7460_v35  ;;  %v7463_v33 = vld [vmem:[#allocation8 + $0x130] sm:$0xff] }
 0x461   :  { %9813 = vst [vmem:[#allocation54_spill] sm:$0xff] %v7448_v40  ;;  %2772 = vmatpush.msrb.mxu0 %v7463_v33  ;;  %v7466_v40 = vld [vmem:[#allocation8 + $0x138] sm:$0xff] }
 0x462   :  { %9814 = vst [vmem:[#allocation66_spill] sm:$0xff] %v7451_v8  ;;  %2792 = vmatpush.msrb.mxu2 %v7466_v40  ;;  %v7469_v8 = vld [vmem:[#allocation8 + $0x100] sm:$0xff] }
 0x463   :  { %9815 = vst [vmem:[#allocation57_spill] sm:$0xff] %v7454_v53  ;;  %2733 = vmatpush.msrb.mxu1 %v7469_v8  ;;  %v7472_v53 = vld [vmem:[#allocation8 + $0x108] sm:$0xff] }
 0x464   :  { %9816 = vst [vmem:[#allocation68_spill] sm:$0xff] %v7457_v42  ;;  %2753 = vmatpush.msrb.mxu3 %v7472_v53  ;;  %v7475_v42 = vld [vmem:[#allocation8 + $0x110] sm:$0xff] }
 0x465   :  { %9817 = vst [vmem:[#allocation70_spill] sm:$0xff] %v7460_v35  ;;  %2773 = vmatpush.msrb.mxu0 %v7475_v42  ;;  %v7478_v35 = vld [vmem:[#allocation8 + $0x118] sm:$0xff] }
 0x466   :  { %9818 = vst [vmem:[#allocation69_spill] sm:$0xff] %v7463_v33  ;;  %2793 = vmatpush.msrb.mxu2 %v7478_v35  ;;  %v7481_v33 = vld [vmem:[#allocation8 + $0xe0] sm:$0xff] }
 0x467   :  { %9819 = vst [vmem:[#allocation72_spill] sm:$0xff] %v7466_v40  ;;  %2734 = vmatpush.msrb.mxu1 %v7481_v33  ;;  %v7484_v40 = vld [vmem:[#allocation8 + $0xe8] sm:$0xff] }
 0x468   :  { %9820 = vst [vmem:[#allocation71_spill] sm:$0xff] %v7469_v8  ;;  %2754 = vmatpush.msrb.mxu3 %v7484_v40  ;;  %v7487_v8 = vld [vmem:[#allocation8 + $0xf0] sm:$0xff] }
 0x469   :  { %9821 = vst [vmem:[#allocation73_spill] sm:$0xff] %v7472_v53  ;;  %2774 = vmatpush.msrb.mxu0 %v7487_v8  ;;  %v7490_v53 = vld [vmem:[#allocation8 + $0xf8] sm:$0xff] }
 0x46a   :  { %9822 = vst [vmem:[#allocation74_spill] sm:$0xff] %v7475_v42  ;;  %2794 = vmatpush.msrb.mxu2 %v7490_v53  ;;  %v7493_v42 = vld [vmem:[#allocation8 + $0xc0] sm:$0xff] }
 0x46b   :  { %9823 = vst [vmem:[#allocation75_spill] sm:$0xff] %v7478_v35  ;;  %2735 = vmatpush.msrb.mxu1 %v7493_v42  ;;  %v7496_v35 = vld [vmem:[#allocation8 + $0xc8] sm:$0xff] }
 0x46c   :  { %9824 = vst [vmem:[#allocation76_spill] sm:$0xff] %v7481_v33  ;;  %2755 = vmatpush.msrb.mxu3 %v7496_v35  ;;  %v7499_v33 = vld [vmem:[#allocation8 + $0xd0] sm:$0xff] }
 0x46d   :  { %9825 = vst [vmem:[#allocation77_spill] sm:$0xff] %v7484_v40  ;;  %2775 = vmatpush.msrb.mxu0 %v7499_v33  ;;  %v7502_v40 = vld [vmem:[#allocation8 + $0xd8] sm:$0xff] }
 0x46e   :  { %9826 = vst [vmem:[#allocation78_spill] sm:$0xff] %v7487_v8  ;;  %2795 = vmatpush.msrb.mxu2 %v7502_v40  ;;  %v7505_v8 = vld [vmem:[#allocation8 + $0xa0] sm:$0xff] }
 0x46f   :  { %9827 = vst [vmem:[#allocation79_spill] sm:$0xff] %v7490_v53  ;;  %2736 = vmatpush.msrb.mxu1 %v7505_v8  ;;  %v7508_v53 = vld [vmem:[#allocation8 + $0xa8] sm:$0xff] }
 0x470   :  { %9828 = vst [vmem:[#allocation80_spill] sm:$0xff] %v7493_v42  ;;  %2756 = vmatpush.msrb.mxu3 %v7508_v53  ;;  %v7511_v42 = vld [vmem:[#allocation8 + $0xb0] sm:$0xff] }
 0x471   :  { %9829 = vst [vmem:[#allocation81_spill] sm:$0xff] %v7496_v35  ;;  %2776 = vmatpush.msrb.mxu0 %v7511_v42  ;;  %v7514_v35 = vld [vmem:[#allocation8 + $0xb8] sm:$0xff] }
 0x472   :  { %9830 = vst [vmem:[#allocation82_spill] sm:$0xff] %v7499_v33  ;;  %2796 = vmatpush.msrb.mxu2 %v7514_v35  ;;  %v7517_v33 = vld [vmem:[#allocation8 + $0x80] sm:$0xff] }
 0x473   :  { %9831 = vst [vmem:[#allocation83_spill] sm:$0xff] %v7502_v40  ;;  %2737 = vmatpush.msrb.mxu1 %v7517_v33  ;;  %v7520_v40 = vld [vmem:[#allocation8 + $0x88] sm:$0xff] }
 0x474   :  { %9832 = vst [vmem:[#allocation84_spill] sm:$0xff] %v7505_v8  ;;  %2757 = vmatpush.msrb.mxu3 %v7520_v40  ;;  %v7523_v8 = vld [vmem:[#allocation8 + $0x90] sm:$0xff] }
 0x475   :  { %9833 = vst [vmem:[#allocation85_spill] sm:$0xff] %v7508_v53  ;;  %2777 = vmatpush.msrb.mxu0 %v7523_v8  ;;  %v7526_v53 = vld [vmem:[#allocation8 + $0x98] sm:$0xff] }
 0x476   :  { %9834 = vst [vmem:[#allocation86_spill] sm:$0xff] %v7511_v42  ;;  %2797 = vmatpush.msrb.mxu2 %v7526_v53  ;;  %v7529_v42 = vld [vmem:[#allocation8 + $0x60] sm:$0xff] }
 0x477   :  { %9835 = vst [vmem:[#allocation87_spill] sm:$0xff] %v7514_v35  ;;  %2738 = vmatpush.msrb.mxu1 %v7529_v42  ;;  %v7532_v35 = vld [vmem:[#allocation8 + $0x68] sm:$0xff] }
 0x478   :  { %9836 = vst [vmem:[#allocation88_spill] sm:$0xff] %v7517_v33  ;;  %2758 = vmatpush.msrb.mxu3 %v7532_v35  ;;  %v7535_v33 = vld [vmem:[#allocation8 + $0x70] sm:$0xff] }
 0x479   :  { %9837 = vst [vmem:[#allocation89_spill] sm:$0xff] %v7520_v40  ;;  %2778 = vmatpush.msrb.mxu0 %v7535_v33  ;;  %v7538_v40 = vld [vmem:[#allocation8 + $0x78] sm:$0xff] }
 0x47a   :  { %9838 = vst [vmem:[#allocation90_spill] sm:$0xff] %v7523_v8  ;;  %2798 = vmatpush.msrb.mxu2 %v7538_v40  ;;  %v7541_v8 = vld [vmem:[#allocation8 + $0x40] sm:$0xff] }
 0x47b   :  { %9839 = vst [vmem:[#allocation91_spill] sm:$0xff] %v7526_v53  ;;  %2739 = vmatpush.msrb.mxu1 %v7541_v8  ;;  %v7544_v53 = vld [vmem:[#allocation8 + $0x48] sm:$0xff] }
 0x47c   :  { %9840 = vst [vmem:[#allocation92_spill] sm:$0xff] %v7529_v42  ;;  %2759 = vmatpush.msrb.mxu3 %v7544_v53  ;;  %v7547_v42 = vld [vmem:[#allocation8 + $0x50] sm:$0xff] }
 0x47d   :  { %9841 = vst [vmem:[#allocation93_spill] sm:$0xff] %v7532_v35  ;;  %2779 = vmatpush.msrb.mxu0 %v7547_v42  ;;  %v7550_v35 = vld [vmem:[#allocation8 + $0x58] sm:$0xff] }
 0x47e   :  { %9842 = vst [vmem:[#allocation94_spill] sm:$0xff] %v7535_v33  ;;  %2799 = vmatpush.msrb.mxu2 %v7550_v35  ;;  %v7553_v33 = vld [vmem:[#allocation8 + $0x20] sm:$0xff] }
 0x47f   :  { %9843 = vst [vmem:[#allocation95_spill] sm:$0xff] %v7538_v40  ;;  %2740 = vmatpush.msrb.mxu1 %v7553_v33  ;;  %v7556_v40 = vld [vmem:[#allocation8 + $0x28] sm:$0xff] }
 0x480   :  { %9844 = vst [vmem:[#allocation96_spill] sm:$0xff] %v7541_v8  ;;  %2760 = vmatpush.msrb.mxu3 %v7556_v40  ;;  %v7559_v8 = vld [vmem:[#allocation8 + $0x30] sm:$0xff] }
 0x481   :  { %9845 = vst [vmem:[#allocation97_spill] sm:$0xff] %v7544_v53  ;;  %2780 = vmatpush.msrb.mxu0 %v7559_v8  ;;  %v7562_v53 = vld [vmem:[#allocation8 + $0x38] sm:$0xff] }
 0x482   :  { %9846 = vst [vmem:[#allocation98_spill] sm:$0xff] %v7547_v42  ;;  %2800 = vmatpush.msrb.mxu2 %v7562_v53  ;;  %v7565_v42 = vld [vmem:[#allocation8] sm:$0xff] }
 0x483   :  { %9847 = vst [vmem:[#allocation99_spill] sm:$0xff] %v7550_v35  ;;  %2741 = vmatpush.msrb.mxu1 %v7565_v42  ;;  %v7568_v35 = vld [vmem:[#allocation8 + $0x8] sm:$0xff] }
 0x484   :  { %9848 = vst [vmem:[#allocation100_spill] sm:$0xff] %v7553_v33  ;;  %2761 = vmatpush.msrb.mxu3 %v7568_v35  ;;  %v7571_v33 = vld [vmem:[#allocation8 + $0x10] sm:$0xff] }
 0x485   :  { %9849 = vst [vmem:[#allocation101_spill] sm:$0xff] %v7556_v40  ;;  %2781 = vmatpush.msrb.mxu0 %v7571_v33  ;;  %v7574_v40 = vld [vmem:[#allocation8 + $0x18] sm:$0xff] }
 0x486   :  { %9850 = vst [vmem:[#allocation102_spill] sm:$0xff] %v7559_v8  ;;  %2801 = vmatpush.msrb.mxu2 %v7574_v40  ;;  %v2254_v8 = vld [vmem:[#allocation2 + $0x43] ss:$8 sm:$0xf0] }
 0x487   :  { %9851 = vst [vmem:[#allocation103_spill] sm:$0xff] %v7562_v53  ;;  %v7577_v53 = vor.u32 %v2254_v8, %v2253_v41  ;;  %v2249_v28 = vld [vmem:[#allocation2 + $0x3] ss:$8 sm:$0xf] }
 0x488   :  { %9852 = vst [vmem:[#allocation104_spill] sm:$0xff] %v7565_v42  ;;  %v7579_v29 = vor.u32 %v2250_v30, %v2249_v28 }
 0x489   :  { %9853 = vst [vmem:[#allocation105_spill] sm:$0xff] %v7568_v35  ;;  %v2274_v42 = vperm.slane %v7577_v53, 0  ;;  %v2275_v18 = vperm.slane %v7577_v53, 1  ;;  %v2279_v46 = vperm.slane %v7577_v53, 5 }
 0x48a   :  { %9854 = vst [vmem:[#allocation106_spill] sm:$0xff] %v7571_v33  ;;  %v2257_v35 = vperm.slane %v7579_v29, 0  ;;  %v2258_v26 = vperm.slane %v7579_v29, 1  ;;  %v2260_v41 = vperm.slane %v7579_v29, 3 }
 0x48b   :  { %9855 = vst [vmem:[#allocation107_spill] sm:$0xff] %v7574_v40  ;;  %v2277_v40 = vperm.slane %v7577_v53, 3 }
 0x48c   :  { %v2290_v23 = vsel %vm1257_vm4, %v2257_v35, %v2274_v42  ;;  %v2291_v28 = vsel %vm1257_vm4, %v2258_v26, %v2275_v18  ;;  %v2276_v18 = vperm.slane %v7577_v53, 2 }
 0x48d   :  { %v2293_v62 = vsel %vm1257_vm4, %v2260_v41, %v2277_v40 }
 0x4a1   :  { %v2315_v10 = vpop.f32.mrf.mxu1 }
 0x4a2   :  { %v2378_v33 = vadd.f32 %v2315_v10, %v2290_v23  ;;  %v2355_v40 = vpop.f32.mrf.mxu0 }
 0x4a4   :  { %v4216_v0 = vmul.f32 -1.442695, %v2378_v33 }
 0x4a6   :  { %4355 = vpow2.f32 %v4216_v0 }
 0x4a7   :  { %v2335_v30 = vpop.f32.mrf.mxu3 }
 0x4a8   :  { %v2379_v8 = vadd.f32 %v2335_v30, %v2291_v28  ;;  %v2375_v61 = vpop.f32.mrf.mxu2 }
 0x4a9   :  { %v2381_v35 = vadd.f32 %v2375_v61, %v2293_v62  ;;  %v2259_v62 = vperm.slane %v7579_v29, 2 }
 0x4aa   :  { %v4217_v42 = vmul.f32 -1.442695, %v2379_v8 }
 0x4ab   :  { %v4218_v10 = vmul.f32 -1.442695, %v2381_v35  ;;  %v2292_v41 = vsel %vm1257_vm4, %v2259_v62, %v2276_v18 }
 0x4ac   :  { %v4356_v23 = vpop.eup %4355  ;;  %4357 = vpow2.f32 %v4217_v42  ;;  %v2380_v8 = vadd.f32 %v2355_v40, %v2292_v41 }
 0x4ad   :  { %v2469_v33 = vadd.f32 1.0, %v4356_v23  ;;  %4359 = vpow2.f32 %v4218_v10  ;;  %v2278_v23 = vperm.slane %v7577_v53, 4 }
 0x4af   :  { %4361 = vrcp.f32 %v2469_v33  ;;  %v2481_v42 = vand.u32 2147483648, %v2469_v33  ;;  %vm2475_vm2 = vweird.f32 %v2469_v33 }
 0x4b2   :  { %v4358_v60 = vpop.eup %4357 }
 0x4b3   :  { %v4360_v49 = vpop.eup %4359  ;;  %v2488_v0 = vadd.f32 1.0, %v4358_v60 }
 0x4b4   :  { %v7590_v44 = vadd.f32 1.0, %v4360_v49 }
 0x4b5   :  { %v4362_v52 = vpop.eup %4361  ;;  %4363 = vrcp.f32 %v2488_v0  ;;  %v2500_v18 = vand.u32 2147483648, %v2488_v0  ;;  %v2498_v41 = vand.u32 2147483647, %v2488_v0  ;;  %vm2494_vm7 = vweird.f32 %v2488_v0 }
 0x4b6   :  { %v2471_v26 = vmul.f32 %v4362_v52, %v2469_v33  ;;  %4365 = vrcp.f32 %v7590_v44  ;;  %vm2476_vm1 = vweird.f32 %v4362_v52  ;;  %vm2514_vm11 = vweird.f32 %v7590_v44 }
 0x4b7   :  { %vm7601_vm3 = vmor %vm2475_vm2, %vm2476_vm1  ;;  %4367 = vtanh.f32 %v2380_v8  ;;  %v2501_v8 = vor.u32 1.1754944e-38, %v2500_v18  ;;  %vm2499_vm9 = vcmp.eq.f32.partialorder %v2498_v41, 8.507059e+37 }
 0x4b8   :  { %v2472_v61 = vsub.f32 1.0, %v2471_v26  ;;  %v2479_v26 = vand.u32 2147483647, %v2469_v33 }
 0x4ba   :  { %v2473_v28 = vmul.f32 %v4362_v52, %v2472_v61  ;;  %v2261_v61 = vperm.slane %v7579_v29, 4  ;;  %vm2480_vm6 = vcmp.eq.f32.partialorder %v2479_v26, 8.507059e+37 }
 0x4bb   :  { %v4364_v30 = vpop.eup %4363 }
 0x4bc   :  { %v7596_v35 = vpop.eup %4365  ;;  %v2474_v49 = vadd.f32 %v4362_v52, %v2473_v28  ;;  %v2490_v60 = vmul.f32 %v4364_v30, %v2488_v0  ;;  %vm2495_vm5 = vweird.f32 %v4364_v30  ;;  %v2482_v28 = vor.u32 1.1754944e-38, %v2481_v42 }
 0x4bd   :  { %v2510_v10 = vmul.f32 %v7596_v35, %v7590_v44  ;;  %v2294_v14 = vsel %vm1257_vm4, %v2261_v61, %v2278_v23  ;;  %vm2496_vm8 = vmor %vm2494_vm7, %vm2495_vm5  ;;  %vm2515_vm10 = vweird.f32 %v7596_v35 }
 0x4be   :  { %v2491_v47 = vsub.f32 1.0, %v2490_v60  ;;  %v2478_v62 = vsel %vm7601_vm3, %v4362_v52, %v2474_v49  ;;  %v4368_v52 = vpop.eup %4367  ;;  %vm2516_vm12 = vmor %vm2514_vm11, %vm2515_vm10 }
 0x4bf   :  { %v2511_v1 = vsub.f32 1.0, %v2510_v10  ;;  %v2483_v19 = vsel %vm2480_vm6, %v2482_v28, %v2478_v62  ;;  %v2262_v10 = vperm.slane %v7579_v29, 5 }
 0x4c0   :  { %v2492_v40 = vmul.f32 %v4364_v30, %v2491_v47  ;;  %v2281_v47 = vperm.slane %v7577_v53, 7  ;;  %v2525_v23 = vmul.f32 %v4368_v52, %v2483_v19  ;;  %v2520_v19 = vand.u32 2147483648, %v7590_v44 }
 0x4c1   :  { %v2512_v42 = vmul.f32 %v7596_v35, %v2511_v1  ;;  %v2295_v26 = vsel %vm1257_vm4, %v2262_v10, %v2279_v46 }
 0x4c2   :  { %v2493_v60 = vadd.f32 %v4364_v30, %v2492_v40  ;;  %v2518_v40 = vand.u32 2147483647, %v7590_v44 }
 0x4c3   :  { %v2513_v1 = vadd.f32 %v7596_v35, %v2512_v42 }
 0x4c4   :  { %v2399_v33 = vpop.f32.mrf.mxu1  ;;  %v2497_v7 = vsel %vm2496_vm8, %v4364_v30, %v2493_v60  ;;  %v2521_v60 = vor.u32 1.1754944e-38, %v2520_v19  ;;  %vm2519_vm13 = vcmp.eq.f32.partialorder %v2518_v40, 8.507059e+37  ;;  %v9871_v19 = vld [vmem:[#allocation28_spill] sm:$0xff]  ;;  %v9874_v40 = vld [vmem:[#allocation33_spill] sm:$0xff] }
 0x4c5   :  { %v2462_v36 = vadd.f32 %v2399_v33, %v2294_v14  ;;  %v2502_v49 = vsel %vm2499_vm9, %v2501_v8, %v2497_v7  ;;  %v2264_v14 = vperm.slane %v7579_v29, 7  ;;  %v2517_v33 = vsel %vm2516_vm12, %v7596_v35, %v2513_v1 }
 0x4c6   :  { %v2524_v0 = vmul.f32 %v2502_v49, %v6925_v4 }
 0x4c7   :  { %v4219_v24 = vmul.f32 -1.442695, %v2462_v36  ;;  %v2297_v36 = vsel %vm1257_vm4, %v2264_v14, %v2281_v47  ;;  %v2439_v14 = vpop.f32.mrf.mxu0 }
 0x4c8   :  { %v7617_v62 = vadd.f32 %v2525_v23, %v2524_v0  ;;  %v2280_v23 = vperm.slane %v7577_v53, 6  ;;  %v9863_v53 = vld [vmem:[#allocation13_spill] sm:$0xff] }
 0x4c9   :  { %4369 = vpow2.f32 %v4219_v24  ;;  %v2522_v24 = vsel %vm2519_vm13, %v2521_v60, %v2517_v33  ;;  %v9876_v33 = vld [vmem:[#allocation30_spill] sm:$0xff] }
 0x4ca   :  { %v2419_v18 = vpop.f32.mrf.mxu3  ;;  %4371 = vtanh.f32 %v7617_v62 }
 0x4cb   :  { %v2463_v30 = vadd.f32 %v2419_v18, %v2295_v26  ;;  %v2459_v61 = vpop.f32.mrf.mxu2  ;;  %v9865_v26 = vld [vmem:[#allocation14_spill] sm:$0xff]  ;;  %v9866_v18 = vld [vmem:[#allocation24_spill] sm:$0xff] }
 0x4cc   :  { %v2465_v7 = vadd.f32 %v2459_v61, %v2297_v36  ;;  %v9869_v61 = vld [vmem:[#allocation22_spill] sm:$0xff] }
 0x4cd   :  { %v4220_v4 = vmul.f32 -1.442695, %v2463_v30  ;;  %v9868_v30 = vld [vmem:[#allocation25_spill] sm:$0xff] }
 0x4ce   :  { %v4221_v46 = vmul.f32 -1.442695, %v2465_v7  ;;  %v9870_v7 = vld [vmem:[#allocation29_spill] sm:$0xff] }
 0x4cf   :  { %v4370_v41 = vpop.eup %4369  ;;  %4373 = vpow2.f32 %v4220_v4  ;;  %v9872_v4 = vld [vmem:[#allocation26_spill] sm:$0xff] }
 0x4d0   :  { %v7625_v28 = vadd.f32 1.0, %v4370_v41  ;;  %4375 = vpow2.f32 %v4221_v46  ;;  %v4372_v8 = vpop.eup %4371  ;;  %v9873_v46 = vld [vmem:[#allocation15_spill] sm:$0xff] }
 0x4d1   :  { %v2528_v47 = vmul.f32 %v4372_v8, %v2522_v24  ;;  %v9877_v8 = vld [vmem:[#allocation18_spill] sm:$0xff]  ;;  %v9878_v24 = vld [vmem:[#allocation37_spill] sm:$0xff] }
 0x4d2   :  { %4377 = vrcp.f32 %v7625_v28  ;;  %vm2538_vm15 = vweird.f32 %v7625_v28 }
 0x4d3   :  { %2658 = vmatmul.f32.vlgmr.msra.gmra.mxu1 %v2528_v47  ;;  %2678 = vmatmul.f32.vlgmr.msra.gmra.mxu3 %v2528_v47 }
 0x4d4   :  { %2698 = vmatmul.f32.vlgmr.msra.gmra.mxu0 %v2528_v47  ;;  %2718 = vmatmul.f32.vlgmr.msra.gmra.mxu2 %v2528_v47  ;;  %v9879_v47 = vld [vmem:[#allocation36_spill] sm:$0xff] }
 0x4d5   :  { %v4374_v52 = vpop.eup %4373  ;;  %2986 = vmatpush.msra.mxu1 %v6947_v38  ;;  %3006 = vmatpush.msra.mxu3 %v6953_v6  ;;  %v2263_v38 = vperm.slane %v7579_v29, 6 }
 0x4d6   :  { %v4376_v49 = vpop.eup %4375  ;;  %v7629_v42 = vadd.f32 1.0, %v4374_v52  ;;  %3026 = vmatpush.msra.mxu0 %v6963_v16  ;;  %3046 = vmatpush.msra.mxu2 %v6969_v48  ;;  %v9880_v52 = vld [vmem:[#allocation34_spill] sm:$0xff] }
 0x4d7   :  { %v7631_v44 = vadd.f32 1.0, %v4376_v49  ;;  %2987 = vmatpush.msra.mxu1 %v6975_v34  ;;  %3007 = vmatpush.msra.mxu3 %v6981_v55  ;;  %v2296_v6 = vsel %vm1257_vm4, %v2263_v38, %v2280_v23  ;;  %v9883_v23 = vld [vmem:[#allocation40_spill] sm:$0xff]  ;;  %v9885_v38 = vld [vmem:[#allocation27_spill] sm:$0xff] }
 0x4d8   :  { %v7633_v10 = vpop.eup %4377  ;;  %4379 = vrcp.f32 %v7629_v42  ;;  %3027 = vmatpush.msra.mxu0 %v6988_v12  ;;  %3047 = vmatpush.msra.mxu2 %v6994_v5  ;;  %v2464_v34 = vadd.f32 %v2439_v14, %v2296_v6  ;;  %vm2557_vm3 = vweird.f32 %v7629_v42  ;;  %v9886_v14 = vld [vmem:[#allocation45_spill] sm:$0xff]  ;;  %v9887_v6 = vld [vmem:[#allocation44_spill] sm:$0xff] }
 0x4d9   :  { %v2534_v35 = vmul.f32 %v7633_v10, %v7625_v28  ;;  %4381 = vrcp.f32 %v7631_v44  ;;  %2988 = vmatpush.msra.mxu1 %v7000_v25  ;;  %3008 = vmatpush.msra.mxu3 %v7006_v37  ;;  %vm2539_vm14 = vweird.f32 %v7633_v10  ;;  %v2544_v25 = vand.u32 2147483648, %v7625_v28 }
 0x4da   :  { %3028 = vmatpush.msra.mxu0 %v7014_v59  ;;  %3048 = vmatpush.msra.mxu2 %v7020_v57  ;;  %v2542_v59 = vand.u32 2147483647, %v7625_v28  ;;  %vm7673_vm0 = vmor %vm2538_vm15, %vm2539_vm14  ;;  %4383 = vtanh.f32 %v2464_v34  ;;  %v2583_v36 = vand.u32 2147483648, %v7631_v44  ;;  %vm2577_vm8 = vweird.f32 %v7631_v44  ;;  %v9875_v28 = vld [vmem:[#allocation32_spill] sm:$0xff]  ;;  %v9890_v34 = vld [vmem:[#allocation49_spill] sm:$0xff] }
 0x4db   :  { %v2535_v0 = vsub.f32 1.0, %v2534_v35  ;;  %2989 = vmatpush.msra.mxu1 %v7028_v13  ;;  %3009 = vmatpush.msra.mxu3 %v7034_v21  ;;  %v2563_v21 = vand.u32 2147483648, %v7629_v42  ;;  %v2581_v1 = vand.u32 2147483647, %v7631_v44  ;;  %v9898_v13 = vld [vmem:[#allocation39_spill] sm:$0xff] }
 0x4dc   :  { %3029 = vmatpush.msra.mxu0 %v7046_v50  ;;  %3049 = vmatpush.msra.mxu2 %v7052_v39  ;;  %vm2543_vm2 = vcmp.eq.f32.partialorder %v2542_v59, 8.507059e+37  ;;  %v2584_v60 = vor.u32 1.1754944e-38, %v2583_v36  ;;  %v9896_v59 = vld [vmem:[#allocation56_spill] sm:$0xff]  ;;  %v9924_v36 = vld [vmem:[#allocation77_spill] sm:$0xff] }
 0x4dd   :  { %v2536_v16 = vmul.f32 %v7633_v10, %v2535_v0  ;;  %2990 = vmatpush.msra.mxu1 %v7061_v32  ;;  %3010 = vmatpush.msra.mxu3 %v7067_v63  ;;  %v2561_v32 = vand.u32 2147483647, %v7629_v42  ;;  %v2545_v63 = vor.u32 1.1754944e-38, %v2544_v25  ;;  %vm2582_vm10 = vcmp.eq.f32.partialorder %v2581_v1, 8.507059e+37  ;;  %v9884_v0 = vld [vmem:[#allocation38_spill] sm:$0xff]  ;;  %v9894_v25 = vld [vmem:[#allocation53_spill] sm:$0xff] }
 0x4de   :  { %v4380_v48 = vpop.eup %4379  ;;  %3030 = vmatpush.msra.mxu0 %v7075_v11  ;;  %3050 = vmatpush.msra.mxu2 %v7081_v43  ;;  %v9927_v1 = vld [vmem:[#allocation80_spill] sm:$0xff] }
 0x4df   :  { %v7657_v55 = vpop.eup %4381  ;;  %v2537_v12 = vadd.f32 %v7633_v10, %v2536_v16  ;;  %v2553_v5 = vmul.f32 %v4380_v48, %v7629_v42  ;;  %2991 = vmatpush.msra.mxu1 %v7094_v56  ;;  %3011 = vmatpush.msra.mxu3 %v7100_v51  ;;  %vm2558_vm1 = vweird.f32 %v4380_v48  ;;  %v2564_v51 = vor.u32 1.1754944e-38, %v2563_v21  ;;  %v9888_v16 = vld [vmem:[#allocation42_spill] sm:$0xff]  ;;  %v9899_v21 = vld [vmem:[#allocation59_spill] sm:$0xff] }
 0x4e0   :  { %v2573_v37 = vmul.f32 %v7657_v55, %v7631_v44  ;;  %3031 = vmatpush.msra.mxu0 %v7112_v2  ;;  %3051 = vmatpush.msra.mxu2 %v7118_v9  ;;  %vm2559_vm5 = vmor %vm2557_vm3, %vm2558_vm1  ;;  %vm2562_vm6 = vcmp.eq.f32.partialorder %v2561_v32, 8.507059e+37  ;;  %v4384_v9 = vpop.eup %4383  ;;  %vm2578_vm7 = vweird.f32 %v7657_v55  ;;  %v9881_v44 = vld [vmem:[#allocation23_spill] sm:$0xff] }
 0x4e1   :  { %v2554_v57 = vsub.f32 1.0, %v2553_v5  ;;  %v2541_v50 = vsel %vm7673_vm0, %v7633_v10, %v2537_v12  ;;  %2992 = vmatpush.msra.mxu1 %v7124_v31  ;;  %3012 = vmatpush.msra.mxu3 %v7130_v17  ;;  %vm2579_vm9 = vmor %vm2577_vm8, %vm2578_vm7  ;;  %v9882_v10 = vld [vmem:[#allocation41_spill] sm:$0xff]  ;;  %v9892_v12 = vld [vmem:[#allocation52_spill] sm:$0xff] }
 0x4e2   :  { %v2574_v11 = vsub.f32 1.0, %v2573_v37  ;;  %3032 = vmatpush.msra.mxu0 %v7138_v54  ;;  %3052 = vmatpush.msra.mxu2 %v7144_v15  ;;  %v2546_v56 = vsel %vm2543_vm2, %v2545_v63, %v2541_v50  ;;  %v9860_v15 = vld [vmem:[#allocation16_spill] sm:$0xff]  ;;  %v9893_v5 = vld [vmem:[#allocation46_spill] sm:$0xff]  ;;  %v9895_v37 = vld [vmem:[#allocation35_spill] sm:$0xff] }
 0x4e3   :  { %v2555_v39 = vmul.f32 %v4380_v48, %v2554_v57  ;;  %2993 = vmatpush.msra.mxu1 %v7152_v20  ;;  %3013 = vmatpush.msra.mxu3 %v7158_v22  ;;  %v2588_v54 = vmul.f32 %v4384_v9, %v2546_v56  ;;  %v9861_v20 = vld [vmem:[#allocation21_spill] sm:$0xff]  ;;  %v9897_v57 = vld [vmem:[#allocation50_spill] sm:$0xff]  ;;  %v9900_v50 = vld [vmem:[#allocation55_spill] sm:$0xff] }
 0x4e4   :  { %3033 = vmatpush.msra.mxu0 %v7165_v58  ;;  %3053 = vmatpush.msra.mxu2 %v7171_v3  ;;  %v2575_v17 = vmul.f32 %v7657_v55, %v2574_v11  ;;  %v9862_v22 = vld [vmem:[#allocation17_spill] sm:$0xff]  ;;  %v9864_v58 = vld [vmem:[#allocation20_spill] sm:$0xff]  ;;  %v9902_v32 = vld [vmem:[#allocation43_spill] sm:$0xff] }
 0x4e5   :  { %v2556_v43 = vadd.f32 %v4380_v48, %v2555_v39  ;;  %2994 = vmatpush.msra.mxu1 %v7178_v45  ;;  %3014 = vmatpush.msra.mxu3 %v7184_v27  ;;  %v9867_v27 = vld [vmem:[#allocation19_spill] sm:$0xff]  ;;  %v9901_v39 = vld [vmem:[#allocation60_spill] sm:$0xff]  ;;  %v9903_v63 = vld [vmem:[#allocation62_spill] sm:$0xff] }
 0x4e6   :  { %3034 = vmatpush.msra.mxu0 %v9861_v20  ;;  %3054 = vmatpush.msra.mxu2 %v9862_v22  ;;  %v2576_v45 = vadd.f32 %v7657_v55, %v2575_v17  ;;  %v9904_v11 = vld [vmem:[#allocation58_spill] sm:$0xff]  ;;  %v9906_v56 = vld [vmem:[#allocation47_spill] sm:$0xff]  ;;  %v9915_v20 = vld [vmem:[#allocation68_spill] sm:$0xff] }
 0x4e7   :  { %v2560_v2 = vsel %vm2559_vm5, %v4380_v48, %v2556_v43  ;;  %2995 = vmatpush.msra.mxu1 %v9863_v53  ;;  %3015 = vmatpush.msra.mxu3 %v9864_v58  ;;  %v9889_v48 = vld [vmem:[#allocation31_spill] sm:$0xff]  ;;  %v9916_v22 = vld [vmem:[#allocation70_spill] sm:$0xff]  ;;  %v9917_v53 = vld [vmem:[#allocation69_spill] sm:$0xff] }
 0x4e8   :  { %v2565_v31 = vsel %vm2562_vm6, %v2564_v51, %v2560_v2  ;;  %3035 = vmatpush.msra.mxu0 %v9865_v26  ;;  %3055 = vmatpush.msra.mxu2 %v9866_v18  ;;  %v2580_v41 = vsel %vm2579_vm9, %v7657_v55, %v2576_v45  ;;  %v9891_v55 = vld [vmem:[#allocation48_spill] sm:$0xff]  ;;  %v9905_v43 = vld [vmem:[#allocation63_spill] sm:$0xff]  ;;  %v9907_v51 = vld [vmem:[#allocation61_spill] sm:$0xff] }
 0x4e9   :  { %v2587_v29 = vmul.f32 %v2565_v31, %v9860_v15  ;;  %2996 = vmatpush.msra.mxu1 %v9867_v27  ;;  %3016 = vmatpush.msra.mxu3 %v9868_v30  ;;  %v2585_v42 = vsel %vm2582_vm10, %v2584_v60, %v2580_v41  ;;  %v9908_v2 = vld [vmem:[#allocation65_spill] sm:$0xff]  ;;  %v9909_v9 = vld [vmem:[#allocation51_spill] sm:$0xff]  ;;  %v9910_v31 = vld [vmem:[#allocation64_spill] sm:$0xff] }
 0x4ea   :  { %3036 = vmatpush.msra.mxu0 %v9869_v61  ;;  %3056 = vmatpush.msra.mxu2 %v9870_v7  ;;  %v9911_v17 = vld [vmem:[#allocation67_spill] sm:$0xff]  ;;  %v9913_v15 = vld [vmem:[#allocation66_spill] sm:$0xff]  ;;  %v9918_v58 = vld [vmem:[#allocation72_spill] sm:$0xff] }
 0x4eb   :  { %v7703_v3 = vadd.f32 %v2588_v54, %v2587_v29  ;;  %2997 = vmatpush.msra.mxu1 %v9871_v19  ;;  %3017 = vmatpush.msra.mxu3 %v9872_v4  ;;  %v9912_v54 = vld [vmem:[#allocation54_spill] sm:$0xff]  ;;  %v9914_v29 = vld [vmem:[#allocation57_spill] sm:$0xff]  ;;  %v9919_v26 = vld [vmem:[#allocation71_spill] sm:$0xff] }
 0x4ec   :  { %3037 = vmatpush.msra.mxu0 %v9873_v46  ;;  %3057 = vmatpush.msra.mxu2 %v9874_v40  ;;  %v9920_v18 = vld [vmem:[#allocation73_spill] sm:$0xff]  ;;  %v9921_v45 = vld [vmem:[#allocation74_spill] sm:$0xff]  ;;  %v9922_v27 = vld [vmem:[#allocation75_spill] sm:$0xff] }
 0x4ed   :  { %4385 = vtanh.f32 %v7703_v3  ;;  %2998 = vmatpush.msra.mxu1 %v9875_v28  ;;  %3018 = vmatpush.msra.mxu3 %v9876_v33  ;;  %v9923_v30 = vld [vmem:[#allocation76_spill] sm:$0xff]  ;;  %v9925_v61 = vld [vmem:[#allocation78_spill] sm:$0xff]  ;;  %v9926_v7 = vld [vmem:[#allocation79_spill] sm:$0xff] }
 0x4ee   :  { %3038 = vmatpush.msra.mxu0 %v9877_v8  ;;  %3058 = vmatpush.msra.mxu2 %v9878_v24  ;;  %v9928_v19 = vld [vmem:[#allocation81_spill] sm:$0xff]  ;;  %v9929_v4 = vld [vmem:[#allocation82_spill] sm:$0xff]  ;;  %v9930_v46 = vld [vmem:[#allocation83_spill] sm:$0xff] }
 0x4ef   :  { %2999 = vmatpush.msra.mxu1 %v9879_v47  ;;  %3019 = vmatpush.msra.mxu3 %v9880_v52  ;;  %v9931_v40 = vld [vmem:[#allocation84_spill] sm:$0xff]  ;;  %v9932_v41 = vld [vmem:[#allocation85_spill] sm:$0xff]  ;;  %v9933_v28 = vld [vmem:[#allocation86_spill] sm:$0xff] }
 0x4f0   :  { %3039 = vmatpush.msra.mxu0 %v9881_v44  ;;  %3059 = vmatpush.msra.mxu2 %v9882_v10  ;;  %v9934_v33 = vld [vmem:[#allocation87_spill] sm:$0xff]  ;;  %v9935_v60 = vld [vmem:[#allocation88_spill] sm:$0xff]  ;;  %v9936_v8 = vld [vmem:[#allocation89_spill] sm:$0xff] }
 0x4f1   :  { %3000 = vmatpush.msra.mxu1 %v9883_v23  ;;  %3020 = vmatpush.msra.mxu3 %v9884_v0  ;;  %v9937_v24 = vld [vmem:[#allocation90_spill] sm:$0xff]  ;;  %v9938_v47 = vld [vmem:[#allocation91_spill] sm:$0xff]  ;;  %v9939_v52 = vld [vmem:[#allocation92_spill] sm:$0xff] }
 0x4f2   :  { %3040 = vmatpush.msra.mxu0 %v9885_v38  ;;  %3060 = vmatpush.msra.mxu2 %v9886_v14  ;;  %v9942_v44 = vld [vmem:[#allocation95_spill] sm:$0xff]  ;;  %v9943_v10 = vld [vmem:[#allocation96_spill] sm:$0xff]  ;;  %v9945_v23 = vld [vmem:[#allocation98_spill] sm:$0xff] }
 0x4f3   :  { %v4386_v49 = vpop.eup %4385  ;;  %3001 = vmatpush.msra.mxu1 %v9887_v6  ;;  %3021 = vmatpush.msra.mxu3 %v9888_v16  ;;  %v9946_v0 = vld [vmem:[#allocation99_spill] sm:$0xff]  ;;  %v9947_v38 = vld [vmem:[#allocation100_spill] sm:$0xff]  ;;  %v9948_v14 = vld [vmem:[#allocation101_spill] sm:$0xff] }
 0x4f4   :  { %v2591_v35 = vmul.f32 %v4386_v49, %v2585_v42  ;;  %3041 = vmatpush.msra.mxu0 %v9889_v48  ;;  %3061 = vmatpush.msra.mxu2 %v9890_v34  ;;  %v9940_v49 = vld [vmem:[#allocation93_spill] sm:$0xff]  ;;  %v9941_v42 = vld [vmem:[#allocation94_spill] sm:$0xff]  ;;  %v9950_v16 = vld [vmem:[#allocation103_spill] sm:$0xff] }
 0x4f5   :  { %v9949_v6 = vld [vmem:[#allocation102_spill] sm:$0xff]  ;;  %v9951_v48 = vld [vmem:[#allocation104_spill] sm:$0xff]  ;;  %v9952_v34 = vld [vmem:[#allocation105_spill] sm:$0xff] }
 0x4f6   :  { %2742 = vmatmul.f32.vlgmr.msrb.gmra.mxu1 %v2591_v35  ;;  %2762 = vmatmul.f32.vlgmr.msrb.gmra.mxu3 %v2591_v35 }
 0x4f7   :  { %2782 = vmatmul.f32.vlgmr.msrb.gmra.mxu0 %v2591_v35  ;;  %2802 = vmatmul.f32.vlgmr.msrb.gmra.mxu2 %v2591_v35  ;;  %v9944_v35 = vld [vmem:[#allocation97_spill] sm:$0xff] }
 0x4f8   :  { %3070 = vmatpush.msrb.mxu1 %v9891_v55  ;;  %3090 = vmatpush.msrb.mxu3 %v9892_v12  ;;  %v9953_v55 = vld [vmem:[#allocation106_spill] sm:$0xff]  ;;  %v9954_v12 = vld [vmem:[#allocation107_spill] sm:$0xff] }
 0x4f9   :  { %3110 = vmatpush.msrb.mxu0 %v9893_v5  ;;  %3130 = vmatpush.msrb.mxu2 %v9894_v25  ;;  %v2598_v5 = vld [vmem:[#allocation2 + $0x44] ss:$8 sm:$0xf0] }
 0x4fa   :  { %3071 = vmatpush.msrb.mxu1 %v9895_v37  ;;  %3091 = vmatpush.msrb.mxu3 %v9896_v59  ;;  %v2597_v25 = vld [vmem:[#allocation2 + $0x44] ss:$8 sm:$0xf] }
 0x4fb   :  { %3111 = vmatpush.msrb.mxu0 %v9897_v57  ;;  %3131 = vmatpush.msrb.mxu2 %v9898_v13  ;;  %v2594_v37 = vld [vmem:[#allocation2 + $0x4] ss:$8 sm:$0xf0]  ;;  %v7802_v59 = vor.u32 %v2598_v5, %v2597_v25 }
 0x4fc   :  { %3072 = vmatpush.msrb.mxu1 %v9899_v21  ;;  %3092 = vmatpush.msrb.mxu3 %v9900_v50  ;;  %v2593_v57 = vld [vmem:[#allocation2 + $0x4] ss:$8 sm:$0xf] }
 0x4fd   :  { %3112 = vmatpush.msrb.mxu0 %v9901_v39  ;;  %3132 = vmatpush.msrb.mxu2 %v9902_v32  ;;  %v7804_v13 = vor.u32 %v2594_v37, %v2593_v57  ;;  %v2618_v21 = vperm.slane %v7802_v59, 0  ;;  %v2623_v5 = vperm.slane %v7802_v59, 5  ;;  %v2625_v57 = vperm.slane %v7802_v59, 7 }
 0x4fe   :  { %3073 = vmatpush.msrb.mxu1 %v9903_v63  ;;  %3093 = vmatpush.msrb.mxu3 %v9904_v11  ;;  %v2619_v11 = vperm.slane %v7802_v59, 1 }
 0x4ff   :  { %3113 = vmatpush.msrb.mxu0 %v9905_v43  ;;  %3133 = vmatpush.msrb.mxu2 %v9906_v56  ;;  %v2601_v50 = vperm.slane %v7804_v13, 0  ;;  %v2621_v56 = vperm.slane %v7802_v59, 3 }
 0x500   :  { %3074 = vmatpush.msrb.mxu1 %v9907_v51  ;;  %3094 = vmatpush.msrb.mxu3 %v9908_v2  ;;  %v2602_v51 = vperm.slane %v7804_v13, 1  ;;  %v2604_v2 = vperm.slane %v7804_v13, 3 }
 0x501   :  { %3114 = vmatpush.msrb.mxu0 %v9909_v9  ;;  %3134 = vmatpush.msrb.mxu2 %v9910_v31  ;;  %v2634_v39 = vsel %vm1257_vm4, %v2601_v50, %v2618_v21 }
 0x502   :  { %3075 = vmatpush.msrb.mxu1 %v9911_v17  ;;  %3095 = vmatpush.msrb.mxu3 %v9912_v54  ;;  %v2635_v9 = vsel %vm1257_vm4, %v2602_v51, %v2619_v11  ;;  %v2637_v54 = vsel %vm1257_vm4, %v2604_v2, %v2621_v56 }
 0x503   :  { %3115 = vmatpush.msrb.mxu0 %v9913_v15  ;;  %3135 = vmatpush.msrb.mxu2 %v9914_v29 }
 0x504   :  { %3076 = vmatpush.msrb.mxu1 %v9915_v20  ;;  %3096 = vmatpush.msrb.mxu3 %v9916_v22 }
 0x505   :  { %3116 = vmatpush.msrb.mxu0 %v9917_v53  ;;  %3136 = vmatpush.msrb.mxu2 %v9918_v58 }
 0x506   :  { %3077 = vmatpush.msrb.mxu1 %v9919_v26  ;;  %3097 = vmatpush.msrb.mxu3 %v9920_v18 }
 0x507   :  { %3117 = vmatpush.msrb.mxu0 %v9921_v45  ;;  %3137 = vmatpush.msrb.mxu2 %v9922_v27 }
 0x508   :  { %3078 = vmatpush.msrb.mxu1 %v9923_v30  ;;  %3098 = vmatpush.msrb.mxu3 %v9924_v36 }
 0x509   :  { %3118 = vmatpush.msrb.mxu0 %v9925_v61  ;;  %3138 = vmatpush.msrb.mxu2 %v9926_v7  ;;  %v2620_v61 = vperm.slane %v7802_v59, 2 }
 0x50a   :  { %3079 = vmatpush.msrb.mxu1 %v9927_v1  ;;  %3099 = vmatpush.msrb.mxu3 %v9928_v19  ;;  %v2603_v1 = vperm.slane %v7804_v13, 2 }
 0x50b   :  { %3119 = vmatpush.msrb.mxu0 %v9929_v4  ;;  %3139 = vmatpush.msrb.mxu2 %v9930_v46 }
 0x50c   :  { %3080 = vmatpush.msrb.mxu1 %v9931_v40  ;;  %3100 = vmatpush.msrb.mxu3 %v9932_v41  ;;  %v2636_v4 = vsel %vm1257_vm4, %v2603_v1, %v2620_v61 }
 0x50d   :  { %3120 = vmatpush.msrb.mxu0 %v9933_v28  ;;  %3140 = vmatpush.msrb.mxu2 %v9934_v33 }
 0x50e   :  { %3081 = vmatpush.msrb.mxu1 %v9935_v60  ;;  %3101 = vmatpush.msrb.mxu3 %v9936_v8 }
 0x50f   :  { %3121 = vmatpush.msrb.mxu0 %v9937_v24  ;;  %3141 = vmatpush.msrb.mxu2 %v9938_v47  ;;  %v2622_v47 = vperm.slane %v7802_v59, 4 }
 0x510   :  { %3082 = vmatpush.msrb.mxu1 %v9939_v52  ;;  %3102 = vmatpush.msrb.mxu3 %v9940_v49 }
 0x511   :  { %3122 = vmatpush.msrb.mxu0 %v9941_v42  ;;  %3142 = vmatpush.msrb.mxu2 %v9942_v44  ;;  %v7917_v42 = vld [vmem:[%s9080_s7 + $0x1a0] sm:$0xff] }
 0x512   :  { %3083 = vmatpush.msrb.mxu1 %v9943_v10  ;;  %3103 = vmatpush.msrb.mxu3 %v9944_v35  ;;  %v2605_v10 = vperm.slane %v7804_v13, 4 }
 0x513   :  { %3123 = vmatpush.msrb.mxu0 %v9945_v23  ;;  %3143 = vmatpush.msrb.mxu2 %v9946_v0 }
 0x514   :  { %3084 = vmatpush.msrb.mxu1 %v9947_v38  ;;  %3104 = vmatpush.msrb.mxu3 %v9948_v14 }
 0x515   :  { %3124 = vmatpush.msrb.mxu0 %v9949_v6  ;;  %3144 = vmatpush.msrb.mxu2 %v9950_v16  ;;  %v2638_v6 = vsel %vm1257_vm4, %v2605_v10, %v2622_v47 }
 0x516   :  { %3085 = vmatpush.msrb.mxu1 %v9951_v48  ;;  %3105 = vmatpush.msrb.mxu3 %v9952_v34 }
 0x517   :  { %3125 = vmatpush.msrb.mxu0 %v9953_v55  ;;  %3145 = vmatpush.msrb.mxu2 %v9954_v12 }
 0x550   :  { %v2659_v32 = vpop.f32.mrf.mxu1 }
 0x551   :  { %v2722_v63 = vadd.f32 %v2659_v32, %v2634_v39  ;;  %v2699_v19 = vpop.f32.mrf.mxu0  ;;  %v2606_v32 = vperm.slane %v7804_v13, 5 }
 0x552   :  { %v2724_v41 = vadd.f32 %v2699_v19, %v2636_v4  ;;  %v7864_v4 = vld [vmem:[%s9080_s7 + $0x1e0] sm:$0xff] }
 0x553   :  { %v4222_v43 = vmul.f32 -1.442695, %v2722_v63  ;;  %v2639_v56 = vsel %vm1257_vm4, %v2606_v32, %v2623_v5  ;;  %v7998_v32 = vld [vmem:[%s9080_s7 + $0x178] sm:$0xff] }
 0x555   :  { %4387 = vpow2.f32 %v4222_v43  ;;  %v2608_v43 = vperm.slane %v7804_v13, 7 }
 0x556   :  { %v2679_v31 = vpop.f32.mrf.mxu3 }
 0x557   :  { %v2723_v17 = vadd.f32 %v2679_v31, %v2635_v9  ;;  %v2719_v15 = vpop.f32.mrf.mxu2  ;;  %v2641_v9 = vsel %vm1257_vm4, %v2608_v43, %v2625_v57  ;;  %v7984_v57 = vld [vmem:[%s9080_s7 + $0x168] sm:$0xff]  ;;  %v8011_v43 = vld [vmem:[%s9080_s7 + $0x140] sm:$0xff] }
 0x558   :  { %v2725_v29 = vadd.f32 %v2719_v15, %v2637_v54 }
 0x559   :  { %v4223_v20 = vmul.f32 -1.442695, %v2723_v17 }
 0x55a   :  { %v4224_v22 = vmul.f32 -1.442695, %v2725_v29 }
 0x55b   :  { %v4388_v53 = vpop.eup %4387  ;;  %4389 = vpow2.f32 %v4223_v20 }
 0x55c   :  { %v2813_v58 = vadd.f32 1.0, %v4388_v53  ;;  %4391 = vpow2.f32 %v4224_v22 }
 0x55e   :  { %4393 = vrcp.f32 %v2813_v58  ;;  %v2825_v8 = vand.u32 2147483648, %v2813_v58  ;;  %vm2819_vm12 = vweird.f32 %v2813_v58  ;;  %v2823_v52 = vand.u32 2147483647, %v2813_v58 }
 0x560   :  { %v2826_v38 = vor.u32 1.1754944e-38, %v2825_v8  ;;  %vm2824_vm15 = vcmp.eq.f32.partialorder %v2823_v52, 8.507059e+37  ;;  %v7905_v52 = vld [vmem:[%s9080_s7 + $0x1d0] sm:$0xff] }
 0x561   :  { %v4390_v26 = vpop.eup %4389 }
 0x562   :  { %v4392_v18 = vpop.eup %4391  ;;  %v2832_v45 = vadd.f32 1.0, %v4390_v26 }
 0x563   :  { %v7815_v27 = vadd.f32 1.0, %v4392_v18 }
 0x564   :  { %v4394_v30 = vpop.eup %4393  ;;  %4395 = vrcp.f32 %v2832_v45  ;;  %v2844_v44 = vand.u32 2147483648, %v2832_v45  ;;  %v2842_v0 = vand.u32 2147483647, %v2832_v45  ;;  %vm2838_vm0 = vweird.f32 %v2832_v45 }
 0x565   :  { %v2815_v36 = vmul.f32 %v4394_v30, %v2813_v58  ;;  %4397 = vrcp.f32 %v7815_v27  ;;  %vm2820_vm11 = vweird.f32 %v4394_v30  ;;  %v2864_v29 = vand.u32 2147483648, %v7815_v27 }
 0x566   :  { %vm7826_vm13 = vmor %vm2819_vm12, %vm2820_vm11  ;;  %4399 = vtanh.f32 %v2724_v41  ;;  %v2845_v12 = vor.u32 1.1754944e-38, %v2844_v44  ;;  %vm2843_vm2 = vcmp.eq.f32.partialorder %v2842_v0, 8.507059e+37  ;;  %vm2858_vm5 = vweird.f32 %v7815_v27 }
 0x567   :  { %v2816_v7 = vsub.f32 1.0, %v2815_v36  ;;  %v2862_v22 = vand.u32 2147483647, %v7815_v27  ;;  %v2865_v18 = vor.u32 1.1754944e-38, %v2864_v29  ;;  %v2624_v41 = vperm.slane %v7802_v59, 6  ;;  %v7892_v59 = vld [vmem:[%s9080_s7 + $0x1c0] sm:$0xff] }
 0x569   :  { %v2817_v46 = vmul.f32 %v4394_v30, %v2816_v7  ;;  %vm2863_vm7 = vcmp.eq.f32.partialorder %v2862_v22, 8.507059e+37 }
 0x56a   :  { %v4396_v40 = vpop.eup %4395 }
 0x56b   :  { %v7821_v28 = vpop.eup %4397  ;;  %v2818_v33 = vadd.f32 %v4394_v30, %v2817_v46  ;;  %v2834_v60 = vmul.f32 %v4396_v40, %v2832_v45  ;;  %vm2839_vm14 = vweird.f32 %v4396_v40  ;;  %v7870_v46 = vld [vmem:[%s9080_s7 + $0x1e8] sm:$0xff] }
 0x56c   :  { %v2854_v24 = vmul.f32 %v7821_v28, %v7815_v27  ;;  %vm2840_vm1 = vmor %vm2838_vm0, %vm2839_vm14  ;;  %v4400_v21 = vpop.eup %4399  ;;  %vm2859_vm3 = vweird.f32 %v7821_v28 }
 0x56d   :  { %v2835_v49 = vsub.f32 1.0, %v2834_v60  ;;  %v2822_v35 = vsel %vm7826_vm13, %v4394_v30, %v2818_v33  ;;  %vm2860_vm6 = vmor %vm2858_vm5, %vm2859_vm3  ;;  %v7886_v33 = vld [vmem:[%s9080_s7 + $0x1f8] sm:$0xff]  ;;  %v7898_v60 = vld [vmem:[%s9080_s7 + $0x1c8] sm:$0xff] }
 0x56e   :  { %v2855_v14 = vsub.f32 1.0, %v2854_v24  ;;  %v2827_v55 = vsel %vm2824_vm15, %v2826_v38, %v2822_v35  ;;  %v2607_v24 = vperm.slane %v7804_v13, 6  ;;  %v7923_v13 = vld [vmem:[%s9080_s7 + $0x1a8] sm:$0xff]  ;;  %v7931_v35 = vld [vmem:[%s9080_s7 + $0x1b0] sm:$0xff] }
 0x56f   :  { %v2836_v23 = vmul.f32 %v4396_v40, %v2835_v49  ;;  %v2869_v63 = vmul.f32 %v4400_v21, %v2827_v55  ;;  %v7911_v49 = vld [vmem:[%s9080_s7 + $0x1d8] sm:$0xff]  ;;  %v7963_v55 = vld [vmem:[%s9080_s7 + $0x190] sm:$0xff] }
 0x570   :  { %v2856_v39 = vmul.f32 %v7821_v28, %v2855_v14  ;;  %v2640_v44 = vsel %vm1257_vm4, %v2607_v24, %v2624_v41  ;;  %v7945_v14 = vld [vmem:[%s9080_s7 + $0x180] sm:$0xff] }
 0x571   :  { %v2837_v48 = vadd.f32 %v4396_v40, %v2836_v23  ;;  %v7937_v23 = vld [vmem:[%s9080_s7 + $0x1b8] sm:$0xff]  ;;  %v8095_v41 = vld [vmem:[%s9080_s7 + $0xe0] sm:$0xff] }
 0x572   :  { %v2857_v15 = vadd.f32 %v7821_v28, %v2856_v39  ;;  %v7992_v39 = vld [vmem:[%s9080_s7 + $0x170] sm:$0xff] }
 0x573   :  { %v2743_v16 = vpop.f32.mrf.mxu1  ;;  %v2841_v25 = vsel %vm2840_vm1, %v4396_v40, %v2837_v48 }
 0x574   :  { %v2806_v34 = vadd.f32 %v2743_v16, %v2638_v6  ;;  %v2846_v50 = vsel %vm2843_vm2, %v2845_v12, %v2841_v25  ;;  %v2861_v26 = vsel %vm2860_vm6, %v7821_v28, %v2857_v15  ;;  %v7880_v28 = vld [vmem:[%s9080_s7 + $0x1f0] sm:$0xff]  ;;  %v2783_v47 = vpop.f32.mrf.mxu0  ;;  %v7951_v6 = vld [vmem:[%s9080_s7 + $0x188] sm:$0xff]  ;;  %v7969_v12 = vld [vmem:[%s9080_s7 + $0x198] sm:$0xff] }
 0x575   :  { %v2868_v11 = vmul.f32 %v2846_v50, %v7617_v62  ;;  %v2866_v30 = vsel %vm2863_vm7, %v2865_v18, %v2861_v26  ;;  %v2808_v38 = vadd.f32 %v2783_v47, %v2640_v44  ;;  %v8108_v44 = vld [vmem:[%s9080_s7 + $0xf0] sm:$0xff] }
 0x576   :  { %v4225_v37 = vmul.f32 -1.442695, %v2806_v34  ;;  %9959 = vst [vmem:[#allocation16_spill] sm:$0xff] %v8108_v44 }
 0x577   :  { %v7842_v17 = vadd.f32 %v2869_v63, %v2868_v11  ;;  %v8162_v63 = vld [vmem:[%s9080_s7 + $0xb0] sm:$0xff] }
 0x578   :  { %4401 = vpow2.f32 %v4225_v37  ;;  %v7978_v37 = vld [vmem:[%s9080_s7 + $0x160] sm:$0xff]  ;;  %9968 = vst [vmem:[#allocation22_spill] sm:$0xff] %v8162_v63 }
 0x579   :  { %v2763_v51 = vpop.f32.mrf.mxu3  ;;  %4403 = vtanh.f32 %v7842_v17 }
 0x57a   :  { %v2807_v2 = vadd.f32 %v2763_v51, %v2639_v56  ;;  %v2803_v31 = vpop.f32.mrf.mxu2  ;;  %v8017_v56 = vld [vmem:[%s9080_s7 + $0x148] sm:$0xff] }
 0x57b   :  { %v2809_v54 = vadd.f32 %v2803_v31, %v2641_v9  ;;  %v8029_v31 = vld [vmem:[%s9080_s7 + $0x150] sm:$0xff] }
 0x57c   :  { %v4226_v62 = vmul.f32 -1.442695, %v2807_v2 }
 0x57d   :  { %v4227_v20 = vmul.f32 -1.442695, %v2809_v54  ;;  %v8035_v54 = vld [vmem:[%s9080_s7 + $0x158] sm:$0xff] }
 0x57e   :  { %v4402_v53 = vpop.eup %4401  ;;  %4405 = vpow2.f32 %v4226_v62  ;;  %v8041_v62 = vld [vmem:[%s9080_s7 + $0x120] sm:$0xff] }
 0x57f   :  { %v7850_v58 = vadd.f32 1.0, %v4402_v53  ;;  %4407 = vpow2.f32 %v4227_v20  ;;  %v4404_v45 = vpop.eup %4403  ;;  %v8047_v20 = vld [vmem:[%s9080_s7 + $0x128] sm:$0xff]  ;;  %v8055_v53 = vld [vmem:[%s9080_s7 + $0x130] sm:$0xff] }
 0x580   :  { %v2872_v36 = vmul.f32 %v4404_v45, %v2866_v30  ;;  %v8069_v45 = vld [vmem:[%s9080_s7 + $0x100] sm:$0xff]  ;;  %v8075_v30 = vld [vmem:[%s9080_s7 + $0x108] sm:$0xff] }
 0x581   :  { %4409 = vrcp.f32 %v7850_v58  ;;  %v2888_v5 = vand.u32 2147483648, %v7850_v58  ;;  %vm2882_vm9 = vweird.f32 %v7850_v58  ;;  %v2886_v21 = vand.u32 2147483647, %v7850_v58 }
 0x582   :  { %3002 = vmatmul.f32.vlgmr.msra.gmra.mxu1 %v2872_v36  ;;  %3022 = vmatmul.f32.vlgmr.msra.gmra.mxu3 %v2872_v36 }
 0x583   :  { %3042 = vmatmul.f32.vlgmr.msra.gmra.mxu0 %v2872_v36  ;;  %3062 = vmatmul.f32.vlgmr.msra.gmra.mxu2 %v2872_v36  ;;  %v2889_v15 = vor.u32 1.1754944e-38, %v2888_v5  ;;  %vm2887_vm12 = vcmp.eq.f32.partialorder %v2886_v21, 8.507059e+37  ;;  %v8154_v21 = vld [vmem:[%s9080_s7 + $0xa8] sm:$0xff] }
 0x584   :  { %v4406_v61 = vpop.eup %4405  ;;  %3330 = vmatpush.msra.mxu1 %v7864_v4  ;;  %3350 = vmatpush.msra.mxu3 %v7870_v46  ;;  %9967 = vst [vmem:[#allocation25_spill] sm:$0xff] %v8154_v21 }
 0x585   :  { %v4408_v7 = vpop.eup %4407  ;;  %v7854_v1 = vadd.f32 1.0, %v4406_v61  ;;  %3370 = vmatpush.msra.mxu0 %v7880_v28  ;;  %3390 = vmatpush.msra.mxu2 %v7886_v33  ;;  %v8082_v61 = vld [vmem:[%s9080_s7 + $0x110] sm:$0xff] }
 0x586   :  { %v7856_v27 = vadd.f32 1.0, %v4408_v7  ;;  %3331 = vmatpush.msra.mxu1 %v7892_v59  ;;  %3351 = vmatpush.msra.mxu3 %v7898_v60  ;;  %v8088_v7 = vld [vmem:[%s9080_s7 + $0x118] sm:$0xff] }
 0x587   :  { %v7858_v19 = vpop.eup %4409  ;;  %4411 = vrcp.f32 %v7854_v1  ;;  %3371 = vmatpush.msra.mxu0 %v7905_v52  ;;  %3391 = vmatpush.msra.mxu2 %v7911_v49  ;;  %v2907_v11 = vand.u32 2147483648, %v7854_v1  ;;  %v2905_v9 = vand.u32 2147483647, %v7854_v1  ;;  %vm2901_vm13 = vweird.f32 %v7854_v1 }
 0x588   :  { %v2878_v40 = vmul.f32 %v7858_v19, %v7850_v58  ;;  %4413 = vrcp.f32 %v7856_v27  ;;  %3332 = vmatpush.msra.mxu1 %v7917_v42  ;;  %3352 = vmatpush.msra.mxu3 %v7923_v13  ;;  %vm2883_vm8 = vweird.f32 %v7858_v19  ;;  %v8061_v58 = vld [vmem:[%s9080_s7 + $0x138] sm:$0xff]  ;;  %vm2921_vm1 = vweird.f32 %v7856_v27 }
 0x589   :  { %3372 = vmatpush.msra.mxu0 %v7931_v35  ;;  %3392 = vmatpush.msra.mxu2 %v7937_v23  ;;  %vm8003_vm10 = vmor %vm2882_vm9, %vm2883_vm8  ;;  %4415 = vtanh.f32 %v2808_v38  ;;  %v2908_v18 = vor.u32 1.1754944e-38, %v2907_v11  ;;  %vm2906_vm15 = vcmp.eq.f32.partialorder %v2905_v9, 8.507059e+37  ;;  %v8168_v11 = vld [vmem:[%s9080_s7 + $0xb8] sm:$0xff]  ;;  %v8182_v9 = vld [vmem:[%s9080_s7 + $0x88] sm:$0xff] }
 0x58a   :  { %v2879_v8 = vsub.f32 1.0, %v2878_v40  ;;  %3333 = vmatpush.msra.mxu1 %v7945_v14  ;;  %3353 = vmatpush.msra.mxu3 %v7951_v6  ;;  %9969 = vst [vmem:[#allocation29_spill] sm:$0xff] %v8168_v11 }
 0x58b   :  { %3373 = vmatpush.msra.mxu0 %v7963_v55  ;;  %3393 = vmatpush.msra.mxu2 %v7969_v12  ;;  %9971 = vst [vmem:[#allocation26_spill] sm:$0xff] %v8182_v9 }
 0x58c   :  { %v2880_v10 = vmul.f32 %v7858_v19, %v2879_v8  ;;  %3334 = vmatpush.msra.mxu1 %v7978_v37  ;;  %3354 = vmatpush.msra.mxu3 %v7984_v57  ;;  %v8101_v8 = vld [vmem:[%s9080_s7 + $0xe8] sm:$0xff] }
 0x58d   :  { %v7940_v0 = vpop.eup %4411  ;;  %3374 = vmatpush.msra.mxu0 %v7992_v39  ;;  %3394 = vmatpush.msra.mxu2 %v7998_v32 }
 0x58e   :  { %v7954_v16 = vpop.eup %4413  ;;  %v2881_v48 = vadd.f32 %v7858_v19, %v2880_v10  ;;  %v2897_v34 = vmul.f32 %v7940_v0, %v7854_v1  ;;  %3335 = vmatpush.msra.mxu1 %v8011_v43  ;;  %3355 = vmatpush.msra.mxu3 %v8017_v56  ;;  %vm2902_vm11 = vweird.f32 %v7940_v0  ;;  %v8114_v10 = vld [vmem:[%s9080_s7 + $0xf8] sm:$0xff] }
 0x58f   :  { %v2917_v25 = vmul.f32 %v7954_v16, %v7856_v27  ;;  %3375 = vmatpush.msra.mxu0 %v8029_v31  ;;  %3395 = vmatpush.msra.mxu2 %v8035_v54  ;;  %vm2903_vm14 = vmor %vm2901_vm13, %vm2902_vm11  ;;  %v4416_v1 = vpop.eup %4415  ;;  %9960 = vst [vmem:[#allocation21_spill] sm:$0xff] %v8114_v10  ;;  %vm2922_vm0 = vweird.f32 %v7954_v16 }
 0x590   :  { %v2898_v50 = vsub.f32 1.0, %v2897_v34  ;;  %v2885_v51 = vsel %vm8003_vm10, %v7858_v19, %v2881_v48  ;;  %3336 = vmatpush.msra.mxu1 %v8041_v62  ;;  %3356 = vmatpush.msra.mxu3 %v8047_v20  ;;  %v8134_v48 = vld [vmem:[%s9080_s7 + $0xd0] sm:$0xff]  ;;  %v8140_v34 = vld [vmem:[%s9080_s7 + $0xd8] sm:$0xff]  ;;  %vm8187_vm2 = vmor %vm2921_vm1, %vm2922_vm0 }
 0x591   :  { %v2918_v29 = vsub.f32 1.0, %v2917_v25  ;;  %3376 = vmatpush.msra.mxu0 %v8055_v53  ;;  %3396 = vmatpush.msra.mxu2 %v8061_v58  ;;  %v2890_v26 = vsel %vm2887_vm12, %v2889_v15, %v2885_v51  ;;  %9964 = vst [vmem:[#allocation14_spill] sm:$0xff] %v8134_v48  ;;  %v8148_v25 = vld [vmem:[%s9080_s7 + $0xa0] sm:$0xff]  ;;  %v2925_v51 = vand.u32 2147483647, %v7856_v27 }
 0x592   :  { %v2899_v2 = vmul.f32 %v7940_v0, %v2898_v50  ;;  %3337 = vmatpush.msra.mxu1 %v8069_v45  ;;  %3357 = vmatpush.msra.mxu3 %v8075_v30  ;;  %v2932_v24 = vmul.f32 %v4416_v1, %v2890_v26  ;;  %9965 = vst [vmem:[#allocation24_spill] sm:$0xff] %v8140_v34  ;;  %v2927_v50 = vand.u32 2147483648, %v7856_v27  ;;  %v8194_v27 = vld [vmem:[%s9080_s7 + $0x90] sm:$0xff]  ;;  %v8209_v26 = vld [vmem:[%s9080_s7 + $0x60] sm:$0xff] }
 0x593   :  { %3377 = vmatpush.msra.mxu0 %v8082_v61  ;;  %3397 = vmatpush.msra.mxu2 %v8088_v7  ;;  %v2919_v40 = vmul.f32 %v7954_v16, %v2918_v29  ;;  %9966 = vst [vmem:[#allocation19_spill] sm:$0xff] %v8148_v25  ;;  %v8200_v29 = vld [vmem:[%s9080_s7 + $0x98] sm:$0xff]  ;;  %v8221_v1 = vld [vmem:[%s9080_s7 + $0x70] sm:$0xff]  ;;  %vm2926_vm3 = vcmp.eq.f32.partialorder %v2925_v51, 8.507059e+37  ;;  %v8257_v15 = vld [vmem:[%s9080_s7 + $0x20] sm:$0xff] }
 0x594   :  { %v2900_v22 = vadd.f32 %v7940_v0, %v2899_v2  ;;  %3338 = vmatpush.msra.mxu1 %v8095_v41  ;;  %3358 = vmatpush.msra.mxu3 %v8101_v8  ;;  %v8176_v2 = vld [vmem:[%s9080_s7 + $0x80] sm:$0xff]  ;;  %9974 = vst [vmem:[#allocation15_spill] sm:$0xff] %v8194_v27 }
 0x595   :  { %3378 = vmatpush.msra.mxu0 %v8108_v44  ;;  %3398 = vmatpush.msra.mxu2 %v8114_v10  ;;  %v2920_v5 = vadd.f32 %v7954_v16, %v2919_v40  ;;  %9970 = vst [vmem:[#allocation28_spill] sm:$0xff] %v8176_v2  ;;  %v8239_v40 = vld [vmem:[%s9080_s7 + $0x48] sm:$0xff] }
 0x596   :  { %v2904_v36 = vsel %vm2903_vm14, %v7940_v0, %v2900_v22  ;;  %v8120_v0 = vld [vmem:[%s9080_s7 + $0xc0] sm:$0xff]  ;;  %9975 = vst [vmem:[#allocation33_spill] sm:$0xff] %v8200_v29 }
 0x597   :  { %v2909_v19 = vsel %vm2906_vm15, %v2908_v18, %v2904_v36  ;;  %9961 = vst [vmem:[#allocation17_spill] sm:$0xff] %v8120_v0  ;;  %3339 = vmatpush.msra.mxu1 %v8120_v0  ;;  %3379 = vmatpush.msra.mxu0 %v8134_v48  ;;  %v2924_v22 = vsel %vm8187_vm2, %v7954_v16, %v2920_v5  ;;  %v8215_v18 = vld [vmem:[%s9080_s7 + $0x68] sm:$0xff]  ;;  %v2928_v36 = vor.u32 1.1754944e-38, %v2927_v50  ;;  %v8227_v16 = vld [vmem:[%s9080_s7 + $0x78] sm:$0xff]  ;;  %v8245_v5 = vld [vmem:[%s9080_s7 + $0x50] sm:$0xff] }
 0x598   :  { %v2931_v47 = vmul.f32 %v2909_v19, %v7703_v3  ;;  %v8126_v3 = vld [vmem:[%s9080_s7 + $0xc8] sm:$0xff]  ;;  %3399 = vmatpush.msra.mxu2 %v8140_v34  ;;  %9976 = vst [vmem:[#allocation32_spill] sm:$0xff] %v8209_v26  ;;  %v8233_v19 = vld [vmem:[%s9080_s7 + $0x40] sm:$0xff]  ;;  %v8251_v50 = vld [vmem:[%s9080_s7 + $0x58] sm:$0xff] }
 0x599   :  { %9962 = vst [vmem:[#allocation13_spill] sm:$0xff] %v8126_v3  ;;  %3359 = vmatpush.msra.mxu3 %v8126_v3  ;;  %3340 = vmatpush.msra.mxu1 %v8148_v25 }
 0x59a   :  { %v8129_v38 = vadd.f32 %v2932_v24, %v2931_v47  ;;  %3380 = vmatpush.msra.mxu0 %v8162_v63  ;;  %3400 = vmatpush.msra.mxu2 %v8168_v11  ;;  %9977 = vst [vmem:[#allocation30_spill] sm:$0xff] %v8215_v18  ;;  %v2929_v47 = vsel %vm2926_vm3, %v2928_v36, %v2924_v22  ;;  %v8263_v22 = vld [vmem:[%s9080_s7 + $0x28] sm:$0xff]  ;;  %v8269_v36 = vld [vmem:[%s9080_s7 + $0x30] sm:$0xff] }
 0x59b   :  { %3360 = vmatpush.msra.mxu3 %v8154_v21  ;;  %3341 = vmatpush.msra.mxu1 %v8176_v2  ;;  %9978 = vst [vmem:[#allocation18_spill] sm:$0xff] %v8221_v1 }
 0x59c   :  { %9963 = vst [vmem:[#allocation20_spill] sm:$0xff] %v8129_v38  ;;  %4417 = vtanh.f32 %v8129_v38  ;;  %3381 = vmatpush.msra.mxu0 %v8194_v27  ;;  %3401 = vmatpush.msra.mxu2 %v8200_v29 }
 0x59d   :  { %3361 = vmatpush.msra.mxu3 %v8182_v9  ;;  %3342 = vmatpush.msra.mxu1 %v8209_v26  ;;  %9979 = vst [vmem:[#allocation37_spill] sm:$0xff] %v8227_v16 }
 0x59e   :  { %3382 = vmatpush.msra.mxu0 %v8221_v1  ;;  %3402 = vmatpush.msra.mxu2 %v8227_v16  ;;  %9980 = vst [vmem:[#allocation36_spill] sm:$0xff] %v8233_v19 }
 0x59f   :  { %3362 = vmatpush.msra.mxu3 %v8215_v18  ;;  %3343 = vmatpush.msra.mxu1 %v8233_v19  ;;  %9981 = vst [vmem:[#allocation34_spill] sm:$0xff] %v8239_v40 }
 0x5a0   :  { %9982 = vst [vmem:[#allocation23_spill] sm:$0xff] %v8245_v5  ;;  %3383 = vmatpush.msra.mxu0 %v8245_v5  ;;  %3403 = vmatpush.msra.mxu2 %v8251_v50  ;;  %v2938_v5 = vld [vmem:[#allocation2 + $0x5] ss:$8 sm:$0xf0] }
 0x5a1   :  { %3363 = vmatpush.msra.mxu3 %v8239_v40  ;;  %9983 = vst [vmem:[#allocation41_spill] sm:$0xff] %v8251_v50  ;;  %3344 = vmatpush.msra.mxu1 %v8257_v15  ;;  %v2941_v50 = vld [vmem:[#allocation2 + $0x45] ss:$8 sm:$0xf] }
 0x5a2   :  { %v4418_v24 = vpop.eup %4417  ;;  %9984 = vst [vmem:[#allocation40_spill] sm:$0xff] %v8257_v15  ;;  %3384 = vmatpush.msra.mxu0 %v8269_v36  ;;  %v8314_v15 = vld [vmem:[#allocation8 + $0x1c0] sm:$0xff] }
 0x5a3   :  { %v2935_v51 = vmul.f32 %v4418_v24, %v2929_v47  ;;  %9985 = vst [vmem:[#allocation38_spill] sm:$0xff] %v8263_v22  ;;  %3364 = vmatpush.msra.mxu3 %v8263_v22  ;;  %v8275_v24 = vld [vmem:[%s9080_s7 + $0x38] sm:$0xff]  ;;  %v8281_v47 = vld [vmem:[%s9080_s7] sm:$0xff]  ;;  %v8305_v22 = vld [vmem:[#allocation8 + $0x1e8] sm:$0xff] }
 0x5a4   :  { %9986 = vst [vmem:[#allocation27_spill] sm:$0xff] %v8269_v36  ;;  %3404 = vmatpush.msra.mxu2 %v8275_v24  ;;  %3345 = vmatpush.msra.mxu1 %v8281_v47  ;;  %v8287_v36 = vld [vmem:[%s9080_s7 + $0x8] sm:$0xff] }
 0x5a5   :  { %9987 = vst [vmem:[#allocation45_spill] sm:$0xff] %v8275_v24  ;;  %3086 = vmatmul.f32.vlgmr.msrb.gmra.mxu1 %v2935_v51  ;;  %3106 = vmatmul.f32.vlgmr.msrb.gmra.mxu3 %v2935_v51  ;;  %v8293_v24 = vld [vmem:[%s9080_s7 + $0x10] sm:$0xff] }
 0x5a6   :  { %3126 = vmatmul.f32.vlgmr.msrb.gmra.mxu0 %v2935_v51  ;;  %3146 = vmatmul.f32.vlgmr.msrb.gmra.mxu2 %v2935_v51  ;;  %9988 = vst [vmem:[#allocation44_spill] sm:$0xff] %v8281_v47  ;;  %v8299_v51 = vld [vmem:[%s9080_s7 + $0x18] sm:$0xff]  ;;  %v8302_v47 = vld [vmem:[#allocation8 + $0x1e0] sm:$0xff] }
 0x5a7   :  { %9989 = vst [vmem:[#allocation42_spill] sm:$0xff] %v8287_v36  ;;  %3365 = vmatpush.msra.mxu3 %v8287_v36  ;;  %3385 = vmatpush.msra.mxu0 %v8293_v24  ;;  %v8308_v36 = vld [vmem:[#allocation8 + $0x1f0] sm:$0xff] }
 0x5a8   :  { %9990 = vst [vmem:[#allocation31_spill] sm:$0xff] %v8293_v24  ;;  %3405 = vmatpush.msra.mxu2 %v8299_v51  ;;  %3414 = vmatpush.msrb.mxu1 %v8302_v47  ;;  %v8311_v24 = vld [vmem:[#allocation8 + $0x1f8] sm:$0xff] }
 0x5a9   :  { %9991 = vst [vmem:[#allocation49_spill] sm:$0xff] %v8299_v51  ;;  %3434 = vmatpush.msrb.mxu3 %v8305_v22  ;;  %3454 = vmatpush.msrb.mxu0 %v8308_v36  ;;  %v8317_v51 = vld [vmem:[#allocation8 + $0x1c8] sm:$0xff] }
 0x5aa   :  { %9992 = vst [vmem:[#allocation48_spill] sm:$0xff] %v8302_v47  ;;  %3474 = vmatpush.msrb.mxu2 %v8311_v24  ;;  %3415 = vmatpush.msrb.mxu1 %v8314_v15  ;;  %v8320_v47 = vld [vmem:[#allocation8 + $0x1d0] sm:$0xff] }
 0x5ab   :  { %9993 = vst [vmem:[#allocation52_spill] sm:$0xff] %v8305_v22  ;;  %3435 = vmatpush.msrb.mxu3 %v8317_v51  ;;  %3455 = vmatpush.msrb.mxu0 %v8320_v47  ;;  %v8323_v22 = vld [vmem:[#allocation8 + $0x1d8] sm:$0xff] }
 0x5ac   :  { %9994 = vst [vmem:[#allocation46_spill] sm:$0xff] %v8308_v36  ;;  %3475 = vmatpush.msrb.mxu2 %v8323_v22  ;;  %v8326_v36 = vld [vmem:[#allocation8 + $0x1a0] sm:$0xff] }
 0x5ad   :  { %9995 = vst [vmem:[#allocation53_spill] sm:$0xff] %v8311_v24  ;;  %3416 = vmatpush.msrb.mxu1 %v8326_v36  ;;  %v8329_v24 = vld [vmem:[#allocation8 + $0x1a8] sm:$0xff] }
 0x5ae   :  { %9996 = vst [vmem:[#allocation35_spill] sm:$0xff] %v8314_v15  ;;  %3436 = vmatpush.msrb.mxu3 %v8329_v24  ;;  %v8332_v15 = vld [vmem:[#allocation8 + $0x1b0] sm:$0xff] }
 0x5af   :  { %9997 = vst [vmem:[#allocation56_spill] sm:$0xff] %v8317_v51  ;;  %3456 = vmatpush.msrb.mxu0 %v8332_v15  ;;  %v8335_v51 = vld [vmem:[#allocation8 + $0x1b8] sm:$0xff] }
 0x5b0   :  { %9998 = vst [vmem:[#allocation50_spill] sm:$0xff] %v8320_v47  ;;  %3476 = vmatpush.msrb.mxu2 %v8335_v51  ;;  %v8338_v47 = vld [vmem:[#allocation8 + $0x180] sm:$0xff] }
 0x5b1   :  { %9999 = vst [vmem:[#allocation39_spill] sm:$0xff] %v8323_v22  ;;  %3417 = vmatpush.msrb.mxu1 %v8338_v47  ;;  %v8341_v22 = vld [vmem:[#allocation8 + $0x188] sm:$0xff] }
 0x5b2   :  { %10000 = vst [vmem:[#allocation59_spill] sm:$0xff] %v8326_v36  ;;  %3437 = vmatpush.msrb.mxu3 %v8341_v22  ;;  %v8344_v36 = vld [vmem:[#allocation8 + $0x190] sm:$0xff] }
 0x5b3   :  { %10001 = vst [vmem:[#allocation55_spill] sm:$0xff] %v8329_v24  ;;  %3457 = vmatpush.msrb.mxu0 %v8344_v36  ;;  %v8347_v24 = vld [vmem:[#allocation8 + $0x198] sm:$0xff] }
 0x5b4   :  { %10002 = vst [vmem:[#allocation60_spill] sm:$0xff] %v8332_v15  ;;  %3477 = vmatpush.msrb.mxu2 %v8347_v24  ;;  %v8350_v15 = vld [vmem:[#allocation8 + $0x160] sm:$0xff] }
 0x5b5   :  { %10003 = vst [vmem:[#allocation43_spill] sm:$0xff] %v8335_v51  ;;  %3418 = vmatpush.msrb.mxu1 %v8350_v15  ;;  %v8353_v51 = vld [vmem:[#allocation8 + $0x168] sm:$0xff] }
 0x5b6   :  { %10004 = vst [vmem:[#allocation62_spill] sm:$0xff] %v8338_v47  ;;  %3438 = vmatpush.msrb.mxu3 %v8353_v51  ;;  %v8356_v47 = vld [vmem:[#allocation8 + $0x170] sm:$0xff] }
 0x5b7   :  { %10005 = vst [vmem:[#allocation58_spill] sm:$0xff] %v8341_v22  ;;  %3458 = vmatpush.msrb.mxu0 %v8356_v47  ;;  %v8359_v22 = vld [vmem:[#allocation8 + $0x178] sm:$0xff] }
 0x5b8   :  { %10006 = vst [vmem:[#allocation63_spill] sm:$0xff] %v8344_v36  ;;  %3478 = vmatpush.msrb.mxu2 %v8359_v22  ;;  %v8362_v36 = vld [vmem:[#allocation8 + $0x140] sm:$0xff] }
 0x5b9   :  { %10007 = vst [vmem:[#allocation47_spill] sm:$0xff] %v8347_v24  ;;  %3419 = vmatpush.msrb.mxu1 %v8362_v36  ;;  %v8365_v24 = vld [vmem:[#allocation8 + $0x148] sm:$0xff] }
 0x5ba   :  { %10008 = vst [vmem:[#allocation61_spill] sm:$0xff] %v8350_v15  ;;  %3439 = vmatpush.msrb.mxu3 %v8365_v24  ;;  %v8368_v15 = vld [vmem:[#allocation8 + $0x150] sm:$0xff] }
 0x5bb   :  { %10009 = vst [vmem:[#allocation65_spill] sm:$0xff] %v8353_v51  ;;  %3459 = vmatpush.msrb.mxu0 %v8368_v15  ;;  %v8371_v51 = vld [vmem:[#allocation8 + $0x158] sm:$0xff] }
 0x5bc   :  { %10010 = vst [vmem:[#allocation51_spill] sm:$0xff] %v8356_v47  ;;  %3479 = vmatpush.msrb.mxu2 %v8371_v51  ;;  %v8374_v47 = vld [vmem:[#allocation8 + $0x120] sm:$0xff] }
 0x5bd   :  { %10011 = vst [vmem:[#allocation64_spill] sm:$0xff] %v8359_v22  ;;  %3420 = vmatpush.msrb.mxu1 %v8374_v47  ;;  %v8377_v22 = vld [vmem:[#allocation8 + $0x128] sm:$0xff] }
 0x5be   :  { %10012 = vst [vmem:[#allocation67_spill] sm:$0xff] %v8362_v36  ;;  %3440 = vmatpush.msrb.mxu3 %v8377_v22  ;;  %v8380_v36 = vld [vmem:[#allocation8 + $0x130] sm:$0xff] }
 0x5bf   :  { %10013 = vst [vmem:[#allocation54_spill] sm:$0xff] %v8365_v24  ;;  %3460 = vmatpush.msrb.mxu0 %v8380_v36  ;;  %v8383_v24 = vld [vmem:[#allocation8 + $0x138] sm:$0xff] }
 0x5c0   :  { %10014 = vst [vmem:[#allocation66_spill] sm:$0xff] %v8368_v15  ;;  %3480 = vmatpush.msrb.mxu2 %v8383_v24  ;;  %v8386_v15 = vld [vmem:[#allocation8 + $0x100] sm:$0xff] }
 0x5c1   :  { %10015 = vst [vmem:[#allocation57_spill] sm:$0xff] %v8371_v51  ;;  %3421 = vmatpush.msrb.mxu1 %v8386_v15  ;;  %v8389_v51 = vld [vmem:[#allocation8 + $0x108] sm:$0xff] }
 0x5c2   :  { %10016 = vst [vmem:[#allocation68_spill] sm:$0xff] %v8374_v47  ;;  %3441 = vmatpush.msrb.mxu3 %v8389_v51  ;;  %v8392_v47 = vld [vmem:[#allocation8 + $0x110] sm:$0xff] }
 0x5c3   :  { %10017 = vst [vmem:[#allocation70_spill] sm:$0xff] %v8377_v22  ;;  %3461 = vmatpush.msrb.mxu0 %v8392_v47  ;;  %v8395_v22 = vld [vmem:[#allocation8 + $0x118] sm:$0xff] }
 0x5c4   :  { %10018 = vst [vmem:[#allocation69_spill] sm:$0xff] %v8380_v36  ;;  %3481 = vmatpush.msrb.mxu2 %v8395_v22  ;;  %v8398_v36 = vld [vmem:[#allocation8 + $0xe0] sm:$0xff] }
 0x5c5   :  { %10019 = vst [vmem:[#allocation72_spill] sm:$0xff] %v8383_v24  ;;  %3422 = vmatpush.msrb.mxu1 %v8398_v36  ;;  %v8401_v24 = vld [vmem:[#allocation8 + $0xe8] sm:$0xff] }
 0x5c6   :  { %10020 = vst [vmem:[#allocation71_spill] sm:$0xff] %v8386_v15  ;;  %3442 = vmatpush.msrb.mxu3 %v8401_v24  ;;  %v8404_v15 = vld [vmem:[#allocation8 + $0xf0] sm:$0xff] }
 0x5c7   :  { %10021 = vst [vmem:[#allocation73_spill] sm:$0xff] %v8389_v51  ;;  %3462 = vmatpush.msrb.mxu0 %v8404_v15  ;;  %v8407_v51 = vld [vmem:[#allocation8 + $0xf8] sm:$0xff] }
 0x5c8   :  { %10022 = vst [vmem:[#allocation74_spill] sm:$0xff] %v8392_v47  ;;  %3482 = vmatpush.msrb.mxu2 %v8407_v51  ;;  %v8410_v47 = vld [vmem:[#allocation8 + $0xc0] sm:$0xff] }
 0x5c9   :  { %10023 = vst [vmem:[#allocation75_spill] sm:$0xff] %v8395_v22  ;;  %3423 = vmatpush.msrb.mxu1 %v8410_v47  ;;  %v8413_v22 = vld [vmem:[#allocation8 + $0xc8] sm:$0xff] }
 0x5ca   :  { %10024 = vst [vmem:[#allocation76_spill] sm:$0xff] %v8398_v36  ;;  %3443 = vmatpush.msrb.mxu3 %v8413_v22  ;;  %v8416_v36 = vld [vmem:[#allocation8 + $0xd0] sm:$0xff] }
 0x5cb   :  { %10025 = vst [vmem:[#allocation77_spill] sm:$0xff] %v8401_v24  ;;  %3463 = vmatpush.msrb.mxu0 %v8416_v36  ;;  %v8419_v24 = vld [vmem:[#allocation8 + $0xd8] sm:$0xff] }
 0x5cc   :  { %10026 = vst [vmem:[#allocation78_spill] sm:$0xff] %v8404_v15  ;;  %3483 = vmatpush.msrb.mxu2 %v8419_v24  ;;  %v8422_v15 = vld [vmem:[#allocation8 + $0xa0] sm:$0xff] }
 0x5cd   :  { %10027 = vst [vmem:[#allocation79_spill] sm:$0xff] %v8407_v51  ;;  %3424 = vmatpush.msrb.mxu1 %v8422_v15  ;;  %v8425_v51 = vld [vmem:[#allocation8 + $0xa8] sm:$0xff] }
 0x5ce   :  { %10028 = vst [vmem:[#allocation80_spill] sm:$0xff] %v8410_v47  ;;  %3444 = vmatpush.msrb.mxu3 %v8425_v51  ;;  %v8428_v47 = vld [vmem:[#allocation8 + $0xb0] sm:$0xff] }
 0x5cf   :  { %10029 = vst [vmem:[#allocation81_spill] sm:$0xff] %v8413_v22  ;;  %3464 = vmatpush.msrb.mxu0 %v8428_v47  ;;  %v8431_v22 = vld [vmem:[#allocation8 + $0xb8] sm:$0xff] }
 0x5d0   :  { %10030 = vst [vmem:[#allocation82_spill] sm:$0xff] %v8416_v36  ;;  %3484 = vmatpush.msrb.mxu2 %v8431_v22  ;;  %v8434_v36 = vld [vmem:[#allocation8 + $0x80] sm:$0xff] }
 0x5d1   :  { %10031 = vst [vmem:[#allocation83_spill] sm:$0xff] %v8419_v24  ;;  %3425 = vmatpush.msrb.mxu1 %v8434_v36  ;;  %v8437_v24 = vld [vmem:[#allocation8 + $0x88] sm:$0xff] }
 0x5d2   :  { %10032 = vst [vmem:[#allocation84_spill] sm:$0xff] %v8422_v15  ;;  %3445 = vmatpush.msrb.mxu3 %v8437_v24  ;;  %v8440_v15 = vld [vmem:[#allocation8 + $0x90] sm:$0xff] }
 0x5d3   :  { %10033 = vst [vmem:[#allocation85_spill] sm:$0xff] %v8425_v51  ;;  %3465 = vmatpush.msrb.mxu0 %v8440_v15  ;;  %v8443_v51 = vld [vmem:[#allocation8 + $0x98] sm:$0xff] }
 0x5d4   :  { %10034 = vst [vmem:[#allocation86_spill] sm:$0xff] %v8428_v47  ;;  %3485 = vmatpush.msrb.mxu2 %v8443_v51  ;;  %v8446_v47 = vld [vmem:[#allocation8 + $0x60] sm:$0xff] }
 0x5d5   :  { %10035 = vst [vmem:[#allocation87_spill] sm:$0xff] %v8431_v22  ;;  %3426 = vmatpush.msrb.mxu1 %v8446_v47  ;;  %v8449_v22 = vld [vmem:[#allocation8 + $0x68] sm:$0xff] }
 0x5d6   :  { %10036 = vst [vmem:[#allocation88_spill] sm:$0xff] %v8434_v36  ;;  %3446 = vmatpush.msrb.mxu3 %v8449_v22  ;;  %v8452_v36 = vld [vmem:[#allocation8 + $0x70] sm:$0xff] }
 0x5d7   :  { %10037 = vst [vmem:[#allocation89_spill] sm:$0xff] %v8437_v24  ;;  %3466 = vmatpush.msrb.mxu0 %v8452_v36  ;;  %v8455_v24 = vld [vmem:[#allocation8 + $0x78] sm:$0xff] }
 0x5d8   :  { %10038 = vst [vmem:[#allocation90_spill] sm:$0xff] %v8440_v15  ;;  %3486 = vmatpush.msrb.mxu2 %v8455_v24  ;;  %v8458_v15 = vld [vmem:[#allocation8 + $0x40] sm:$0xff] }
 0x5d9   :  { %10039 = vst [vmem:[#allocation91_spill] sm:$0xff] %v8443_v51  ;;  %3427 = vmatpush.msrb.mxu1 %v8458_v15  ;;  %v8461_v51 = vld [vmem:[#allocation8 + $0x48] sm:$0xff] }
 0x5da   :  { %10040 = vst [vmem:[#allocation92_spill] sm:$0xff] %v8446_v47  ;;  %3447 = vmatpush.msrb.mxu3 %v8461_v51  ;;  %v8464_v47 = vld [vmem:[#allocation8 + $0x50] sm:$0xff] }
 0x5db   :  { %10041 = vst [vmem:[#allocation93_spill] sm:$0xff] %v8449_v22  ;;  %3467 = vmatpush.msrb.mxu0 %v8464_v47  ;;  %v8467_v22 = vld [vmem:[#allocation8 + $0x58] sm:$0xff] }
 0x5dc   :  { %10042 = vst [vmem:[#allocation94_spill] sm:$0xff] %v8452_v36  ;;  %3487 = vmatpush.msrb.mxu2 %v8467_v22  ;;  %v8470_v36 = vld [vmem:[#allocation8 + $0x20] sm:$0xff] }
 0x5dd   :  { %10043 = vst [vmem:[#allocation95_spill] sm:$0xff] %v8455_v24  ;;  %3428 = vmatpush.msrb.mxu1 %v8470_v36  ;;  %v8473_v24 = vld [vmem:[#allocation8 + $0x28] sm:$0xff] }
 0x5de   :  { %10044 = vst [vmem:[#allocation96_spill] sm:$0xff] %v8458_v15  ;;  %3448 = vmatpush.msrb.mxu3 %v8473_v24  ;;  %v8476_v15 = vld [vmem:[#allocation8 + $0x30] sm:$0xff] }
 0x5df   :  { %10045 = vst [vmem:[#allocation97_spill] sm:$0xff] %v8461_v51  ;;  %3468 = vmatpush.msrb.mxu0 %v8476_v15  ;;  %v8479_v51 = vld [vmem:[#allocation8 + $0x38] sm:$0xff] }
 0x5e0   :  { %10046 = vst [vmem:[#allocation98_spill] sm:$0xff] %v8464_v47  ;;  %3488 = vmatpush.msrb.mxu2 %v8479_v51  ;;  %v8482_v47 = vld [vmem:[#allocation8] sm:$0xff] }
 0x5e1   :  { %10047 = vst [vmem:[#allocation99_spill] sm:$0xff] %v8467_v22  ;;  %3429 = vmatpush.msrb.mxu1 %v8482_v47  ;;  %v8485_v22 = vld [vmem:[#allocation8 + $0x8] sm:$0xff] }
 0x5e2   :  { %10048 = vst [vmem:[#allocation100_spill] sm:$0xff] %v8470_v36  ;;  %3449 = vmatpush.msrb.mxu3 %v8485_v22  ;;  %v8488_v36 = vld [vmem:[#allocation8 + $0x10] sm:$0xff] }
 0x5e3   :  { %10049 = vst [vmem:[#allocation101_spill] sm:$0xff] %v8473_v24  ;;  %3469 = vmatpush.msrb.mxu0 %v8488_v36  ;;  %v8491_v24 = vld [vmem:[#allocation8 + $0x18] sm:$0xff] }
 0x5e4   :  { %10050 = vst [vmem:[#allocation102_spill] sm:$0xff] %v8476_v15  ;;  %3489 = vmatpush.msrb.mxu2 %v8491_v24  ;;  %v2942_v15 = vld [vmem:[#allocation2 + $0x45] ss:$8 sm:$0xf0] }
 0x5e5   :  { %10051 = vst [vmem:[#allocation103_spill] sm:$0xff] %v8479_v51  ;;  %v8494_v51 = vor.u32 %v2942_v15, %v2941_v50  ;;  %v2937_v40 = vld [vmem:[#allocation2 + $0x5] ss:$8 sm:$0xf] }
 0x5e6   :  { %10052 = vst [vmem:[#allocation104_spill] sm:$0xff] %v8482_v47  ;;  %v8496_v19 = vor.u32 %v2938_v5, %v2937_v40 }
 0x5e7   :  { %10053 = vst [vmem:[#allocation105_spill] sm:$0xff] %v8485_v22  ;;  %v2962_v47 = vperm.slane %v8494_v51, 0  ;;  %v2963_v18 = vperm.slane %v8494_v51, 1  ;;  %v2967_v44 = vperm.slane %v8494_v51, 5 }
 0x5e8   :  { %10054 = vst [vmem:[#allocation106_spill] sm:$0xff] %v8488_v36  ;;  %v2945_v22 = vperm.slane %v8496_v19, 0  ;;  %v2946_v29 = vperm.slane %v8496_v19, 1  ;;  %v2948_v50 = vperm.slane %v8496_v19, 3 }
 0x5e9   :  { %10055 = vst [vmem:[#allocation107_spill] sm:$0xff] %v8491_v24  ;;  %v2965_v24 = vperm.slane %v8494_v51, 3 }
 0x5ea   :  { %v2978_v16 = vsel %vm1257_vm4, %v2945_v22, %v2962_v47  ;;  %v2979_v40 = vsel %vm1257_vm4, %v2946_v29, %v2963_v18  ;;  %v2964_v18 = vperm.slane %v8494_v51, 2 }
 0x5eb   :  { %v2981_v27 = vsel %vm1257_vm4, %v2948_v50, %v2965_v24 }
 0x5ff   :  { %v3003_v1 = vpop.f32.mrf.mxu1 }
 0x600   :  { %v3066_v36 = vadd.f32 %v3003_v1, %v2978_v16  ;;  %v3043_v24 = vpop.f32.mrf.mxu0 }
 0x602   :  { %v4228_v26 = vmul.f32 -1.442695, %v3066_v36 }
 0x604   :  { %4419 = vpow2.f32 %v4228_v26 }
 0x605   :  { %v3023_v5 = vpop.f32.mrf.mxu3 }
 0x606   :  { %v3067_v15 = vadd.f32 %v3023_v5, %v2979_v40  ;;  %v3063_v9 = vpop.f32.mrf.mxu2 }
 0x607   :  { %v3069_v22 = vadd.f32 %v3063_v9, %v2981_v27  ;;  %v2947_v27 = vperm.slane %v8496_v19, 2 }
 0x608   :  { %v4229_v47 = vmul.f32 -1.442695, %v3067_v15 }
 0x609   :  { %v4230_v1 = vmul.f32 -1.442695, %v3069_v22  ;;  %v2980_v50 = vsel %vm1257_vm4, %v2947_v27, %v2964_v18 }
 0x60a   :  { %v4420_v16 = vpop.eup %4419  ;;  %4421 = vpow2.f32 %v4229_v47  ;;  %v3068_v15 = vadd.f32 %v3043_v24, %v2980_v50 }
 0x60b   :  { %v3157_v36 = vadd.f32 1.0, %v4420_v16  ;;  %4423 = vpow2.f32 %v4230_v1  ;;  %v2966_v16 = vperm.slane %v8494_v51, 4 }
 0x60d   :  { %4425 = vrcp.f32 %v3157_v36  ;;  %v3169_v47 = vand.u32 2147483648, %v3157_v36  ;;  %vm3163_vm6 = vweird.f32 %v3157_v36 }
 0x610   :  { %v4422_v2 = vpop.eup %4421 }
 0x611   :  { %v4424_v11 = vpop.eup %4423  ;;  %v3176_v26 = vadd.f32 1.0, %v4422_v2 }
 0x612   :  { %v8507_v63 = vadd.f32 1.0, %v4424_v11 }
 0x613   :  { %v4426_v21 = vpop.eup %4425  ;;  %4427 = vrcp.f32 %v3176_v26  ;;  %v3188_v18 = vand.u32 2147483648, %v3176_v26  ;;  %v3186_v50 = vand.u32 2147483647, %v3176_v26  ;;  %vm3182_vm10 = vweird.f32 %v3176_v26 }
 0x614   :  { %v3159_v29 = vmul.f32 %v4426_v21, %v3157_v36  ;;  %4429 = vrcp.f32 %v8507_v63  ;;  %vm3164_vm5 = vweird.f32 %v4426_v21  ;;  %vm3202_vm14 = vweird.f32 %v8507_v63 }
 0x615   :  { %vm8518_vm7 = vmor %vm3163_vm6, %vm3164_vm5  ;;  %4431 = vtanh.f32 %v3068_v15  ;;  %v3189_v15 = vor.u32 1.1754944e-38, %v3188_v18  ;;  %vm3187_vm12 = vcmp.eq.f32.partialorder %v3186_v50, 8.507059e+37 }
 0x616   :  { %v3160_v9 = vsub.f32 1.0, %v3159_v29  ;;  %v3167_v29 = vand.u32 2147483647, %v3157_v36 }
 0x618   :  { %v3161_v40 = vmul.f32 %v4426_v21, %v3160_v9  ;;  %v2949_v9 = vperm.slane %v8496_v19, 4  ;;  %vm3168_vm9 = vcmp.eq.f32.partialorder %v3167_v29, 8.507059e+37 }
 0x619   :  { %v4428_v5 = vpop.eup %4427 }
 0x61a   :  { %v8513_v22 = vpop.eup %4429  ;;  %v3162_v11 = vadd.f32 %v4426_v21, %v3161_v40  ;;  %v3178_v2 = vmul.f32 %v4428_v5, %v3176_v26  ;;  %vm3183_vm8 = vweird.f32 %v4428_v5  ;;  %v3170_v40 = vor.u32 1.1754944e-38, %v3169_v47 }
 0x61b   :  { %v3198_v1 = vmul.f32 %v8513_v22, %v8507_v63  ;;  %v2982_v3 = vsel %vm1257_vm4, %v2949_v9, %v2966_v16  ;;  %vm3184_vm11 = vmor %vm3182_vm10, %vm3183_vm8  ;;  %vm3203_vm13 = vweird.f32 %v8513_v22 }
 0x61c   :  { %v3179_v25 = vsub.f32 1.0, %v3178_v2  ;;  %v3166_v27 = vsel %vm8518_vm7, %v4426_v21, %v3162_v11  ;;  %v4432_v21 = vpop.eup %4431  ;;  %vm3204_vm15 = vmor %vm3202_vm14, %vm3203_vm13 }
 0x61d   :  { %v3199_v48 = vsub.f32 1.0, %v3198_v1  ;;  %v3171_v10 = vsel %vm3168_vm9, %v3170_v40, %v3166_v27  ;;  %v2950_v1 = vperm.slane %v8496_v19, 5 }
 0x61e   :  { %v3180_v24 = vmul.f32 %v4428_v5, %v3179_v25  ;;  %v2969_v25 = vperm.slane %v8494_v51, 7  ;;  %v3213_v16 = vmul.f32 %v4432_v21, %v3171_v10  ;;  %v3208_v10 = vand.u32 2147483648, %v8507_v63 }
 0x61f   :  { %v3200_v47 = vmul.f32 %v8513_v22, %v3199_v48  ;;  %v2983_v29 = vsel %vm1257_vm4, %v2950_v1, %v2967_v44 }
 0x620   :  { %v3181_v2 = vadd.f32 %v4428_v5, %v3180_v24  ;;  %v3206_v24 = vand.u32 2147483647, %v8507_v63 }
 0x621   :  { %v3201_v48 = vadd.f32 %v8513_v22, %v3200_v47 }
 0x622   :  { %v3087_v36 = vpop.f32.mrf.mxu1  ;;  %v3185_v38 = vsel %vm3184_vm11, %v4428_v5, %v3181_v2  ;;  %v3209_v2 = vor.u32 1.1754944e-38, %v3208_v10  ;;  %vm3207_vm0 = vcmp.eq.f32.partialorder %v3206_v24, 8.507059e+37  ;;  %v10071_v10 = vld [vmem:[#allocation28_spill] sm:$0xff]  ;;  %v10074_v24 = vld [vmem:[#allocation33_spill] sm:$0xff] }
 0x623   :  { %v3150_v0 = vadd.f32 %v3087_v36, %v2982_v3  ;;  %v3190_v11 = vsel %vm3187_vm12, %v3189_v15, %v3185_v38  ;;  %v2952_v3 = vperm.slane %v8496_v19, 7  ;;  %v3205_v36 = vsel %vm3204_vm15, %v8513_v22, %v3201_v48 }
 0x624   :  { %v3212_v26 = vmul.f32 %v3190_v11, %v7842_v17 }
 0x625   :  { %v4231_v34 = vmul.f32 -1.442695, %v3150_v0  ;;  %v2985_v0 = vsel %vm1257_vm4, %v2952_v3, %v2969_v25  ;;  %v3127_v3 = vpop.f32.mrf.mxu0 }
 0x626   :  { %v8534_v27 = vadd.f32 %v3213_v16, %v3212_v26  ;;  %v2968_v16 = vperm.slane %v8494_v51, 6  ;;  %v10063_v51 = vld [vmem:[#allocation17_spill] sm:$0xff] }
 0x627   :  { %4433 = vpow2.f32 %v4231_v34  ;;  %v3210_v34 = vsel %vm3207_vm0, %v3209_v2, %v3205_v36  ;;  %v10076_v36 = vld [vmem:[#allocation30_spill] sm:$0xff] }
 0x628   :  { %v3107_v18 = vpop.f32.mrf.mxu3  ;;  %4435 = vtanh.f32 %v8534_v27 }
 0x629   :  { %v3151_v5 = vadd.f32 %v3107_v18, %v2983_v29  ;;  %v3147_v9 = vpop.f32.mrf.mxu2  ;;  %v10065_v29 = vld [vmem:[#allocation14_spill] sm:$0xff]  ;;  %v10066_v18 = vld [vmem:[#allocation24_spill] sm:$0xff] }
 0x62a   :  { %v3153_v38 = vadd.f32 %v3147_v9, %v2985_v0  ;;  %v10069_v9 = vld [vmem:[#allocation22_spill] sm:$0xff] }
 0x62b   :  { %v4232_v17 = vmul.f32 -1.442695, %v3151_v5  ;;  %v10068_v5 = vld [vmem:[#allocation25_spill] sm:$0xff] }
 0x62c   :  { %v4233_v44 = vmul.f32 -1.442695, %v3153_v38  ;;  %v10070_v38 = vld [vmem:[#allocation29_spill] sm:$0xff] }
 0x62d   :  { %v4434_v50 = vpop.eup %4433  ;;  %4437 = vpow2.f32 %v4232_v17  ;;  %v10072_v17 = vld [vmem:[#allocation26_spill] sm:$0xff] }
 0x62e   :  { %v8542_v40 = vadd.f32 1.0, %v4434_v50  ;;  %4439 = vpow2.f32 %v4233_v44  ;;  %v4436_v15 = vpop.eup %4435  ;;  %v10073_v44 = vld [vmem:[#allocation15_spill] sm:$0xff] }
 0x62f   :  { %v3216_v25 = vmul.f32 %v4436_v15, %v3210_v34  ;;  %v10077_v15 = vld [vmem:[#allocation18_spill] sm:$0xff]  ;;  %v10078_v34 = vld [vmem:[#allocation37_spill] sm:$0xff] }
 0x630   :  { %4441 = vrcp.f32 %v8542_v40  ;;  %vm3226_vm2 = vweird.f32 %v8542_v40 }
 0x631   :  { %3346 = vmatmul.f32.vlgmr.msra.gmra.mxu1 %v3216_v25  ;;  %3366 = vmatmul.f32.vlgmr.msra.gmra.mxu3 %v3216_v25 }
 0x632   :  { %3386 = vmatmul.f32.vlgmr.msra.gmra.mxu0 %v3216_v25  ;;  %3406 = vmatmul.f32.vlgmr.msra.gmra.mxu2 %v3216_v25  ;;  %v10079_v25 = vld [vmem:[#allocation36_spill] sm:$0xff] }
 0x633   :  { %v4438_v21 = vpop.eup %4437  ;;  %3674 = vmatpush.msra.mxu1 %v7864_v4  ;;  %3694 = vmatpush.msra.mxu3 %v7870_v46  ;;  %v2951_v4 = vperm.slane %v8496_v19, 6 }
 0x634   :  { %v4440_v11 = vpop.eup %4439  ;;  %v8546_v47 = vadd.f32 1.0, %v4438_v21  ;;  %3714 = vmatpush.msra.mxu0 %v7880_v28  ;;  %3734 = vmatpush.msra.mxu2 %v7886_v33  ;;  %v10080_v21 = vld [vmem:[#allocation34_spill] sm:$0xff] }
 0x635   :  { %v8548_v63 = vadd.f32 1.0, %v4440_v11  ;;  %3675 = vmatpush.msra.mxu1 %v7892_v59  ;;  %3695 = vmatpush.msra.mxu3 %v7898_v60  ;;  %v2984_v46 = vsel %vm1257_vm4, %v2951_v4, %v2968_v16  ;;  %v10083_v16 = vld [vmem:[#allocation40_spill] sm:$0xff]  ;;  %v10085_v4 = vld [vmem:[#allocation27_spill] sm:$0xff] }
 0x636   :  { %v8550_v1 = vpop.eup %4441  ;;  %4443 = vrcp.f32 %v8546_v47  ;;  %3715 = vmatpush.msra.mxu0 %v7905_v52  ;;  %3735 = vmatpush.msra.mxu2 %v7911_v49  ;;  %v3152_v59 = vadd.f32 %v3127_v3, %v2984_v46  ;;  %vm3245_vm7 = vweird.f32 %v8546_v47  ;;  %v10086_v3 = vld [vmem:[#allocation45_spill] sm:$0xff]  ;;  %v10087_v46 = vld [vmem:[#allocation44_spill] sm:$0xff] }
 0x637   :  { %v3222_v22 = vmul.f32 %v8550_v1, %v8542_v40  ;;  %4445 = vrcp.f32 %v8548_v63  ;;  %3676 = vmatpush.msra.mxu1 %v7917_v42  ;;  %3696 = vmatpush.msra.mxu3 %v7923_v13  ;;  %vm3227_vm1 = vweird.f32 %v8550_v1  ;;  %v3232_v42 = vand.u32 2147483648, %v8542_v40 }
 0x638   :  { %3716 = vmatpush.msra.mxu0 %v7931_v35  ;;  %3736 = vmatpush.msra.mxu2 %v7937_v23  ;;  %v3230_v35 = vand.u32 2147483647, %v8542_v40  ;;  %vm8590_vm3 = vmor %vm3226_vm2, %vm3227_vm1  ;;  %4447 = vtanh.f32 %v3152_v59  ;;  %v3271_v0 = vand.u32 2147483648, %v8548_v63  ;;  %vm3265_vm11 = vweird.f32 %v8548_v63  ;;  %v10075_v40 = vld [vmem:[#allocation32_spill] sm:$0xff]  ;;  %v10090_v59 = vld [vmem:[#allocation49_spill] sm:$0xff] }
 0x639   :  { %v3223_v26 = vsub.f32 1.0, %v3222_v22  ;;  %3677 = vmatpush.msra.mxu1 %v7945_v14  ;;  %3697 = vmatpush.msra.mxu3 %v7951_v6  ;;  %v3251_v6 = vand.u32 2147483648, %v8546_v47  ;;  %v3269_v48 = vand.u32 2147483647, %v8548_v63  ;;  %v10098_v14 = vld [vmem:[#allocation39_spill] sm:$0xff] }
 0x63a   :  { %3717 = vmatpush.msra.mxu0 %v7963_v55  ;;  %3737 = vmatpush.msra.mxu2 %v7969_v12  ;;  %vm3231_vm6 = vcmp.eq.f32.partialorder %v3230_v35, 8.507059e+37  ;;  %v3272_v2 = vor.u32 1.1754944e-38, %v3271_v0  ;;  %v10096_v35 = vld [vmem:[#allocation56_spill] sm:$0xff]  ;;  %v10124_v0 = vld [vmem:[#allocation77_spill] sm:$0xff] }
 0x63b   :  { %v3224_v28 = vmul.f32 %v8550_v1, %v3223_v26  ;;  %3678 = vmatpush.msra.mxu1 %v7978_v37  ;;  %3698 = vmatpush.msra.mxu3 %v7984_v57  ;;  %v3249_v37 = vand.u32 2147483647, %v8546_v47  ;;  %v3233_v57 = vor.u32 1.1754944e-38, %v3232_v42  ;;  %vm3270_vm13 = vcmp.eq.f32.partialorder %v3269_v48, 8.507059e+37  ;;  %v10084_v26 = vld [vmem:[#allocation38_spill] sm:$0xff]  ;;  %v10094_v42 = vld [vmem:[#allocation53_spill] sm:$0xff] }
 0x63c   :  { %v4444_v33 = vpop.eup %4443  ;;  %3718 = vmatpush.msra.mxu0 %v7992_v39  ;;  %3738 = vmatpush.msra.mxu2 %v7998_v32  ;;  %v10127_v48 = vld [vmem:[#allocation80_spill] sm:$0xff] }
 0x63d   :  { %v8574_v60 = vpop.eup %4445  ;;  %v3225_v52 = vadd.f32 %v8550_v1, %v3224_v28  ;;  %v3241_v49 = vmul.f32 %v4444_v33, %v8546_v47  ;;  %3679 = vmatpush.msra.mxu1 %v8011_v43  ;;  %3699 = vmatpush.msra.mxu3 %v8017_v56  ;;  %vm3246_vm5 = vweird.f32 %v4444_v33  ;;  %v3252_v56 = vor.u32 1.1754944e-38, %v3251_v6  ;;  %v10088_v28 = vld [vmem:[#allocation42_spill] sm:$0xff]  ;;  %v10099_v6 = vld [vmem:[#allocation59_spill] sm:$0xff] }
 0x63e   :  { %v3261_v13 = vmul.f32 %v8574_v60, %v8548_v63  ;;  %3719 = vmatpush.msra.mxu0 %v8029_v31  ;;  %3739 = vmatpush.msra.mxu2 %v8035_v54  ;;  %vm3247_vm8 = vmor %vm3245_vm7, %vm3246_vm5  ;;  %vm3250_vm9 = vcmp.eq.f32.partialorder %v3249_v37, 8.507059e+37  ;;  %v4448_v54 = vpop.eup %4447  ;;  %vm3266_vm10 = vweird.f32 %v8574_v60  ;;  %v10081_v63 = vld [vmem:[#allocation23_spill] sm:$0xff] }
 0x63f   :  { %v3242_v23 = vsub.f32 1.0, %v3241_v49  ;;  %v3229_v55 = vsel %vm8590_vm3, %v8550_v1, %v3225_v52  ;;  %3680 = vmatpush.msra.mxu1 %v8041_v62  ;;  %3700 = vmatpush.msra.mxu3 %v8047_v20  ;;  %vm3267_vm12 = vmor %vm3265_vm11, %vm3266_vm10  ;;  %v10082_v1 = vld [vmem:[#allocation41_spill] sm:$0xff]  ;;  %v10092_v52 = vld [vmem:[#allocation52_spill] sm:$0xff] }
 0x640   :  { %v3262_v39 = vsub.f32 1.0, %v3261_v13  ;;  %3720 = vmatpush.msra.mxu0 %v8055_v53  ;;  %3740 = vmatpush.msra.mxu2 %v8061_v58  ;;  %v3234_v43 = vsel %vm3231_vm6, %v3233_v57, %v3229_v55  ;;  %v10060_v58 = vld [vmem:[#allocation20_spill] sm:$0xff]  ;;  %v10093_v49 = vld [vmem:[#allocation46_spill] sm:$0xff]  ;;  %v10095_v13 = vld [vmem:[#allocation35_spill] sm:$0xff] }
 0x641   :  { %v3243_v12 = vmul.f32 %v4444_v33, %v3242_v23  ;;  %3681 = vmatpush.msra.mxu1 %v8069_v45  ;;  %3701 = vmatpush.msra.mxu3 %v8075_v30  ;;  %v3276_v53 = vmul.f32 %v4448_v54, %v3234_v43  ;;  %v10061_v45 = vld [vmem:[#allocation16_spill] sm:$0xff]  ;;  %v10062_v30 = vld [vmem:[#allocation21_spill] sm:$0xff]  ;;  %v10097_v23 = vld [vmem:[#allocation50_spill] sm:$0xff] }
 0x642   :  { %3721 = vmatpush.msra.mxu0 %v8082_v61  ;;  %3741 = vmatpush.msra.mxu2 %v8088_v7  ;;  %v3263_v20 = vmul.f32 %v8574_v60, %v3262_v39  ;;  %v10064_v61 = vld [vmem:[#allocation13_spill] sm:$0xff]  ;;  %v10100_v55 = vld [vmem:[#allocation55_spill] sm:$0xff]  ;;  %v10103_v57 = vld [vmem:[#allocation62_spill] sm:$0xff] }
 0x643   :  { %v3244_v32 = vadd.f32 %v4444_v33, %v3243_v12  ;;  %3682 = vmatpush.msra.mxu1 %v8095_v41  ;;  %3702 = vmatpush.msra.mxu3 %v8101_v8  ;;  %v10067_v8 = vld [vmem:[#allocation19_spill] sm:$0xff]  ;;  %v10101_v12 = vld [vmem:[#allocation60_spill] sm:$0xff]  ;;  %v10104_v39 = vld [vmem:[#allocation58_spill] sm:$0xff] }
 0x644   :  { %3722 = vmatpush.msra.mxu0 %v10061_v45  ;;  %3742 = vmatpush.msra.mxu2 %v10062_v30  ;;  %v3264_v41 = vadd.f32 %v8574_v60, %v3263_v20  ;;  %v10102_v37 = vld [vmem:[#allocation43_spill] sm:$0xff]  ;;  %v10115_v45 = vld [vmem:[#allocation68_spill] sm:$0xff]  ;;  %v10116_v30 = vld [vmem:[#allocation70_spill] sm:$0xff] }
 0x645   :  { %v3248_v31 = vsel %vm3247_vm8, %v4444_v33, %v3244_v32  ;;  %3683 = vmatpush.msra.mxu1 %v10063_v51  ;;  %3703 = vmatpush.msra.mxu3 %v10064_v61  ;;  %v10089_v33 = vld [vmem:[#allocation31_spill] sm:$0xff]  ;;  %v10117_v51 = vld [vmem:[#allocation69_spill] sm:$0xff]  ;;  %v10118_v61 = vld [vmem:[#allocation72_spill] sm:$0xff] }
 0x646   :  { %v3253_v62 = vsel %vm3250_vm9, %v3252_v56, %v3248_v31  ;;  %3723 = vmatpush.msra.mxu0 %v10065_v29  ;;  %3743 = vmatpush.msra.mxu2 %v10066_v18  ;;  %v3268_v50 = vsel %vm3267_vm12, %v8574_v60, %v3264_v41  ;;  %v10091_v60 = vld [vmem:[#allocation48_spill] sm:$0xff]  ;;  %v10105_v32 = vld [vmem:[#allocation63_spill] sm:$0xff]  ;;  %v10107_v56 = vld [vmem:[#allocation61_spill] sm:$0xff] }
 0x647   :  { %v3275_v19 = vmul.f32 %v3253_v62, %v10060_v58  ;;  %3684 = vmatpush.msra.mxu1 %v10067_v8  ;;  %3704 = vmatpush.msra.mxu3 %v10068_v5  ;;  %v3273_v47 = vsel %vm3270_vm13, %v3272_v2, %v3268_v50  ;;  %v10106_v43 = vld [vmem:[#allocation47_spill] sm:$0xff]  ;;  %v10108_v31 = vld [vmem:[#allocation65_spill] sm:$0xff]  ;;  %v10110_v62 = vld [vmem:[#allocation64_spill] sm:$0xff] }
 0x648   :  { %3724 = vmatpush.msra.mxu0 %v10069_v9  ;;  %3744 = vmatpush.msra.mxu2 %v10070_v38  ;;  %v10109_v54 = vld [vmem:[#allocation51_spill] sm:$0xff]  ;;  %v10113_v58 = vld [vmem:[#allocation66_spill] sm:$0xff]  ;;  %v10120_v18 = vld [vmem:[#allocation73_spill] sm:$0xff] }
 0x649   :  { %v8620_v7 = vadd.f32 %v3276_v53, %v3275_v19  ;;  %3685 = vmatpush.msra.mxu1 %v10071_v10  ;;  %3705 = vmatpush.msra.mxu3 %v10072_v17  ;;  %v10111_v20 = vld [vmem:[#allocation67_spill] sm:$0xff]  ;;  %v10112_v53 = vld [vmem:[#allocation54_spill] sm:$0xff]  ;;  %v10114_v19 = vld [vmem:[#allocation57_spill] sm:$0xff] }
 0x64a   :  { %3725 = vmatpush.msra.mxu0 %v10073_v44  ;;  %3745 = vmatpush.msra.mxu2 %v10074_v24  ;;  %v10119_v29 = vld [vmem:[#allocation71_spill] sm:$0xff]  ;;  %v10121_v41 = vld [vmem:[#allocation74_spill] sm:$0xff]  ;;  %v10123_v5 = vld [vmem:[#allocation76_spill] sm:$0xff] }
 0x64b   :  { %4449 = vtanh.f32 %v8620_v7  ;;  %3686 = vmatpush.msra.mxu1 %v10075_v40  ;;  %3706 = vmatpush.msra.mxu3 %v10076_v36  ;;  %v10122_v8 = vld [vmem:[#allocation75_spill] sm:$0xff]  ;;  %v10125_v9 = vld [vmem:[#allocation78_spill] sm:$0xff]  ;;  %v10128_v10 = vld [vmem:[#allocation81_spill] sm:$0xff] }
 0x64c   :  { %3726 = vmatpush.msra.mxu0 %v10077_v15  ;;  %3746 = vmatpush.msra.mxu2 %v10078_v34  ;;  %v10126_v38 = vld [vmem:[#allocation79_spill] sm:$0xff]  ;;  %v10129_v17 = vld [vmem:[#allocation82_spill] sm:$0xff]  ;;  %v10131_v24 = vld [vmem:[#allocation84_spill] sm:$0xff] }
 0x64d   :  { %3687 = vmatpush.msra.mxu1 %v10079_v25  ;;  %3707 = vmatpush.msra.mxu3 %v10080_v21  ;;  %v10130_v44 = vld [vmem:[#allocation83_spill] sm:$0xff]  ;;  %v10132_v50 = vld [vmem:[#allocation85_spill] sm:$0xff]  ;;  %v10133_v40 = vld [vmem:[#allocation86_spill] sm:$0xff] }
 0x64e   :  { %3727 = vmatpush.msra.mxu0 %v10081_v63  ;;  %3747 = vmatpush.msra.mxu2 %v10082_v1  ;;  %v10134_v36 = vld [vmem:[#allocation87_spill] sm:$0xff]  ;;  %v10135_v2 = vld [vmem:[#allocation88_spill] sm:$0xff]  ;;  %v10136_v15 = vld [vmem:[#allocation89_spill] sm:$0xff] }
 0x64f   :  { %3688 = vmatpush.msra.mxu1 %v10083_v16  ;;  %3708 = vmatpush.msra.mxu3 %v10084_v26  ;;  %v10137_v34 = vld [vmem:[#allocation90_spill] sm:$0xff]  ;;  %v10138_v25 = vld [vmem:[#allocation91_spill] sm:$0xff]  ;;  %v10139_v21 = vld [vmem:[#allocation92_spill] sm:$0xff] }
 0x650   :  { %3728 = vmatpush.msra.mxu0 %v10085_v4  ;;  %3748 = vmatpush.msra.mxu2 %v10086_v3  ;;  %v10142_v63 = vld [vmem:[#allocation95_spill] sm:$0xff]  ;;  %v10143_v1 = vld [vmem:[#allocation96_spill] sm:$0xff]  ;;  %v10145_v16 = vld [vmem:[#allocation98_spill] sm:$0xff] }
 0x651   :  { %v4450_v11 = vpop.eup %4449  ;;  %3689 = vmatpush.msra.mxu1 %v10087_v46  ;;  %3709 = vmatpush.msra.mxu3 %v10088_v28  ;;  %v10146_v26 = vld [vmem:[#allocation99_spill] sm:$0xff]  ;;  %v10147_v4 = vld [vmem:[#allocation100_spill] sm:$0xff]  ;;  %v10148_v3 = vld [vmem:[#allocation101_spill] sm:$0xff] }
 0x652   :  { %v3279_v22 = vmul.f32 %v4450_v11, %v3273_v47  ;;  %3729 = vmatpush.msra.mxu0 %v10089_v33  ;;  %3749 = vmatpush.msra.mxu2 %v10090_v59  ;;  %v10140_v11 = vld [vmem:[#allocation93_spill] sm:$0xff]  ;;  %v10141_v47 = vld [vmem:[#allocation94_spill] sm:$0xff]  ;;  %v10150_v28 = vld [vmem:[#allocation103_spill] sm:$0xff] }
 0x653   :  { %v10149_v46 = vld [vmem:[#allocation102_spill] sm:$0xff]  ;;  %v10151_v33 = vld [vmem:[#allocation104_spill] sm:$0xff]  ;;  %v10152_v59 = vld [vmem:[#allocation105_spill] sm:$0xff] }
 0x654   :  { %3430 = vmatmul.f32.vlgmr.msrb.gmra.mxu1 %v3279_v22  ;;  %3450 = vmatmul.f32.vlgmr.msrb.gmra.mxu3 %v3279_v22 }
 0x655   :  { %3470 = vmatmul.f32.vlgmr.msrb.gmra.mxu0 %v3279_v22  ;;  %3490 = vmatmul.f32.vlgmr.msrb.gmra.mxu2 %v3279_v22  ;;  %v10144_v22 = vld [vmem:[#allocation97_spill] sm:$0xff] }
 0x656   :  { %3758 = vmatpush.msrb.mxu1 %v10091_v60  ;;  %3778 = vmatpush.msrb.mxu3 %v10092_v52  ;;  %v10153_v60 = vld [vmem:[#allocation106_spill] sm:$0xff]  ;;  %v10154_v52 = vld [vmem:[#allocation107_spill] sm:$0xff] }
 0x657   :  { %3798 = vmatpush.msrb.mxu0 %v10093_v49  ;;  %3818 = vmatpush.msrb.mxu2 %v10094_v42  ;;  %v3286_v49 = vld [vmem:[#allocation2 + $0x46] ss:$8 sm:$0xf0] }
 0x658   :  { %3759 = vmatpush.msrb.mxu1 %v10095_v13  ;;  %3779 = vmatpush.msrb.mxu3 %v10096_v35  ;;  %v3285_v42 = vld [vmem:[#allocation2 + $0x46] ss:$8 sm:$0xf] }
 0x659   :  { %3799 = vmatpush.msrb.mxu0 %v10097_v23  ;;  %3819 = vmatpush.msrb.mxu2 %v10098_v14  ;;  %v3282_v13 = vld [vmem:[#allocation2 + $0x6] ss:$8 sm:$0xf0]  ;;  %v8719_v35 = vor.u32 %v3286_v49, %v3285_v42 }
 0x65a   :  { %3760 = vmatpush.msrb.mxu1 %v10099_v6  ;;  %3780 = vmatpush.msrb.mxu3 %v10100_v55  ;;  %v3281_v23 = vld [vmem:[#allocation2 + $0x6] ss:$8 sm:$0xf] }
 0x65b   :  { %3800 = vmatpush.msrb.mxu0 %v10101_v12  ;;  %3820 = vmatpush.msrb.mxu2 %v10102_v37  ;;  %v8721_v14 = vor.u32 %v3282_v13, %v3281_v23  ;;  %v3306_v6 = vperm.slane %v8719_v35, 0  ;;  %v3311_v49 = vperm.slane %v8719_v35, 5  ;;  %v3313_v23 = vperm.slane %v8719_v35, 7 }
 0x65c   :  { %3761 = vmatpush.msrb.mxu1 %v10103_v57  ;;  %3781 = vmatpush.msrb.mxu3 %v10104_v39  ;;  %v3307_v39 = vperm.slane %v8719_v35, 1 }
 0x65d   :  { %3801 = vmatpush.msrb.mxu0 %v10105_v32  ;;  %3821 = vmatpush.msrb.mxu2 %v10106_v43  ;;  %v3289_v55 = vperm.slane %v8721_v14, 0  ;;  %v3309_v43 = vperm.slane %v8719_v35, 3 }
 0x65e   :  { %3762 = vmatpush.msrb.mxu1 %v10107_v56  ;;  %3782 = vmatpush.msrb.mxu3 %v10108_v31  ;;  %v3290_v56 = vperm.slane %v8721_v14, 1  ;;  %v3292_v31 = vperm.slane %v8721_v14, 3 }
 0x65f   :  { %3802 = vmatpush.msrb.mxu0 %v10109_v54  ;;  %3822 = vmatpush.msrb.mxu2 %v10110_v62  ;;  %v3322_v12 = vsel %vm1257_vm4, %v3289_v55, %v3306_v6 }
 0x660   :  { %3763 = vmatpush.msrb.mxu1 %v10111_v20  ;;  %3783 = vmatpush.msrb.mxu3 %v10112_v53  ;;  %v3323_v54 = vsel %vm1257_vm4, %v3290_v56, %v3307_v39  ;;  %v3325_v53 = vsel %vm1257_vm4, %v3292_v31, %v3309_v43 }
 0x661   :  { %3803 = vmatpush.msrb.mxu0 %v10113_v58  ;;  %3823 = vmatpush.msrb.mxu2 %v10114_v19 }
 0x662   :  { %3764 = vmatpush.msrb.mxu1 %v10115_v45  ;;  %3784 = vmatpush.msrb.mxu3 %v10116_v30 }
 0x663   :  { %3804 = vmatpush.msrb.mxu0 %v10117_v51  ;;  %3824 = vmatpush.msrb.mxu2 %v10118_v61 }
 0x664   :  { %3765 = vmatpush.msrb.mxu1 %v10119_v29  ;;  %3785 = vmatpush.msrb.mxu3 %v10120_v18 }
 0x665   :  { %3805 = vmatpush.msrb.mxu0 %v10121_v41  ;;  %3825 = vmatpush.msrb.mxu2 %v10122_v8 }
 0x666   :  { %3766 = vmatpush.msrb.mxu1 %v10123_v5  ;;  %3786 = vmatpush.msrb.mxu3 %v10124_v0 }
 0x667   :  { %3806 = vmatpush.msrb.mxu0 %v10125_v9  ;;  %3826 = vmatpush.msrb.mxu2 %v10126_v38  ;;  %v3308_v9 = vperm.slane %v8719_v35, 2 }
 0x668   :  { %3767 = vmatpush.msrb.mxu1 %v10127_v48  ;;  %3787 = vmatpush.msrb.mxu3 %v10128_v10  ;;  %v3291_v48 = vperm.slane %v8721_v14, 2 }
 0x669   :  { %3807 = vmatpush.msrb.mxu0 %v10129_v17  ;;  %3827 = vmatpush.msrb.mxu2 %v10130_v44 }
 0x66a   :  { %3768 = vmatpush.msrb.mxu1 %v10131_v24  ;;  %3788 = vmatpush.msrb.mxu3 %v10132_v50  ;;  %v3324_v17 = vsel %vm1257_vm4, %v3291_v48, %v3308_v9 }
 0x66b   :  { %3808 = vmatpush.msrb.mxu0 %v10133_v40  ;;  %3828 = vmatpush.msrb.mxu2 %v10134_v36 }
 0x66c   :  { %3769 = vmatpush.msrb.mxu1 %v10135_v2  ;;  %3789 = vmatpush.msrb.mxu3 %v10136_v15 }
 0x66d   :  { %3809 = vmatpush.msrb.mxu0 %v10137_v34  ;;  %3829 = vmatpush.msrb.mxu2 %v10138_v25  ;;  %v3310_v25 = vperm.slane %v8719_v35, 4 }
 0x66e   :  { %3770 = vmatpush.msrb.mxu1 %v10139_v21  ;;  %3790 = vmatpush.msrb.mxu3 %v10140_v11 }
 0x66f   :  { %3810 = vmatpush.msrb.mxu0 %v10141_v47  ;;  %3830 = vmatpush.msrb.mxu2 %v10142_v63 }
 0x670   :  { %3771 = vmatpush.msrb.mxu1 %v10143_v1  ;;  %3791 = vmatpush.msrb.mxu3 %v10144_v22  ;;  %v3293_v1 = vperm.slane %v8721_v14, 4 }
 0x671   :  { %3811 = vmatpush.msrb.mxu0 %v10145_v16  ;;  %3831 = vmatpush.msrb.mxu2 %v10146_v26 }
 0x672   :  { %3772 = vmatpush.msrb.mxu1 %v10147_v4  ;;  %3792 = vmatpush.msrb.mxu3 %v10148_v3 }
 0x673   :  { %3812 = vmatpush.msrb.mxu0 %v10149_v46  ;;  %3832 = vmatpush.msrb.mxu2 %v10150_v28  ;;  %v3326_v46 = vsel %vm1257_vm4, %v3293_v1, %v3310_v25 }
 0x674   :  { %3773 = vmatpush.msrb.mxu1 %v10151_v33  ;;  %3793 = vmatpush.msrb.mxu3 %v10152_v59 }
 0x675   :  { %3813 = vmatpush.msrb.mxu0 %v10153_v60  ;;  %3833 = vmatpush.msrb.mxu2 %v10154_v52 }
 0x6ae   :  { %v3347_v37 = vpop.f32.mrf.mxu1 }
 0x6af   :  { %v3410_v57 = vadd.f32 %v3347_v37, %v3322_v12  ;;  %v3387_v10 = vpop.f32.mrf.mxu0  ;;  %v3294_v37 = vperm.slane %v8721_v14, 5 }
 0x6b0   :  { %v3412_v50 = vadd.f32 %v3387_v10, %v3324_v17 }
 0x6b1   :  { %v4234_v32 = vmul.f32 -1.442695, %v3410_v57  ;;  %v3327_v43 = vsel %vm1257_vm4, %v3294_v37, %v3311_v49 }
 0x6b3   :  { %4451 = vpow2.f32 %v4234_v32  ;;  %v3296_v32 = vperm.slane %v8721_v14, 7 }
 0x6b4   :  { %v3367_v62 = vpop.f32.mrf.mxu3 }
 0x6b5   :  { %v3411_v20 = vadd.f32 %v3367_v62, %v3323_v54  ;;  %v3407_v58 = vpop.f32.mrf.mxu2  ;;  %v3329_v54 = vsel %vm1257_vm4, %v3296_v32, %v3313_v23 }
 0x6b6   :  { %v3413_v19 = vadd.f32 %v3407_v58, %v3325_v53 }
 0x6b7   :  { %v4235_v45 = vmul.f32 -1.442695, %v3411_v20 }
 0x6b8   :  { %v4236_v30 = vmul.f32 -1.442695, %v3413_v19 }
 0x6b9   :  { %v4452_v51 = vpop.eup %4451  ;;  %4453 = vpow2.f32 %v4235_v45 }
 0x6ba   :  { %v3501_v61 = vadd.f32 1.0, %v4452_v51  ;;  %4455 = vpow2.f32 %v4236_v30 }
 0x6bc   :  { %4457 = vrcp.f32 %v3501_v61  ;;  %v3513_v15 = vand.u32 2147483648, %v3501_v61  ;;  %vm3507_vm15 = vweird.f32 %v3501_v61  ;;  %v3511_v21 = vand.u32 2147483647, %v3501_v61 }
 0x6be   :  { %v3514_v4 = vor.u32 1.1754944e-38, %v3513_v15  ;;  %vm3512_vm2 = vcmp.eq.f32.partialorder %v3511_v21, 8.507059e+37 }
 0x6bf   :  { %v4454_v29 = vpop.eup %4453 }
 0x6c0   :  { %v4456_v18 = vpop.eup %4455  ;;  %v3520_v41 = vadd.f32 1.0, %v4454_v29 }
 0x6c1   :  { %v8732_v8 = vadd.f32 1.0, %v4456_v18 }
 0x6c2   :  { %v4458_v5 = vpop.eup %4457  ;;  %4459 = vrcp.f32 %v3520_v41  ;;  %v3532_v63 = vand.u32 2147483648, %v3520_v41  ;;  %v3530_v26 = vand.u32 2147483647, %v3520_v41  ;;  %vm3526_vm3 = vweird.f32 %v3520_v41 }
 0x6c3   :  { %v3503_v0 = vmul.f32 %v4458_v5, %v3501_v61  ;;  %4461 = vrcp.f32 %v8732_v8  ;;  %vm3508_vm14 = vweird.f32 %v4458_v5  ;;  %v3552_v19 = vand.u32 2147483648, %v8732_v8 }
 0x6c4   :  { %vm8743_vm0 = vmor %vm3507_vm15, %vm3508_vm14  ;;  %4463 = vtanh.f32 %v3412_v50  ;;  %v3533_v52 = vor.u32 1.1754944e-38, %v3532_v63  ;;  %vm3531_vm6 = vcmp.eq.f32.partialorder %v3530_v26, 8.507059e+37  ;;  %vm3546_vm8 = vweird.f32 %v8732_v8 }
 0x6c5   :  { %v3504_v38 = vsub.f32 1.0, %v3503_v0  ;;  %v3550_v30 = vand.u32 2147483647, %v8732_v8  ;;  %v3553_v18 = vor.u32 1.1754944e-38, %v3552_v19  ;;  %v3295_v50 = vperm.slane %v8721_v14, 6 }
 0x6c7   :  { %v3505_v44 = vmul.f32 %v4458_v5, %v3504_v38  ;;  %vm3551_vm10 = vcmp.eq.f32.partialorder %v3550_v30, 8.507059e+37 }
 0x6c8   :  { %v4460_v24 = vpop.eup %4459 }
 0x6c9   :  { %v8738_v40 = vpop.eup %4461  ;;  %v3506_v36 = vadd.f32 %v4458_v5, %v3505_v44  ;;  %v3522_v2 = vmul.f32 %v4460_v24, %v3520_v41  ;;  %vm3527_vm1 = vweird.f32 %v4460_v24  ;;  %v3312_v44 = vperm.slane %v8719_v35, 6 }
 0x6ca   :  { %v3542_v34 = vmul.f32 %v8738_v40, %v8732_v8  ;;  %vm3528_vm5 = vmor %vm3526_vm3, %vm3527_vm1  ;;  %v4464_v6 = vpop.eup %4463  ;;  %vm3547_vm7 = vweird.f32 %v8738_v40 }
 0x6cb   :  { %v3523_v11 = vsub.f32 1.0, %v3522_v2  ;;  %v3510_v22 = vsel %vm8743_vm0, %v4458_v5, %v3506_v36  ;;  %vm3548_vm9 = vmor %vm3546_vm8, %vm3547_vm7  ;;  %v3328_v36 = vsel %vm1257_vm4, %v3295_v50, %v3312_v44  ;;  %v3995_v50 = vld [vmem:[%s9082_s9 + $0xd8] sm:$0xff] }
 0x6cc   :  { %v3543_v3 = vsub.f32 1.0, %v3542_v34  ;;  %v3515_v60 = vsel %vm3512_vm2, %v3514_v4, %v3510_v22 }
 0x6cd   :  { %v3524_v16 = vmul.f32 %v4460_v24, %v3523_v11  ;;  %v3557_v57 = vmul.f32 %v4464_v6, %v3515_v60 }
 0x6ce   :  { %v3544_v12 = vmul.f32 %v8738_v40, %v3543_v3 }
 0x6cf   :  { %v3525_v33 = vadd.f32 %v4460_v24, %v3524_v16 }
 0x6d0   :  { %v3545_v58 = vadd.f32 %v8738_v40, %v3544_v12 }
 0x6d1   :  { %v3431_v28 = vpop.f32.mrf.mxu1  ;;  %v3529_v42 = vsel %vm3528_vm5, %v4460_v24, %v3525_v33 }
 0x6d2   :  { %v3494_v59 = vadd.f32 %v3431_v28, %v3326_v46  ;;  %v3534_v55 = vsel %vm3531_vm6, %v3533_v52, %v3529_v42  ;;  %v3549_v29 = vsel %vm3548_vm9, %v8738_v40, %v3545_v58  ;;  %v3471_v40 = vpop.f32.mrf.mxu0 }
 0x6d3   :  { %v3556_v39 = vmul.f32 %v3534_v55, %v8534_v27  ;;  %v3554_v5 = vsel %vm3551_vm10, %v3553_v18, %v3549_v29  ;;  %v3496_v34 = vadd.f32 %v3471_v40, %v3328_v36 }
 0x6d4   :  { %v4237_v13 = vmul.f32 -1.442695, %v3494_v59 }
 0x6d5   :  { %v8759_v20 = vadd.f32 %v3557_v57, %v3556_v39 }
 0x6d6   :  { %4465 = vpow2.f32 %v4237_v13 }
 0x6d7   :  { %v3451_v56 = vpop.f32.mrf.mxu3  ;;  %4467 = vtanh.f32 %v8759_v20 }
 0x6d8   :  { %v3495_v31 = vadd.f32 %v3451_v56, %v3327_v43  ;;  %v3491_v62 = vpop.f32.mrf.mxu2  ;;  %v3629_v56 = vld [vmem:[#allocation2 + $0x47] ss:$8 sm:$0xf] }
 0x6d9   :  { %v3497_v53 = vadd.f32 %v3491_v62, %v3329_v54  ;;  %v3625_v62 = vld [vmem:[#allocation2 + $0x7] ss:$8 sm:$0xf] }
 0x6da   :  { %v4238_v27 = vmul.f32 -1.442695, %v3495_v31  ;;  %v3626_v31 = vld [vmem:[#allocation2 + $0x7] ss:$8 sm:$0xf0] }
 0x6db   :  { %v4239_v45 = vmul.f32 -1.442695, %v3497_v53  ;;  %v8777_v53 = vor.u32 %v3626_v31, %v3625_v62 }
 0x6dc   :  { %v4466_v51 = vpop.eup %4465  ;;  %4469 = vpow2.f32 %v4238_v27 }
 0x6dd   :  { %v3564_v61 = vadd.f32 1.0, %v4466_v51  ;;  %4471 = vpow2.f32 %v4239_v45  ;;  %v4468_v41 = vpop.eup %4467  ;;  %v3633_v19 = vperm.slane %v8777_v53, 0  ;;  %v3634_v18 = vperm.slane %v8777_v53, 1 }
 0x6de   :  { %v3560_v0 = vmul.f32 %v4468_v41, %v3554_v5  ;;  %v3636_v41 = vperm.slane %v8777_v53, 3  ;;  %v3998_v5 = vld [vmem:[%s9082_s9 + $0xf0] sm:$0xff] }
 0x6df   :  { %4473 = vrcp.f32 %v3564_v61  ;;  %v3576_v47 = vand.u32 2147483648, %v3564_v61  ;;  %vm3570_vm12 = vweird.f32 %v3564_v61  ;;  %v3574_v1 = vand.u32 2147483647, %v3564_v61 }
 0x6e0   :  { %3690 = vmatmul.f32.vlgmr.msra.gmra.mxu1 %v3560_v0  ;;  %3710 = vmatmul.f32.vlgmr.msra.gmra.mxu3 %v3560_v0 }
 0x6e1   :  { %3730 = vmatmul.f32.vlgmr.msra.gmra.mxu0 %v3560_v0  ;;  %3750 = vmatmul.f32.vlgmr.msra.gmra.mxu2 %v3560_v0  ;;  %v3577_v4 = vor.u32 1.1754944e-38, %v3576_v47  ;;  %vm3575_vm15 = vcmp.eq.f32.partialorder %v3574_v1, 8.507059e+37  ;;  %v3999_v0 = vld [vmem:[%s9082_s9 + $0xf8] sm:$0xff]  ;;  %v3989_v1 = vld [vmem:[%s9082_s9 + $0xa8] sm:$0xff] }
 0x6e2   :  { %v4470_v9 = vpop.eup %4469  ;;  %4072 = vmatpush.msra.mxu0 %v3998_v5  ;;  %4092 = vmatpush.msra.mxu2 %v3999_v0  ;;  %v3982_v5 = vld [vmem:[%s9082_s9 + $0x70] sm:$0xff]  ;;  %v3983_v0 = vld [vmem:[%s9082_s9 + $0x78] sm:$0xff] }
 0x6e3   :  { %v4472_v38 = vpop.eup %4471  ;;  %v3583_v48 = vadd.f32 1.0, %v4470_v9  ;;  %v3996_v9 = vld [vmem:[%s9082_s9 + $0xe0] sm:$0xff] }
 0x6e4   :  { %v3603_v10 = vadd.f32 1.0, %v4472_v38  ;;  %4073 = vmatpush.msra.mxu0 %v3996_v9 }
 0x6e5   :  { %v4474_v8 = vpop.eup %4473  ;;  %4475 = vrcp.f32 %v3583_v48  ;;  %v3595_v35 = vand.u32 2147483648, %v3583_v48  ;;  %v3593_v26 = vand.u32 2147483647, %v3583_v48  ;;  %vm3589_vm0 = vweird.f32 %v3583_v48 }
 0x6e6   :  { %v3566_v17 = vmul.f32 %v4474_v8, %v3564_v61  ;;  %4477 = vrcp.f32 %v3603_v10  ;;  %vm3571_vm11 = vweird.f32 %v4474_v8  ;;  %v3615_v55 = vand.u32 2147483648, %v3603_v10 }
 0x6e7   :  { %vm3572_vm13 = vmor %vm3570_vm12, %vm3571_vm11  ;;  %4479 = vtanh.f32 %v3496_v34  ;;  %v3596_v33 = vor.u32 1.1754944e-38, %v3595_v35  ;;  %vm3594_vm2 = vcmp.eq.f32.partialorder %v3593_v26, 8.507059e+37  ;;  %vm3609_vm5 = vweird.f32 %v3603_v10 }
 0x6e8   :  { %v3567_v24 = vsub.f32 1.0, %v3566_v17  ;;  %v3613_v12 = vand.u32 2147483647, %v3603_v10  ;;  %v3616_v57 = vor.u32 1.1754944e-38, %v3615_v55 }
 0x6ea   :  { %v3568_v2 = vmul.f32 %v4474_v8, %v3567_v24  ;;  %vm3614_vm7 = vcmp.eq.f32.partialorder %v3613_v12, 8.507059e+37  ;;  %v3994_v24 = vld [vmem:[%s9082_s9 + $0xd0] sm:$0xff] }
 0x6eb   :  { %v4476_v15 = vpop.eup %4475  ;;  %4074 = vmatpush.msra.mxu0 %v3994_v24 }
 0x6ec   :  { %v4478_v25 = vpop.eup %4477  ;;  %v3569_v21 = vadd.f32 %v4474_v8, %v3568_v2  ;;  %v3585_v11 = vmul.f32 %v4476_v15, %v3583_v48  ;;  %vm3590_vm14 = vweird.f32 %v4476_v15  ;;  %v3992_v2 = vld [vmem:[%s9082_s9 + $0xc0] sm:$0xff] }
 0x6ed   :  { %v3605_v63 = vmul.f32 %v4478_v25, %v3603_v10  ;;  %vm3591_vm1 = vmor %vm3589_vm0, %vm3590_vm14  ;;  %v4480_v60 = vpop.eup %4479  ;;  %vm3610_vm3 = vweird.f32 %v4478_v25  ;;  %v3997_v10 = vld [vmem:[%s9082_s9 + $0xe8] sm:$0xff]  ;;  %4075 = vmatpush.msra.mxu0 %v3992_v2 }
 0x6ee   :  { %v3586_v22 = vsub.f32 1.0, %v3585_v11  ;;  %v3573_v16 = vsel %vm3572_vm13, %v4474_v8, %v3569_v21  ;;  %vm3611_vm6 = vmor %vm3609_vm5, %vm3610_vm3  ;;  %4093 = vmatpush.msra.mxu2 %v3997_v10  ;;  %v3990_v21 = vld [vmem:[%s9082_s9 + $0xb0] sm:$0xff]  ;;  %v3991_v11 = vld [vmem:[%s9082_s9 + $0xb8] sm:$0xff] }
 0x6ef   :  { %v3606_v3 = vsub.f32 1.0, %v3605_v63  ;;  %v3578_v28 = vsel %vm3575_vm15, %v3577_v4, %v3573_v16  ;;  %v3988_v63 = vld [vmem:[%s9082_s9 + $0xa0] sm:$0xff]  ;;  %4076 = vmatpush.msra.mxu0 %v3990_v21  ;;  %v3978_v21 = vld [vmem:[%s9082_s9 + $0x50] sm:$0xff] }
 0x6f0   :  { %v3587_v14 = vmul.f32 %v4476_v15, %v3586_v22  ;;  %v3620_v42 = vmul.f32 %v4480_v60, %v3578_v28  ;;  %4094 = vmatpush.msra.mxu2 %v3995_v50  ;;  %v3635_v28 = vperm.slane %v8777_v53, 2 }
 0x6f1   :  { %v3607_v49 = vmul.f32 %v4478_v25, %v3606_v3  ;;  %4077 = vmatpush.msra.mxu0 %v3988_v63 }
 0x6f2   :  { %v3588_v46 = vadd.f32 %v4476_v15, %v3587_v14 }
 0x6f3   :  { %v3608_v6 = vadd.f32 %v4478_v25, %v3607_v49 }
 0x6f4   :  { %v3592_v59 = vsel %vm3591_vm1, %v4476_v15, %v3588_v46  ;;  %v3993_v15 = vld [vmem:[%s9082_s9 + $0xc8] sm:$0xff] }
 0x6f5   :  { %v3597_v52 = vsel %vm3594_vm2, %v3596_v33, %v3592_v59  ;;  %v3612_v37 = vsel %vm3611_vm6, %v4478_v25, %v3608_v6  ;;  %4095 = vmatpush.msra.mxu2 %v3993_v15  ;;  %v3640_v15 = vperm.slane %v8777_v53, 7 }
 0x6f6   :  { %v3619_v13 = vmul.f32 %v3597_v52, %v8620_v7  ;;  %v3617_v32 = vsel %vm3614_vm7, %v3616_v57, %v3612_v37  ;;  %v3630_v7 = vld [vmem:[#allocation2 + $0x47] ss:$8 sm:$0xf0] }
 0x6f7   :  { %v8775_v54 = vor.u32 %v3630_v7, %v3629_v56  ;;  %4096 = vmatpush.msra.mxu2 %v3991_v11  ;;  %v3637_v7 = vperm.slane %v8777_v53, 4 }
 0x6f8   :  { %v8772_v23 = vadd.f32 %v3620_v42, %v3619_v13 }
 0x6f9   :  { %v3650_v58 = vperm.slane %v8775_v54, 0  ;;  %v3651_v51 = vperm.slane %v8775_v54, 1  ;;  %v3653_v29 = vperm.slane %v8775_v54, 3  ;;  %4097 = vmatpush.msra.mxu2 %v3989_v1  ;;  %v3652_v3 = vperm.slane %v8775_v54, 2 }
 0x6fa   :  { %4481 = vtanh.f32 %v8772_v23  ;;  %v3654_v37 = vperm.slane %v8775_v54, 4 }
 0x6fb   :  { %v3666_v27 = vsel %vm1257_vm4, %v3633_v19, %v3650_v58  ;;  %v3667_v38 = vsel %vm1257_vm4, %v3634_v18, %v3651_v51  ;;  %v3669_v17 = vsel %vm1257_vm4, %v3636_v41, %v3653_v29  ;;  %v3668_v59 = vsel %vm1257_vm4, %v3635_v28, %v3652_v3  ;;  %v3986_v58 = vld [vmem:[%s9082_s9 + $0x90] sm:$0xff]  ;;  %v3987_v19 = vld [vmem:[%s9082_s9 + $0x98] sm:$0xff]  ;;  %v3985_v29 = vld [vmem:[%s9082_s9 + $0x88] sm:$0xff] }
 0x6fc   :  { %v3670_v51 = vsel %vm1257_vm4, %v3637_v7, %v3654_v37  ;;  %4078 = vmatpush.msra.mxu0 %v3986_v58  ;;  %4098 = vmatpush.msra.mxu2 %v3987_v19  ;;  %v3972_v37 = vld [vmem:[%s9082_s9 + $0x20] sm:$0xff]  ;;  %v4027_v7 = vld [vmem:[%s9083_s10 + $0xd8] sm:$0xff]  ;;  %v4025_v58 = vld [vmem:[%s9083_s10 + $0xc8] sm:$0xff] }
 0x6fe   :  { %4099 = vmatpush.msra.mxu2 %v3985_v29  ;;  %v4022_v29 = vld [vmem:[%s9083_s10 + $0xb0] sm:$0xff] }
 0x700   :  { %v4482_v39 = vpop.eup %4481  ;;  %4100 = vmatpush.msra.mxu2 %v3983_v0 }
 0x701   :  { %v3623_v43 = vmul.f32 %v4482_v39, %v3617_v32 }
 0x703   :  { %3774 = vmatmul.f32.vlgmr.msrb.gmra.mxu1 %v3623_v43  ;;  %3794 = vmatmul.f32.vlgmr.msrb.gmra.mxu3 %v3623_v43 }
 0x704   :  { %3814 = vmatmul.f32.vlgmr.msrb.gmra.mxu0 %v3623_v43  ;;  %3834 = vmatmul.f32.vlgmr.msrb.gmra.mxu2 %v3623_v43 }
 0x75d   :  { %v3691_v45 = vpop.f32.mrf.mxu1 }
 0x75e   :  { %v3754_v30 = vadd.f32 %v3691_v45, %v3666_v27  ;;  %v3731_v33 = vpop.f32.mrf.mxu0  ;;  %v3984_v27 = vld [vmem:[%s9082_s9 + $0x80] sm:$0xff] }
 0x75f   :  { %v3756_v49 = vadd.f32 %v3731_v33, %v3668_v59  ;;  %4079 = vmatpush.msra.mxu0 %v3984_v27  ;;  %v3974_v59 = vld [vmem:[%s9082_s9 + $0x30] sm:$0xff]  ;;  %v3968_v27 = vld [vmem:[%s9082_s9] sm:$0xff] }
 0x760   :  { %v4240_v61 = vmul.f32 -1.442695, %v3754_v30 }
 0x761   :  { %4080 = vmatpush.msra.mxu0 %v3982_v5 }
 0x762   :  { %4483 = vpow2.f32 %v4240_v61 }
 0x763   :  { %v3711_v48 = vpop.f32.mrf.mxu3 }
 0x764   :  { %v3755_v8 = vadd.f32 %v3711_v48, %v3667_v38  ;;  %v3751_v44 = vpop.f32.mrf.mxu2  ;;  %v3655_v48 = vperm.slane %v8775_v54, 5 }
 0x765   :  { %v3757_v40 = vadd.f32 %v3751_v44, %v3669_v17  ;;  %v3657_v17 = vperm.slane %v8775_v54, 7 }
 0x766   :  { %v4241_v36 = vmul.f32 -1.442695, %v3755_v8 }
 0x767   :  { %v4242_v34 = vmul.f32 -1.442695, %v3757_v40  ;;  %v3638_v40 = vperm.slane %v8777_v53, 5  ;;  %v3673_v1 = vsel %vm1257_vm4, %v3640_v15, %v3657_v17  ;;  %v4018_v17 = vld [vmem:[%s9083_s10 + $0x90] sm:$0xff] }
 0x768   :  { %v4484_v25 = vpop.eup %4483  ;;  %4485 = vpow2.f32 %v4241_v36 }
 0x769   :  { %v3845_v47 = vadd.f32 1.0, %v4484_v25  ;;  %4487 = vpow2.f32 %v4242_v34  ;;  %v3980_v34 = vld [vmem:[%s9082_s9 + $0x60] sm:$0xff]  ;;  %v3981_v25 = vld [vmem:[%s9082_s9 + $0x68] sm:$0xff]  ;;  %v3671_v11 = vsel %vm1257_vm4, %v3638_v40, %v3655_v48 }
 0x76a   :  { %4081 = vmatpush.msra.mxu0 %v3980_v34  ;;  %4101 = vmatpush.msra.mxu2 %v3981_v25  ;;  %v4014_v34 = vld [vmem:[%s9083_s10 + $0x70] sm:$0xff] }
 0x76b   :  { %4489 = vrcp.f32 %v3845_v47  ;;  %v3857_v55 = vand.u32 2147483648, %v3845_v47  ;;  %vm3851_vm9 = vweird.f32 %v3845_v47  ;;  %v3855_v57 = vand.u32 2147483647, %v3845_v47 }
 0x76c   :  { %4082 = vmatpush.msra.mxu0 %v3978_v21 }
 0x76d   :  { %v3858_v45 = vor.u32 1.1754944e-38, %v3857_v55  ;;  %vm3856_vm12 = vcmp.eq.f32.partialorder %v3855_v57, 8.507059e+37  ;;  %v4029_v55 = vld [vmem:[%s9083_s10 + $0xe8] sm:$0xff] }
 0x76e   :  { %v4486_v22 = vpop.eup %4485  ;;  %v3973_v57 = vld [vmem:[%s9082_s9 + $0x28] sm:$0xff] }
 0x76f   :  { %v4488_v35 = vpop.eup %4487  ;;  %v3864_v16 = vadd.f32 1.0, %v4486_v22 }
 0x770   :  { %v8824_v14 = vadd.f32 1.0, %v4488_v35  ;;  %v3976_v35 = vld [vmem:[%s9082_s9 + $0x40] sm:$0xff] }
 0x771   :  { %v4490_v26 = vpop.eup %4489  ;;  %4491 = vrcp.f32 %v3864_v16  ;;  %v3876_v43 = vand.u32 2147483648, %v3864_v16  ;;  %v3874_v62 = vand.u32 2147483647, %v3864_v16  ;;  %vm3870_vm13 = vweird.f32 %v3864_v16  ;;  %4083 = vmatpush.msra.mxu0 %v3976_v35 }
 0x772   :  { %v3847_v4 = vmul.f32 %v4490_v26, %v3845_v47  ;;  %4493 = vrcp.f32 %v8824_v14  ;;  %vm3852_vm8 = vweird.f32 %v4490_v26  ;;  %v3896_v28 = vand.u32 2147483648, %v8824_v14 }
 0x773   :  { %vm8835_vm10 = vmor %vm3851_vm9, %vm3852_vm8  ;;  %4495 = vtanh.f32 %v3756_v49  ;;  %v3877_v38 = vor.u32 1.1754944e-38, %v3876_v43  ;;  %vm3875_vm15 = vcmp.eq.f32.partialorder %v3874_v62, 8.507059e+37  ;;  %vm3890_vm1 = vweird.f32 %v8824_v14  ;;  %4084 = vmatpush.msra.mxu0 %v3974_v59  ;;  %v4026_v43 = vld [vmem:[%s9083_s10 + $0xd0] sm:$0xff]  ;;  %v3971_v62 = vld [vmem:[%s9082_s9 + $0x18] sm:$0xff] }
 0x774   :  { %v3848_v46 = vsub.f32 1.0, %v3847_v4 }
 0x775   :  { %4085 = vmatpush.msra.mxu0 %v3972_v37 }
 0x776   :  { %v3849_v60 = vmul.f32 %v4490_v26, %v3848_v46  ;;  %v3894_v46 = vand.u32 2147483647, %v8824_v14 }
 0x777   :  { %v4492_v52 = vpop.eup %4491 }
 0x778   :  { %v8830_v42 = vpop.eup %4493  ;;  %v3850_v13 = vadd.f32 %v4490_v26, %v3849_v60  ;;  %v3866_v6 = vmul.f32 %v4492_v52, %v3864_v16  ;;  %vm3871_vm11 = vweird.f32 %v4492_v52  ;;  %v3977_v16 = vld [vmem:[%s9082_s9 + $0x48] sm:$0xff]  ;;  %v3975_v60 = vld [vmem:[%s9082_s9 + $0x38] sm:$0xff]  ;;  %vm3895_vm3 = vcmp.eq.f32.partialorder %v3894_v46, 8.507059e+37 }
 0x779   :  { %v3886_v12 = vmul.f32 %v8830_v42, %v8824_v14  ;;  %vm3872_vm14 = vmor %vm3870_vm13, %vm3871_vm11  ;;  %v4496_v44 = vpop.eup %4495  ;;  %vm3891_vm0 = vweird.f32 %v8830_v42  ;;  %v4007_v14 = vld [vmem:[%s9083_s10 + $0x38] sm:$0xff] }
 0x77a   :  { %v3867_v39 = vsub.f32 1.0, %v3866_v6  ;;  %v3854_v56 = vsel %vm8835_vm10, %v4490_v26, %v3850_v13  ;;  %v4031_v13 = vld [vmem:[%s9083_s10 + $0xf8] sm:$0xff]  ;;  %v4028_v6 = vld [vmem:[%s9083_s10 + $0xe0] sm:$0xff]  ;;  %vm8913_vm2 = vmor %vm3890_vm1, %vm3891_vm0  ;;  %vm4123_vm0 = vcmask 1041408   ;;  %vm4126_vm1 = vcmask 224258  }
 0x77b   :  { %v3887_v30 = vsub.f32 1.0, %v3886_v12  ;;  %v3859_v9 = vsel %vm3856_vm12, %v3858_v45, %v3854_v56  ;;  %4052 = vmatpush.msra.mxu3 %v4031_v13  ;;  %v3897_v56 = vor.u32 1.1754944e-38, %v3896_v28  ;;  %v3969_v45 = vld [vmem:[%s9082_s9 + $0x8] sm:$0xff] }
 0x77c   :  { %v3868_v31 = vmul.f32 %v4492_v52, %v3867_v39  ;;  %v3901_v36 = vmul.f32 %v4496_v44, %v3859_v9  ;;  %v4020_v9 = vld [vmem:[%s9083_s10 + $0xa0] sm:$0xff]  ;;  %v4019_v44 = vld [vmem:[%s9083_s10 + $0x98] sm:$0xff] }
 0x77d   :  { %v3888_v50 = vmul.f32 %v8830_v42, %v3887_v30  ;;  %4053 = vmatpush.msra.mxu3 %v4029_v55 }
 0x77e   :  { %v3869_v18 = vadd.f32 %v4492_v52, %v3868_v31  ;;  %v3970_v31 = vld [vmem:[%s9082_s9 + $0x10] sm:$0xff] }
 0x77f   :  { %v3889_v3 = vadd.f32 %v8830_v42, %v3888_v50  ;;  %4054 = vmatpush.msra.mxu3 %v4027_v7  ;;  %4086 = vmatpush.msra.mxu0 %v3970_v31  ;;  %v3639_v50 = vperm.slane %v8777_v53, 6  ;;  %v4015_v53 = vld [vmem:[%s9083_s10 + $0x78] sm:$0xff] }
 0x780   :  { %v3775_v61 = vpop.f32.mrf.mxu1  ;;  %v3873_v10 = vsel %vm3872_vm14, %v4492_v52, %v3869_v18  ;;  %v4030_v52 = vld [vmem:[%s9083_s10 + $0xf0] sm:$0xff]  ;;  %v4023_v18 = vld [vmem:[%s9083_s10 + $0xb8] sm:$0xff] }
 0x781   :  { %v3838_v41 = vadd.f32 %v3775_v61, %v3670_v51  ;;  %v3878_v24 = vsel %vm3875_vm15, %v3877_v38, %v3873_v10  ;;  %4032 = vmatpush.msra.mxu1 %v4030_v52  ;;  %v3893_v32 = vsel %vm8913_vm2, %v8830_v42, %v3889_v3  ;;  %v4024_v42 = vld [vmem:[%s9083_s10 + $0xc0] sm:$0xff]  ;;  %4055 = vmatpush.msra.mxu3 %v4025_v58  ;;  %v4021_v38 = vld [vmem:[%s9083_s10 + $0xa8] sm:$0xff]  ;;  %v3815_v40 = vpop.f32.mrf.mxu0  ;;  %v4011_v3 = vld [vmem:[%s9083_s10 + $0x58] sm:$0xff] }
 0x782   :  { %v3900_v2 = vmul.f32 %v3878_v24, %v8759_v20  ;;  %v3979_v20 = vld [vmem:[%s9082_s9 + $0x58] sm:$0xff]  ;;  %v3898_v30 = vsel %vm3895_vm3, %v3897_v56, %v3893_v32  ;;  %4087 = vmatpush.msra.mxu0 %v3968_v27  ;;  %v4008_v52 = vld [vmem:[%s9083_s10 + $0x40] sm:$0xff]  ;;  %v4002_v58 = vld [vmem:[%s9083_s10 + $0x10] sm:$0xff] }
 0x783   :  { %v4243_v8 = vmul.f32 -1.442695, %v3838_v41  ;;  %4102 = vmatpush.msra.mxu2 %v3979_v20  ;;  %4033 = vmatpush.msra.mxu1 %v4028_v6  ;;  %v4004_v32 = vld [vmem:[%s9083_s10 + $0x20] sm:$0xff]  ;;  %vm4127_vm2 = vmor %vm4126_vm1, %vm4123_vm0 }
 0x784   :  { %v3902_v26 = vadd.f32 %v3901_v36, %v3900_v2  ;;  %4056 = vmatpush.msra.mxu3 %v4023_v18  ;;  %v4017_v36 = vld [vmem:[%s9083_s10 + $0x88] sm:$0xff]  ;;  %v4000_v27 = vld [vmem:[%s9083_s10] sm:$0xff] }
 0x785   :  { %4497 = vpow2.f32 %v4243_v8  ;;  %4103 = vmatpush.msra.mxu2 %v3977_v16  ;;  %4034 = vmatpush.msra.mxu1 %v4026_v43  ;;  %v3656_v8 = vperm.slane %v8775_v54, 6  ;;  %v4016_v54 = vld [vmem:[%s9083_s10 + $0x80] sm:$0xff]  ;;  %v4005_v43 = vld [vmem:[%s9083_s10 + $0x28] sm:$0xff] }
 0x786   :  { %v3795_v47 = vpop.f32.mrf.mxu3  ;;  %4499 = vtanh.f32 %v3902_v26  ;;  %4057 = vmatpush.msra.mxu3 %v4021_v38 }
 0x787   :  { %v3839_v63 = vadd.f32 %v3795_v47, %v3671_v11  ;;  %v3835_v22 = vpop.f32.mrf.mxu2  ;;  %4104 = vmatpush.msra.mxu2 %v3975_v60  ;;  %4035 = vmatpush.msra.mxu1 %v4024_v42  ;;  %v3672_v2 = vsel %vm1257_vm4, %v3639_v50, %v3656_v8 }
 0x788   :  { %v3841_v4 = vadd.f32 %v3835_v22, %v3673_v1  ;;  %4058 = vmatpush.msra.mxu3 %v4019_v44  ;;  %v3840_v21 = vadd.f32 %v3815_v40, %v3672_v2  ;;  %v4013_v1 = vld [vmem:[%s9083_s10 + $0x68] sm:$0xff] }
 0x789   :  { %v4244_v33 = vmul.f32 -1.442695, %v3839_v63  ;;  %4105 = vmatpush.msra.mxu2 %v3973_v57  ;;  %4036 = vmatpush.msra.mxu1 %v4022_v29  ;;  %v4012_v63 = vld [vmem:[%s9083_s10 + $0x60] sm:$0xff] }
 0x78a   :  { %v4245_v49 = vmul.f32 -1.442695, %v3841_v4  ;;  %4059 = vmatpush.msra.mxu3 %v4017_v36  ;;  %v4010_v4 = vld [vmem:[%s9083_s10 + $0x50] sm:$0xff] }
 0x78b   :  { %v4498_v12 = vpop.eup %4497  ;;  %4501 = vpow2.f32 %v4244_v33  ;;  %4106 = vmatpush.msra.mxu2 %v3971_v62  ;;  %4037 = vmatpush.msra.mxu1 %v4020_v9 }
 0x78c   :  { %v8923_v39 = vadd.f32 1.0, %v4498_v12  ;;  %4503 = vpow2.f32 %v4245_v49  ;;  %v4500_v19 = vpop.eup %4499  ;;  %4060 = vmatpush.msra.mxu3 %v4015_v53  ;;  %v4009_v49 = vld [vmem:[%s9083_s10 + $0x48] sm:$0xff]  ;;  %v4006_v12 = vld [vmem:[%s9083_s10 + $0x30] sm:$0xff] }
 0x78d   :  { %v3904_v51 = vmul.f32 %v4500_v19, %v3898_v30  ;;  %4107 = vmatpush.msra.mxu2 %v3969_v45  ;;  %4038 = vmatpush.msra.mxu1 %v4018_v17  ;;  %v4003_v19 = vld [vmem:[%s9083_s10 + $0x18] sm:$0xff]  ;;  %v4001_v45 = vld [vmem:[%s9083_s10 + $0x8] sm:$0xff] }
 0x78e   :  { %4505 = vrcp.f32 %v8923_v39  ;;  %v3920_v22 = vand.u32 2147483648, %v8923_v39  ;;  %vm3914_vm5 = vweird.f32 %v8923_v39  ;;  %v3918_v16 = vand.u32 2147483647, %v8923_v39  ;;  %4061 = vmatpush.msra.mxu3 %v4013_v1 }
 0x78f   :  { %4088 = vmatmul.f32.vlgmr.msra.gmra.mxu0 %v3904_v51  ;;  %4108 = vmatmul.f32.vlgmr.msra.gmra.mxu2 %v3904_v51 }
 0x790   :  { %4039 = vmatpush.msra.mxu1 %v4016_v54  ;;  %v3921_v13 = vor.u32 1.1754944e-38, %v3920_v22  ;;  %4062 = vmatpush.msra.mxu3 %v4011_v3  ;;  %vm3919_vm8 = vcmp.eq.f32.partialorder %v3918_v16, 8.507059e+37 }
 0x791   :  { %v4502_v61 = vpop.eup %4501 }
 0x792   :  { %v4504_v41 = vpop.eup %4503  ;;  %v8959_v5 = vadd.f32 1.0, %v4502_v61  ;;  %4040 = vmatpush.msra.mxu1 %v4014_v34  ;;  %4063 = vmatpush.msra.mxu3 %v4009_v49 }
 0x793   :  { %v8961_v0 = vadd.f32 1.0, %v4504_v41 }
 0x794   :  { %v8969_v48 = vpop.eup %4505  ;;  %4507 = vrcp.f32 %v8959_v5  ;;  %v3939_v28 = vand.u32 2147483648, %v8959_v5  ;;  %4041 = vmatpush.msra.mxu1 %v4012_v63  ;;  %v3937_v60 = vand.u32 2147483647, %v8959_v5  ;;  %vm3933_vm9 = vweird.f32 %v8959_v5  ;;  %4064 = vmatpush.msra.mxu3 %v4007_v14 }
 0x795   :  { %v3910_v10 = vmul.f32 %v8969_v48, %v8923_v39  ;;  %4509 = vrcp.f32 %v8961_v0  ;;  %vm3915_vm4 = vweird.f32 %v8969_v48  ;;  %v3959_v51 = vand.u32 2147483648, %v8961_v0 }
 0x796   :  { %vm9019_vm6 = vmor %vm3914_vm5, %vm3915_vm4  ;;  %4511 = vtanh.f32 %v3840_v21  ;;  %4042 = vmatpush.msra.mxu1 %v4010_v4  ;;  %v3940_v57 = vor.u32 1.1754944e-38, %v3939_v28  ;;  %vm3938_vm11 = vcmp.eq.f32.partialorder %v3937_v60, 8.507059e+37  ;;  %4065 = vmatpush.msra.mxu3 %v4005_v43  ;;  %vm3953_vm13 = vweird.f32 %v8961_v0 }
 0x797   :  { %v3911_v24 = vsub.f32 1.0, %v3910_v10  ;;  %v3957_v61 = vand.u32 2147483647, %v8961_v0  ;;  %v3960_v18 = vor.u32 1.1754944e-38, %v3959_v51 }
 0x798   :  { %4043 = vmatpush.msra.mxu1 %v4008_v52  ;;  %4066 = vmatpush.msra.mxu3 %v4003_v19 }
 0x799   :  { %v3912_v15 = vmul.f32 %v8969_v48, %v3911_v24  ;;  %vm3958_vm15 = vcmp.eq.f32.partialorder %v3957_v61, 8.507059e+37 }
 0x79a   :  { %v4508_v25 = vpop.eup %4507  ;;  %4044 = vmatpush.msra.mxu1 %v4006_v12  ;;  %4067 = vmatpush.msra.mxu3 %v4001_v45 }
 0x79b   :  { %v8997_v11 = vpop.eup %4509  ;;  %v3913_v47 = vadd.f32 %v8969_v48, %v3912_v15  ;;  %v3929_v20 = vmul.f32 %v4508_v25, %v8959_v5  ;;  %vm3934_vm7 = vweird.f32 %v4508_v25 }
 0x79c   :  { %v3949_v35 = vmul.f32 %v8997_v11, %v8961_v0  ;;  %vm3935_vm10 = vmor %vm3933_vm9, %vm3934_vm7  ;;  %v4512_v7 = vpop.eup %4511  ;;  %4045 = vmatpush.msra.mxu1 %v4004_v32  ;;  %vm3954_vm12 = vweird.f32 %v8997_v11 }
 0x79d   :  { %v3930_v26 = vsub.f32 1.0, %v3929_v20  ;;  %v3917_v33 = vsel %vm9019_vm6, %v8969_v48, %v3913_v47  ;;  %vm3955_vm14 = vmor %vm3953_vm13, %vm3954_vm12  ;;  %v4112_v48 = vld [vmem:[%s9084_s11] sm:$0x3] }
 0x79e   :  { %v3950_v6 = vsub.f32 1.0, %v3949_v35  ;;  %v3922_v37 = vsel %vm3919_vm8, %v3921_v13, %v3917_v33  ;;  %4046 = vmatpush.msra.mxu1 %v4002_v58  ;;  %v4115_v8 = vperm.slane %v4112_v48, 1  ;;  %v4114_v24 = vperm.slane %v4112_v48, 0 }
 0x79f   :  { %v3931_v59 = vmul.f32 %v4508_v25, %v3930_v26  ;;  %v3964_v62 = vmul.f32 %v4512_v7, %v3922_v37 }
 0x7a0   :  { %v3951_v31 = vmul.f32 %v8997_v11, %v3950_v6  ;;  %4047 = vmatpush.msra.mxu1 %v4000_v27 }
 0x7a1   :  { %v3932_v55 = vadd.f32 %v4508_v25, %v3931_v59 }
 0x7a3   :  { %v3936_v39 = vsel %vm3935_vm10, %v4508_v25, %v3932_v55 }
 0x7a4   :  { %v3941_v56 = vsel %vm3938_vm11, %v3940_v57, %v3936_v39 }
 0x7a5   :  { %v3963_v42 = vmul.f32 %v3941_v56, %v8772_v23  ;;  %v3952_v23 = vadd.f32 %v8997_v11, %v3951_v31 }
 0x7a7   :  { %v3965_v30 = vadd.f32 %v3964_v62, %v3963_v42  ;;  %v3956_v29 = vsel %vm3955_vm14, %v8997_v11, %v3952_v23 }
 0x7a8   :  { %v3961_v5 = vsel %vm3958_vm15, %v3960_v18, %v3956_v29 }
 0x7a9   :  { %4513 = vtanh.f32 %v3965_v30 }
 0x7af   :  { %v4514_v41 = vpop.eup %4513 }
 0x7b0   :  { %v3967_v9 = vmul.f32 %v4514_v41, %v3961_v5 }
 0x7b2   :  { %4048 = vmatmul.f32.vlgmr.msra.gmra.mxu1 %v3967_v9  ;;  %4068 = vmatmul.f32.vlgmr.msra.gmra.mxu3 %v3967_v9 }
 0x80c   :  { %v4089_v10 = vpop.f32.mrf.mxu0 }
 0x812   :  { %v4109_v17 = vpop.f32.mrf.mxu2 }
 0x82f   :  { %v4049_v38 = vpop.f32.mrf.mxu1 }
 0x830   :  { %v4090_v0 = vadd.f32 %v4089_v10, %v4049_v38 }
 0x832   :  { %v4118_v54 = vadd.f32 %v4114_v24, %v4090_v0 }
 0x835   :  { %v4069_v44 = vpop.f32.mrf.mxu3 }
 0x836   :  { %v4110_v50 = vadd.f32 %v4109_v17, %v4069_v44 }
 0x838   :  { %v4119_v40 = vadd.f32 %v4115_v8, %v4110_v50 }
 0x83a   :  { %v4122_v36 = vrot.slane %v4119_v40, 6 }
 0x83c   :  { %v4124_v2 = vsel %vm4123_vm0, %v4118_v54, %v4122_v36 }
 0x83d   :  { %4128 = vst.msk [vmem:[#allocation9] sm:$0xf] %vm4127_vm2, %v4124_v2 }
 0x83e   :  { %4139 = dma.vmem_to_hbm [thread:$0]  %s4135_s30, 64, %s4137_s4, [#allocation5]  }
 0x83f   :  { %4999 = dma.done.wait [#allocation5], 64  }
 0x840   :  { %5000 = vsyncadd [#allocation5], 4294967232 }
 0x841   :  { %4144 = vsyncpa [#allocation4], 1 }
 0x842   :  { %4145 = vsyncpa [#allocation7], 1 }
 0x843   :  { %4146 = vsyncpa [#allocation5], 1 }

</bundles_post_ra>
